<compile_context>
chip_gen: v5e
topology: v5e:2x2
jax: 0.10.0
libtpu: 0.0.40
codegen_flags: <defaults>
</compile_context>

<pallas_src>
import functools
import math

import jax
import jax.numpy as jnp
from jax import lax
from jax.experimental import pallas as pl
from jax.experimental.pallas import tpu as pltpu


# ----------------------------------------------------------------------------
# Fused per-point encoder kernel (Linear(3->H) + ReLU + Linear(H->emb))
# ----------------------------------------------------------------------------
def _encoder_kernel(x_ref, w1_ref, b1_ref, w2_ref, b2_ref, o_ref):
    x = x_ref[...]                                  # (T, 3)  f32
    w1 = w1_ref[...]                                # (3, H)  f32
    # K=3 contraction on the VPU (broadcast multiply-adds) instead of a
    # 3/128-utilized MXU matmul.
    h = (x[:, 0:1] * w1[0:1, :]
         + x[:, 1:2] * w1[1:2, :]
         + x[:, 2:3] * w1[2:3, :]
         + b1_ref[...])
    h = jnp.maximum(h, 0.0)
    y = jnp.dot(h.astype(jnp.bfloat16), w2_ref[...],
                preferred_element_type=jnp.float32)
    o_ref[...] = (y + b2_ref[...]).astype(o_ref.dtype)


def pallas_point_encoder(pc, p):
    """pc: (B, N, 3) -> (B, N, emb) via one fused per-point MLP kernel."""
    B, N, _ = pc.shape
    M = B * N
    H = p["w1"].shape[1]
    emb = p["w2"].shape[1]
    T = M if M <= 512 else 512
    assert M % T == 0, "point count must be tileable"
    x = pc.reshape(M, 3)
    out = pl.pallas_call(
        _encoder_kernel,
        grid=(M // T,),
        out_shape=jax.ShapeDtypeStruct((M, emb), jnp.float32),
        in_specs=[
            pl.BlockSpec((T, 3), lambda i: (i, 0)),
            pl.BlockSpec((3, H), lambda i: (0, 0)),
            pl.BlockSpec((1, H), lambda i: (0, 0)),
            pl.BlockSpec((H, emb), lambda i: (0, 0)),
            pl.BlockSpec((1, emb), lambda i: (0, 0)),
        ],
        out_specs=pl.BlockSpec((T, emb), lambda i: (i, 0)),
        compiler_params=pltpu.CompilerParams(dimension_semantics=("parallel",)),
    )(x, p["w1"], p["b1"], p["w2"], p["b2"])
    return out.reshape(B, N, emb)


# ----------------------------------------------------------------------------
# Fused cross-attention Transformer kernel (both blocks, all heads, LN, FF,
# residuals, and the outer `src + transformer(src)` residual) per batch elem.
# ----------------------------------------------------------------------------
def _layer_norm(x, g, b, eps=1e-5):
    mu = jnp.mean(x, axis=-1, keepdims=True)
    d = x - mu
    var = jnp.mean(d * d, axis=-1, keepdims=True)
    return d * lax.rsqrt(var + eps) * g + b


def _transformer_kernel(src_ref, tgt_ref,
                        wq_ref, bq_ref, wkv_ref, bkv_ref, wo_ref, bo_ref,
                        wff1_ref, bff1_ref, wff2_ref, bff2_ref,
                        ln1g_ref, ln1b_ref, ln2g_ref, ln2b_ref,
                        o_ref, *, n_blocks, n_heads):
    f32 = jnp.float32
    bf16 = jnp.bfloat16

    x0 = src_ref[0]                                  # (Ns, D) f32
    tgt = tgt_ref[0]                                 # (Nt, D) f32
    tgt_b = tgt.astype(bf16)
    D = x0.shape[-1]
    dh = D // n_heads
    scale = 1.0 / math.sqrt(dh)

    x = x0
    for blk in range(n_blocks):                      # static unroll (n_blocks=2)
        wq = wq_ref[blk]                             # (D, D)  bf16
        wkv = wkv_ref[blk]                           # (D, 2D) bf16
        wo = wo_ref[blk]                             # (D, D)  bf16

        q = jnp.dot(x.astype(bf16), wq, preferred_element_type=f32) + bq_ref[blk]
        kv = jnp.dot(tgt_b, wkv, preferred_element_type=f32) + bkv_ref[blk]
        k = kv[:, :D]
        v = kv[:, D:]

        # All heads in this single kernel step; fold the output projection
        # into the per-head accumulation to avoid re-packing heads.
        attn = jnp.zeros_like(x) + bo_ref[blk]
        for h in range(n_heads):                     # static unroll
            sl = slice(h * dh, (h + 1) * dh)
            qh = q[:, sl].astype(bf16)
            kh = k[:, sl].astype(bf16)
            vh = v[:, sl].astype(bf16)
            s = lax.dot_general(qh, kh, (((1,), (1,)), ((), ())),
                                preferred_element_type=f32) * scale
            m = jnp.max(s, axis=-1, keepdims=True)
            p = jnp.exp(s - m)
            denom = jnp.sum(p, axis=-1, keepdims=True)
            p = p * pl.reciprocal(denom, approx=True)     # EUP, not VPU divide
            oh = jnp.dot(p.astype(bf16), vh, preferred_element_type=f32)
            attn = attn + jnp.dot(oh.astype(bf16), wo[sl, :],
                                  preferred_element_type=f32)

        x = _layer_norm(x + attn, ln1g_ref[blk], ln1b_ref[blk])
        ff = jnp.dot(x.astype(bf16), wff1_ref[blk],
                     preferred_element_type=f32) + bff1_ref[blk]
        ff = jnp.maximum(ff, 0.0)
        ff = jnp.dot(ff.astype(bf16), wff2_ref[blk],
                     preferred_element_type=f32) + bff2_ref[blk]
        x = _layer_norm(x + ff, ln2g_ref[blk], ln2b_ref[blk])

    # Fold in the outer residual (robot/object_embedding_z + src_embedding)
    # to save one HBM round-trip of the (B, N, D) activation.
    o_ref[0] = (x0 + x).astype(o_ref.dtype)


def pallas_transformer(p, src, tgt, n_heads):
    """Returns src + Transformer(src attends to tgt), shape (B, Ns, D)."""
    B, Ns, D = src.shape
    Nt = tgt.shape[1]
    n_blocks = p["wq"].shape[0]
    ff = p["wff1"].shape[-1]

    def wspec(shape):
        return pl.BlockSpec(shape, lambda b: (0, 0, 0))

    kernel = functools.partial(_transformer_kernel,
                               n_blocks=n_blocks, n_heads=n_heads)
    return pl.pallas_call(
        kernel,
        grid=(B,),
        out_shape=jax.ShapeDtypeStruct((B, Ns, D), jnp.float32),
        in_specs=[
            pl.BlockSpec((1, Ns, D), lambda b: (b, 0, 0)),
            pl.BlockSpec((1, Nt, D), lambda b: (b, 0, 0)),
            wspec((n_blocks, D, D)),        # wq
            wspec((n_blocks, 1, D)),        # bq
            wspec((n_blocks, D, 2 * D)),    # wkv (K/V projections fused)
            wspec((n_blocks, 1, 2 * D)),    # bkv
            wspec((n_blocks, D, D)),        # wo
            wspec((n_blocks, 1, D)),        # bo
            wspec((n_blocks, D, ff)),       # wff1
            wspec((n_blocks, 1, ff)),       # bff1
            wspec((n_blocks, ff, D)),       # wff2
            wspec((n_blocks, 1, D)),        # bff2
            wspec((n_blocks, 1, D)),        # ln1 gamma
            wspec((n_blocks, 1, D)),        # ln1 beta
            wspec((n_blocks, 1, D)),        # ln2 gamma
            wspec((n_blocks, 1, D)),        # ln2 beta
        ],
        out_specs=pl.BlockSpec((1, Ns, D), lambda b: (b, 0, 0)),
        compiler_params=pltpu.CompilerParams(dimension_semantics=("parallel",)),
    )(src, tgt, p["wq"], p["bq"], p["wkv"], p["bkv"], p["wo"], p["bo"],
      p["wff1"], p["bff1"], p["wff2"], p["bff2"],
      p["ln1g"], p["ln1b"], p["ln2g"], p["ln2b"])


# ----------------------------------------------------------------------------
# Pairwise MLP kernel: dro[b, i, j] = MLPKernel([Phi_A[b, i]; Phi_B[b, j]])
# Tiled over (batch, A tile, B tile); lane-dense (TN, TM) output blocks.
# ----------------------------------------------------------------------------
def _pairwise_dro_kernel(a_ref, b_ref, w1a_ref, w1b_ref, b1_ref,
                         w2_ref, b2_ref, w3_ref, b3_ref, o_ref):
    f32 = jnp.float32
    bf16 = jnp.bfloat16
    a = a_ref[0]                                     # (TN, D) f32
    bb = b_ref[0]                                    # (TM, D) f32
    TN = a.shape[0]
    TM = bb.shape[0]

    # first layer of MLP([phi_A ; phi_B]) split into two matmuls
    pa = jnp.dot(a.astype(bf16), w1a_ref[...], preferred_element_type=f32)   # (TN, H1)
    pb = jnp.dot(bb.astype(bf16), w1b_ref[...], preferred_element_type=f32)  # (TM, H1)
    h1 = pa[:, None, :] + pb[None, :, :] + b1_ref[...][None, :, :]           # (TN, TM, H1)
    h1 = jnp.maximum(h1, 0.0)
    H1 = h1.shape[-1]

    h2 = jnp.dot(h1.reshape(TN * TM, H1).astype(bf16), w2_ref[...],
                 preferred_element_type=f32) + b2_ref[...]
    h2 = jnp.maximum(h2, 0.0)                                                # (TN*TM, H2)
    H2 = h2.shape[-1]

    # Final Linear(H2 -> 1) as a VPU multiply + lane reduction so the stored
    # block is a lane-dense (TN, TM) tile (no masked width-1 vst).
    prod = h2.reshape(TN, TM, H2) * w3_ref[...][None, :, :]
    out = jnp.sum(prod, axis=-1) + b3_ref[...]                               # (TN, TM)
    o_ref[0] = out.astype(o_ref.dtype)


def pallas_pairwise_dro(phi_a, phi_b, kp):
    """dro[b, i, j] = MLPKernel(Phi_A[b, i], Phi_B[b, j]) -> (B, N, M)."""
    B, N, D = phi_a.shape
    M = phi_b.shape[1]
    H1 = kp["w1a"].shape[1]
    H2 = kp["w2"].shape[1]
    # Pair-tile so the (TN*TM, H1) f32 intermediate stays well inside the
    # default scoped VMEM on every generation (v7x: 32 MiB scoped / 64 phys).
    TN = N if N <= 128 else 128
    TM = M if M <= 128 else 128
    assert N % TN == 0 and M % TM == 0, "point counts must be tileable"
    return pl.pallas_call(
        _pairwise_dro_kernel,
        grid=(B, N // TN, M // TM),
        out_shape=jax.ShapeDtypeStruct((B, N, M), jnp.float32),
        in_specs=[
            pl.BlockSpec((1, TN, D), lambda b, i, j: (b, i, 0)),
            pl.BlockSpec((1, TM, D), lambda b, i, j: (b, j, 0)),
            pl.BlockSpec((D, H1), lambda b, i, j: (0, 0)),   # weights resident
            pl.BlockSpec((D, H1), lambda b, i, j: (0, 0)),
            pl.BlockSpec((1, H1), lambda b, i, j: (0, 0)),
            pl.BlockSpec((H1, H2), lambda b, i, j: (0, 0)),
            pl.BlockSpec((1, H2), lambda b, i, j: (0, 0)),
            pl.BlockSpec((1, H2), lambda b, i, j: (0, 0)),
            pl.BlockSpec((1, 1), lambda b, i, j: (0, 0)),
        ],
        out_specs=pl.BlockSpec((1, TN, TM), lambda b, i, j: (b, i, j)),
        compiler_params=pltpu.CompilerParams(
            dimension_semantics=("parallel", "parallel", "parallel")),
    )(phi_a, phi_b, kp["w1a"], kp["w1b"], kp["b1"],
      kp["w2"], kp["b2"], kp["w3"], kp["b3"])


# ----------------------------------------------------------------------------
# Parameter init (deterministic, synthetic; MXU weights stored in bf16)
# ----------------------------------------------------------------------------
def init_params(key, cfg):
    emb = cfg["emb_dim"]
    D = cfg["emb_dim"] + cfg["latent_dim"]
    ff = 2 * D
    n_blocks = 2
    keys = jax.random.split(key, 7)

    def enc_init(k):
        k1, k2, k3, k4 = jax.random.split(k, 4)
        return {
            "w1": 0.1 * jax.random.normal(k1, (3, 64), jnp.float32),
            "b1": 0.1 * jax.random.normal(k2, (1, 64), jnp.float32),
            "w2": (0.1 * jax.random.normal(k3, (64, emb), jnp.float32)
                   ).astype(jnp.bfloat16),
            "b2": 0.1 * jax.random.normal(k4, (1, emb), jnp.float32),
        }

    def tf_init(k):
        def w(kk, shape):
            return (0.1 * jax.random.normal(kk, shape, jnp.float32)
                    ).astype(jnp.bfloat16)
        ks = jax.random.split(k, 5)
        return {
            "wq": w(ks[0], (n_blocks, D, D)),
            "bq": jnp.zeros((n_blocks, 1, D), jnp.float32),
            "wkv": w(ks[1], (n_blocks, D, 2 * D)),
            "bkv": jnp.zeros((n_blocks, 1, 2 * D), jnp.float32),
            "wo": w(ks[2], (n_blocks, D, D)),
            "bo": jnp.zeros((n_blocks, 1, D), jnp.float32),
            "wff1": w(ks[3], (n_blocks, D, ff)),
            "bff1": jnp.zeros((n_blocks, 1, ff), jnp.float32),
            "wff2": w(ks[4], (n_blocks, ff, D)),
            "bff2": jnp.zeros((n_blocks, 1, D), jnp.float32),
            "ln1g": jnp.ones((n_blocks, 1, D), jnp.float32),
            "ln1b": jnp.zeros((n_blocks, 1, D), jnp.float32),
            "ln2g": jnp.ones((n_blocks, 1, D), jnp.float32),
            "ln2b": jnp.zeros((n_blocks, 1, D), jnp.float32),
        }

    kk = jax.random.split(keys[6], 3)
    # MLPKernel(D): Linear(2D->D) ReLU Linear(D->D) ReLU Linear(D->1)
    w1 = 0.1 * jax.random.normal(kk[0], (2 * D, D), jnp.float32)
    params = {
        "encoder_robot": enc_init(keys[0]),
        "encoder_object": enc_init(keys[1]),
        "transformer_robot": tf_init(keys[2]),
        "transformer_object": tf_init(keys[3]),
        "kernel": {
            "w1a": w1[:D].astype(jnp.bfloat16),      # applied to Phi_A
            "w1b": w1[D:].astype(jnp.bfloat16),      # applied to Phi_B
            "b1": jnp.zeros((1, D), jnp.float32),
            "w2": (0.1 * jax.random.normal(kk[1], (D, D), jnp.float32)
                   ).astype(jnp.bfloat16),
            "b2": jnp.zeros((1, D), jnp.float32),
            "w3": 0.1 * jax.random.normal(kk[2], (1, D), jnp.float32),  # f32, VPU reduce
            "b3": jnp.zeros((1, 1), jnp.float32),
        },
    }
    return params


# ----------------------------------------------------------------------------
# Model forward (thin JAX glue around the fused Pallas kernels)
# ----------------------------------------------------------------------------
def encoder_robot_forward(p, robot_pc):
    return pallas_point_encoder(robot_pc, p)


def encoder_object_forward(p, object_pc_cn):
    # receives (B, 3, N) exactly like the torch call; returns (emb, aux)
    pc = jnp.transpose(object_pc_cn, (0, 2, 1))
    return pallas_point_encoder(pc, p), None


def network_forward(params, robot_pc, object_pc, language_emb, cfg):
    # ---- asserts mirrored from the torch module ----
    assert cfg["use_language"], "Must use language embedding."
    assert not (cfg["use_intent"] and cfg["use_language"])

    if cfg["center_pc"]:
        robot_pc = robot_pc - robot_pc.mean(axis=1, keepdims=True)

    robot_embedding = encoder_robot_forward(params["encoder_robot"], robot_pc)
    object_embedding, _ = encoder_object_forward(
        params["encoder_object"], jnp.transpose(object_pc, (0, 2, 1)))

    if cfg["pretrain"] is not None:
        robot_embedding = jax.lax.stop_gradient(robot_embedding)
    object_embedding = jax.lax.stop_gradient(object_embedding)

    # use_language branch: z is the provided language embedding
    z = language_emb
    mu, logvar = None, None

    z_rep = jnp.repeat(z[:, None, :], robot_embedding.shape[1], axis=1)
    robot_embedding_z = jnp.concatenate([robot_embedding, z_rep], axis=-1)
    object_embedding_z = jnp.concatenate([object_embedding, z_rep], axis=-1)

    n_heads = cfg["n_heads"]
    # Each call is ONE fused kernel (2 blocks) and already includes the outer
    # residual: returns src_embedding_z + transformer(src_z, tgt_z).
    robot_embedding_tf = pallas_transformer(
        params["transformer_robot"], robot_embedding_z, object_embedding_z, n_heads)
    object_embedding_tf = pallas_transformer(
        params["transformer_object"], object_embedding_z, robot_embedding_z, n_heads)

    # pairwise MLP kernel -> dro (B, N_robot, N_object); mathematically
    # identical to the block_computing loop as well.
    dro = pallas_pairwise_dro(robot_embedding_tf, object_embedding_tf,
                              params["kernel"])
    return {"dro": dro, "mu": mu, "logvar": logvar}


# ----------------------------------------------------------------------------
# main
# ----------------------------------------------------------------------------
if __name__ == "__main__":
    cfg = dict(
        emb_dim=32,
        latent_dim=32,
        use_intent=False,
        use_language=True,
        center_pc=True,
        block_computing=False,
        pretrain=None,
        obj_pretrain=None,
        n_heads=4,
    )
    B, N_robot, N_obj = 2, 16, 16

    key = jax.random.PRNGKey(0)
    k1, k2, k3, kp = jax.random.split(key, 4)
    robot_pc = jax.random.normal(k1, (B, N_robot, 3), jnp.float32)
    object_pc = jax.random.normal(k2, (B, N_obj, 3), jnp.float32)
    language_emb = jax.random.normal(k3, (B, cfg["latent_dim"]), jnp.float32)

    params = init_params(kp, cfg)

    fwd = jax.jit(lambda p, r, o, l: network_forward(p, r, o, l, cfg))
    outputs = fwd(params, robot_pc, object_pc, language_emb)
    dro = jax.block_until_ready(outputs["dro"])

    assert dro.shape == (B, N_robot, N_obj)
    assert dro.dtype == jnp.float32
    assert bool(jnp.all(jnp.isfinite(dro)))
    print("KERNEL_OK")
</pallas_src>

<mosaic_0001>
module attributes {stable_mosaic.version = 11 : i64} {
  func.func @_encoder_kernel(%arg0: i32, %arg1: memref<32x3xf32, #tpu.memory_space<vmem>>, %arg2: memref<3x64xf32, #tpu.memory_space<vmem>>, %arg3: memref<1x64xf32, #tpu.memory_space<vmem>>, %arg4: memref<64x32xbf16, #tpu.memory_space<vmem>>, %arg5: memref<1x32xf32, #tpu.memory_space<vmem>>, %arg6: memref<32x32xf32, #tpu.memory_space<vmem>>) attributes {dimension_semantics = [#tpu.dimension_semantics<parallel>], iteration_bounds = array<i64: 1>, scalar_prefetch = 0 : i64, scratch_operands = 0 : i64, tpu.core_type = #tpu.core_type<tc>, window_params = [{transform_indices = @transform_0, window_bounds = array<i64: 32, 3>}, {pipeline_mode = #tpu.pipeline_mode<synchronous>, transform_indices = @transform_1, window_bounds = array<i64: 3, 64>}, {pipeline_mode = #tpu.pipeline_mode<synchronous>, transform_indices = @transform_2, window_bounds = array<i64: 1, 64>}, {pipeline_mode = #tpu.pipeline_mode<synchronous>, transform_indices = @transform_3, window_bounds = array<i64: 64, 32>}, {pipeline_mode = #tpu.pipeline_mode<synchronous>, transform_indices = @transform_4, window_bounds = array<i64: 1, 32>}, {transform_indices = @transform_5, window_bounds = array<i64: 32, 32>}]} {
    %c0 = arith.constant 0 : index
    %c0_0 = arith.constant 0 : index
    %0 = vector.load %arg1[%c0, %c0_0] : memref<32x3xf32, #tpu.memory_space<vmem>>, vector<32x3xf32>
    %c0_1 = arith.constant 0 : index
    %c0_2 = arith.constant 0 : index
    %1 = vector.load %arg2[%c0_1, %c0_2] : memref<3x64xf32, #tpu.memory_space<vmem>>, vector<3x64xf32>
    %2 = vector.extract_strided_slice %0 {offsets = [0, 0], sizes = [32, 1], strides = [1, 1]} : vector<32x3xf32> to vector<32x1xf32>
    %3 = vector.extract_strided_slice %1 {offsets = [0, 0], sizes = [1, 64], strides = [1, 1]} : vector<3x64xf32> to vector<1x64xf32>
    %4 = vector.broadcast %2 : vector<32x1xf32> to vector<32x64xf32>
    %5 = vector.broadcast %3 : vector<1x64xf32> to vector<32x64xf32>
    %6 = arith.mulf %4, %5 : vector<32x64xf32>
    %7 = vector.extract_strided_slice %0 {offsets = [0, 1], sizes = [32, 1], strides = [1, 1]} : vector<32x3xf32> to vector<32x1xf32>
    %8 = vector.extract_strided_slice %1 {offsets = [1, 0], sizes = [1, 64], strides = [1, 1]} : vector<3x64xf32> to vector<1x64xf32>
    %9 = vector.broadcast %7 : vector<32x1xf32> to vector<32x64xf32>
    %10 = vector.broadcast %8 : vector<1x64xf32> to vector<32x64xf32>
    %11 = arith.mulf %9, %10 : vector<32x64xf32>
    %12 = arith.addf %6, %11 : vector<32x64xf32>
    %13 = vector.extract_strided_slice %0 {offsets = [0, 2], sizes = [32, 1], strides = [1, 1]} : vector<32x3xf32> to vector<32x1xf32>
    %14 = vector.extract_strided_slice %1 {offsets = [2, 0], sizes = [1, 64], strides = [1, 1]} : vector<3x64xf32> to vector<1x64xf32>
    %15 = vector.broadcast %13 : vector<32x1xf32> to vector<32x64xf32>
    %16 = vector.broadcast %14 : vector<1x64xf32> to vector<32x64xf32>
    %17 = arith.mulf %15, %16 : vector<32x64xf32>
    %18 = arith.addf %12, %17 : vector<32x64xf32>
    %c0_3 = arith.constant 0 : index
    %c0_4 = arith.constant 0 : index
    %19 = vector.load %arg3[%c0_3, %c0_4] : memref<1x64xf32, #tpu.memory_space<vmem>>, vector<1x64xf32>
    %20 = vector.broadcast %19 : vector<1x64xf32> to vector<32x64xf32>
    %21 = arith.addf %18, %20 : vector<32x64xf32>
    %cst = arith.constant 0.000000e+00 : f32
    %22 = vector.broadcast %cst : f32 to vector<32x64xf32>
    %23 = arith.maximumf %21, %22 : vector<32x64xf32>
    %24 = arith.truncf %23 : vector<32x64xf32> to vector<32x64xbf16>
    %c0_5 = arith.constant 0 : index
    %c0_6 = arith.constant 0 : index
    %25 = vector.load %arg4[%c0_5, %c0_6] : memref<64x32xbf16, #tpu.memory_space<vmem>>, vector<64x32xbf16>
    %cst_7 = arith.constant dense<0.000000e+00> : vector<32x32xf32>
    %26 = tpu.matmul %24, %25, %cst_7 {dimension_numbers = #tpu.dot_dimension_numbers<[1], [0], [0], [1], [0, 0, 1, 1], [], []>} : vector<32x64xbf16>, vector<64x32xbf16>, vector<32x32xf32> -> vector<32x32xf32>
    %c0_8 = arith.constant 0 : index
    %c0_9 = arith.constant 0 : index
    %27 = vector.load %arg5[%c0_8, %c0_9] : memref<1x32xf32, #tpu.memory_space<vmem>>, vector<1x32xf32>
    %28 = vector.broadcast %27 : vector<1x32xf32> to vector<32x32xf32>
    %29 = arith.addf %26, %28 : vector<32x32xf32>
    %c0_10 = arith.constant 0 : index
    %c0_11 = arith.constant 0 : index
    %30 = vector.load %arg6[%c0_10, %c0_11] : memref<32x32xf32, #tpu.memory_space<vmem>>, vector<32x32xf32>
    tpu.vector_store %arg6[%c0_10, %c0_11], %29 {strides = array<i32>} : memref<32x32xf32, #tpu.memory_space<vmem>>, vector<32x32xf32>,
    return
  }
  func.func @transform_0(%arg0: i32) -> (i32, i32) {
    %c0_i32 = arith.constant 0 : i32
    %c0_i32_0 = arith.constant 0 : i32
    return %arg0, %c0_i32 : i32, i32
  }
  func.func @transform_1(%arg0: i32) -> (i32, i32) {
    %c0_i32 = arith.constant 0 : i32
    %c0_i32_0 = arith.constant 0 : i32
    %c0_i32_1 = arith.constant 0 : i32
    return %c0_i32, %c0_i32_0 : i32, i32
  }
  func.func @transform_2(%arg0: i32) -> (i32, i32) {
    %c0_i32 = arith.constant 0 : i32
    %c0_i32_0 = arith.constant 0 : i32
    %c0_i32_1 = arith.constant 0 : i32
    return %c0_i32, %c0_i32_0 : i32, i32
  }
  func.func @transform_3(%arg0: i32) -> (i32, i32) {
    %c0_i32 = arith.constant 0 : i32
    %c0_i32_0 = arith.constant 0 : i32
    %c0_i32_1 = arith.constant 0 : i32
    return %c0_i32, %c0_i32_0 : i32, i32
  }
  func.func @transform_4(%arg0: i32) -> (i32, i32) {
    %c0_i32 = arith.constant 0 : i32
    %c0_i32_0 = arith.constant 0 : i32
    %c0_i32_1 = arith.constant 0 : i32
    return %c0_i32, %c0_i32_0 : i32, i32
  }
  func.func @transform_5(%arg0: i32) -> (i32, i32) {
    %c0_i32 = arith.constant 0 : i32
    %c0_i32_0 = arith.constant 0 : i32
    return %arg0, %c0_i32 : i32, i32
  }
}

module attributes {stable_mosaic.version = 11 : i64} {
  func.func @_pairwise_dro_kernel(%arg0: i32, %arg1: i32, %arg2: i32, %arg3: memref<1x16x64xf32, #tpu.memory_space<vmem>>, %arg4: memref<1x16x64xf32, #tpu.memory_space<vmem>>, %arg5: memref<64x64xbf16, #tpu.memory_space<vmem>>, %arg6: memref<64x64xbf16, #tpu.memory_space<vmem>>, %arg7: memref<1x64xf32, #tpu.memory_space<vmem>>, %arg8: memref<64x64xbf16, #tpu.memory_space<vmem>>, %arg9: memref<1x64xf32, #tpu.memory_space<vmem>>, %arg10: memref<1x64xf32, #tpu.memory_space<vmem>>, %arg11: memref<1x1xf32, #tpu.memory_space<vmem>>, %arg12: memref<1x16x16xf32, #tpu.memory_space<vmem>>) attributes {dimension_semantics = [#tpu.dimension_semantics<parallel>, #tpu.dimension_semantics<parallel>, #tpu.dimension_semantics<parallel>], iteration_bounds = array<i64: 2, 1, 1>, scalar_prefetch = 0 : i64, scratch_operands = 0 : i64, tpu.core_type = #tpu.core_type<tc>, window_params = [{transform_indices = @transform_0, window_bounds = array<i64: 1, 16, 64>}, {transform_indices = @transform_1, window_bounds = array<i64: 1, 16, 64>}, {pipeline_mode = #tpu.pipeline_mode<synchronous>, transform_indices = @transform_2, window_bounds = array<i64: 64, 64>}, {pipeline_mode = #tpu.pipeline_mode<synchronous>, transform_indices = @transform_3, window_bounds = array<i64: 64, 64>}, {pipeline_mode = #tpu.pipeline_mode<synchronous>, transform_indices = @transform_4, window_bounds = array<i64: 1, 64>}, {pipeline_mode = #tpu.pipeline_mode<synchronous>, transform_indices = @transform_5, window_bounds = array<i64: 64, 64>}, {pipeline_mode = #tpu.pipeline_mode<synchronous>, transform_indices = @transform_6, window_bounds = array<i64: 1, 64>}, {pipeline_mode = #tpu.pipeline_mode<synchronous>, transform_indices = @transform_7, window_bounds = array<i64: 1, 64>}, {pipeline_mode = #tpu.pipeline_mode<synchronous>, transform_indices = @transform_8, window_bounds = array<i64: 1, 1>}, {transform_indices = @transform_9, window_bounds = array<i64: 1, 16, 16>}]} {
    %c0 = arith.constant 0 : index
    %c0_0 = arith.constant 0 : index
    %c0_1 = arith.constant 0 : index
    %0 = vector.load %arg3[%c0, %c0_0, %c0_1] : memref<1x16x64xf32, #tpu.memory_space<vmem>>, vector<1x16x64xf32>
    %1 = vector.shape_cast %0 : vector<1x16x64xf32> to vector<16x64xf32>
    %c0_2 = arith.constant 0 : index
    %c0_3 = arith.constant 0 : index
    %c0_4 = arith.constant 0 : index
    %2 = vector.load %arg4[%c0_2, %c0_3, %c0_4] : memref<1x16x64xf32, #tpu.memory_space<vmem>>, vector<1x16x64xf32>
    %3 = vector.shape_cast %2 : vector<1x16x64xf32> to vector<16x64xf32>
    %4 = arith.truncf %1 : vector<16x64xf32> to vector<16x64xbf16>
    %c0_5 = arith.constant 0 : index
    %c0_6 = arith.constant 0 : index
    %5 = vector.load %arg5[%c0_5, %c0_6] : memref<64x64xbf16, #tpu.memory_space<vmem>>, vector<64x64xbf16>
    %cst = arith.constant dense<0.000000e+00> : vector<16x64xf32>
    %6 = tpu.matmul %4, %5, %cst {dimension_numbers = #tpu.dot_dimension_numbers<[1], [0], [0], [1], [0, 0, 1, 1], [], []>} : vector<16x64xbf16>, vector<64x64xbf16>, vector<16x64xf32> -> vector<16x64xf32>
    %7 = arith.truncf %3 : vector<16x64xf32> to vector<16x64xbf16>
    %c0_7 = arith.constant 0 : index
    %c0_8 = arith.constant 0 : index
    %8 = vector.load %arg6[%c0_7, %c0_8] : memref<64x64xbf16, #tpu.memory_space<vmem>>, vector<64x64xbf16>
    %cst_9 = arith.constant dense<0.000000e+00> : vector<16x64xf32>
    %9 = tpu.matmul %7, %8, %cst_9 {dimension_numbers = #tpu.dot_dimension_numbers<[1], [0], [0], [1], [0, 0, 1, 1], [], []>} : vector<16x64xbf16>, vector<64x64xbf16>, vector<16x64xf32> -> vector<16x64xf32>
    %10 = vector.shape_cast %6 : vector<16x64xf32> to vector<16x1x64xf32>
    %11 = vector.shape_cast %9 : vector<16x64xf32> to vector<1x16x64xf32>
    %12 = vector.broadcast %10 : vector<16x1x64xf32> to vector<16x16x64xf32>
    %13 = vector.broadcast %11 : vector<1x16x64xf32> to vector<16x16x64xf32>
    %14 = arith.addf %12, %13 : vector<16x16x64xf32>
    %c0_10 = arith.constant 0 : index
    %c0_11 = arith.constant 0 : index
    %15 = vector.load %arg7[%c0_10, %c0_11] : memref<1x64xf32, #tpu.memory_space<vmem>>, vector<1x64xf32>
    %16 = vector.shape_cast %15 : vector<1x64xf32> to vector<1x1x64xf32>
    %17 = vector.broadcast %16 : vector<1x1x64xf32> to vector<16x16x64xf32>
    %18 = arith.addf %14, %17 : vector<16x16x64xf32>
    %cst_12 = arith.constant 0.000000e+00 : f32
    %19 = vector.broadcast %cst_12 : f32 to vector<16x16x64xf32>
    %20 = arith.maximumf %18, %19 : vector<16x16x64xf32>
    %21 = vector.shape_cast %20 : vector<16x16x64xf32> to vector<256x64xf32>
    %22 = arith.truncf %21 : vector<256x64xf32> to vector<256x64xbf16>
    %c0_13 = arith.constant 0 : index
    %c0_14 = arith.constant 0 : index
    %23 = vector.load %arg8[%c0_13, %c0_14] : memref<64x64xbf16, #tpu.memory_space<vmem>>, vector<64x64xbf16>
    %cst_15 = arith.constant dense<0.000000e+00> : vector<256x64xf32>
    %24 = tpu.matmul %22, %23, %cst_15 {dimension_numbers = #tpu.dot_dimension_numbers<[1], [0], [0], [1], [0, 0, 1, 1], [], []>} : vector<256x64xbf16>, vector<64x64xbf16>, vector<256x64xf32> -> vector<256x64xf32>
    %c0_16 = arith.constant 0 : index
    %c0_17 = arith.constant 0 : index
    %25 = vector.load %arg9[%c0_16, %c0_17] : memref<1x64xf32, #tpu.memory_space<vmem>>, vector<1x64xf32>
    %26 = vector.broadcast %25 : vector<1x64xf32> to vector<256x64xf32>
    %27 = arith.addf %24, %26 : vector<256x64xf32>
    %cst_18 = arith.constant 0.000000e+00 : f32
    %28 = vector.broadcast %cst_18 : f32 to vector<256x64xf32>
    %29 = arith.maximumf %27, %28 : vector<256x64xf32>
    %30 = vector.shape_cast %29 : vector<256x64xf32> to vector<16x16x64xf32>
    %c0_19 = arith.constant 0 : index
    %c0_20 = arith.constant 0 : index
    %31 = vector.load %arg10[%c0_19, %c0_20] : memref<1x64xf32, #tpu.memory_space<vmem>>, vector<1x64xf32>
    %32 = vector.shape_cast %31 : vector<1x64xf32> to vector<1x1x64xf32>
    %33 = vector.broadcast %32 : vector<1x1x64xf32> to vector<16x16x64xf32>
    %34 = arith.mulf %30, %33 : vector<16x16x64xf32>
    %cst_21 = arith.constant dense<0.000000e+00> : vector<16x16xf32>
    %35 = vector.multi_reduction <add>, %34, %cst_21 [2] : vector<16x16x64xf32> to vector<16x16xf32>
    %c0_22 = arith.constant 0 : index
    %c0_23 = arith.constant 0 : index
    %36 = vector.load %arg11[%c0_22, %c0_23] : memref<1x1xf32, #tpu.memory_space<vmem>>, vector<1x1xf32>
    %37 = vector.broadcast %36 : vector<1x1xf32> to vector<16x16xf32>
    %38 = arith.addf %35, %37 : vector<16x16xf32>
    %c0_24 = arith.constant 0 : index
    %c0_25 = arith.constant 0 : index
    %c0_26 = arith.constant 0 : index
    %39 = vector.load %arg12[%c0_24, %c0_25, %c0_26] : memref<1x16x16xf32, #tpu.memory_space<vmem>>, vector<1x16x16xf32>
    %40 = vector.shape_cast %39 : vector<1x16x16xf32> to vector<16x16xf32>
    %41 = vector.shape_cast %38 : vector<16x16xf32> to vector<1x16x16xf32>
    tpu.vector_store %arg12[%c0_24, %c0_25, %c0_26], %41 {strides = array<i32>} : memref<1x16x16xf32, #tpu.memory_space<vmem>>, vector<1x16x16xf32>,
    return
  }
  func.func @transform_0(%arg0: i32, %arg1: i32, %arg2: i32) -> (i32, i32, i32) {
    %c0_i32 = arith.constant 0 : i32
    %c0_i32_0 = arith.constant 0 : i32
    return %arg0, %arg1, %c0_i32 : i32, i32, i32
  }
  func.func @transform_1(%arg0: i32, %arg1: i32, %arg2: i32) -> (i32, i32, i32) {
    %c0_i32 = arith.constant 0 : i32
    %c0_i32_0 = arith.constant 0 : i32
    return %arg0, %arg2, %c0_i32 : i32, i32, i32
  }
  func.func @transform_2(%arg0: i32, %arg1: i32, %arg2: i32) -> (i32, i32) {
    %c0_i32 = arith.constant 0 : i32
    %c0_i32_0 = arith.constant 0 : i32
    %c0_i32_1 = arith.constant 0 : i32
    return %c0_i32, %c0_i32_0 : i32, i32
  }
  func.func @transform_3(%arg0: i32, %arg1: i32, %arg2: i32) -> (i32, i32) {
    %c0_i32 = arith.constant 0 : i32
    %c0_i32_0 = arith.constant 0 : i32
    %c0_i32_1 = arith.constant 0 : i32
    return %c0_i32, %c0_i32_0 : i32, i32
  }
  func.func @transform_4(%arg0: i32, %arg1: i32, %arg2: i32) -> (i32, i32) {
    %c0_i32 = arith.constant 0 : i32
    %c0_i32_0 = arith.constant 0 : i32
    %c0_i32_1 = arith.constant 0 : i32
    return %c0_i32, %c0_i32_0 : i32, i32
  }
  func.func @transform_5(%arg0: i32, %arg1: i32, %arg2: i32) -> (i32, i32) {
    %c0_i32 = arith.constant 0 : i32
    %c0_i32_0 = arith.constant 0 : i32
    %c0_i32_1 = arith.constant 0 : i32
    return %c0_i32, %c0_i32_0 : i32, i32
  }
  func.func @transform_6(%arg0: i32, %arg1: i32, %arg2: i32) -> (i32, i32) {
    %c0_i32 = arith.constant 0 : i32
    %c0_i32_0 = arith.constant 0 : i32
    %c0_i32_1 = arith.constant 0 : i32
    return %c0_i32, %c0_i32_0 : i32, i32
  }
  func.func @transform_7(%arg0: i32, %arg1: i32, %arg2: i32) -> (i32, i32) {
    %c0_i32 = arith.constant 0 : i32
    %c0_i32_0 = arith.constant 0 : i32
    %c0_i32_1 = arith.constant 0 : i32
    return %c0_i32, %c0_i32_0 : i32, i32
  }
  func.func @transform_8(%arg0: i32, %arg1: i32, %arg2: i32) -> (i32, i32) {
    %c0_i32 = arith.constant 0 : i32
    %c0_i32_0 = arith.constant 0 : i32
    %c0_i32_1 = arith.constant 0 : i32
    return %c0_i32, %c0_i32_0 : i32, i32
  }
  func.func @transform_9(%arg0: i32, %arg1: i32, %arg2: i32) -> (i32, i32, i32) {
    %c0_i32 = arith.constant 0 : i32
    return %arg0, %arg1, %arg2 : i32, i32, i32
  }
}

module attributes {stable_mosaic.version = 11 : i64} {
  func.func @_transformer_kernel(%arg0: i32, %arg1: memref<1x16x64xf32, #tpu.memory_space<vmem>>, %arg2: memref<1x16x64xf32, #tpu.memory_space<vmem>>, %arg3: memref<2x64x64xbf16, #tpu.memory_space<vmem>>, %arg4: memref<2x1x64xf32, #tpu.memory_space<vmem>>, %arg5: memref<2x64x128xbf16, #tpu.memory_space<vmem>>, %arg6: memref<2x1x128xf32, #tpu.memory_space<vmem>>, %arg7: memref<2x64x64xbf16, #tpu.memory_space<vmem>>, %arg8: memref<2x1x64xf32, #tpu.memory_space<vmem>>, %arg9: memref<2x64x128xbf16, #tpu.memory_space<vmem>>, %arg10: memref<2x1x128xf32, #tpu.memory_space<vmem>>, %arg11: memref<2x128x64xbf16, #tpu.memory_space<vmem>>, %arg12: memref<2x1x64xf32, #tpu.memory_space<vmem>>, %arg13: memref<2x1x64xf32, #tpu.memory_space<vmem>>, %arg14: memref<2x1x64xf32, #tpu.memory_space<vmem>>, %arg15: memref<2x1x64xf32, #tpu.memory_space<vmem>>, %arg16: memref<2x1x64xf32, #tpu.memory_space<vmem>>, %arg17: memref<1x16x64xf32, #tpu.memory_space<vmem>>) attributes {dimension_semantics = [#tpu.dimension_semantics<parallel>], iteration_bounds = array<i64: 2>, scalar_prefetch = 0 : i64, scratch_operands = 0 : i64, tpu.core_type = #tpu.core_type<tc>, window_params = [{transform_indices = @transform_0, window_bounds = array<i64: 1, 16, 64>}, {transform_indices = @transform_1, window_bounds = array<i64: 1, 16, 64>}, {pipeline_mode = #tpu.pipeline_mode<synchronous>, transform_indices = @transform_2, window_bounds = array<i64: 2, 64, 64>}, {pipeline_mode = #tpu.pipeline_mode<synchronous>, transform_indices = @transform_3, window_bounds = array<i64: 2, 1, 64>}, {pipeline_mode = #tpu.pipeline_mode<synchronous>, transform_indices = @transform_4, window_bounds = array<i64: 2, 64, 128>}, {pipeline_mode = #tpu.pipeline_mode<synchronous>, transform_indices = @transform_5, window_bounds = array<i64: 2, 1, 128>}, {pipeline_mode = #tpu.pipeline_mode<synchronous>, transform_indices = @transform_6, window_bounds = array<i64: 2, 64, 64>}, {pipeline_mode = #tpu.pipeline_mode<synchronous>, transform_indices = @transform_7, window_bounds = array<i64: 2, 1, 64>}, {pipeline_mode = #tpu.pipeline_mode<synchronous>, transform_indices = @transform_8, window_bounds = array<i64: 2, 64, 128>}, {pipeline_mode = #tpu.pipeline_mode<synchronous>, transform_indices = @transform_9, window_bounds = array<i64: 2, 1, 128>}, {pipeline_mode = #tpu.pipeline_mode<synchronous>, transform_indices = @transform_10, window_bounds = array<i64: 2, 128, 64>}, {pipeline_mode = #tpu.pipeline_mode<synchronous>, transform_indices = @transform_11, window_bounds = array<i64: 2, 1, 64>}, {pipeline_mode = #tpu.pipeline_mode<synchronous>, transform_indices = @transform_12, window_bounds = array<i64: 2, 1, 64>}, {pipeline_mode = #tpu.pipeline_mode<synchronous>, transform_indices = @transform_13, window_bounds = array<i64: 2, 1, 64>}, {pipeline_mode = #tpu.pipeline_mode<synchronous>, transform_indices = @transform_14, window_bounds = array<i64: 2, 1, 64>}, {pipeline_mode = #tpu.pipeline_mode<synchronous>, transform_indices = @transform_15, window_bounds = array<i64: 2, 1, 64>}, {transform_indices = @transform_16, window_bounds = array<i64: 1, 16, 64>}]} {
    %c0 = arith.constant 0 : index
    %c0_0 = arith.constant 0 : index
    %c0_1 = arith.constant 0 : index
    %0 = vector.load %arg1[%c0, %c0_0, %c0_1] : memref<1x16x64xf32, #tpu.memory_space<vmem>>, vector<1x16x64xf32>
    %1 = vector.shape_cast %0 : vector<1x16x64xf32> to vector<16x64xf32>
    %c0_2 = arith.constant 0 : index
    %c0_3 = arith.constant 0 : index
    %c0_4 = arith.constant 0 : index
    %2 = vector.load %arg2[%c0_2, %c0_3, %c0_4] : memref<1x16x64xf32, #tpu.memory_space<vmem>>, vector<1x16x64xf32>
    %3 = vector.shape_cast %2 : vector<1x16x64xf32> to vector<16x64xf32>
    %4 = arith.truncf %3 : vector<16x64xf32> to vector<16x64xbf16>
    %c0_5 = arith.constant 0 : index
    %c0_6 = arith.constant 0 : index
    %c0_7 = arith.constant 0 : index
    %5 = vector.load %arg3[%c0_5, %c0_6, %c0_7] : memref<2x64x64xbf16, #tpu.memory_space<vmem>>, vector<1x64x64xbf16>
    %6 = vector.shape_cast %5 : vector<1x64x64xbf16> to vector<64x64xbf16>
    %c0_8 = arith.constant 0 : index
    %c0_9 = arith.constant 0 : index
    %c0_10 = arith.constant 0 : index
    %7 = vector.load %arg5[%c0_8, %c0_9, %c0_10] : memref<2x64x128xbf16, #tpu.memory_space<vmem>>, vector<1x64x128xbf16>
    %8 = vector.shape_cast %7 : vector<1x64x128xbf16> to vector<64x128xbf16>
    %c0_11 = arith.constant 0 : index
    %c0_12 = arith.constant 0 : index
    %c0_13 = arith.constant 0 : index
    %9 = vector.load %arg7[%c0_11, %c0_12, %c0_13] : memref<2x64x64xbf16, #tpu.memory_space<vmem>>, vector<1x64x64xbf16>
    %10 = vector.shape_cast %9 : vector<1x64x64xbf16> to vector<64x64xbf16>
    %11 = arith.truncf %1 : vector<16x64xf32> to vector<16x64xbf16>
    %cst = arith.constant dense<0.000000e+00> : vector<16x64xf32>
    %12 = tpu.matmul %11, %6, %cst {dimension_numbers = #tpu.dot_dimension_numbers<[1], [0], [0], [1], [0, 0, 1, 1], [], []>} : vector<16x64xbf16>, vector<64x64xbf16>, vector<16x64xf32> -> vector<16x64xf32>
    %c0_14 = arith.constant 0 : index
    %c0_15 = arith.constant 0 : index
    %c0_16 = arith.constant 0 : index
    %13 = vector.load %arg4[%c0_14, %c0_15, %c0_16] : memref<2x1x64xf32, #tpu.memory_space<vmem>>, vector<1x1x64xf32>
    %14 = vector.shape_cast %13 : vector<1x1x64xf32> to vector<1x64xf32>
    %15 = vector.broadcast %14 : vector<1x64xf32> to vector<16x64xf32>
    %16 = arith.addf %12, %15 : vector<16x64xf32>
    %cst_17 = arith.constant dense<0.000000e+00> : vector<16x128xf32>
    %17 = tpu.matmul %4, %8, %cst_17 {dimension_numbers = #tpu.dot_dimension_numbers<[1], [0], [0], [1], [0, 0, 1, 1], [], []>} : vector<16x64xbf16>, vector<64x128xbf16>, vector<16x128xf32> -> vector<16x128xf32>
    %c0_18 = arith.constant 0 : index
    %c0_19 = arith.constant 0 : index
    %c0_20 = arith.constant 0 : index
    %18 = vector.load %arg6[%c0_18, %c0_19, %c0_20] : memref<2x1x128xf32, #tpu.memory_space<vmem>>, vector<1x1x128xf32>
    %19 = vector.shape_cast %18 : vector<1x1x128xf32> to vector<1x128xf32>
    %20 = vector.broadcast %19 : vector<1x128xf32> to vector<16x128xf32>
    %21 = arith.addf %17, %20 : vector<16x128xf32>
    %22 = vector.extract_strided_slice %21 {offsets = [0, 0], sizes = [16, 64], strides = [1, 1]} : vector<16x128xf32> to vector<16x64xf32>
    %23 = vector.extract_strided_slice %21 {offsets = [0, 64], sizes = [16, 64], strides = [1, 1]} : vector<16x128xf32> to vector<16x64xf32>
    %cst_21 = arith.constant 0.000000e+00 : f32
    %24 = vector.broadcast %cst_21 : f32 to vector<16x64xf32>
    %c0_22 = arith.constant 0 : index
    %c0_23 = arith.constant 0 : index
    %c0_24 = arith.constant 0 : index
    %25 = vector.load %arg8[%c0_22, %c0_23, %c0_24] : memref<2x1x64xf32, #tpu.memory_space<vmem>>, vector<1x1x64xf32>
    %26 = vector.shape_cast %25 : vector<1x1x64xf32> to vector<1x64xf32>
    %27 = vector.broadcast %26 : vector<1x64xf32> to vector<16x64xf32>
    %28 = arith.addf %24, %27 : vector<16x64xf32>
    %29 = vector.extract_strided_slice %16 {offsets = [0, 0], sizes = [16, 16], strides = [1, 1]} : vector<16x64xf32> to vector<16x16xf32>
    %30 = arith.truncf %29 : vector<16x16xf32> to vector<16x16xbf16>
    %31 = vector.extract_strided_slice %22 {offsets = [0, 0], sizes = [16, 16], strides = [1, 1]} : vector<16x64xf32> to vector<16x16xf32>
    %32 = arith.truncf %31 : vector<16x16xf32> to vector<16x16xbf16>
    %33 = vector.extract_strided_slice %23 {offsets = [0, 0], sizes = [16, 16], strides = [1, 1]} : vector<16x64xf32> to vector<16x16xf32>
    %34 = arith.truncf %33 : vector<16x16xf32> to vector<16x16xbf16>
    %cst_25 = arith.constant dense<0.000000e+00> : vector<16x16xf32>
    %35 = tpu.matmul %30, %32, %cst_25 {dimension_numbers = #tpu.dot_dimension_numbers<[1], [1], [0], [0], [0, 0, 1, 0], [], []>} : vector<16x16xbf16>, vector<16x16xbf16>, vector<16x16xf32> -> vector<16x16xf32>
    %cst_26 = arith.constant 2.500000e-01 : f32
    %36 = vector.broadcast %cst_26 : f32 to vector<16x16xf32>
    %37 = arith.mulf %35, %36 : vector<16x16xf32>
    %cst_27 = arith.constant dense<0xFF800000> : vector<16xf32>
    %38 = vector.multi_reduction <maximumf>, %37, %cst_27 [1] : vector<16x16xf32> to vector<16xf32>
    %39 = vector.shape_cast %38 : vector<16xf32> to vector<16x1xf32>
    %40 = vector.broadcast %39 : vector<16x1xf32> to vector<16x16xf32>
    %41 = arith.subf %37, %40 : vector<16x16xf32>
    %42 = math.exp %41 : vector<16x16xf32>
    %cst_28 = arith.constant dense<0.000000e+00> : vector<16xf32>
    %43 = vector.multi_reduction <add>, %42, %cst_28 [1] : vector<16x16xf32> to vector<16xf32>
    %44 = vector.shape_cast %43 : vector<16xf32> to vector<16x1xf32>
    %45 = tpu.reciprocal %44 {approx = true} : vector<16x1xf32> -> vector<16x1xf32>
    %46 = vector.broadcast %45 : vector<16x1xf32> to vector<16x16xf32>
    %47 = arith.mulf %42, %46 : vector<16x16xf32>
    %48 = arith.truncf %47 : vector<16x16xf32> to vector<16x16xbf16>
    %cst_29 = arith.constant dense<0.000000e+00> : vector<16x16xf32>
    %49 = tpu.matmul %48, %34, %cst_29 {dimension_numbers = #tpu.dot_dimension_numbers<[1], [0], [0], [1], [0, 0, 1, 1], [], []>} : vector<16x16xbf16>, vector<16x16xbf16>, vector<16x16xf32> -> vector<16x16xf32>
    %50 = arith.truncf %49 : vector<16x16xf32> to vector<16x16xbf16>
    %51 = vector.extract_strided_slice %10 {offsets = [0, 0], sizes = [16, 64], strides = [1, 1]} : vector<64x64xbf16> to vector<16x64xbf16>
    %cst_30 = arith.constant dense<0.000000e+00> : vector<16x64xf32>
    %52 = tpu.matmul %50, %51, %cst_30 {dimension_numbers = #tpu.dot_dimension_numbers<[1], [0], [0], [1], [0, 0, 1, 1], [], []>} : vector<16x16xbf16>, vector<16x64xbf16>, vector<16x64xf32> -> vector<16x64xf32>
    %53 = arith.addf %28, %52 : vector<16x64xf32>
    %54 = vector.extract_strided_slice %16 {offsets = [0, 16], sizes = [16, 16], strides = [1, 1]} : vector<16x64xf32> to vector<16x16xf32>
    %55 = arith.truncf %54 : vector<16x16xf32> to vector<16x16xbf16>
    %56 = vector.extract_strided_slice %22 {offsets = [0, 16], sizes = [16, 16], strides = [1, 1]} : vector<16x64xf32> to vector<16x16xf32>
    %57 = arith.truncf %56 : vector<16x16xf32> to vector<16x16xbf16>
    %58 = vector.extract_strided_slice %23 {offsets = [0, 16], sizes = [16, 16], strides = [1, 1]} : vector<16x64xf32> to vector<16x16xf32>
    %59 = arith.truncf %58 : vector<16x16xf32> to vector<16x16xbf16>
    %cst_31 = arith.constant dense<0.000000e+00> : vector<16x16xf32>
    %60 = tpu.matmul %55, %57, %cst_31 {dimension_numbers = #tpu.dot_dimension_numbers<[1], [1], [0], [0], [0, 0, 1, 0], [], []>} : vector<16x16xbf16>, vector<16x16xbf16>, vector<16x16xf32> -> vector<16x16xf32>
    %cst_32 = arith.constant 2.500000e-01 : f32
    %61 = vector.broadcast %cst_32 : f32 to vector<16x16xf32>
    %62 = arith.mulf %60, %61 : vector<16x16xf32>
    %cst_33 = arith.constant dense<0xFF800000> : vector<16xf32>
    %63 = vector.multi_reduction <maximumf>, %62, %cst_33 [1] : vector<16x16xf32> to vector<16xf32>
    %64 = vector.shape_cast %63 : vector<16xf32> to vector<16x1xf32>
    %65 = vector.broadcast %64 : vector<16x1xf32> to vector<16x16xf32>
    %66 = arith.subf %62, %65 : vector<16x16xf32>
    %67 = math.exp %66 : vector<16x16xf32>
    %cst_34 = arith.constant dense<0.000000e+00> : vector<16xf32>
    %68 = vector.multi_reduction <add>, %67, %cst_34 [1] : vector<16x16xf32> to vector<16xf32>
    %69 = vector.shape_cast %68 : vector<16xf32> to vector<16x1xf32>
    %70 = tpu.reciprocal %69 {approx = true} : vector<16x1xf32> -> vector<16x1xf32>
    %71 = vector.broadcast %70 : vector<16x1xf32> to vector<16x16xf32>
    %72 = arith.mulf %67, %71 : vector<16x16xf32>
    %73 = arith.truncf %72 : vector<16x16xf32> to vector<16x16xbf16>
    %cst_35 = arith.constant dense<0.000000e+00> : vector<16x16xf32>
    %74 = tpu.matmul %73, %59, %cst_35 {dimension_numbers = #tpu.dot_dimension_numbers<[1], [0], [0], [1], [0, 0, 1, 1], [], []>} : vector<16x16xbf16>, vector<16x16xbf16>, vector<16x16xf32> -> vector<16x16xf32>
    %75 = arith.truncf %74 : vector<16x16xf32> to vector<16x16xbf16>
    %76 = vector.extract_strided_slice %10 {offsets = [16, 0], sizes = [16, 64], strides = [1, 1]} : vector<64x64xbf16> to vector<16x64xbf16>
    %cst_36 = arith.constant dense<0.000000e+00> : vector<16x64xf32>
    %77 = tpu.matmul %75, %76, %cst_36 {dimension_numbers = #tpu.dot_dimension_numbers<[1], [0], [0], [1], [0, 0, 1, 1], [], []>} : vector<16x16xbf16>, vector<16x64xbf16>, vector<16x64xf32> -> vector<16x64xf32>
    %78 = arith.addf %53, %77 : vector<16x64xf32>
    %79 = vector.extract_strided_slice %16 {offsets = [0, 32], sizes = [16, 16], strides = [1, 1]} : vector<16x64xf32> to vector<16x16xf32>
    %80 = arith.truncf %79 : vector<16x16xf32> to vector<16x16xbf16>
    %81 = vector.extract_strided_slice %22 {offsets = [0, 32], sizes = [16, 16], strides = [1, 1]} : vector<16x64xf32> to vector<16x16xf32>
    %82 = arith.truncf %81 : vector<16x16xf32> to vector<16x16xbf16>
    %83 = vector.extract_strided_slice %23 {offsets = [0, 32], sizes = [16, 16], strides = [1, 1]} : vector<16x64xf32> to vector<16x16xf32>
    %84 = arith.truncf %83 : vector<16x16xf32> to vector<16x16xbf16>
    %cst_37 = arith.constant dense<0.000000e+00> : vector<16x16xf32>
    %85 = tpu.matmul %80, %82, %cst_37 {dimension_numbers = #tpu.dot_dimension_numbers<[1], [1], [0], [0], [0, 0, 1, 0], [], []>} : vector<16x16xbf16>, vector<16x16xbf16>, vector<16x16xf32> -> vector<16x16xf32>
    %cst_38 = arith.constant 2.500000e-01 : f32
    %86 = vector.broadcast %cst_38 : f32 to vector<16x16xf32>
    %87 = arith.mulf %85, %86 : vector<16x16xf32>
    %cst_39 = arith.constant dense<0xFF800000> : vector<16xf32>
    %88 = vector.multi_reduction <maximumf>, %87, %cst_39 [1] : vector<16x16xf32> to vector<16xf32>
    %89 = vector.shape_cast %88 : vector<16xf32> to vector<16x1xf32>
    %90 = vector.broadcast %89 : vector<16x1xf32> to vector<16x16xf32>
    %91 = arith.subf %87, %90 : vector<16x16xf32>
    %92 = math.exp %91 : vector<16x16xf32>
    %cst_40 = arith.constant dense<0.000000e+00> : vector<16xf32>
    %93 = vector.multi_reduction <add>, %92, %cst_40 [1] : vector<16x16xf32> to vector<16xf32>
    %94 = vector.shape_cast %93 : vector<16xf32> to vector<16x1xf32>
    %95 = tpu.reciprocal %94 {approx = true} : vector<16x1xf32> -> vector<16x1xf32>
    %96 = vector.broadcast %95 : vector<16x1xf32> to vector<16x16xf32>
    %97 = arith.mulf %92, %96 : vector<16x16xf32>
    %98 = arith.truncf %97 : vector<16x16xf32> to vector<16x16xbf16>
    %cst_41 = arith.constant dense<0.000000e+00> : vector<16x16xf32>
    %99 = tpu.matmul %98, %84, %cst_41 {dimension_numbers = #tpu.dot_dimension_numbers<[1], [0], [0], [1], [0, 0, 1, 1], [], []>} : vector<16x16xbf16>, vector<16x16xbf16>, vector<16x16xf32> -> vector<16x16xf32>
    %100 = arith.truncf %99 : vector<16x16xf32> to vector<16x16xbf16>
    %101 = vector.extract_strided_slice %10 {offsets = [32, 0], sizes = [16, 64], strides = [1, 1]} : vector<64x64xbf16> to vector<16x64xbf16>
    %cst_42 = arith.constant dense<0.000000e+00> : vector<16x64xf32>
    %102 = tpu.matmul %100, %101, %cst_42 {dimension_numbers = #tpu.dot_dimension_numbers<[1], [0], [0], [1], [0, 0, 1, 1], [], []>} : vector<16x16xbf16>, vector<16x64xbf16>, vector<16x64xf32> -> vector<16x64xf32>
    %103 = arith.addf %78, %102 : vector<16x64xf32>
    %104 = vector.extract_strided_slice %16 {offsets = [0, 48], sizes = [16, 16], strides = [1, 1]} : vector<16x64xf32> to vector<16x16xf32>
    %105 = arith.truncf %104 : vector<16x16xf32> to vector<16x16xbf16>
    %106 = vector.extract_strided_slice %22 {offsets = [0, 48], sizes = [16, 16], strides = [1, 1]} : vector<16x64xf32> to vector<16x16xf32>
    %107 = arith.truncf %106 : vector<16x16xf32> to vector<16x16xbf16>
    %108 = vector.extract_strided_slice %23 {offsets = [0, 48], sizes = [16, 16], strides = [1, 1]} : vector<16x64xf32> to vector<16x16xf32>
    %109 = arith.truncf %108 : vector<16x16xf32> to vector<16x16xbf16>
    %cst_43 = arith.constant dense<0.000000e+00> : vector<16x16xf32>
    %110 = tpu.matmul %105, %107, %cst_43 {dimension_numbers = #tpu.dot_dimension_numbers<[1], [1], [0], [0], [0, 0, 1, 0], [], []>} : vector<16x16xbf16>, vector<16x16xbf16>, vector<16x16xf32> -> vector<16x16xf32>
    %cst_44 = arith.constant 2.500000e-01 : f32
    %111 = vector.broadcast %cst_44 : f32 to vector<16x16xf32>
    %112 = arith.mulf %110, %111 : vector<16x16xf32>
    %cst_45 = arith.constant dense<0xFF800000> : vector<16xf32>
    %113 = vector.multi_reduction <maximumf>, %112, %cst_45 [1] : vector<16x16xf32> to vector<16xf32>
    %114 = vector.shape_cast %113 : vector<16xf32> to vector<16x1xf32>
    %115 = vector.broadcast %114 : vector<16x1xf32> to vector<16x16xf32>
    %116 = arith.subf %112, %115 : vector<16x16xf32>
    %117 = math.exp %116 : vector<16x16xf32>
    %cst_46 = arith.constant dense<0.000000e+00> : vector<16xf32>
    %118 = vector.multi_reduction <add>, %117, %cst_46 [1] : vector<16x16xf32> to vector<16xf32>
    %119 = vector.shape_cast %118 : vector<16xf32> to vector<16x1xf32>
    %120 = tpu.reciprocal %119 {approx = true} : vector<16x1xf32> -> vector<16x1xf32>
    %121 = vector.broadcast %120 : vector<16x1xf32> to vector<16x16xf32>
    %122 = arith.mulf %117, %121 : vector<16x16xf32>
    %123 = arith.truncf %122 : vector<16x16xf32> to vector<16x16xbf16>
    %cst_47 = arith.constant dense<0.000000e+00> : vector<16x16xf32>
    %124 = tpu.matmul %123, %109, %cst_47 {dimension_numbers = #tpu.dot_dimension_numbers<[1], [0], [0], [1], [0, 0, 1, 1], [], []>} : vector<16x16xbf16>, vector<16x16xbf16>, vector<16x16xf32> -> vector<16x16xf32>
    %125 = arith.truncf %124 : vector<16x16xf32> to vector<16x16xbf16>
    %126 = vector.extract_strided_slice %10 {offsets = [48, 0], sizes = [16, 64], strides = [1, 1]} : vector<64x64xbf16> to vector<16x64xbf16>
    %cst_48 = arith.constant dense<0.000000e+00> : vector<16x64xf32>
    %127 = tpu.matmul %125, %126, %cst_48 {dimension_numbers = #tpu.dot_dimension_numbers<[1], [0], [0], [1], [0, 0, 1, 1], [], []>} : vector<16x16xbf16>, vector<16x64xbf16>, vector<16x64xf32> -> vector<16x64xf32>
    %128 = arith.addf %103, %127 : vector<16x64xf32>
    %129 = arith.addf %1, %128 : vector<16x64xf32>
    %c0_49 = arith.constant 0 : index
    %c0_50 = arith.constant 0 : index
    %c0_51 = arith.constant 0 : index
    %130 = vector.load %arg13[%c0_49, %c0_50, %c0_51] : memref<2x1x64xf32, #tpu.memory_space<vmem>>, vector<1x1x64xf32>
    %131 = vector.shape_cast %130 : vector<1x1x64xf32> to vector<1x64xf32>
    %c0_52 = arith.constant 0 : index
    %c0_53 = arith.constant 0 : index
    %c0_54 = arith.constant 0 : index
    %132 = vector.load %arg14[%c0_52, %c0_53, %c0_54] : memref<2x1x64xf32, #tpu.memory_space<vmem>>, vector<1x1x64xf32>
    %133 = vector.shape_cast %132 : vector<1x1x64xf32> to vector<1x64xf32>
    %cst_55 = arith.constant dense<0.000000e+00> : vector<16xf32>
    %134 = vector.multi_reduction <add>, %129, %cst_55 [1] : vector<16x64xf32> to vector<16xf32>
    %135 = vector.shape_cast %134 : vector<16xf32> to vector<16x1xf32>
    %cst_56 = arith.constant 6.400000e+01 : f32
    %136 = vector.broadcast %cst_56 : f32 to vector<16x1xf32>
    %137 = arith.divf %135, %136 : vector<16x1xf32>
    %138 = vector.broadcast %137 : vector<16x1xf32> to vector<16x64xf32>
    %139 = arith.subf %129, %138 : vector<16x64xf32>
    %140 = arith.mulf %139, %139 : vector<16x64xf32>
    %cst_57 = arith.constant dense<0.000000e+00> : vector<16xf32>
    %141 = vector.multi_reduction <add>, %140, %cst_57 [1] : vector<16x64xf32> to vector<16xf32>
    %142 = vector.shape_cast %141 : vector<16xf32> to vector<16x1xf32>
    %cst_58 = arith.constant 6.400000e+01 : f32
    %143 = vector.broadcast %cst_58 : f32 to vector<16x1xf32>
    %144 = arith.divf %142, %143 : vector<16x1xf32>
    %cst_59 = arith.constant 9.99999974E-6 : f32
    %145 = vector.broadcast %cst_59 : f32 to vector<16x1xf32>
    %146 = arith.addf %144, %145 : vector<16x1xf32>
    %147 = math.rsqrt %146 : vector<16x1xf32>
    %148 = vector.broadcast %147 : vector<16x1xf32> to vector<16x64xf32>
    %149 = arith.mulf %139, %148 : vector<16x64xf32>
    %150 = vector.broadcast %131 : vector<1x64xf32> to vector<16x64xf32>
    %151 = arith.mulf %149, %150 : vector<16x64xf32>
    %152 = vector.broadcast %133 : vector<1x64xf32> to vector<16x64xf32>
    %153 = arith.addf %151, %152 : vector<16x64xf32>
    %154 = arith.truncf %153 : vector<16x64xf32> to vector<16x64xbf16>
    %c0_60 = arith.constant 0 : index
    %c0_61 = arith.constant 0 : index
    %c0_62 = arith.constant 0 : index
    %155 = vector.load %arg9[%c0_60, %c0_61, %c0_62] : memref<2x64x128xbf16, #tpu.memory_space<vmem>>, vector<1x64x128xbf16>
    %156 = vector.shape_cast %155 : vector<1x64x128xbf16> to vector<64x128xbf16>
    %cst_63 = arith.constant dense<0.000000e+00> : vector<16x128xf32>
    %157 = tpu.matmul %154, %156, %cst_63 {dimension_numbers = #tpu.dot_dimension_numbers<[1], [0], [0], [1], [0, 0, 1, 1], [], []>} : vector<16x64xbf16>, vector<64x128xbf16>, vector<16x128xf32> -> vector<16x128xf32>
    %c0_64 = arith.constant 0 : index
    %c0_65 = arith.constant 0 : index
    %c0_66 = arith.constant 0 : index
    %158 = vector.load %arg10[%c0_64, %c0_65, %c0_66] : memref<2x1x128xf32, #tpu.memory_space<vmem>>, vector<1x1x128xf32>
    %159 = vector.shape_cast %158 : vector<1x1x128xf32> to vector<1x128xf32>
    %160 = vector.broadcast %159 : vector<1x128xf32> to vector<16x128xf32>
    %161 = arith.addf %157, %160 : vector<16x128xf32>
    %cst_67 = arith.constant 0.000000e+00 : f32
    %162 = vector.broadcast %cst_67 : f32 to vector<16x128xf32>
    %163 = arith.maximumf %161, %162 : vector<16x128xf32>
    %164 = arith.truncf %163 : vector<16x128xf32> to vector<16x128xbf16>
    %c0_68 = arith.constant 0 : index
    %c0_69 = arith.constant 0 : index
    %c0_70 = arith.constant 0 : index
    %165 = vector.load %arg11[%c0_68, %c0_69, %c0_70] : memref<2x128x64xbf16, #tpu.memory_space<vmem>>, vector<1x128x64xbf16>
    %166 = vector.shape_cast %165 : vector<1x128x64xbf16> to vector<128x64xbf16>
    %cst_71 = arith.constant dense<0.000000e+00> : vector<16x64xf32>
    %167 = tpu.matmul %164, %166, %cst_71 {dimension_numbers = #tpu.dot_dimension_numbers<[1], [0], [0], [1], [0, 0, 1, 1], [], []>} : vector<16x128xbf16>, vector<128x64xbf16>, vector<16x64xf32> -> vector<16x64xf32>
    %c0_72 = arith.constant 0 : index
    %c0_73 = arith.constant 0 : index
    %c0_74 = arith.constant 0 : index
    %168 = vector.load %arg12[%c0_72, %c0_73, %c0_74] : memref<2x1x64xf32, #tpu.memory_space<vmem>>, vector<1x1x64xf32>
    %169 = vector.shape_cast %168 : vector<1x1x64xf32> to vector<1x64xf32>
    %170 = vector.broadcast %169 : vector<1x64xf32> to vector<16x64xf32>
    %171 = arith.addf %167, %170 : vector<16x64xf32>
    %172 = arith.addf %153, %171 : vector<16x64xf32>
    %c0_75 = arith.constant 0 : index
    %c0_76 = arith.constant 0 : index
    %c0_77 = arith.constant 0 : index
    %173 = vector.load %arg15[%c0_75, %c0_76, %c0_77] : memref<2x1x64xf32, #tpu.memory_space<vmem>>, vector<1x1x64xf32>
    %174 = vector.shape_cast %173 : vector<1x1x64xf32> to vector<1x64xf32>
    %c0_78 = arith.constant 0 : index
    %c0_79 = arith.constant 0 : index
    %c0_80 = arith.constant 0 : index
    %175 = vector.load %arg16[%c0_78, %c0_79, %c0_80] : memref<2x1x64xf32, #tpu.memory_space<vmem>>, vector<1x1x64xf32>
    %176 = vector.shape_cast %175 : vector<1x1x64xf32> to vector<1x64xf32>
    %cst_81 = arith.constant dense<0.000000e+00> : vector<16xf32>
    %177 = vector.multi_reduction <add>, %172, %cst_81 [1] : vector<16x64xf32> to vector<16xf32>
    %178 = vector.shape_cast %177 : vector<16xf32> to vector<16x1xf32>
    %cst_82 = arith.constant 6.400000e+01 : f32
    %179 = vector.broadcast %cst_82 : f32 to vector<16x1xf32>
    %180 = arith.divf %178, %179 : vector<16x1xf32>
    %181 = vector.broadcast %180 : vector<16x1xf32> to vector<16x64xf32>
    %182 = arith.subf %172, %181 : vector<16x64xf32>
    %183 = arith.mulf %182, %182 : vector<16x64xf32>
    %cst_83 = arith.constant dense<0.000000e+00> : vector<16xf32>
    %184 = vector.multi_reduction <add>, %183, %cst_83 [1] : vector<16x64xf32> to vector<16xf32>
    %185 = vector.shape_cast %184 : vector<16xf32> to vector<16x1xf32>
    %cst_84 = arith.constant 6.400000e+01 : f32
    %186 = vector.broadcast %cst_84 : f32 to vector<16x1xf32>
    %187 = arith.divf %185, %186 : vector<16x1xf32>
    %cst_85 = arith.constant 9.99999974E-6 : f32
    %188 = vector.broadcast %cst_85 : f32 to vector<16x1xf32>
    %189 = arith.addf %187, %188 : vector<16x1xf32>
    %190 = math.rsqrt %189 : vector<16x1xf32>
    %191 = vector.broadcast %190 : vector<16x1xf32> to vector<16x64xf32>
    %192 = arith.mulf %182, %191 : vector<16x64xf32>
    %193 = vector.broadcast %174 : vector<1x64xf32> to vector<16x64xf32>
    %194 = arith.mulf %192, %193 : vector<16x64xf32>
    %195 = vector.broadcast %176 : vector<1x64xf32> to vector<16x64xf32>
    %196 = arith.addf %194, %195 : vector<16x64xf32>
    %c1 = arith.constant 1 : index
    %c0_86 = arith.constant 0 : index
    %c0_87 = arith.constant 0 : index
    %197 = vector.load %arg3[%c1, %c0_86, %c0_87] : memref<2x64x64xbf16, #tpu.memory_space<vmem>>, vector<1x64x64xbf16>
    %198 = vector.shape_cast %197 : vector<1x64x64xbf16> to vector<64x64xbf16>
    %c1_88 = arith.constant 1 : index
    %c0_89 = arith.constant 0 : index
    %c0_90 = arith.constant 0 : index
    %199 = vector.load %arg5[%c1_88, %c0_89, %c0_90] : memref<2x64x128xbf16, #tpu.memory_space<vmem>>, vector<1x64x128xbf16>
    %200 = vector.shape_cast %199 : vector<1x64x128xbf16> to vector<64x128xbf16>
    %c1_91 = arith.constant 1 : index
    %c0_92 = arith.constant 0 : index
    %c0_93 = arith.constant 0 : index
    %201 = vector.load %arg7[%c1_91, %c0_92, %c0_93] : memref<2x64x64xbf16, #tpu.memory_space<vmem>>, vector<1x64x64xbf16>
    %202 = vector.shape_cast %201 : vector<1x64x64xbf16> to vector<64x64xbf16>
    %203 = arith.truncf %196 : vector<16x64xf32> to vector<16x64xbf16>
    %cst_94 = arith.constant dense<0.000000e+00> : vector<16x64xf32>
    %204 = tpu.matmul %203, %198, %cst_94 {dimension_numbers = #tpu.dot_dimension_numbers<[1], [0], [0], [1], [0, 0, 1, 1], [], []>} : vector<16x64xbf16>, vector<64x64xbf16>, vector<16x64xf32> -> vector<16x64xf32>
    %c1_95 = arith.constant 1 : index
    %c0_96 = arith.constant 0 : index
    %c0_97 = arith.constant 0 : index
    %205 = vector.load %arg4[%c1_95, %c0_96, %c0_97] : memref<2x1x64xf32, #tpu.memory_space<vmem>>, vector<1x1x64xf32>
    %206 = vector.shape_cast %205 : vector<1x1x64xf32> to vector<1x64xf32>
    %207 = vector.broadcast %206 : vector<1x64xf32> to vector<16x64xf32>
    %208 = arith.addf %204, %207 : vector<16x64xf32>
    %cst_98 = arith.constant dense<0.000000e+00> : vector<16x128xf32>
    %209 = tpu.matmul %4, %200, %cst_98 {dimension_numbers = #tpu.dot_dimension_numbers<[1], [0], [0], [1], [0, 0, 1, 1], [], []>} : vector<16x64xbf16>, vector<64x128xbf16>, vector<16x128xf32> -> vector<16x128xf32>
    %c1_99 = arith.constant 1 : index
    %c0_100 = arith.constant 0 : index
    %c0_101 = arith.constant 0 : index
    %210 = vector.load %arg6[%c1_99, %c0_100, %c0_101] : memref<2x1x128xf32, #tpu.memory_space<vmem>>, vector<1x1x128xf32>
    %211 = vector.shape_cast %210 : vector<1x1x128xf32> to vector<1x128xf32>
    %212 = vector.broadcast %211 : vector<1x128xf32> to vector<16x128xf32>
    %213 = arith.addf %209, %212 : vector<16x128xf32>
    %214 = vector.extract_strided_slice %213 {offsets = [0, 0], sizes = [16, 64], strides = [1, 1]} : vector<16x128xf32> to vector<16x64xf32>
    %215 = vector.extract_strided_slice %213 {offsets = [0, 64], sizes = [16, 64], strides = [1, 1]} : vector<16x128xf32> to vector<16x64xf32>
    %cst_102 = arith.constant 0.000000e+00 : f32
    %216 = vector.broadcast %cst_102 : f32 to vector<16x64xf32>
    %c1_103 = arith.constant 1 : index
    %c0_104 = arith.constant 0 : index
    %c0_105 = arith.constant 0 : index
    %217 = vector.load %arg8[%c1_103, %c0_104, %c0_105] : memref<2x1x64xf32, #tpu.memory_space<vmem>>, vector<1x1x64xf32>
    %218 = vector.shape_cast %217 : vector<1x1x64xf32> to vector<1x64xf32>
    %219 = vector.broadcast %218 : vector<1x64xf32> to vector<16x64xf32>
    %220 = arith.addf %216, %219 : vector<16x64xf32>
    %221 = vector.extract_strided_slice %208 {offsets = [0, 0], sizes = [16, 16], strides = [1, 1]} : vector<16x64xf32> to vector<16x16xf32>
    %222 = arith.truncf %221 : vector<16x16xf32> to vector<16x16xbf16>
    %223 = vector.extract_strided_slice %214 {offsets = [0, 0], sizes = [16, 16], strides = [1, 1]} : vector<16x64xf32> to vector<16x16xf32>
    %224 = arith.truncf %223 : vector<16x16xf32> to vector<16x16xbf16>
    %225 = vector.extract_strided_slice %215 {offsets = [0, 0], sizes = [16, 16], strides = [1, 1]} : vector<16x64xf32> to vector<16x16xf32>
    %226 = arith.truncf %225 : vector<16x16xf32> to vector<16x16xbf16>
    %cst_106 = arith.constant dense<0.000000e+00> : vector<16x16xf32>
    %227 = tpu.matmul %222, %224, %cst_106 {dimension_numbers = #tpu.dot_dimension_numbers<[1], [1], [0], [0], [0, 0, 1, 0], [], []>} : vector<16x16xbf16>, vector<16x16xbf16>, vector<16x16xf32> -> vector<16x16xf32>
    %cst_107 = arith.constant 2.500000e-01 : f32
    %228 = vector.broadcast %cst_107 : f32 to vector<16x16xf32>
    %229 = arith.mulf %227, %228 : vector<16x16xf32>
    %cst_108 = arith.constant dense<0xFF800000> : vector<16xf32>
    %230 = vector.multi_reduction <maximumf>, %229, %cst_108 [1] : vector<16x16xf32> to vector<16xf32>
    %231 = vector.shape_cast %230 : vector<16xf32> to vector<16x1xf32>
    %232 = vector.broadcast %231 : vector<16x1xf32> to vector<16x16xf32>
    %233 = arith.subf %229, %232 : vector<16x16xf32>
    %234 = math.exp %233 : vector<16x16xf32>
    %cst_109 = arith.constant dense<0.000000e+00> : vector<16xf32>
    %235 = vector.multi_reduction <add>, %234, %cst_109 [1] : vector<16x16xf32> to vector<16xf32>
    %236 = vector.shape_cast %235 : vector<16xf32> to vector<16x1xf32>
    %237 = tpu.reciprocal %236 {approx = true} : vector<16x1xf32> -> vector<16x1xf32>
    %238 = vector.broadcast %237 : vector<16x1xf32> to vector<16x16xf32>
    %239 = arith.mulf %234, %238 : vector<16x16xf32>
    %240 = arith.truncf %239 : vector<16x16xf32> to vector<16x16xbf16>
    %cst_110 = arith.constant dense<0.000000e+00> : vector<16x16xf32>
    %241 = tpu.matmul %240, %226, %cst_110 {dimension_numbers = #tpu.dot_dimension_numbers<[1], [0], [0], [1], [0, 0, 1, 1], [], []>} : vector<16x16xbf16>, vector<16x16xbf16>, vector<16x16xf32> -> vector<16x16xf32>
    %242 = arith.truncf %241 : vector<16x16xf32> to vector<16x16xbf16>
    %243 = vector.extract_strided_slice %202 {offsets = [0, 0], sizes = [16, 64], strides = [1, 1]} : vector<64x64xbf16> to vector<16x64xbf16>
    %cst_111 = arith.constant dense<0.000000e+00> : vector<16x64xf32>
    %244 = tpu.matmul %242, %243, %cst_111 {dimension_numbers = #tpu.dot_dimension_numbers<[1], [0], [0], [1], [0, 0, 1, 1], [], []>} : vector<16x16xbf16>, vector<16x64xbf16>, vector<16x64xf32> -> vector<16x64xf32>
    %245 = arith.addf %220, %244 : vector<16x64xf32>
    %246 = vector.extract_strided_slice %208 {offsets = [0, 16], sizes = [16, 16], strides = [1, 1]} : vector<16x64xf32> to vector<16x16xf32>
    %247 = arith.truncf %246 : vector<16x16xf32> to vector<16x16xbf16>
    %248 = vector.extract_strided_slice %214 {offsets = [0, 16], sizes = [16, 16], strides = [1, 1]} : vector<16x64xf32> to vector<16x16xf32>
    %249 = arith.truncf %248 : vector<16x16xf32> to vector<16x16xbf16>
    %250 = vector.extract_strided_slice %215 {offsets = [0, 16], sizes = [16, 16], strides = [1, 1]} : vector<16x64xf32> to vector<16x16xf32>
    %251 = arith.truncf %250 : vector<16x16xf32> to vector<16x16xbf16>
    %cst_112 = arith.constant dense<0.000000e+00> : vector<16x16xf32>
    %252 = tpu.matmul %247, %249, %cst_112 {dimension_numbers = #tpu.dot_dimension_numbers<[1], [1], [0], [0], [0, 0, 1, 0], [], []>} : vector<16x16xbf16>, vector<16x16xbf16>, vector<16x16xf32> -> vector<16x16xf32>
    %cst_113 = arith.constant 2.500000e-01 : f32
    %253 = vector.broadcast %cst_113 : f32 to vector<16x16xf32>
    %254 = arith.mulf %252, %253 : vector<16x16xf32>
    %cst_114 = arith.constant dense<0xFF800000> : vector<16xf32>
    %255 = vector.multi_reduction <maximumf>, %254, %cst_114 [1] : vector<16x16xf32> to vector<16xf32>
    %256 = vector.shape_cast %255 : vector<16xf32> to vector<16x1xf32>
    %257 = vector.broadcast %256 : vector<16x1xf32> to vector<16x16xf32>
    %258 = arith.subf %254, %257 : vector<16x16xf32>
    %259 = math.exp %258 : vector<16x16xf32>
    %cst_115 = arith.constant dense<0.000000e+00> : vector<16xf32>
    %260 = vector.multi_reduction <add>, %259, %cst_115 [1] : vector<16x16xf32> to vector<16xf32>
    %261 = vector.shape_cast %260 : vector<16xf32> to vector<16x1xf32>
    %262 = tpu.reciprocal %261 {approx = true} : vector<16x1xf32> -> vector<16x1xf32>
    %263 = vector.broadcast %262 : vector<16x1xf32> to vector<16x16xf32>
    %264 = arith.mulf %259, %263 : vector<16x16xf32>
    %265 = arith.truncf %264 : vector<16x16xf32> to vector<16x16xbf16>
    %cst_116 = arith.constant dense<0.000000e+00> : vector<16x16xf32>
    %266 = tpu.matmul %265, %251, %cst_116 {dimension_numbers = #tpu.dot_dimension_numbers<[1], [0], [0], [1], [0, 0, 1, 1], [], []>} : vector<16x16xbf16>, vector<16x16xbf16>, vector<16x16xf32> -> vector<16x16xf32>
    %267 = arith.truncf %266 : vector<16x16xf32> to vector<16x16xbf16>
    %268 = vector.extract_strided_slice %202 {offsets = [16, 0], sizes = [16, 64], strides = [1, 1]} : vector<64x64xbf16> to vector<16x64xbf16>
    %cst_117 = arith.constant dense<0.000000e+00> : vector<16x64xf32>
    %269 = tpu.matmul %267, %268, %cst_117 {dimension_numbers = #tpu.dot_dimension_numbers<[1], [0], [0], [1], [0, 0, 1, 1], [], []>} : vector<16x16xbf16>, vector<16x64xbf16>, vector<16x64xf32> -> vector<16x64xf32>
    %270 = arith.addf %245, %269 : vector<16x64xf32>
    %271 = vector.extract_strided_slice %208 {offsets = [0, 32], sizes = [16, 16], strides = [1, 1]} : vector<16x64xf32> to vector<16x16xf32>
    %272 = arith.truncf %271 : vector<16x16xf32> to vector<16x16xbf16>
    %273 = vector.extract_strided_slice %214 {offsets = [0, 32], sizes = [16, 16], strides = [1, 1]} : vector<16x64xf32> to vector<16x16xf32>
    %274 = arith.truncf %273 : vector<16x16xf32> to vector<16x16xbf16>
    %275 = vector.extract_strided_slice %215 {offsets = [0, 32], sizes = [16, 16], strides = [1, 1]} : vector<16x64xf32> to vector<16x16xf32>
    %276 = arith.truncf %275 : vector<16x16xf32> to vector<16x16xbf16>
    %cst_118 = arith.constant dense<0.000000e+00> : vector<16x16xf32>
    %277 = tpu.matmul %272, %274, %cst_118 {dimension_numbers = #tpu.dot_dimension_numbers<[1], [1], [0], [0], [0, 0, 1, 0], [], []>} : vector<16x16xbf16>, vector<16x16xbf16>, vector<16x16xf32> -> vector<16x16xf32>
    %cst_119 = arith.constant 2.500000e-01 : f32
    %278 = vector.broadcast %cst_119 : f32 to vector<16x16xf32>
    %279 = arith.mulf %277, %278 : vector<16x16xf32>
    %cst_120 = arith.constant dense<0xFF800000> : vector<16xf32>
    %280 = vector.multi_reduction <maximumf>, %279, %cst_120 [1] : vector<16x16xf32> to vector<16xf32>
    %281 = vector.shape_cast %280 : vector<16xf32> to vector<16x1xf32>
    %282 = vector.broadcast %281 : vector<16x1xf32> to vector<16x16xf32>
    %283 = arith.subf %279, %282 : vector<16x16xf32>
    %284 = math.exp %283 : vector<16x16xf32>
    %cst_121 = arith.constant dense<0.000000e+00> : vector<16xf32>
    %285 = vector.multi_reduction <add>, %284, %cst_121 [1] : vector<16x16xf32> to vector<16xf32>
    %286 = vector.shape_cast %285 : vector<16xf32> to vector<16x1xf32>
    %287 = tpu.reciprocal %286 {approx = true} : vector<16x1xf32> -> vector<16x1xf32>
    %288 = vector.broadcast %287 : vector<16x1xf32> to vector<16x16xf32>
    %289 = arith.mulf %284, %288 : vector<16x16xf32>
    %290 = arith.truncf %289 : vector<16x16xf32> to vector<16x16xbf16>
    %cst_122 = arith.constant dense<0.000000e+00> : vector<16x16xf32>
    %291 = tpu.matmul %290, %276, %cst_122 {dimension_numbers = #tpu.dot_dimension_numbers<[1], [0], [0], [1], [0, 0, 1, 1], [], []>} : vector<16x16xbf16>, vector<16x16xbf16>, vector<16x16xf32> -> vector<16x16xf32>
    %292 = arith.truncf %291 : vector<16x16xf32> to vector<16x16xbf16>
    %293 = vector.extract_strided_slice %202 {offsets = [32, 0], sizes = [16, 64], strides = [1, 1]} : vector<64x64xbf16> to vector<16x64xbf16>
    %cst_123 = arith.constant dense<0.000000e+00> : vector<16x64xf32>
    %294 = tpu.matmul %292, %293, %cst_123 {dimension_numbers = #tpu.dot_dimension_numbers<[1], [0], [0], [1], [0, 0, 1, 1], [], []>} : vector<16x16xbf16>, vector<16x64xbf16>, vector<16x64xf32> -> vector<16x64xf32>
    %295 = arith.addf %270, %294 : vector<16x64xf32>
    %296 = vector.extract_strided_slice %208 {offsets = [0, 48], sizes = [16, 16], strides = [1, 1]} : vector<16x64xf32> to vector<16x16xf32>
    %297 = arith.truncf %296 : vector<16x16xf32> to vector<16x16xbf16>
    %298 = vector.extract_strided_slice %214 {offsets = [0, 48], sizes = [16, 16], strides = [1, 1]} : vector<16x64xf32> to vector<16x16xf32>
    %299 = arith.truncf %298 : vector<16x16xf32> to vector<16x16xbf16>
    %300 = vector.extract_strided_slice %215 {offsets = [0, 48], sizes = [16, 16], strides = [1, 1]} : vector<16x64xf32> to vector<16x16xf32>
    %301 = arith.truncf %300 : vector<16x16xf32> to vector<16x16xbf16>
    %cst_124 = arith.constant dense<0.000000e+00> : vector<16x16xf32>
    %302 = tpu.matmul %297, %299, %cst_124 {dimension_numbers = #tpu.dot_dimension_numbers<[1], [1], [0], [0], [0, 0, 1, 0], [], []>} : vector<16x16xbf16>, vector<16x16xbf16>, vector<16x16xf32> -> vector<16x16xf32>
    %cst_125 = arith.constant 2.500000e-01 : f32
    %303 = vector.broadcast %cst_125 : f32 to vector<16x16xf32>
    %304 = arith.mulf %302, %303 : vector<16x16xf32>
    %cst_126 = arith.constant dense<0xFF800000> : vector<16xf32>
    %305 = vector.multi_reduction <maximumf>, %304, %cst_126 [1] : vector<16x16xf32> to vector<16xf32>
    %306 = vector.shape_cast %305 : vector<16xf32> to vector<16x1xf32>
    %307 = vector.broadcast %306 : vector<16x1xf32> to vector<16x16xf32>
    %308 = arith.subf %304, %307 : vector<16x16xf32>
    %309 = math.exp %308 : vector<16x16xf32>
    %cst_127 = arith.constant dense<0.000000e+00> : vector<16xf32>
    %310 = vector.multi_reduction <add>, %309, %cst_127 [1] : vector<16x16xf32> to vector<16xf32>
    %311 = vector.shape_cast %310 : vector<16xf32> to vector<16x1xf32>
    %312 = tpu.reciprocal %311 {approx = true} : vector<16x1xf32> -> vector<16x1xf32>
    %313 = vector.broadcast %312 : vector<16x1xf32> to vector<16x16xf32>
    %314 = arith.mulf %309, %313 : vector<16x16xf32>
    %315 = arith.truncf %314 : vector<16x16xf32> to vector<16x16xbf16>
    %cst_128 = arith.constant dense<0.000000e+00> : vector<16x16xf32>
    %316 = tpu.matmul %315, %301, %cst_128 {dimension_numbers = #tpu.dot_dimension_numbers<[1], [0], [0], [1], [0, 0, 1, 1], [], []>} : vector<16x16xbf16>, vector<16x16xbf16>, vector<16x16xf32> -> vector<16x16xf32>
    %317 = arith.truncf %316 : vector<16x16xf32> to vector<16x16xbf16>
    %318 = vector.extract_strided_slice %202 {offsets = [48, 0], sizes = [16, 64], strides = [1, 1]} : vector<64x64xbf16> to vector<16x64xbf16>
    %cst_129 = arith.constant dense<0.000000e+00> : vector<16x64xf32>
    %319 = tpu.matmul %317, %318, %cst_129 {dimension_numbers = #tpu.dot_dimension_numbers<[1], [0], [0], [1], [0, 0, 1, 1], [], []>} : vector<16x16xbf16>, vector<16x64xbf16>, vector<16x64xf32> -> vector<16x64xf32>
    %320 = arith.addf %295, %319 : vector<16x64xf32>
    %321 = arith.addf %196, %320 : vector<16x64xf32>
    %c1_130 = arith.constant 1 : index
    %c0_131 = arith.constant 0 : index
    %c0_132 = arith.constant 0 : index
    %322 = vector.load %arg13[%c1_130, %c0_131, %c0_132] : memref<2x1x64xf32, #tpu.memory_space<vmem>>, vector<1x1x64xf32>
    %323 = vector.shape_cast %322 : vector<1x1x64xf32> to vector<1x64xf32>
    %c1_133 = arith.constant 1 : index
    %c0_134 = arith.constant 0 : index
    %c0_135 = arith.constant 0 : index
    %324 = vector.load %arg14[%c1_133, %c0_134, %c0_135] : memref<2x1x64xf32, #tpu.memory_space<vmem>>, vector<1x1x64xf32>
    %325 = vector.shape_cast %324 : vector<1x1x64xf32> to vector<1x64xf32>
    %cst_136 = arith.constant dense<0.000000e+00> : vector<16xf32>
    %326 = vector.multi_reduction <add>, %321, %cst_136 [1] : vector<16x64xf32> to vector<16xf32>
    %327 = vector.shape_cast %326 : vector<16xf32> to vector<16x1xf32>
    %cst_137 = arith.constant 6.400000e+01 : f32
    %328 = vector.broadcast %cst_137 : f32 to vector<16x1xf32>
    %329 = arith.divf %327, %328 : vector<16x1xf32>
    %330 = vector.broadcast %329 : vector<16x1xf32> to vector<16x64xf32>
    %331 = arith.subf %321, %330 : vector<16x64xf32>
    %332 = arith.mulf %331, %331 : vector<16x64xf32>
    %cst_138 = arith.constant dense<0.000000e+00> : vector<16xf32>
    %333 = vector.multi_reduction <add>, %332, %cst_138 [1] : vector<16x64xf32> to vector<16xf32>
    %334 = vector.shape_cast %333 : vector<16xf32> to vector<16x1xf32>
    %cst_139 = arith.constant 6.400000e+01 : f32
    %335 = vector.broadcast %cst_139 : f32 to vector<16x1xf32>
    %336 = arith.divf %334, %335 : vector<16x1xf32>
    %cst_140 = arith.constant 9.99999974E-6 : f32
    %337 = vector.broadcast %cst_140 : f32 to vector<16x1xf32>
    %338 = arith.addf %336, %337 : vector<16x1xf32>
    %339 = math.rsqrt %338 : vector<16x1xf32>
    %340 = vector.broadcast %339 : vector<16x1xf32> to vector<16x64xf32>
    %341 = arith.mulf %331, %340 : vector<16x64xf32>
    %342 = vector.broadcast %323 : vector<1x64xf32> to vector<16x64xf32>
    %343 = arith.mulf %341, %342 : vector<16x64xf32>
    %344 = vector.broadcast %325 : vector<1x64xf32> to vector<16x64xf32>
    %345 = arith.addf %343, %344 : vector<16x64xf32>
    %346 = arith.truncf %345 : vector<16x64xf32> to vector<16x64xbf16>
    %c1_141 = arith.constant 1 : index
    %c0_142 = arith.constant 0 : index
    %c0_143 = arith.constant 0 : index
    %347 = vector.load %arg9[%c1_141, %c0_142, %c0_143] : memref<2x64x128xbf16, #tpu.memory_space<vmem>>, vector<1x64x128xbf16>
    %348 = vector.shape_cast %347 : vector<1x64x128xbf16> to vector<64x128xbf16>
    %cst_144 = arith.constant dense<0.000000e+00> : vector<16x128xf32>
    %349 = tpu.matmul %346, %348, %cst_144 {dimension_numbers = #tpu.dot_dimension_numbers<[1], [0], [0], [1], [0, 0, 1, 1], [], []>} : vector<16x64xbf16>, vector<64x128xbf16>, vector<16x128xf32> -> vector<16x128xf32>
    %c1_145 = arith.constant 1 : index
    %c0_146 = arith.constant 0 : index
    %c0_147 = arith.constant 0 : index
    %350 = vector.load %arg10[%c1_145, %c0_146, %c0_147] : memref<2x1x128xf32, #tpu.memory_space<vmem>>, vector<1x1x128xf32>
    %351 = vector.shape_cast %350 : vector<1x1x128xf32> to vector<1x128xf32>
    %352 = vector.broadcast %351 : vector<1x128xf32> to vector<16x128xf32>
    %353 = arith.addf %349, %352 : vector<16x128xf32>
    %cst_148 = arith.constant 0.000000e+00 : f32
    %354 = vector.broadcast %cst_148 : f32 to vector<16x128xf32>
    %355 = arith.maximumf %353, %354 : vector<16x128xf32>
    %356 = arith.truncf %355 : vector<16x128xf32> to vector<16x128xbf16>
    %c1_149 = arith.constant 1 : index
    %c0_150 = arith.constant 0 : index
    %c0_151 = arith.constant 0 : index
    %357 = vector.load %arg11[%c1_149, %c0_150, %c0_151] : memref<2x128x64xbf16, #tpu.memory_space<vmem>>, vector<1x128x64xbf16>
    %358 = vector.shape_cast %357 : vector<1x128x64xbf16> to vector<128x64xbf16>
    %cst_152 = arith.constant dense<0.000000e+00> : vector<16x64xf32>
    %359 = tpu.matmul %356, %358, %cst_152 {dimension_numbers = #tpu.dot_dimension_numbers<[1], [0], [0], [1], [0, 0, 1, 1], [], []>} : vector<16x128xbf16>, vector<128x64xbf16>, vector<16x64xf32> -> vector<16x64xf32>
    %c1_153 = arith.constant 1 : index
    %c0_154 = arith.constant 0 : index
    %c0_155 = arith.constant 0 : index
    %360 = vector.load %arg12[%c1_153, %c0_154, %c0_155] : memref<2x1x64xf32, #tpu.memory_space<vmem>>, vector<1x1x64xf32>
    %361 = vector.shape_cast %360 : vector<1x1x64xf32> to vector<1x64xf32>
    %362 = vector.broadcast %361 : vector<1x64xf32> to vector<16x64xf32>
    %363 = arith.addf %359, %362 : vector<16x64xf32>
    %364 = arith.addf %345, %363 : vector<16x64xf32>
    %c1_156 = arith.constant 1 : index
    %c0_157 = arith.constant 0 : index
    %c0_158 = arith.constant 0 : index
    %365 = vector.load %arg15[%c1_156, %c0_157, %c0_158] : memref<2x1x64xf32, #tpu.memory_space<vmem>>, vector<1x1x64xf32>
    %366 = vector.shape_cast %365 : vector<1x1x64xf32> to vector<1x64xf32>
    %c1_159 = arith.constant 1 : index
    %c0_160 = arith.constant 0 : index
    %c0_161 = arith.constant 0 : index
    %367 = vector.load %arg16[%c1_159, %c0_160, %c0_161] : memref<2x1x64xf32, #tpu.memory_space<vmem>>, vector<1x1x64xf32>
    %368 = vector.shape_cast %367 : vector<1x1x64xf32> to vector<1x64xf32>
    %cst_162 = arith.constant dense<0.000000e+00> : vector<16xf32>
    %369 = vector.multi_reduction <add>, %364, %cst_162 [1] : vector<16x64xf32> to vector<16xf32>
    %370 = vector.shape_cast %369 : vector<16xf32> to vector<16x1xf32>
    %cst_163 = arith.constant 6.400000e+01 : f32
    %371 = vector.broadcast %cst_163 : f32 to vector<16x1xf32>
    %372 = arith.divf %370, %371 : vector<16x1xf32>
    %373 = vector.broadcast %372 : vector<16x1xf32> to vector<16x64xf32>
    %374 = arith.subf %364, %373 : vector<16x64xf32>
    %375 = arith.mulf %374, %374 : vector<16x64xf32>
    %cst_164 = arith.constant dense<0.000000e+00> : vector<16xf32>
    %376 = vector.multi_reduction <add>, %375, %cst_164 [1] : vector<16x64xf32> to vector<16xf32>
    %377 = vector.shape_cast %376 : vector<16xf32> to vector<16x1xf32>
    %cst_165 = arith.constant 6.400000e+01 : f32
    %378 = vector.broadcast %cst_165 : f32 to vector<16x1xf32>
    %379 = arith.divf %377, %378 : vector<16x1xf32>
    %cst_166 = arith.constant 9.99999974E-6 : f32
    %380 = vector.broadcast %cst_166 : f32 to vector<16x1xf32>
    %381 = arith.addf %379, %380 : vector<16x1xf32>
    %382 = math.rsqrt %381 : vector<16x1xf32>
    %383 = vector.broadcast %382 : vector<16x1xf32> to vector<16x64xf32>
    %384 = arith.mulf %374, %383 : vector<16x64xf32>
    %385 = vector.broadcast %366 : vector<1x64xf32> to vector<16x64xf32>
    %386 = arith.mulf %384, %385 : vector<16x64xf32>
    %387 = vector.broadcast %368 : vector<1x64xf32> to vector<16x64xf32>
    %388 = arith.addf %386, %387 : vector<16x64xf32>
    %389 = arith.addf %1, %388 : vector<16x64xf32>
    %c0_167 = arith.constant 0 : index
    %c0_168 = arith.constant 0 : index
    %c0_169 = arith.constant 0 : index
    %390 = vector.load %arg17[%c0_167, %c0_168, %c0_169] : memref<1x16x64xf32, #tpu.memory_space<vmem>>, vector<1x16x64xf32>
    %391 = vector.shape_cast %390 : vector<1x16x64xf32> to vector<16x64xf32>
    %392 = vector.shape_cast %389 : vector<16x64xf32> to vector<1x16x64xf32>
    tpu.vector_store %arg17[%c0_167, %c0_168, %c0_169], %392 {strides = array<i32>} : memref<1x16x64xf32, #tpu.memory_space<vmem>>, vector<1x16x64xf32>,
    return
  }
  func.func @transform_0(%arg0: i32) -> (i32, i32, i32) {
    %c0_i32 = arith.constant 0 : i32
    %c0_i32_0 = arith.constant 0 : i32
    %c0_i32_1 = arith.constant 0 : i32
    return %arg0, %c0_i32, %c0_i32_0 : i32, i32, i32
  }
  func.func @transform_1(%arg0: i32) -> (i32, i32, i32) {
    %c0_i32 = arith.constant 0 : i32
    %c0_i32_0 = arith.constant 0 : i32
    %c0_i32_1 = arith.constant 0 : i32
    return %arg0, %c0_i32, %c0_i32_0 : i32, i32, i32
  }
  func.func @transform_2(%arg0: i32) -> (i32, i32, i32) {
    %c0_i32 = arith.constant 0 : i32
    %c0_i32_0 = arith.constant 0 : i32
    %c0_i32_1 = arith.constant 0 : i32
    %c0_i32_2 = arith.constant 0 : i32
    return %c0_i32, %c0_i32_0, %c0_i32_1 : i32, i32, i32
  }
  func.func @transform_3(%arg0: i32) -> (i32, i32, i32) {
    %c0_i32 = arith.constant 0 : i32
    %c0_i32_0 = arith.constant 0 : i32
    %c0_i32_1 = arith.constant 0 : i32
    %c0_i32_2 = arith.constant 0 : i32
    return %c0_i32, %c0_i32_0, %c0_i32_1 : i32, i32, i32
  }
  func.func @transform_4(%arg0: i32) -> (i32, i32, i32) {
    %c0_i32 = arith.constant 0 : i32
    %c0_i32_0 = arith.constant 0 : i32
    %c0_i32_1 = arith.constant 0 : i32
    %c0_i32_2 = arith.constant 0 : i32
    return %c0_i32, %c0_i32_0, %c0_i32_1 : i32, i32, i32
  }
  func.func @transform_5(%arg0: i32) -> (i32, i32, i32) {
    %c0_i32 = arith.constant 0 : i32
    %c0_i32_0 = arith.constant 0 : i32
    %c0_i32_1 = arith.constant 0 : i32
    %c0_i32_2 = arith.constant 0 : i32
    return %c0_i32, %c0_i32_0, %c0_i32_1 : i32, i32, i32
  }
  func.func @transform_6(%arg0: i32) -> (i32, i32, i32) {
    %c0_i32 = arith.constant 0 : i32
    %c0_i32_0 = arith.constant 0 : i32
    %c0_i32_1 = arith.constant 0 : i32
    %c0_i32_2 = arith.constant 0 : i32
    return %c0_i32, %c0_i32_0, %c0_i32_1 : i32, i32, i32
  }
  func.func @transform_7(%arg0: i32) -> (i32, i32, i32) {
    %c0_i32 = arith.constant 0 : i32
    %c0_i32_0 = arith.constant 0 : i32
    %c0_i32_1 = arith.constant 0 : i32
    %c0_i32_2 = arith.constant 0 : i32
    return %c0_i32, %c0_i32_0, %c0_i32_1 : i32, i32, i32
  }
  func.func @transform_8(%arg0: i32) -> (i32, i32, i32) {
    %c0_i32 = arith.constant 0 : i32
    %c0_i32_0 = arith.constant 0 : i32
    %c0_i32_1 = arith.constant 0 : i32
    %c0_i32_2 = arith.constant 0 : i32
    return %c0_i32, %c0_i32_0, %c0_i32_1 : i32, i32, i32
  }
  func.func @transform_9(%arg0: i32) -> (i32, i32, i32) {
    %c0_i32 = arith.constant 0 : i32
    %c0_i32_0 = arith.constant 0 : i32
    %c0_i32_1 = arith.constant 0 : i32
    %c0_i32_2 = arith.constant 0 : i32
    return %c0_i32, %c0_i32_0, %c0_i32_1 : i32, i32, i32
  }
  func.func @transform_10(%arg0: i32) -> (i32, i32, i32) {
    %c0_i32 = arith.constant 0 : i32
    %c0_i32_0 = arith.constant 0 : i32
    %c0_i32_1 = arith.constant 0 : i32
    %c0_i32_2 = arith.constant 0 : i32
    return %c0_i32, %c0_i32_0, %c0_i32_1 : i32, i32, i32
  }
  func.func @transform_11(%arg0: i32) -> (i32, i32, i32) {
    %c0_i32 = arith.constant 0 : i32
    %c0_i32_0 = arith.constant 0 : i32
    %c0_i32_1 = arith.constant 0 : i32
    %c0_i32_2 = arith.constant 0 : i32
    return %c0_i32, %c0_i32_0, %c0_i32_1 : i32, i32, i32
  }
  func.func @transform_12(%arg0: i32) -> (i32, i32, i32) {
    %c0_i32 = arith.constant 0 : i32
    %c0_i32_0 = arith.constant 0 : i32
    %c0_i32_1 = arith.constant 0 : i32
    %c0_i32_2 = arith.constant 0 : i32
    return %c0_i32, %c0_i32_0, %c0_i32_1 : i32, i32, i32
  }
  func.func @transform_13(%arg0: i32) -> (i32, i32, i32) {
    %c0_i32 = arith.constant 0 : i32
    %c0_i32_0 = arith.constant 0 : i32
    %c0_i32_1 = arith.constant 0 : i32
    %c0_i32_2 = arith.constant 0 : i32
    return %c0_i32, %c0_i32_0, %c0_i32_1 : i32, i32, i32
  }
  func.func @transform_14(%arg0: i32) -> (i32, i32, i32) {
    %c0_i32 = arith.constant 0 : i32
    %c0_i32_0 = arith.constant 0 : i32
    %c0_i32_1 = arith.constant 0 : i32
    %c0_i32_2 = arith.constant 0 : i32
    return %c0_i32, %c0_i32_0, %c0_i32_1 : i32, i32, i32
  }
  func.func @transform_15(%arg0: i32) -> (i32, i32, i32) {
    %c0_i32 = arith.constant 0 : i32
    %c0_i32_0 = arith.constant 0 : i32
    %c0_i32_1 = arith.constant 0 : i32
    %c0_i32_2 = arith.constant 0 : i32
    return %c0_i32, %c0_i32_0, %c0_i32_1 : i32, i32, i32
  }
  func.func @transform_16(%arg0: i32) -> (i32, i32, i32) {
    %c0_i32 = arith.constant 0 : i32
    %c0_i32_0 = arith.constant 0 : i32
    %c0_i32_1 = arith.constant 0 : i32
    return %arg0, %c0_i32, %c0_i32_0 : i32, i32, i32
  }
}

module attributes {stable_mosaic.version = 11 : i64} {
  func.func @_transformer_kernel(%arg0: i32, %arg1: memref<1x16x64xf32, #tpu.memory_space<vmem>>, %arg2: memref<1x16x64xf32, #tpu.memory_space<vmem>>, %arg3: memref<2x64x64xbf16, #tpu.memory_space<vmem>>, %arg4: memref<2x1x64xf32, #tpu.memory_space<vmem>>, %arg5: memref<2x64x128xbf16, #tpu.memory_space<vmem>>, %arg6: memref<2x1x128xf32, #tpu.memory_space<vmem>>, %arg7: memref<2x64x64xbf16, #tpu.memory_space<vmem>>, %arg8: memref<2x1x64xf32, #tpu.memory_space<vmem>>, %arg9: memref<2x64x128xbf16, #tpu.memory_space<vmem>>, %arg10: memref<2x1x128xf32, #tpu.memory_space<vmem>>, %arg11: memref<2x128x64xbf16, #tpu.memory_space<vmem>>, %arg12: memref<2x1x64xf32, #tpu.memory_space<vmem>>, %arg13: memref<2x1x64xf32, #tpu.memory_space<vmem>>, %arg14: memref<2x1x64xf32, #tpu.memory_space<vmem>>, %arg15: memref<2x1x64xf32, #tpu.memory_space<vmem>>, %arg16: memref<2x1x64xf32, #tpu.memory_space<vmem>>, %arg17: memref<1x16x64xf32, #tpu.memory_space<vmem>>) attributes {dimension_semantics = [#tpu.dimension_semantics<parallel>], iteration_bounds = array<i64: 2>, scalar_prefetch = 0 : i64, scratch_operands = 0 : i64, tpu.core_type = #tpu.core_type<tc>, window_params = [{transform_indices = @transform_0, window_bounds = array<i64: 1, 16, 64>}, {transform_indices = @transform_1, window_bounds = array<i64: 1, 16, 64>}, {pipeline_mode = #tpu.pipeline_mode<synchronous>, transform_indices = @transform_2, window_bounds = array<i64: 2, 64, 64>}, {pipeline_mode = #tpu.pipeline_mode<synchronous>, transform_indices = @transform_3, window_bounds = array<i64: 2, 1, 64>}, {pipeline_mode = #tpu.pipeline_mode<synchronous>, transform_indices = @transform_4, window_bounds = array<i64: 2, 64, 128>}, {pipeline_mode = #tpu.pipeline_mode<synchronous>, transform_indices = @transform_5, window_bounds = array<i64: 2, 1, 128>}, {pipeline_mode = #tpu.pipeline_mode<synchronous>, transform_indices = @transform_6, window_bounds = array<i64: 2, 64, 64>}, {pipeline_mode = #tpu.pipeline_mode<synchronous>, transform_indices = @transform_7, window_bounds = array<i64: 2, 1, 64>}, {pipeline_mode = #tpu.pipeline_mode<synchronous>, transform_indices = @transform_8, window_bounds = array<i64: 2, 64, 128>}, {pipeline_mode = #tpu.pipeline_mode<synchronous>, transform_indices = @transform_9, window_bounds = array<i64: 2, 1, 128>}, {pipeline_mode = #tpu.pipeline_mode<synchronous>, transform_indices = @transform_10, window_bounds = array<i64: 2, 128, 64>}, {pipeline_mode = #tpu.pipeline_mode<synchronous>, transform_indices = @transform_11, window_bounds = array<i64: 2, 1, 64>}, {pipeline_mode = #tpu.pipeline_mode<synchronous>, transform_indices = @transform_12, window_bounds = array<i64: 2, 1, 64>}, {pipeline_mode = #tpu.pipeline_mode<synchronous>, transform_indices = @transform_13, window_bounds = array<i64: 2, 1, 64>}, {pipeline_mode = #tpu.pipeline_mode<synchronous>, transform_indices = @transform_14, window_bounds = array<i64: 2, 1, 64>}, {pipeline_mode = #tpu.pipeline_mode<synchronous>, transform_indices = @transform_15, window_bounds = array<i64: 2, 1, 64>}, {transform_indices = @transform_16, window_bounds = array<i64: 1, 16, 64>}]} {
    %c0 = arith.constant 0 : index
    %c0_0 = arith.constant 0 : index
    %c0_1 = arith.constant 0 : index
    %0 = vector.load %arg1[%c0, %c0_0, %c0_1] : memref<1x16x64xf32, #tpu.memory_space<vmem>>, vector<1x16x64xf32>
    %1 = vector.shape_cast %0 : vector<1x16x64xf32> to vector<16x64xf32>
    %c0_2 = arith.constant 0 : index
    %c0_3 = arith.constant 0 : index
    %c0_4 = arith.constant 0 : index
    %2 = vector.load %arg2[%c0_2, %c0_3, %c0_4] : memref<1x16x64xf32, #tpu.memory_space<vmem>>, vector<1x16x64xf32>
    %3 = vector.shape_cast %2 : vector<1x16x64xf32> to vector<16x64xf32>
    %4 = arith.truncf %3 : vector<16x64xf32> to vector<16x64xbf16>
    %c0_5 = arith.constant 0 : index
    %c0_6 = arith.constant 0 : index
    %c0_7 = arith.constant 0 : index
    %5 = vector.load %arg3[%c0_5, %c0_6, %c0_7] : memref<2x64x64xbf16, #tpu.memory_space<vmem>>, vector<1x64x64xbf16>
    %6 = vector.shape_cast %5 : vector<1x64x64xbf16> to vector<64x64xbf16>
    %c0_8 = arith.constant 0 : index
    %c0_9 = arith.constant 0 : index
    %c0_10 = arith.constant 0 : index
    %7 = vector.load %arg5[%c0_8, %c0_9, %c0_10] : memref<2x64x128xbf16, #tpu.memory_space<vmem>>, vector<1x64x128xbf16>
    %8 = vector.shape_cast %7 : vector<1x64x128xbf16> to vector<64x128xbf16>
    %c0_11 = arith.constant 0 : index
    %c0_12 = arith.constant 0 : index
    %c0_13 = arith.constant 0 : index
    %9 = vector.load %arg7[%c0_11, %c0_12, %c0_13] : memref<2x64x64xbf16, #tpu.memory_space<vmem>>, vector<1x64x64xbf16>
    %10 = vector.shape_cast %9 : vector<1x64x64xbf16> to vector<64x64xbf16>
    %11 = arith.truncf %1 : vector<16x64xf32> to vector<16x64xbf16>
    %cst = arith.constant dense<0.000000e+00> : vector<16x64xf32>
    %12 = tpu.matmul %11, %6, %cst {dimension_numbers = #tpu.dot_dimension_numbers<[1], [0], [0], [1], [0, 0, 1, 1], [], []>} : vector<16x64xbf16>, vector<64x64xbf16>, vector<16x64xf32> -> vector<16x64xf32>
    %c0_14 = arith.constant 0 : index
    %c0_15 = arith.constant 0 : index
    %c0_16 = arith.constant 0 : index
    %13 = vector.load %arg4[%c0_14, %c0_15, %c0_16] : memref<2x1x64xf32, #tpu.memory_space<vmem>>, vector<1x1x64xf32>
    %14 = vector.shape_cast %13 : vector<1x1x64xf32> to vector<1x64xf32>
    %15 = vector.broadcast %14 : vector<1x64xf32> to vector<16x64xf32>
    %16 = arith.addf %12, %15 : vector<16x64xf32>
    %cst_17 = arith.constant dense<0.000000e+00> : vector<16x128xf32>
    %17 = tpu.matmul %4, %8, %cst_17 {dimension_numbers = #tpu.dot_dimension_numbers<[1], [0], [0], [1], [0, 0, 1, 1], [], []>} : vector<16x64xbf16>, vector<64x128xbf16>, vector<16x128xf32> -> vector<16x128xf32>
    %c0_18 = arith.constant 0 : index
    %c0_19 = arith.constant 0 : index
    %c0_20 = arith.constant 0 : index
    %18 = vector.load %arg6[%c0_18, %c0_19, %c0_20] : memref<2x1x128xf32, #tpu.memory_space<vmem>>, vector<1x1x128xf32>
    %19 = vector.shape_cast %18 : vector<1x1x128xf32> to vector<1x128xf32>
    %20 = vector.broadcast %19 : vector<1x128xf32> to vector<16x128xf32>
    %21 = arith.addf %17, %20 : vector<16x128xf32>
    %22 = vector.extract_strided_slice %21 {offsets = [0, 0], sizes = [16, 64], strides = [1, 1]} : vector<16x128xf32> to vector<16x64xf32>
    %23 = vector.extract_strided_slice %21 {offsets = [0, 64], sizes = [16, 64], strides = [1, 1]} : vector<16x128xf32> to vector<16x64xf32>
    %cst_21 = arith.constant 0.000000e+00 : f32
    %24 = vector.broadcast %cst_21 : f32 to vector<16x64xf32>
    %c0_22 = arith.constant 0 : index
    %c0_23 = arith.constant 0 : index
    %c0_24 = arith.constant 0 : index
    %25 = vector.load %arg8[%c0_22, %c0_23, %c0_24] : memref<2x1x64xf32, #tpu.memory_space<vmem>>, vector<1x1x64xf32>
    %26 = vector.shape_cast %25 : vector<1x1x64xf32> to vector<1x64xf32>
    %27 = vector.broadcast %26 : vector<1x64xf32> to vector<16x64xf32>
    %28 = arith.addf %24, %27 : vector<16x64xf32>
    %29 = vector.extract_strided_slice %16 {offsets = [0, 0], sizes = [16, 16], strides = [1, 1]} : vector<16x64xf32> to vector<16x16xf32>
    %30 = arith.truncf %29 : vector<16x16xf32> to vector<16x16xbf16>
    %31 = vector.extract_strided_slice %22 {offsets = [0, 0], sizes = [16, 16], strides = [1, 1]} : vector<16x64xf32> to vector<16x16xf32>
    %32 = arith.truncf %31 : vector<16x16xf32> to vector<16x16xbf16>
    %33 = vector.extract_strided_slice %23 {offsets = [0, 0], sizes = [16, 16], strides = [1, 1]} : vector<16x64xf32> to vector<16x16xf32>
    %34 = arith.truncf %33 : vector<16x16xf32> to vector<16x16xbf16>
    %cst_25 = arith.constant dense<0.000000e+00> : vector<16x16xf32>
    %35 = tpu.matmul %30, %32, %cst_25 {dimension_numbers = #tpu.dot_dimension_numbers<[1], [1], [0], [0], [0, 0, 1, 0], [], []>} : vector<16x16xbf16>, vector<16x16xbf16>, vector<16x16xf32> -> vector<16x16xf32>
    %cst_26 = arith.constant 2.500000e-01 : f32
    %36 = vector.broadcast %cst_26 : f32 to vector<16x16xf32>
    %37 = arith.mulf %35, %36 : vector<16x16xf32>
    %cst_27 = arith.constant dense<0xFF800000> : vector<16xf32>
    %38 = vector.multi_reduction <maximumf>, %37, %cst_27 [1] : vector<16x16xf32> to vector<16xf32>
    %39 = vector.shape_cast %38 : vector<16xf32> to vector<16x1xf32>
    %40 = vector.broadcast %39 : vector<16x1xf32> to vector<16x16xf32>
    %41 = arith.subf %37, %40 : vector<16x16xf32>
    %42 = math.exp %41 : vector<16x16xf32>
    %cst_28 = arith.constant dense<0.000000e+00> : vector<16xf32>
    %43 = vector.multi_reduction <add>, %42, %cst_28 [1] : vector<16x16xf32> to vector<16xf32>
    %44 = vector.shape_cast %43 : vector<16xf32> to vector<16x1xf32>
    %45 = tpu.reciprocal %44 {approx = true} : vector<16x1xf32> -> vector<16x1xf32>
    %46 = vector.broadcast %45 : vector<16x1xf32> to vector<16x16xf32>
    %47 = arith.mulf %42, %46 : vector<16x16xf32>
    %48 = arith.truncf %47 : vector<16x16xf32> to vector<16x16xbf16>
    %cst_29 = arith.constant dense<0.000000e+00> : vector<16x16xf32>
    %49 = tpu.matmul %48, %34, %cst_29 {dimension_numbers = #tpu.dot_dimension_numbers<[1], [0], [0], [1], [0, 0, 1, 1], [], []>} : vector<16x16xbf16>, vector<16x16xbf16>, vector<16x16xf32> -> vector<16x16xf32>
    %50 = arith.truncf %49 : vector<16x16xf32> to vector<16x16xbf16>
    %51 = vector.extract_strided_slice %10 {offsets = [0, 0], sizes = [16, 64], strides = [1, 1]} : vector<64x64xbf16> to vector<16x64xbf16>
    %cst_30 = arith.constant dense<0.000000e+00> : vector<16x64xf32>
    %52 = tpu.matmul %50, %51, %cst_30 {dimension_numbers = #tpu.dot_dimension_numbers<[1], [0], [0], [1], [0, 0, 1, 1], [], []>} : vector<16x16xbf16>, vector<16x64xbf16>, vector<16x64xf32> -> vector<16x64xf32>
    %53 = arith.addf %28, %52 : vector<16x64xf32>
    %54 = vector.extract_strided_slice %16 {offsets = [0, 16], sizes = [16, 16], strides = [1, 1]} : vector<16x64xf32> to vector<16x16xf32>
    %55 = arith.truncf %54 : vector<16x16xf32> to vector<16x16xbf16>
    %56 = vector.extract_strided_slice %22 {offsets = [0, 16], sizes = [16, 16], strides = [1, 1]} : vector<16x64xf32> to vector<16x16xf32>
    %57 = arith.truncf %56 : vector<16x16xf32> to vector<16x16xbf16>
    %58 = vector.extract_strided_slice %23 {offsets = [0, 16], sizes = [16, 16], strides = [1, 1]} : vector<16x64xf32> to vector<16x16xf32>
    %59 = arith.truncf %58 : vector<16x16xf32> to vector<16x16xbf16>
    %cst_31 = arith.constant dense<0.000000e+00> : vector<16x16xf32>
    %60 = tpu.matmul %55, %57, %cst_31 {dimension_numbers = #tpu.dot_dimension_numbers<[1], [1], [0], [0], [0, 0, 1, 0], [], []>} : vector<16x16xbf16>, vector<16x16xbf16>, vector<16x16xf32> -> vector<16x16xf32>
    %cst_32 = arith.constant 2.500000e-01 : f32
    %61 = vector.broadcast %cst_32 : f32 to vector<16x16xf32>
    %62 = arith.mulf %60, %61 : vector<16x16xf32>
    %cst_33 = arith.constant dense<0xFF800000> : vector<16xf32>
    %63 = vector.multi_reduction <maximumf>, %62, %cst_33 [1] : vector<16x16xf32> to vector<16xf32>
    %64 = vector.shape_cast %63 : vector<16xf32> to vector<16x1xf32>
    %65 = vector.broadcast %64 : vector<16x1xf32> to vector<16x16xf32>
    %66 = arith.subf %62, %65 : vector<16x16xf32>
    %67 = math.exp %66 : vector<16x16xf32>
    %cst_34 = arith.constant dense<0.000000e+00> : vector<16xf32>
    %68 = vector.multi_reduction <add>, %67, %cst_34 [1] : vector<16x16xf32> to vector<16xf32>
    %69 = vector.shape_cast %68 : vector<16xf32> to vector<16x1xf32>
    %70 = tpu.reciprocal %69 {approx = true} : vector<16x1xf32> -> vector<16x1xf32>
    %71 = vector.broadcast %70 : vector<16x1xf32> to vector<16x16xf32>
    %72 = arith.mulf %67, %71 : vector<16x16xf32>
    %73 = arith.truncf %72 : vector<16x16xf32> to vector<16x16xbf16>
    %cst_35 = arith.constant dense<0.000000e+00> : vector<16x16xf32>
    %74 = tpu.matmul %73, %59, %cst_35 {dimension_numbers = #tpu.dot_dimension_numbers<[1], [0], [0], [1], [0, 0, 1, 1], [], []>} : vector<16x16xbf16>, vector<16x16xbf16>, vector<16x16xf32> -> vector<16x16xf32>
    %75 = arith.truncf %74 : vector<16x16xf32> to vector<16x16xbf16>
    %76 = vector.extract_strided_slice %10 {offsets = [16, 0], sizes = [16, 64], strides = [1, 1]} : vector<64x64xbf16> to vector<16x64xbf16>
    %cst_36 = arith.constant dense<0.000000e+00> : vector<16x64xf32>
    %77 = tpu.matmul %75, %76, %cst_36 {dimension_numbers = #tpu.dot_dimension_numbers<[1], [0], [0], [1], [0, 0, 1, 1], [], []>} : vector<16x16xbf16>, vector<16x64xbf16>, vector<16x64xf32> -> vector<16x64xf32>
    %78 = arith.addf %53, %77 : vector<16x64xf32>
    %79 = vector.extract_strided_slice %16 {offsets = [0, 32], sizes = [16, 16], strides = [1, 1]} : vector<16x64xf32> to vector<16x16xf32>
    %80 = arith.truncf %79 : vector<16x16xf32> to vector<16x16xbf16>
    %81 = vector.extract_strided_slice %22 {offsets = [0, 32], sizes = [16, 16], strides = [1, 1]} : vector<16x64xf32> to vector<16x16xf32>
    %82 = arith.truncf %81 : vector<16x16xf32> to vector<16x16xbf16>
    %83 = vector.extract_strided_slice %23 {offsets = [0, 32], sizes = [16, 16], strides = [1, 1]} : vector<16x64xf32> to vector<16x16xf32>
    %84 = arith.truncf %83 : vector<16x16xf32> to vector<16x16xbf16>
    %cst_37 = arith.constant dense<0.000000e+00> : vector<16x16xf32>
    %85 = tpu.matmul %80, %82, %cst_37 {dimension_numbers = #tpu.dot_dimension_numbers<[1], [1], [0], [0], [0, 0, 1, 0], [], []>} : vector<16x16xbf16>, vector<16x16xbf16>, vector<16x16xf32> -> vector<16x16xf32>
    %cst_38 = arith.constant 2.500000e-01 : f32
    %86 = vector.broadcast %cst_38 : f32 to vector<16x16xf32>
    %87 = arith.mulf %85, %86 : vector<16x16xf32>
    %cst_39 = arith.constant dense<0xFF800000> : vector<16xf32>
    %88 = vector.multi_reduction <maximumf>, %87, %cst_39 [1] : vector<16x16xf32> to vector<16xf32>
    %89 = vector.shape_cast %88 : vector<16xf32> to vector<16x1xf32>
    %90 = vector.broadcast %89 : vector<16x1xf32> to vector<16x16xf32>
    %91 = arith.subf %87, %90 : vector<16x16xf32>
    %92 = math.exp %91 : vector<16x16xf32>
    %cst_40 = arith.constant dense<0.000000e+00> : vector<16xf32>
    %93 = vector.multi_reduction <add>, %92, %cst_40 [1] : vector<16x16xf32> to vector<16xf32>
    %94 = vector.shape_cast %93 : vector<16xf32> to vector<16x1xf32>
    %95 = tpu.reciprocal %94 {approx = true} : vector<16x1xf32> -> vector<16x1xf32>
    %96 = vector.broadcast %95 : vector<16x1xf32> to vector<16x16xf32>
    %97 = arith.mulf %92, %96 : vector<16x16xf32>
    %98 = arith.truncf %97 : vector<16x16xf32> to vector<16x16xbf16>
    %cst_41 = arith.constant dense<0.000000e+00> : vector<16x16xf32>
    %99 = tpu.matmul %98, %84, %cst_41 {dimension_numbers = #tpu.dot_dimension_numbers<[1], [0], [0], [1], [0, 0, 1, 1], [], []>} : vector<16x16xbf16>, vector<16x16xbf16>, vector<16x16xf32> -> vector<16x16xf32>
    %100 = arith.truncf %99 : vector<16x16xf32> to vector<16x16xbf16>
    %101 = vector.extract_strided_slice %10 {offsets = [32, 0], sizes = [16, 64], strides = [1, 1]} : vector<64x64xbf16> to vector<16x64xbf16>
    %cst_42 = arith.constant dense<0.000000e+00> : vector<16x64xf32>
    %102 = tpu.matmul %100, %101, %cst_42 {dimension_numbers = #tpu.dot_dimension_numbers<[1], [0], [0], [1], [0, 0, 1, 1], [], []>} : vector<16x16xbf16>, vector<16x64xbf16>, vector<16x64xf32> -> vector<16x64xf32>
    %103 = arith.addf %78, %102 : vector<16x64xf32>
    %104 = vector.extract_strided_slice %16 {offsets = [0, 48], sizes = [16, 16], strides = [1, 1]} : vector<16x64xf32> to vector<16x16xf32>
    %105 = arith.truncf %104 : vector<16x16xf32> to vector<16x16xbf16>
    %106 = vector.extract_strided_slice %22 {offsets = [0, 48], sizes = [16, 16], strides = [1, 1]} : vector<16x64xf32> to vector<16x16xf32>
    %107 = arith.truncf %106 : vector<16x16xf32> to vector<16x16xbf16>
    %108 = vector.extract_strided_slice %23 {offsets = [0, 48], sizes = [16, 16], strides = [1, 1]} : vector<16x64xf32> to vector<16x16xf32>
    %109 = arith.truncf %108 : vector<16x16xf32> to vector<16x16xbf16>
    %cst_43 = arith.constant dense<0.000000e+00> : vector<16x16xf32>
    %110 = tpu.matmul %105, %107, %cst_43 {dimension_numbers = #tpu.dot_dimension_numbers<[1], [1], [0], [0], [0, 0, 1, 0], [], []>} : vector<16x16xbf16>, vector<16x16xbf16>, vector<16x16xf32> -> vector<16x16xf32>
    %cst_44 = arith.constant 2.500000e-01 : f32
    %111 = vector.broadcast %cst_44 : f32 to vector<16x16xf32>
    %112 = arith.mulf %110, %111 : vector<16x16xf32>
    %cst_45 = arith.constant dense<0xFF800000> : vector<16xf32>
    %113 = vector.multi_reduction <maximumf>, %112, %cst_45 [1] : vector<16x16xf32> to vector<16xf32>
    %114 = vector.shape_cast %113 : vector<16xf32> to vector<16x1xf32>
    %115 = vector.broadcast %114 : vector<16x1xf32> to vector<16x16xf32>
    %116 = arith.subf %112, %115 : vector<16x16xf32>
    %117 = math.exp %116 : vector<16x16xf32>
    %cst_46 = arith.constant dense<0.000000e+00> : vector<16xf32>
    %118 = vector.multi_reduction <add>, %117, %cst_46 [1] : vector<16x16xf32> to vector<16xf32>
    %119 = vector.shape_cast %118 : vector<16xf32> to vector<16x1xf32>
    %120 = tpu.reciprocal %119 {approx = true} : vector<16x1xf32> -> vector<16x1xf32>
    %121 = vector.broadcast %120 : vector<16x1xf32> to vector<16x16xf32>
    %122 = arith.mulf %117, %121 : vector<16x16xf32>
    %123 = arith.truncf %122 : vector<16x16xf32> to vector<16x16xbf16>
    %cst_47 = arith.constant dense<0.000000e+00> : vector<16x16xf32>
    %124 = tpu.matmul %123, %109, %cst_47 {dimension_numbers = #tpu.dot_dimension_numbers<[1], [0], [0], [1], [0, 0, 1, 1], [], []>} : vector<16x16xbf16>, vector<16x16xbf16>, vector<16x16xf32> -> vector<16x16xf32>
    %125 = arith.truncf %124 : vector<16x16xf32> to vector<16x16xbf16>
    %126 = vector.extract_strided_slice %10 {offsets = [48, 0], sizes = [16, 64], strides = [1, 1]} : vector<64x64xbf16> to vector<16x64xbf16>
    %cst_48 = arith.constant dense<0.000000e+00> : vector<16x64xf32>
    %127 = tpu.matmul %125, %126, %cst_48 {dimension_numbers = #tpu.dot_dimension_numbers<[1], [0], [0], [1], [0, 0, 1, 1], [], []>} : vector<16x16xbf16>, vector<16x64xbf16>, vector<16x64xf32> -> vector<16x64xf32>
    %128 = arith.addf %103, %127 : vector<16x64xf32>
    %129 = arith.addf %1, %128 : vector<16x64xf32>
    %c0_49 = arith.constant 0 : index
    %c0_50 = arith.constant 0 : index
    %c0_51 = arith.constant 0 : index
    %130 = vector.load %arg13[%c0_49, %c0_50, %c0_51] : memref<2x1x64xf32, #tpu.memory_space<vmem>>, vector<1x1x64xf32>
    %131 = vector.shape_cast %130 : vector<1x1x64xf32> to vector<1x64xf32>
    %c0_52 = arith.constant 0 : index
    %c0_53 = arith.constant 0 : index
    %c0_54 = arith.constant 0 : index
    %132 = vector.load %arg14[%c0_52, %c0_53, %c0_54] : memref<2x1x64xf32, #tpu.memory_space<vmem>>, vector<1x1x64xf32>
    %133 = vector.shape_cast %132 : vector<1x1x64xf32> to vector<1x64xf32>
    %cst_55 = arith.constant dense<0.000000e+00> : vector<16xf32>
    %134 = vector.multi_reduction <add>, %129, %cst_55 [1] : vector<16x64xf32> to vector<16xf32>
    %135 = vector.shape_cast %134 : vector<16xf32> to vector<16x1xf32>
    %cst_56 = arith.constant 6.400000e+01 : f32
    %136 = vector.broadcast %cst_56 : f32 to vector<16x1xf32>
    %137 = arith.divf %135, %136 : vector<16x1xf32>
    %138 = vector.broadcast %137 : vector<16x1xf32> to vector<16x64xf32>
    %139 = arith.subf %129, %138 : vector<16x64xf32>
    %140 = arith.mulf %139, %139 : vector<16x64xf32>
    %cst_57 = arith.constant dense<0.000000e+00> : vector<16xf32>
    %141 = vector.multi_reduction <add>, %140, %cst_57 [1] : vector<16x64xf32> to vector<16xf32>
    %142 = vector.shape_cast %141 : vector<16xf32> to vector<16x1xf32>
    %cst_58 = arith.constant 6.400000e+01 : f32
    %143 = vector.broadcast %cst_58 : f32 to vector<16x1xf32>
    %144 = arith.divf %142, %143 : vector<16x1xf32>
    %cst_59 = arith.constant 9.99999974E-6 : f32
    %145 = vector.broadcast %cst_59 : f32 to vector<16x1xf32>
    %146 = arith.addf %144, %145 : vector<16x1xf32>
    %147 = math.rsqrt %146 : vector<16x1xf32>
    %148 = vector.broadcast %147 : vector<16x1xf32> to vector<16x64xf32>
    %149 = arith.mulf %139, %148 : vector<16x64xf32>
    %150 = vector.broadcast %131 : vector<1x64xf32> to vector<16x64xf32>
    %151 = arith.mulf %149, %150 : vector<16x64xf32>
    %152 = vector.broadcast %133 : vector<1x64xf32> to vector<16x64xf32>
    %153 = arith.addf %151, %152 : vector<16x64xf32>
    %154 = arith.truncf %153 : vector<16x64xf32> to vector<16x64xbf16>
    %c0_60 = arith.constant 0 : index
    %c0_61 = arith.constant 0 : index
    %c0_62 = arith.constant 0 : index
    %155 = vector.load %arg9[%c0_60, %c0_61, %c0_62] : memref<2x64x128xbf16, #tpu.memory_space<vmem>>, vector<1x64x128xbf16>
    %156 = vector.shape_cast %155 : vector<1x64x128xbf16> to vector<64x128xbf16>
    %cst_63 = arith.constant dense<0.000000e+00> : vector<16x128xf32>
    %157 = tpu.matmul %154, %156, %cst_63 {dimension_numbers = #tpu.dot_dimension_numbers<[1], [0], [0], [1], [0, 0, 1, 1], [], []>} : vector<16x64xbf16>, vector<64x128xbf16>, vector<16x128xf32> -> vector<16x128xf32>
    %c0_64 = arith.constant 0 : index
    %c0_65 = arith.constant 0 : index
    %c0_66 = arith.constant 0 : index
    %158 = vector.load %arg10[%c0_64, %c0_65, %c0_66] : memref<2x1x128xf32, #tpu.memory_space<vmem>>, vector<1x1x128xf32>
    %159 = vector.shape_cast %158 : vector<1x1x128xf32> to vector<1x128xf32>
    %160 = vector.broadcast %159 : vector<1x128xf32> to vector<16x128xf32>
    %161 = arith.addf %157, %160 : vector<16x128xf32>
    %cst_67 = arith.constant 0.000000e+00 : f32
    %162 = vector.broadcast %cst_67 : f32 to vector<16x128xf32>
    %163 = arith.maximumf %161, %162 : vector<16x128xf32>
    %164 = arith.truncf %163 : vector<16x128xf32> to vector<16x128xbf16>
    %c0_68 = arith.constant 0 : index
    %c0_69 = arith.constant 0 : index
    %c0_70 = arith.constant 0 : index
    %165 = vector.load %arg11[%c0_68, %c0_69, %c0_70] : memref<2x128x64xbf16, #tpu.memory_space<vmem>>, vector<1x128x64xbf16>
    %166 = vector.shape_cast %165 : vector<1x128x64xbf16> to vector<128x64xbf16>
    %cst_71 = arith.constant dense<0.000000e+00> : vector<16x64xf32>
    %167 = tpu.matmul %164, %166, %cst_71 {dimension_numbers = #tpu.dot_dimension_numbers<[1], [0], [0], [1], [0, 0, 1, 1], [], []>} : vector<16x128xbf16>, vector<128x64xbf16>, vector<16x64xf32> -> vector<16x64xf32>
    %c0_72 = arith.constant 0 : index
    %c0_73 = arith.constant 0 : index
    %c0_74 = arith.constant 0 : index
    %168 = vector.load %arg12[%c0_72, %c0_73, %c0_74] : memref<2x1x64xf32, #tpu.memory_space<vmem>>, vector<1x1x64xf32>
    %169 = vector.shape_cast %168 : vector<1x1x64xf32> to vector<1x64xf32>
    %170 = vector.broadcast %169 : vector<1x64xf32> to vector<16x64xf32>
    %171 = arith.addf %167, %170 : vector<16x64xf32>
    %172 = arith.addf %153, %171 : vector<16x64xf32>
    %c0_75 = arith.constant 0 : index
    %c0_76 = arith.constant 0 : index
    %c0_77 = arith.constant 0 : index
    %173 = vector.load %arg15[%c0_75, %c0_76, %c0_77] : memref<2x1x64xf32, #tpu.memory_space<vmem>>, vector<1x1x64xf32>
    %174 = vector.shape_cast %173 : vector<1x1x64xf32> to vector<1x64xf32>
    %c0_78 = arith.constant 0 : index
    %c0_79 = arith.constant 0 : index
    %c0_80 = arith.constant 0 : index
    %175 = vector.load %arg16[%c0_78, %c0_79, %c0_80] : memref<2x1x64xf32, #tpu.memory_space<vmem>>, vector<1x1x64xf32>
    %176 = vector.shape_cast %175 : vector<1x1x64xf32> to vector<1x64xf32>
    %cst_81 = arith.constant dense<0.000000e+00> : vector<16xf32>
    %177 = vector.multi_reduction <add>, %172, %cst_81 [1] : vector<16x64xf32> to vector<16xf32>
    %178 = vector.shape_cast %177 : vector<16xf32> to vector<16x1xf32>
    %cst_82 = arith.constant 6.400000e+01 : f32
    %179 = vector.broadcast %cst_82 : f32 to vector<16x1xf32>
    %180 = arith.divf %178, %179 : vector<16x1xf32>
    %181 = vector.broadcast %180 : vector<16x1xf32> to vector<16x64xf32>
    %182 = arith.subf %172, %181 : vector<16x64xf32>
    %183 = arith.mulf %182, %182 : vector<16x64xf32>
    %cst_83 = arith.constant dense<0.000000e+00> : vector<16xf32>
    %184 = vector.multi_reduction <add>, %183, %cst_83 [1] : vector<16x64xf32> to vector<16xf32>
    %185 = vector.shape_cast %184 : vector<16xf32> to vector<16x1xf32>
    %cst_84 = arith.constant 6.400000e+01 : f32
    %186 = vector.broadcast %cst_84 : f32 to vector<16x1xf32>
    %187 = arith.divf %185, %186 : vector<16x1xf32>
    %cst_85 = arith.constant 9.99999974E-6 : f32
    %188 = vector.broadcast %cst_85 : f32 to vector<16x1xf32>
    %189 = arith.addf %187, %188 : vector<16x1xf32>
    %190 = math.rsqrt %189 : vector<16x1xf32>
    %191 = vector.broadcast %190 : vector<16x1xf32> to vector<16x64xf32>
    %192 = arith.mulf %182, %191 : vector<16x64xf32>
    %193 = vector.broadcast %174 : vector<1x64xf32> to vector<16x64xf32>
    %194 = arith.mulf %192, %193 : vector<16x64xf32>
    %195 = vector.broadcast %176 : vector<1x64xf32> to vector<16x64xf32>
    %196 = arith.addf %194, %195 : vector<16x64xf32>
    %c1 = arith.constant 1 : index
    %c0_86 = arith.constant 0 : index
    %c0_87 = arith.constant 0 : index
    %197 = vector.load %arg3[%c1, %c0_86, %c0_87] : memref<2x64x64xbf16, #tpu.memory_space<vmem>>, vector<1x64x64xbf16>
    %198 = vector.shape_cast %197 : vector<1x64x64xbf16> to vector<64x64xbf16>
    %c1_88 = arith.constant 1 : index
    %c0_89 = arith.constant 0 : index
    %c0_90 = arith.constant 0 : index
    %199 = vector.load %arg5[%c1_88, %c0_89, %c0_90] : memref<2x64x128xbf16, #tpu.memory_space<vmem>>, vector<1x64x128xbf16>
    %200 = vector.shape_cast %199 : vector<1x64x128xbf16> to vector<64x128xbf16>
    %c1_91 = arith.constant 1 : index
    %c0_92 = arith.constant 0 : index
    %c0_93 = arith.constant 0 : index
    %201 = vector.load %arg7[%c1_91, %c0_92, %c0_93] : memref<2x64x64xbf16, #tpu.memory_space<vmem>>, vector<1x64x64xbf16>
    %202 = vector.shape_cast %201 : vector<1x64x64xbf16> to vector<64x64xbf16>
    %203 = arith.truncf %196 : vector<16x64xf32> to vector<16x64xbf16>
    %cst_94 = arith.constant dense<0.000000e+00> : vector<16x64xf32>
    %204 = tpu.matmul %203, %198, %cst_94 {dimension_numbers = #tpu.dot_dimension_numbers<[1], [0], [0], [1], [0, 0, 1, 1], [], []>} : vector<16x64xbf16>, vector<64x64xbf16>, vector<16x64xf32> -> vector<16x64xf32>
    %c1_95 = arith.constant 1 : index
    %c0_96 = arith.constant 0 : index
    %c0_97 = arith.constant 0 : index
    %205 = vector.load %arg4[%c1_95, %c0_96, %c0_97] : memref<2x1x64xf32, #tpu.memory_space<vmem>>, vector<1x1x64xf32>
    %206 = vector.shape_cast %205 : vector<1x1x64xf32> to vector<1x64xf32>
    %207 = vector.broadcast %206 : vector<1x64xf32> to vector<16x64xf32>
    %208 = arith.addf %204, %207 : vector<16x64xf32>
    %cst_98 = arith.constant dense<0.000000e+00> : vector<16x128xf32>
    %209 = tpu.matmul %4, %200, %cst_98 {dimension_numbers = #tpu.dot_dimension_numbers<[1], [0], [0], [1], [0, 0, 1, 1], [], []>} : vector<16x64xbf16>, vector<64x128xbf16>, vector<16x128xf32> -> vector<16x128xf32>
    %c1_99 = arith.constant 1 : index
    %c0_100 = arith.constant 0 : index
    %c0_101 = arith.constant 0 : index
    %210 = vector.load %arg6[%c1_99, %c0_100, %c0_101] : memref<2x1x128xf32, #tpu.memory_space<vmem>>, vector<1x1x128xf32>
    %211 = vector.shape_cast %210 : vector<1x1x128xf32> to vector<1x128xf32>
    %212 = vector.broadcast %211 : vector<1x128xf32> to vector<16x128xf32>
    %213 = arith.addf %209, %212 : vector<16x128xf32>
    %214 = vector.extract_strided_slice %213 {offsets = [0, 0], sizes = [16, 64], strides = [1, 1]} : vector<16x128xf32> to vector<16x64xf32>
    %215 = vector.extract_strided_slice %213 {offsets = [0, 64], sizes = [16, 64], strides = [1, 1]} : vector<16x128xf32> to vector<16x64xf32>
    %cst_102 = arith.constant 0.000000e+00 : f32
    %216 = vector.broadcast %cst_102 : f32 to vector<16x64xf32>
    %c1_103 = arith.constant 1 : index
    %c0_104 = arith.constant 0 : index
    %c0_105 = arith.constant 0 : index
    %217 = vector.load %arg8[%c1_103, %c0_104, %c0_105] : memref<2x1x64xf32, #tpu.memory_space<vmem>>, vector<1x1x64xf32>
    %218 = vector.shape_cast %217 : vector<1x1x64xf32> to vector<1x64xf32>
    %219 = vector.broadcast %218 : vector<1x64xf32> to vector<16x64xf32>
    %220 = arith.addf %216, %219 : vector<16x64xf32>
    %221 = vector.extract_strided_slice %208 {offsets = [0, 0], sizes = [16, 16], strides = [1, 1]} : vector<16x64xf32> to vector<16x16xf32>
    %222 = arith.truncf %221 : vector<16x16xf32> to vector<16x16xbf16>
    %223 = vector.extract_strided_slice %214 {offsets = [0, 0], sizes = [16, 16], strides = [1, 1]} : vector<16x64xf32> to vector<16x16xf32>
    %224 = arith.truncf %223 : vector<16x16xf32> to vector<16x16xbf16>
    %225 = vector.extract_strided_slice %215 {offsets = [0, 0], sizes = [16, 16], strides = [1, 1]} : vector<16x64xf32> to vector<16x16xf32>
    %226 = arith.truncf %225 : vector<16x16xf32> to vector<16x16xbf16>
    %cst_106 = arith.constant dense<0.000000e+00> : vector<16x16xf32>
    %227 = tpu.matmul %222, %224, %cst_106 {dimension_numbers = #tpu.dot_dimension_numbers<[1], [1], [0], [0], [0, 0, 1, 0], [], []>} : vector<16x16xbf16>, vector<16x16xbf16>, vector<16x16xf32> -> vector<16x16xf32>
    %cst_107 = arith.constant 2.500000e-01 : f32
    %228 = vector.broadcast %cst_107 : f32 to vector<16x16xf32>
    %229 = arith.mulf %227, %228 : vector<16x16xf32>
    %cst_108 = arith.constant dense<0xFF800000> : vector<16xf32>
    %230 = vector.multi_reduction <maximumf>, %229, %cst_108 [1] : vector<16x16xf32> to vector<16xf32>
    %231 = vector.shape_cast %230 : vector<16xf32> to vector<16x1xf32>
    %232 = vector.broadcast %231 : vector<16x1xf32> to vector<16x16xf32>
    %233 = arith.subf %229, %232 : vector<16x16xf32>
    %234 = math.exp %233 : vector<16x16xf32>
    %cst_109 = arith.constant dense<0.000000e+00> : vector<16xf32>
    %235 = vector.multi_reduction <add>, %234, %cst_109 [1] : vector<16x16xf32> to vector<16xf32>
    %236 = vector.shape_cast %235 : vector<16xf32> to vector<16x1xf32>
    %237 = tpu.reciprocal %236 {approx = true} : vector<16x1xf32> -> vector<16x1xf32>
    %238 = vector.broadcast %237 : vector<16x1xf32> to vector<16x16xf32>
    %239 = arith.mulf %234, %238 : vector<16x16xf32>
    %240 = arith.truncf %239 : vector<16x16xf32> to vector<16x16xbf16>
    %cst_110 = arith.constant dense<0.000000e+00> : vector<16x16xf32>
    %241 = tpu.matmul %240, %226, %cst_110 {dimension_numbers = #tpu.dot_dimension_numbers<[1], [0], [0], [1], [0, 0, 1, 1], [], []>} : vector<16x16xbf16>, vector<16x16xbf16>, vector<16x16xf32> -> vector<16x16xf32>
    %242 = arith.truncf %241 : vector<16x16xf32> to vector<16x16xbf16>
    %243 = vector.extract_strided_slice %202 {offsets = [0, 0], sizes = [16, 64], strides = [1, 1]} : vector<64x64xbf16> to vector<16x64xbf16>
    %cst_111 = arith.constant dense<0.000000e+00> : vector<16x64xf32>
    %244 = tpu.matmul %242, %243, %cst_111 {dimension_numbers = #tpu.dot_dimension_numbers<[1], [0], [0], [1], [0, 0, 1, 1], [], []>} : vector<16x16xbf16>, vector<16x64xbf16>, vector<16x64xf32> -> vector<16x64xf32>
    %245 = arith.addf %220, %244 : vector<16x64xf32>
    %246 = vector.extract_strided_slice %208 {offsets = [0, 16], sizes = [16, 16], strides = [1, 1]} : vector<16x64xf32> to vector<16x16xf32>
    %247 = arith.truncf %246 : vector<16x16xf32> to vector<16x16xbf16>
    %248 = vector.extract_strided_slice %214 {offsets = [0, 16], sizes = [16, 16], strides = [1, 1]} : vector<16x64xf32> to vector<16x16xf32>
    %249 = arith.truncf %248 : vector<16x16xf32> to vector<16x16xbf16>
    %250 = vector.extract_strided_slice %215 {offsets = [0, 16], sizes = [16, 16], strides = [1, 1]} : vector<16x64xf32> to vector<16x16xf32>
    %251 = arith.truncf %250 : vector<16x16xf32> to vector<16x16xbf16>
    %cst_112 = arith.constant dense<0.000000e+00> : vector<16x16xf32>
    %252 = tpu.matmul %247, %249, %cst_112 {dimension_numbers = #tpu.dot_dimension_numbers<[1], [1], [0], [0], [0, 0, 1, 0], [], []>} : vector<16x16xbf16>, vector<16x16xbf16>, vector<16x16xf32> -> vector<16x16xf32>
    %cst_113 = arith.constant 2.500000e-01 : f32
    %253 = vector.broadcast %cst_113 : f32 to vector<16x16xf32>
    %254 = arith.mulf %252, %253 : vector<16x16xf32>
    %cst_114 = arith.constant dense<0xFF800000> : vector<16xf32>
    %255 = vector.multi_reduction <maximumf>, %254, %cst_114 [1] : vector<16x16xf32> to vector<16xf32>
    %256 = vector.shape_cast %255 : vector<16xf32> to vector<16x1xf32>
    %257 = vector.broadcast %256 : vector<16x1xf32> to vector<16x16xf32>
    %258 = arith.subf %254, %257 : vector<16x16xf32>
    %259 = math.exp %258 : vector<16x16xf32>
    %cst_115 = arith.constant dense<0.000000e+00> : vector<16xf32>
    %260 = vector.multi_reduction <add>, %259, %cst_115 [1] : vector<16x16xf32> to vector<16xf32>
    %261 = vector.shape_cast %260 : vector<16xf32> to vector<16x1xf32>
    %262 = tpu.reciprocal %261 {approx = true} : vector<16x1xf32> -> vector<16x1xf32>
    %263 = vector.broadcast %262 : vector<16x1xf32> to vector<16x16xf32>
    %264 = arith.mulf %259, %263 : vector<16x16xf32>
    %265 = arith.truncf %264 : vector<16x16xf32> to vector<16x16xbf16>
    %cst_116 = arith.constant dense<0.000000e+00> : vector<16x16xf32>
    %266 = tpu.matmul %265, %251, %cst_116 {dimension_numbers = #tpu.dot_dimension_numbers<[1], [0], [0], [1], [0, 0, 1, 1], [], []>} : vector<16x16xbf16>, vector<16x16xbf16>, vector<16x16xf32> -> vector<16x16xf32>
    %267 = arith.truncf %266 : vector<16x16xf32> to vector<16x16xbf16>
    %268 = vector.extract_strided_slice %202 {offsets = [16, 0], sizes = [16, 64], strides = [1, 1]} : vector<64x64xbf16> to vector<16x64xbf16>
    %cst_117 = arith.constant dense<0.000000e+00> : vector<16x64xf32>
    %269 = tpu.matmul %267, %268, %cst_117 {dimension_numbers = #tpu.dot_dimension_numbers<[1], [0], [0], [1], [0, 0, 1, 1], [], []>} : vector<16x16xbf16>, vector<16x64xbf16>, vector<16x64xf32> -> vector<16x64xf32>
    %270 = arith.addf %245, %269 : vector<16x64xf32>
    %271 = vector.extract_strided_slice %208 {offsets = [0, 32], sizes = [16, 16], strides = [1, 1]} : vector<16x64xf32> to vector<16x16xf32>
    %272 = arith.truncf %271 : vector<16x16xf32> to vector<16x16xbf16>
    %273 = vector.extract_strided_slice %214 {offsets = [0, 32], sizes = [16, 16], strides = [1, 1]} : vector<16x64xf32> to vector<16x16xf32>
    %274 = arith.truncf %273 : vector<16x16xf32> to vector<16x16xbf16>
    %275 = vector.extract_strided_slice %215 {offsets = [0, 32], sizes = [16, 16], strides = [1, 1]} : vector<16x64xf32> to vector<16x16xf32>
    %276 = arith.truncf %275 : vector<16x16xf32> to vector<16x16xbf16>
    %cst_118 = arith.constant dense<0.000000e+00> : vector<16x16xf32>
    %277 = tpu.matmul %272, %274, %cst_118 {dimension_numbers = #tpu.dot_dimension_numbers<[1], [1], [0], [0], [0, 0, 1, 0], [], []>} : vector<16x16xbf16>, vector<16x16xbf16>, vector<16x16xf32> -> vector<16x16xf32>
    %cst_119 = arith.constant 2.500000e-01 : f32
    %278 = vector.broadcast %cst_119 : f32 to vector<16x16xf32>
    %279 = arith.mulf %277, %278 : vector<16x16xf32>
    %cst_120 = arith.constant dense<0xFF800000> : vector<16xf32>
    %280 = vector.multi_reduction <maximumf>, %279, %cst_120 [1] : vector<16x16xf32> to vector<16xf32>
    %281 = vector.shape_cast %280 : vector<16xf32> to vector<16x1xf32>
    %282 = vector.broadcast %281 : vector<16x1xf32> to vector<16x16xf32>
    %283 = arith.subf %279, %282 : vector<16x16xf32>
    %284 = math.exp %283 : vector<16x16xf32>
    %cst_121 = arith.constant dense<0.000000e+00> : vector<16xf32>
    %285 = vector.multi_reduction <add>, %284, %cst_121 [1] : vector<16x16xf32> to vector<16xf32>
    %286 = vector.shape_cast %285 : vector<16xf32> to vector<16x1xf32>
    %287 = tpu.reciprocal %286 {approx = true} : vector<16x1xf32> -> vector<16x1xf32>
    %288 = vector.broadcast %287 : vector<16x1xf32> to vector<16x16xf32>
    %289 = arith.mulf %284, %288 : vector<16x16xf32>
    %290 = arith.truncf %289 : vector<16x16xf32> to vector<16x16xbf16>
    %cst_122 = arith.constant dense<0.000000e+00> : vector<16x16xf32>
    %291 = tpu.matmul %290, %276, %cst_122 {dimension_numbers = #tpu.dot_dimension_numbers<[1], [0], [0], [1], [0, 0, 1, 1], [], []>} : vector<16x16xbf16>, vector<16x16xbf16>, vector<16x16xf32> -> vector<16x16xf32>
    %292 = arith.truncf %291 : vector<16x16xf32> to vector<16x16xbf16>
    %293 = vector.extract_strided_slice %202 {offsets = [32, 0], sizes = [16, 64], strides = [1, 1]} : vector<64x64xbf16> to vector<16x64xbf16>
    %cst_123 = arith.constant dense<0.000000e+00> : vector<16x64xf32>
    %294 = tpu.matmul %292, %293, %cst_123 {dimension_numbers = #tpu.dot_dimension_numbers<[1], [0], [0], [1], [0, 0, 1, 1], [], []>} : vector<16x16xbf16>, vector<16x64xbf16>, vector<16x64xf32> -> vector<16x64xf32>
    %295 = arith.addf %270, %294 : vector<16x64xf32>
    %296 = vector.extract_strided_slice %208 {offsets = [0, 48], sizes = [16, 16], strides = [1, 1]} : vector<16x64xf32> to vector<16x16xf32>
    %297 = arith.truncf %296 : vector<16x16xf32> to vector<16x16xbf16>
    %298 = vector.extract_strided_slice %214 {offsets = [0, 48], sizes = [16, 16], strides = [1, 1]} : vector<16x64xf32> to vector<16x16xf32>
    %299 = arith.truncf %298 : vector<16x16xf32> to vector<16x16xbf16>
    %300 = vector.extract_strided_slice %215 {offsets = [0, 48], sizes = [16, 16], strides = [1, 1]} : vector<16x64xf32> to vector<16x16xf32>
    %301 = arith.truncf %300 : vector<16x16xf32> to vector<16x16xbf16>
    %cst_124 = arith.constant dense<0.000000e+00> : vector<16x16xf32>
    %302 = tpu.matmul %297, %299, %cst_124 {dimension_numbers = #tpu.dot_dimension_numbers<[1], [1], [0], [0], [0, 0, 1, 0], [], []>} : vector<16x16xbf16>, vector<16x16xbf16>, vector<16x16xf32> -> vector<16x16xf32>
    %cst_125 = arith.constant 2.500000e-01 : f32
    %303 = vector.broadcast %cst_125 : f32 to vector<16x16xf32>
    %304 = arith.mulf %302, %303 : vector<16x16xf32>
    %cst_126 = arith.constant dense<0xFF800000> : vector<16xf32>
    %305 = vector.multi_reduction <maximumf>, %304, %cst_126 [1] : vector<16x16xf32> to vector<16xf32>
    %306 = vector.shape_cast %305 : vector<16xf32> to vector<16x1xf32>
    %307 = vector.broadcast %306 : vector<16x1xf32> to vector<16x16xf32>
    %308 = arith.subf %304, %307 : vector<16x16xf32>
    %309 = math.exp %308 : vector<16x16xf32>
    %cst_127 = arith.constant dense<0.000000e+00> : vector<16xf32>
    %310 = vector.multi_reduction <add>, %309, %cst_127 [1] : vector<16x16xf32> to vector<16xf32>
    %311 = vector.shape_cast %310 : vector<16xf32> to vector<16x1xf32>
    %312 = tpu.reciprocal %311 {approx = true} : vector<16x1xf32> -> vector<16x1xf32>
    %313 = vector.broadcast %312 : vector<16x1xf32> to vector<16x16xf32>
    %314 = arith.mulf %309, %313 : vector<16x16xf32>
    %315 = arith.truncf %314 : vector<16x16xf32> to vector<16x16xbf16>
    %cst_128 = arith.constant dense<0.000000e+00> : vector<16x16xf32>
    %316 = tpu.matmul %315, %301, %cst_128 {dimension_numbers = #tpu.dot_dimension_numbers<[1], [0], [0], [1], [0, 0, 1, 1], [], []>} : vector<16x16xbf16>, vector<16x16xbf16>, vector<16x16xf32> -> vector<16x16xf32>
    %317 = arith.truncf %316 : vector<16x16xf32> to vector<16x16xbf16>
    %318 = vector.extract_strided_slice %202 {offsets = [48, 0], sizes = [16, 64], strides = [1, 1]} : vector<64x64xbf16> to vector<16x64xbf16>
    %cst_129 = arith.constant dense<0.000000e+00> : vector<16x64xf32>
    %319 = tpu.matmul %317, %318, %cst_129 {dimension_numbers = #tpu.dot_dimension_numbers<[1], [0], [0], [1], [0, 0, 1, 1], [], []>} : vector<16x16xbf16>, vector<16x64xbf16>, vector<16x64xf32> -> vector<16x64xf32>
    %320 = arith.addf %295, %319 : vector<16x64xf32>
    %321 = arith.addf %196, %320 : vector<16x64xf32>
    %c1_130 = arith.constant 1 : index
    %c0_131 = arith.constant 0 : index
    %c0_132 = arith.constant 0 : index
    %322 = vector.load %arg13[%c1_130, %c0_131, %c0_132] : memref<2x1x64xf32, #tpu.memory_space<vmem>>, vector<1x1x64xf32>
    %323 = vector.shape_cast %322 : vector<1x1x64xf32> to vector<1x64xf32>
    %c1_133 = arith.constant 1 : index
    %c0_134 = arith.constant 0 : index
    %c0_135 = arith.constant 0 : index
    %324 = vector.load %arg14[%c1_133, %c0_134, %c0_135] : memref<2x1x64xf32, #tpu.memory_space<vmem>>, vector<1x1x64xf32>
    %325 = vector.shape_cast %324 : vector<1x1x64xf32> to vector<1x64xf32>
    %cst_136 = arith.constant dense<0.000000e+00> : vector<16xf32>
    %326 = vector.multi_reduction <add>, %321, %cst_136 [1] : vector<16x64xf32> to vector<16xf32>
    %327 = vector.shape_cast %326 : vector<16xf32> to vector<16x1xf32>
    %cst_137 = arith.constant 6.400000e+01 : f32
    %328 = vector.broadcast %cst_137 : f32 to vector<16x1xf32>
    %329 = arith.divf %327, %328 : vector<16x1xf32>
    %330 = vector.broadcast %329 : vector<16x1xf32> to vector<16x64xf32>
    %331 = arith.subf %321, %330 : vector<16x64xf32>
    %332 = arith.mulf %331, %331 : vector<16x64xf32>
    %cst_138 = arith.constant dense<0.000000e+00> : vector<16xf32>
    %333 = vector.multi_reduction <add>, %332, %cst_138 [1] : vector<16x64xf32> to vector<16xf32>
    %334 = vector.shape_cast %333 : vector<16xf32> to vector<16x1xf32>
    %cst_139 = arith.constant 6.400000e+01 : f32
    %335 = vector.broadcast %cst_139 : f32 to vector<16x1xf32>
    %336 = arith.divf %334, %335 : vector<16x1xf32>
    %cst_140 = arith.constant 9.99999974E-6 : f32
    %337 = vector.broadcast %cst_140 : f32 to vector<16x1xf32>
    %338 = arith.addf %336, %337 : vector<16x1xf32>
    %339 = math.rsqrt %338 : vector<16x1xf32>
    %340 = vector.broadcast %339 : vector<16x1xf32> to vector<16x64xf32>
    %341 = arith.mulf %331, %340 : vector<16x64xf32>
    %342 = vector.broadcast %323 : vector<1x64xf32> to vector<16x64xf32>
    %343 = arith.mulf %341, %342 : vector<16x64xf32>
    %344 = vector.broadcast %325 : vector<1x64xf32> to vector<16x64xf32>
    %345 = arith.addf %343, %344 : vector<16x64xf32>
    %346 = arith.truncf %345 : vector<16x64xf32> to vector<16x64xbf16>
    %c1_141 = arith.constant 1 : index
    %c0_142 = arith.constant 0 : index
    %c0_143 = arith.constant 0 : index
    %347 = vector.load %arg9[%c1_141, %c0_142, %c0_143] : memref<2x64x128xbf16, #tpu.memory_space<vmem>>, vector<1x64x128xbf16>
    %348 = vector.shape_cast %347 : vector<1x64x128xbf16> to vector<64x128xbf16>
    %cst_144 = arith.constant dense<0.000000e+00> : vector<16x128xf32>
    %349 = tpu.matmul %346, %348, %cst_144 {dimension_numbers = #tpu.dot_dimension_numbers<[1], [0], [0], [1], [0, 0, 1, 1], [], []>} : vector<16x64xbf16>, vector<64x128xbf16>, vector<16x128xf32> -> vector<16x128xf32>
    %c1_145 = arith.constant 1 : index
    %c0_146 = arith.constant 0 : index
    %c0_147 = arith.constant 0 : index
    %350 = vector.load %arg10[%c1_145, %c0_146, %c0_147] : memref<2x1x128xf32, #tpu.memory_space<vmem>>, vector<1x1x128xf32>
    %351 = vector.shape_cast %350 : vector<1x1x128xf32> to vector<1x128xf32>
    %352 = vector.broadcast %351 : vector<1x128xf32> to vector<16x128xf32>
    %353 = arith.addf %349, %352 : vector<16x128xf32>
    %cst_148 = arith.constant 0.000000e+00 : f32
    %354 = vector.broadcast %cst_148 : f32 to vector<16x128xf32>
    %355 = arith.maximumf %353, %354 : vector<16x128xf32>
    %356 = arith.truncf %355 : vector<16x128xf32> to vector<16x128xbf16>
    %c1_149 = arith.constant 1 : index
    %c0_150 = arith.constant 0 : index
    %c0_151 = arith.constant 0 : index
    %357 = vector.load %arg11[%c1_149, %c0_150, %c0_151] : memref<2x128x64xbf16, #tpu.memory_space<vmem>>, vector<1x128x64xbf16>
    %358 = vector.shape_cast %357 : vector<1x128x64xbf16> to vector<128x64xbf16>
    %cst_152 = arith.constant dense<0.000000e+00> : vector<16x64xf32>
    %359 = tpu.matmul %356, %358, %cst_152 {dimension_numbers = #tpu.dot_dimension_numbers<[1], [0], [0], [1], [0, 0, 1, 1], [], []>} : vector<16x128xbf16>, vector<128x64xbf16>, vector<16x64xf32> -> vector<16x64xf32>
    %c1_153 = arith.constant 1 : index
    %c0_154 = arith.constant 0 : index
    %c0_155 = arith.constant 0 : index
    %360 = vector.load %arg12[%c1_153, %c0_154, %c0_155] : memref<2x1x64xf32, #tpu.memory_space<vmem>>, vector<1x1x64xf32>
    %361 = vector.shape_cast %360 : vector<1x1x64xf32> to vector<1x64xf32>
    %362 = vector.broadcast %361 : vector<1x64xf32> to vector<16x64xf32>
    %363 = arith.addf %359, %362 : vector<16x64xf32>
    %364 = arith.addf %345, %363 : vector<16x64xf32>
    %c1_156 = arith.constant 1 : index
    %c0_157 = arith.constant 0 : index
    %c0_158 = arith.constant 0 : index
    %365 = vector.load %arg15[%c1_156, %c0_157, %c0_158] : memref<2x1x64xf32, #tpu.memory_space<vmem>>, vector<1x1x64xf32>
    %366 = vector.shape_cast %365 : vector<1x1x64xf32> to vector<1x64xf32>
    %c1_159 = arith.constant 1 : index
    %c0_160 = arith.constant 0 : index
    %c0_161 = arith.constant 0 : index
    %367 = vector.load %arg16[%c1_159, %c0_160, %c0_161] : memref<2x1x64xf32, #tpu.memory_space<vmem>>, vector<1x1x64xf32>
    %368 = vector.shape_cast %367 : vector<1x1x64xf32> to vector<1x64xf32>
    %cst_162 = arith.constant dense<0.000000e+00> : vector<16xf32>
    %369 = vector.multi_reduction <add>, %364, %cst_162 [1] : vector<16x64xf32> to vector<16xf32>
    %370 = vector.shape_cast %369 : vector<16xf32> to vector<16x1xf32>
    %cst_163 = arith.constant 6.400000e+01 : f32
    %371 = vector.broadcast %cst_163 : f32 to vector<16x1xf32>
    %372 = arith.divf %370, %371 : vector<16x1xf32>
    %373 = vector.broadcast %372 : vector<16x1xf32> to vector<16x64xf32>
    %374 = arith.subf %364, %373 : vector<16x64xf32>
    %375 = arith.mulf %374, %374 : vector<16x64xf32>
    %cst_164 = arith.constant dense<0.000000e+00> : vector<16xf32>
    %376 = vector.multi_reduction <add>, %375, %cst_164 [1] : vector<16x64xf32> to vector<16xf32>
    %377 = vector.shape_cast %376 : vector<16xf32> to vector<16x1xf32>
    %cst_165 = arith.constant 6.400000e+01 : f32
    %378 = vector.broadcast %cst_165 : f32 to vector<16x1xf32>
    %379 = arith.divf %377, %378 : vector<16x1xf32>
    %cst_166 = arith.constant 9.99999974E-6 : f32
    %380 = vector.broadcast %cst_166 : f32 to vector<16x1xf32>
    %381 = arith.addf %379, %380 : vector<16x1xf32>
    %382 = math.rsqrt %381 : vector<16x1xf32>
    %383 = vector.broadcast %382 : vector<16x1xf32> to vector<16x64xf32>
    %384 = arith.mulf %374, %383 : vector<16x64xf32>
    %385 = vector.broadcast %366 : vector<1x64xf32> to vector<16x64xf32>
    %386 = arith.mulf %384, %385 : vector<16x64xf32>
    %387 = vector.broadcast %368 : vector<1x64xf32> to vector<16x64xf32>
    %388 = arith.addf %386, %387 : vector<16x64xf32>
    %389 = arith.addf %1, %388 : vector<16x64xf32>
    %c0_167 = arith.constant 0 : index
    %c0_168 = arith.constant 0 : index
    %c0_169 = arith.constant 0 : index
    %390 = vector.load %arg17[%c0_167, %c0_168, %c0_169] : memref<1x16x64xf32, #tpu.memory_space<vmem>>, vector<1x16x64xf32>
    %391 = vector.shape_cast %390 : vector<1x16x64xf32> to vector<16x64xf32>
    %392 = vector.shape_cast %389 : vector<16x64xf32> to vector<1x16x64xf32>
    tpu.vector_store %arg17[%c0_167, %c0_168, %c0_169], %392 {strides = array<i32>} : memref<1x16x64xf32, #tpu.memory_space<vmem>>, vector<1x16x64xf32>,
    return
  }
  func.func @transform_0(%arg0: i32) -> (i32, i32, i32) {
    %c0_i32 = arith.constant 0 : i32
    %c0_i32_0 = arith.constant 0 : i32
    %c0_i32_1 = arith.constant 0 : i32
    return %arg0, %c0_i32, %c0_i32_0 : i32, i32, i32
  }
  func.func @transform_1(%arg0: i32) -> (i32, i32, i32) {
    %c0_i32 = arith.constant 0 : i32
    %c0_i32_0 = arith.constant 0 : i32
    %c0_i32_1 = arith.constant 0 : i32
    return %arg0, %c0_i32, %c0_i32_0 : i32, i32, i32
  }
  func.func @transform_2(%arg0: i32) -> (i32, i32, i32) {
    %c0_i32 = arith.constant 0 : i32
    %c0_i32_0 = arith.constant 0 : i32
    %c0_i32_1 = arith.constant 0 : i32
    %c0_i32_2 = arith.constant 0 : i32
    return %c0_i32, %c0_i32_0, %c0_i32_1 : i32, i32, i32
  }
  func.func @transform_3(%arg0: i32) -> (i32, i32, i32) {
    %c0_i32 = arith.constant 0 : i32
    %c0_i32_0 = arith.constant 0 : i32
    %c0_i32_1 = arith.constant 0 : i32
    %c0_i32_2 = arith.constant 0 : i32
    return %c0_i32, %c0_i32_0, %c0_i32_1 : i32, i32, i32
  }
  func.func @transform_4(%arg0: i32) -> (i32, i32, i32) {
    %c0_i32 = arith.constant 0 : i32
    %c0_i32_0 = arith.constant 0 : i32
    %c0_i32_1 = arith.constant 0 : i32
    %c0_i32_2 = arith.constant 0 : i32
    return %c0_i32, %c0_i32_0, %c0_i32_1 : i32, i32, i32
  }
  func.func @transform_5(%arg0: i32) -> (i32, i32, i32) {
    %c0_i32 = arith.constant 0 : i32
    %c0_i32_0 = arith.constant 0 : i32
    %c0_i32_1 = arith.constant 0 : i32
    %c0_i32_2 = arith.constant 0 : i32
    return %c0_i32, %c0_i32_0, %c0_i32_1 : i32, i32, i32
  }
  func.func @transform_6(%arg0: i32) -> (i32, i32, i32) {
    %c0_i32 = arith.constant 0 : i32
    %c0_i32_0 = arith.constant 0 : i32
    %c0_i32_1 = arith.constant 0 : i32
    %c0_i32_2 = arith.constant 0 : i32
    return %c0_i32, %c0_i32_0, %c0_i32_1 : i32, i32, i32
  }
  func.func @transform_7(%arg0: i32) -> (i32, i32, i32) {
    %c0_i32 = arith.constant 0 : i32
    %c0_i32_0 = arith.constant 0 : i32
    %c0_i32_1 = arith.constant 0 : i32
    %c0_i32_2 = arith.constant 0 : i32
    return %c0_i32, %c0_i32_0, %c0_i32_1 : i32, i32, i32
  }
  func.func @transform_8(%arg0: i32) -> (i32, i32, i32) {
    %c0_i32 = arith.constant 0 : i32
    %c0_i32_0 = arith.constant 0 : i32
    %c0_i32_1 = arith.constant 0 : i32
    %c0_i32_2 = arith.constant 0 : i32
    return %c0_i32, %c0_i32_0, %c0_i32_1 : i32, i32, i32
  }
  func.func @transform_9(%arg0: i32) -> (i32, i32, i32) {
    %c0_i32 = arith.constant 0 : i32
    %c0_i32_0 = arith.constant 0 : i32
    %c0_i32_1 = arith.constant 0 : i32
    %c0_i32_2 = arith.constant 0 : i32
    return %c0_i32, %c0_i32_0, %c0_i32_1 : i32, i32, i32
  }
  func.func @transform_10(%arg0: i32) -> (i32, i32, i32) {
    %c0_i32 = arith.constant 0 : i32
    %c0_i32_0 = arith.constant 0 : i32
    %c0_i32_1 = arith.constant 0 : i32
    %c0_i32_2 = arith.constant 0 : i32
    return %c0_i32, %c0_i32_0, %c0_i32_1 : i32, i32, i32
  }
  func.func @transform_11(%arg0: i32) -> (i32, i32, i32) {
    %c0_i32 = arith.constant 0 : i32
    %c0_i32_0 = arith.constant 0 : i32
    %c0_i32_1 = arith.constant 0 : i32
    %c0_i32_2 = arith.constant 0 : i32
    return %c0_i32, %c0_i32_0, %c0_i32_1 : i32, i32, i32
  }
  func.func @transform_12(%arg0: i32) -> (i32, i32, i32) {
    %c0_i32 = arith.constant 0 : i32
    %c0_i32_0 = arith.constant 0 : i32
    %c0_i32_1 = arith.constant 0 : i32
    %c0_i32_2 = arith.constant 0 : i32
    return %c0_i32, %c0_i32_0, %c0_i32_1 : i32, i32, i32
  }
  func.func @transform_13(%arg0: i32) -> (i32, i32, i32) {
    %c0_i32 = arith.constant 0 : i32
    %c0_i32_0 = arith.constant 0 : i32
    %c0_i32_1 = arith.constant 0 : i32
    %c0_i32_2 = arith.constant 0 : i32
    return %c0_i32, %c0_i32_0, %c0_i32_1 : i32, i32, i32
  }
  func.func @transform_14(%arg0: i32) -> (i32, i32, i32) {
    %c0_i32 = arith.constant 0 : i32
    %c0_i32_0 = arith.constant 0 : i32
    %c0_i32_1 = arith.constant 0 : i32
    %c0_i32_2 = arith.constant 0 : i32
    return %c0_i32, %c0_i32_0, %c0_i32_1 : i32, i32, i32
  }
  func.func @transform_15(%arg0: i32) -> (i32, i32, i32) {
    %c0_i32 = arith.constant 0 : i32
    %c0_i32_0 = arith.constant 0 : i32
    %c0_i32_1 = arith.constant 0 : i32
    %c0_i32_2 = arith.constant 0 : i32
    return %c0_i32, %c0_i32_0, %c0_i32_1 : i32, i32, i32
  }
  func.func @transform_16(%arg0: i32) -> (i32, i32, i32) {
    %c0_i32 = arith.constant 0 : i32
    %c0_i32_0 = arith.constant 0 : i32
    %c0_i32_1 = arith.constant 0 : i32
    return %arg0, %c0_i32, %c0_i32_0 : i32, i32, i32
  }
}

</mosaic_0001>

<bundles_post_ra>
// kernel: _lambda_.5
= control target key start
LH: loop header
LB: loop body
LE: loop exit
PB: predicated region body
PF: predicated region fallthrough
CT: control target
= control target key end

     0   :  { %v225_v0 = vmov 0   ;;  %v226_v3 = vmov 1   ;;  %v227_v6 = vmov 2   ;;  %vm151_vm0 = vcmask 523264   ;;  %s303_s0 = inlined_call_operand.vmem [shape: f32[32,3], index: 0, kind: input, shape index: {}]   ;;  %s304_s2 = inlined_call_operand.vmem [shape: f32[1,64], index: 2, kind: input, shape index: {}]   ;;  %s305_s4 = inlined_call_operand.vmem [shape: f32[1,32], index: 4, kind: input, shape index: {}]   ;;  %s306_s3 = inlined_call_operand.vmem [shape: bf16[64,32], index: 3, kind: input, shape index: {}]   ;;  %s307_s1 = inlined_call_operand.vmem [shape: f32[3,64], index: 1, kind: input, shape index: {}]   ;;  %s308_s5 = inlined_call_operand.vmem [shape: f32[32,32], index: 5, kind: output, shape index: {}]  }
   0x1   :  { %216 = vset.pattern.permute.xlu1 %v225_v0  ;;  %215 = vset.pattern.permute.xlu0 %v225_v0  ;;  %v23_v1 = vld [vmem:[%s303_s0 + $0x10] sm:$0xff]  ;;  %v21_v2 = vld [vmem:[%s303_s0] sm:$0xff]  ;;  %v24_v4 = vld [vmem:[%s303_s0 + $0x18] sm:$0xff]  ;;  %vm177_vm1 = vcmask 261120  }
   0x2   :  { %38 = vperm.xlu1 %216, %v23_v1   ;;  %28 = vperm.xlu0 %215, %v21_v2   ;;  %v22_v5 = vld [vmem:[%s303_s0 + $0x8] sm:$0xff]  ;;  %v207_v7 = vld [vmem:[%s306_s3 + $0x18] sm:$0xff]  ;;  %v206_v9 = vld [vmem:[%s306_s3 + $0x10] sm:$0xff] }
   0x3   :  { %217 = vset.pattern.permute.xlu2 %v226_v3  ;;  %162 = vmatpush.bf16.msra.mxu0 %v207_v7  ;;  %v205_v10 = vld [vmem:[%s306_s3 + $0x8] sm:$0xff]  ;;  %v204_v14 = vld [vmem:[%s306_s3] sm:$0xff] }
   0x4   :  { %52 = vperm.xlu2 %217, %v21_v2   ;;  %208 = vmatpush.bf16.msra.mxu1 %v207_v7  ;;  %v25_v17 = vld [vmem:[%s307_s1] sm:$0x7] }
   0x5   :  { %v67_v19 = vperm.slane %v25_v17, 1  ;;  %v46_v20 = vperm.slane %v25_v17, 0  ;;  %v92_v23 = vperm.slane %v25_v17, 2  ;;  %v223_v36 = vld [vmem:[%s304_s2] ss:$0 sm:$0xff] }
   0x6   :  { %v224_v58 = vld [vmem:[%s305_s4] ss:$0 sm:$0xff] }
   0x7   :  { %163 = vmatpush.bf16.msra.mxu0 %v206_v9 }
   0x8   :  { %209 = vmatpush.bf16.msra.mxu1 %v206_v9 }
   0xa   :  { %43 = vperm.xlu1 %216, %v24_v4   ;;  %33 = vperm.xlu0 %215, %v22_v5  }
   0xb   :  { %164 = vmatpush.bf16.msra.mxu0 %v205_v10 }
   0xc   :  { %56 = vperm.xlu2 %217, %v22_v5   ;;  %210 = vmatpush.bf16.msra.mxu1 %v205_v10 }
   0xf   :  { %165 = vmatpush.bf16.msra.mxu0 %v204_v14 }
  0x10   :  { %211 = vmatpush.bf16.msra.mxu1 %v204_v14 }
  0x12   :  { %219 = vset.pattern.permute.xlu1 %v226_v3  ;;  %218 = vset.pattern.permute.xlu0 %v226_v3 }
  0x13   :  { %64 = vperm.xlu1 %219, %v24_v4   ;;  %60 = vperm.xlu0 %218, %v23_v1  }
  0x14   :  { %220 = vset.pattern.permute.xlu2 %v227_v6 }
  0x15   :  { %77 = vperm.xlu2 %220, %v21_v2  }
  0x1b   :  { %221 = vset.pattern.permute.xlu1 %v227_v6  ;;  %222 = vset.pattern.permute.xlu0 %v227_v6 }
  0x1c   :  { %81 = vperm.xlu1 %221, %v22_v5   ;;  %89 = vperm.xlu0 %222, %v24_v4  }
  0x1d   :  { %85 = vperm.xlu2 %220, %v23_v1  }
  0x5e   :  { %v53_v8 = vpop.permute.xlu2 %52 }
  0x5f   :  { %v68_v21 = vmul.f32 %v67_v19, %v53_v8 }
  0x66   :  { %v57_v11 = vpop.permute.xlu2 %56 }
  0x67   :  { %v69_v35 = vmul.f32 %v67_v19, %v57_v11 }
  0x6f   :  { %v78_v18 = vpop.permute.xlu2 %77 }
  0x70   :  { %v93_v30 = vmul.f32 %v92_v23, %v78_v18 }
  0x74   :  { %v39_v12 = vpop.permute.xlu1 %38  ;;  %v29_v13 = vpop.permute.xlu0 %28 }
  0x75   :  { %v47_v22 = vmul.f32 %v46_v20, %v29_v13  ;;  %v49_v28 = vmul.f32 %v46_v20, %v39_v12 }
  0x77   :  { %v86_v27 = vpop.permute.xlu2 %85  ;;  %v72_v29 = vadd.f32 %v68_v21, %v47_v22 }
  0x78   :  { %v95_v32 = vmul.f32 %v92_v23, %v86_v27 }
  0x79   :  { %v97_v37 = vadd.f32 %v93_v30, %v72_v29 }
  0x7b   :  { %v105_v46 = vadd.f32 %v223_v36, %v97_v37 }
  0x7c   :  { %v44_v15 = vpop.permute.xlu1 %43  ;;  %v34_v16 = vpop.permute.xlu0 %33 }
  0x7d   :  { %v48_v33 = vmul.f32 %v46_v20, %v34_v16  ;;  %v50_v38 = vmul.f32 %v46_v20, %v44_v15  ;;  %v109_v52 = vmax.f32 %v105_v46, 0.0 }
  0x7f   :  { %v73_v42 = vadd.f32 %v69_v35, %v48_v33 }
  0x85   :  { %v65_v24 = vpop.permute.xlu1 %64  ;;  %v61_v25 = vpop.permute.xlu0 %60 }
  0x86   :  { %v70_v26 = vmul.f32 %v67_v19, %v61_v25  ;;  %v71_v34 = vmul.f32 %v67_v19, %v65_v24 }
  0x88   :  { %v74_v31 = vadd.f32 %v70_v26, %v49_v28  ;;  %v75_v43 = vadd.f32 %v71_v34, %v50_v38 }
  0x8a   :  { %v99_v39 = vadd.f32 %v95_v32, %v74_v31 }
  0x8c   :  { %v107_v47 = vadd.f32 %v223_v36, %v99_v39 }
  0x8e   :  { %v82_v40 = vpop.permute.xlu1 %81  ;;  %v90_v41 = vpop.permute.xlu0 %89  ;;  %v111_v53 = vmax.f32 %v107_v47, 0.0 }
  0x8f   :  { %v94_v44 = vmul.f32 %v92_v23, %v82_v40  ;;  %v96_v45 = vmul.f32 %v92_v23, %v90_v41 }
  0x91   :  { %v98_v48 = vadd.f32 %v94_v44, %v73_v42  ;;  %v100_v49 = vadd.f32 %v96_v45, %v75_v43 }
  0x93   :  { %v106_v50 = vadd.f32 %v223_v36, %v98_v48  ;;  %v108_v51 = vadd.f32 %v223_v36, %v100_v49 }
  0x95   :  { %v110_v54 = vmax.f32 %v106_v50, 0.0  ;;  %v112_v55 = vmax.f32 %v108_v51, 0.0 }
  0x97   :  { %v113_v56 = vpack.c.bf16 %v110_v54, %v109_v52  ;;  %v114_v57 = vpack.c.bf16 %v112_v55, %v111_v53 }
  0x99   :  { %202 = vmatmul.msk.bf16.vlgmr.msra.gmra.mxu0 %vm151_vm0, %v113_v56  ;;  %203 = vmatmul.msk.bf16.vlgmr.msra.gmra.mxu1 %vm151_vm0, %v114_v57 }
 0x116   :  { %v167_v59 = vpop.f32.mrf.mxu0  ;;  %v172_v60 = vpop.f32.mrf.mxu1 }
 0x117   :  { %v168_v61 = vadd.f32 %v224_v58, %v167_v59  ;;  %v173_v62 = vadd.f32 %v224_v58, %v172_v60 }
 0x119   :  { %178 = vst.msk [vmem:[%s308_s5] sm:$0xff] %vm177_vm1, %v168_v61 }
 0x11a   :  { %180 = vst.msk [vmem:[%s308_s5 + $0x10] sm:$0xff] %vm177_vm1, %v173_v62 }
 0x11e   :  { %v169_v63 = vpop.f32.mrf.mxu0  ;;  %v174_v0 = vpop.f32.mrf.mxu1 }
 0x11f   :  { %v170_v1 = vadd.f32 %v224_v58, %v169_v63  ;;  %v175_v2 = vadd.f32 %v224_v58, %v174_v0 }
 0x121   :  { %179 = vst.msk [vmem:[%s308_s5 + $0x8] sm:$0xff] %vm177_vm1, %v170_v1 }
 0x122   :  { %181 = vst.msk [vmem:[%s308_s5 + $0x18] sm:$0xff] %vm177_vm1, %v175_v2 }

// kernel: _lambda_.9
= control target key start
LH: loop header
LB: loop body
LE: loop exit
PB: predicated region body
PF: predicated region fallthrough
CT: control target
= control target key end

     0   :  { %s2160_s0 = inlined_call_operand.vmem [shape: f32[2,16,64], index: 0, kind: input, shape index: {}]   ;;  %s2161_s1 = inlined_call_operand.vmem [shape: f32[2,16,64], index: 1, kind: input, shape index: {}]   ;;  %s2162_s2 = inlined_call_operand.vmem [shape: bf16[64,64], index: 2, kind: input, shape index: {}]   ;;  %s2163_s3 = inlined_call_operand.vmem [shape: bf16[64,64], index: 3, kind: input, shape index: {}]   ;;  %s2164_s4 = inlined_call_operand.vmem [shape: f32[1,64], index: 4, kind: input, shape index: {}]   ;;  %s2165_s5 = inlined_call_operand.vmem [shape: bf16[64,64], index: 5, kind: input, shape index: {}]   ;;  %s2166_s6 = inlined_call_operand.vmem [shape: f32[1,64], index: 6, kind: input, shape index: {}]   ;;  %s2167_s7 = inlined_call_operand.hbm [shape: f32[1,64], index: 7, kind: input, shape index: {}]   ;;  %s2168_s8 = inlined_call_operand.<no memory space> [shape: f32[1,1], index: 8, kind: input, shape index: {}]   ;;  %s2169_s9 = inlined_call_operand.hbm [shape: f32[2,16,16], index: 9, kind: output, shape index: {}]  }
   0x1   :  { %2170 = sst [smem:[#allocation9_spill]] %s2167_s7  ;;  %v14_v0 = vstv %s2168_s8 }
   0x2   :  { %15 = vst [vmem:[#allocation2] sm:$0x1] %v14_v0 }
   0x3   :  { %16 = vsyncpa [#allocation4], 0 }
   0x4   :  { %17 = vsyncpa [#allocation5], 0 }
   0x5   :  { %19 = vsyncpa [#allocation5 + $0x1], 0  ;;  %s1668_s11 = smov 0   ;;  %s1670_s12 = smov 0  }
   0x6   :  { %s1672_s13 = smov 0   ;;  %s1674_s14 = smov 0  }
   0x7   :  { %s1676_s15 = smov 0   ;;  %s1678_s16 = smov 0  }
   0x8 LB: > { %s1312_s8 = sadd.s32 4294967295, %s1609_s16   ;;  %s1313_s17 = sadd.s32 4294967294, %s1609_s16   ;;  %s1609_s16 = sphi %s1678_s16, %s25_s16   ;;  %s1605_s15 = sphi %s1676_s15, %s2178_s15   ;;  %s1601_s14 = sphi %s1674_s14, %s2177_s14   ;;  %s1597_s13 = sphi %s1672_s13, %s2176_s13   ;;  %s1593_s12 = sphi %s1670_s12, %s2175_s12   ;;  %s1589_s11 = sphi %s1668_s11, %s2174_s11  }
   0x9   : > { %s44_s18 = sadd.s32 1, %s1605_s15  ;;  %s258_s19 = sadd.s32 1, %s1597_s13 }
   0xa   : > { %p46_p0 = scmp.ge.s32.totalorder %s44_s18, 2  ;;  %p268_p1 = scmp.ne.s32.totalorder %s1597_s13, %s1593_s12 }
   0xb   : > { %p269_p2 = scmp.eq.s32.totalorder %s1312_s8, 1  ;;  %p274_p3 = scmp.ne.s32.totalorder %s1593_s12, %s1589_s11 }
   0xc   : > { %s2180_s18 = smov (%p46_p0, %s44_s18), 0  ;;  %p275_p5 = scmp.eq.s32.totalorder %s1313_s17, 1 }
   0xd   : > { %p1708_p4 = por %p269_p2, %p268_p1  ;;  %s251_s21 = ssub.s32 %s1605_s15, %s2180_s18 }
   0xe   : > { %p1314_p6 = scmp.ge.s32.totalorder %s1609_s16, 1  ;;  %p256_p7 = scmp.eq.s32.totalorder %s251_s21, 0 }
   0xf   : > { %p1715_p8 = por %p275_p5, %p274_p3  ;;  %p282_p9 = scmp.lt.s32.totalorder %s1609_s16, 3 }
  0x10   : > { %s1721_s23 = scalar_select %p256_p7, %s1597_s13, %s258_s19  }
  0x11   : > { %p283_p10 = pnand %p1314_p6, %p282_p9  ;;  %p1436_p11 = scmp.eq.s32.totalorder %s1312_s8, 0 }
  0x12   : > { %s2173_s7 = sld [smem:[#allocation9_spill]]  ;;  %s1611_s27 = smov [#allocation3]  }
  0x13   : > { %p1428_p12 = pneg %p283_p10  ;;  %s311_s28 = sshll.u32 %s1611_s27, 4  ;;  %s312_s28 = int_to_ptr.vmem [resolvable:$true] %s311_s28 }
  0x15   : > { %p1429_p13 = pnand %p1436_p11, %p1428_p12  ;;  %353 = sbr.rel (%p283_p10) target bundleno = 555 (0x22b), region = 56 }
  0x18   : > { %s309_s26 = sshll.u32 %s2173_s7, 4  ;;  %s310_s26 = int_to_ptr.hbm [resolvable:$true] %s309_s26 }
  0x19   : > { %1431 = dma.hbm_to_vmem [thread:$0]  (!%p1429_p13), %s310_s26, 16, %s312_s28, [#allocation4]  }
  0x1a   : > { %1580 = dma.done.wait (%p1436_p11), [#allocation4], 16  }
  0x1b   : > { %1582 = vsyncadd (%p1436_p11), [#allocation4], 4294967280  ;;  %p404_p0 = scmp.lt.s32.totalorder %s1601_s14, 1  ;;  %v1400_v1 = vld [vmem:[%s2162_s2 + $0x18] sm:$0xff]  ;;  %v1399_v2 = vld [vmem:[%s2162_s2 + $0x10] sm:$0xff]  ;;  %vm462_vm0 = vcmask 523264  }
  0x1c   : > { %470 = vmatpush.bf16.msra.mxu1 %v1400_v1  ;;  %v1398_v3 = vld [vmem:[%s2162_s2 + $0x8] sm:$0xff]  ;;  %v1397_v4 = vld [vmem:[%s2162_s2] sm:$0xff]  ;;  %v1404_v7 = vld [vmem:[%s2163_s3 + $0x18] sm:$0xff]  ;;  %vm1107_vm1 = vcmask 130112   ;;  %vm1154_vm2 = vcmask 1041409   ;;  %vm1156_vm3 = vcmask 1042434  }
  0x1d   : > { %s405_s29 = scalar_select %p404_p0, %s1601_s14, 1  ;;  %v1403_v9 = vld [vmem:[%s2163_s3 + $0x10] sm:$0xff]  ;;  %v1402_v10 = vld [vmem:[%s2163_s3 + $0x8] sm:$0xff]  ;;  %v1401_v11 = vld [vmem:[%s2163_s3] sm:$0xff]  ;;  %vm1158_vm4 = vcmask 1043459   ;;  %vm1160_vm5 = vcmask 1044484  }
  0x1e   : > { %v1408_v15 = vld [vmem:[%s2165_s5 + $0x18] sm:$0xff]  ;;  %v1407_v16 = vld [vmem:[%s2165_s5 + $0x10] sm:$0xff]  ;;  %v1406_v17 = vld [vmem:[%s2165_s5 + $0x8] sm:$0xff]  ;;  %vm1162_vm6 = vcmask 1045509   ;;  %vm1164_vm7 = vcmask 1046534   ;;  %vm1166_vm8 = vcmask 1047559  }
  0x1f   : > { %s1395_s19 = sshll.u32 %s405_s29, 4  ;;  %782 = vmatpush.bf16.msra.mxu0 %v1408_v15  ;;  %1411 = vmatpush.bf16.msra.mxu2 %v1408_v15  ;;  %v1405_v18 = vld [vmem:[%s2165_s5] sm:$0xff]  ;;  %vm1177_vm9 = vcmask 130048   ;;  %s1409_s10 = sshll.u32 %s1601_s14, 4 }
  0x20   : > { %471 = vmatpush.bf16.msra.mxu1 %v1399_v2  ;;  %s411_s27 = scalar_lea.vmem %s2160_s0, %s1395_s19  ;;  %s421_s25 = scalar_lea.vmem %s2161_s1, %s1395_s19  ;;  %1412 = vmatpush.bf16.msra.mxu3 %v1408_v15  ;;  %v1788_v32 = vld [vmem:[%s2164_s4] ss:$0 sm:$0xff] }
  0x21   : > { %v425_v5 = vld [vmem:[%s411_s27] sm:$0xff]  ;;  %v426_v6 = vld [vmem:[%s411_s27 + $0x8] sm:$0xff]  ;;  %s400_s27 = sand.u32 1, %s1593_s12   ;;  %s1195_s19 = scalar_lea.hbm %s2169_s9, %s1409_s10 }
  0x22   : > { %v429_v8 = vpack.c.bf16 %v426_v6, %v425_v5  ;;  %v427_v12 = vld [vmem:[%s421_s25] sm:$0xff]  ;;  %v428_v13 = vld [vmem:[%s421_s25 + $0x8] sm:$0xff]  ;;  %s1319_s28 = sshll.u32 %s400_s27, 4  ;;  %s1198_s17 = sshll.u32 %s1195_s19, 4  ;;  %s1199_s17 = int_to_ptr.hbm [resolvable:$true] %s1198_s17 }
  0x23   : > { %v480_v14 = vpack.c.bf16 %v428_v13, %v427_v12  ;;  %783 = vmatpush.bf16.msra.mxu0 %v1407_v16  ;;  %1414 = vmatpush.bf16.msra.mxu2 %v1407_v16  ;;  %s2061_s30 = scalar_lea.vmem [#allocation6], %s1319_s28  ;;  %s1181_s7 = scalar_lea.sflag [#allocation5], %s400_s27 }
  0x24   : > { %472 = vmatpush.bf16.msra.mxu1 %v1398_v3  ;;  %1415 = vmatpush.bf16.msra.mxu3 %v1407_v16  ;;  %s1196_s8 = sshll.u32 %s2061_s30, 4  ;;  %s1541_s21 = sshra.s32 %s1199_s17, 4  ;;  %s1197_s8 = int_to_ptr.vmem [resolvable:$true] %s1196_s8  ;;  %s1542_s21 = int_to_ptr.hbm [resolvable:$true] %s1541_s21 }
  0x25   : > { %s1543_s24 = scalar_lea.hbm %s1542_s21, 16  ;;  %s1547_s28 = scalar_lea.hbm %s2169_s9, 32 }
  0x26   : > { %p1544_p1 = scmp.ne.s32.totalorder %s1542_s21, %s1543_s24  ;;  %p1548_p5 = scmp.lt.s32.totalorder %s1542_s21, %s2169_s9 }
  0x27   : > { %784 = vmatpush.bf16.msra.mxu0 %v1406_v17  ;;  %1417 = vmatpush.bf16.msra.mxu2 %v1406_v17  ;;  %p1549_p6 = scmp.lt.s32.totalorder %s1547_s28, %s1543_s24 }
  0x28   : > { %473 = vmatpush.bf16.msra.mxu1 %v1397_v4  ;;  %1418 = vmatpush.bf16.msra.mxu3 %v1406_v17  ;;  %p1545_p2 = pnand %p1544_p1, %p1708_p4 }
  0x29   : > { %p1550_p7 = por %p1549_p6, %p1548_p5 }
  0x2a   : > { %p1546_p3 = pneg %p1545_p2 }
  0x2b   : > { %1340 = vmatmul.msk.bf16.vlgmr.msra.gmra.mxu1 %vm462_vm0, %v429_v8  ;;  %785 = vmatpush.bf16.msra.mxu0 %v1405_v18 }
  0x2c   : > { %520 = vmatpush.bf16.msrb.mxu1 %v1404_v7  ;;  %1420 = vmatpush.bf16.msra.mxu2 %v1405_v18  ;;  %p1551_p9 = pnand %p1550_p7, %p1546_p3 }
  0x2d   : > { %1421 = vmatpush.bf16.msra.mxu3 %v1405_v18 }
  0x30   : > { %521 = vmatpush.bf16.msrb.mxu1 %v1403_v9 }
  0x34   : > { %522 = vmatpush.bf16.msrb.mxu1 %v1402_v10 }
  0x38   : > { %523 = vmatpush.bf16.msrb.mxu1 %v1401_v11 }
  0x3b   : > { %1357 = vmatmul.msk.bf16.vlgmr.msrb.gmra.mxu1 %vm462_vm0, %v480_v14 }
  0x3c   : > { %1410 = vmatpush.bf16.msra.mxu1 %v1408_v15 }
  0x40   : > { %1413 = vmatpush.bf16.msra.mxu1 %v1407_v16 }
  0x44   : > { %1416 = vmatpush.bf16.msra.mxu1 %v1406_v17 }
  0x48   : > { %1419 = vmatpush.bf16.msra.mxu1 %v1405_v18 }
  0xa8   : > { %v1772_v19 = vpop.f32.mrf.mxu1 }
  0xa9   : > { %v535_v21 = vrot.slane %v1772_v19, 4  ;;  %v537_v22 = vrot.slane %v1772_v19, 6  ;;  %v546_v25 = vperm.slane %v1772_v19, 0  ;;  %v532_v49 = vrot.slane %v1772_v19, 1 }
  0xaa   : > { %v536_v50 = vrot.slane %v1772_v19, 5  ;;  %v538_v63 = vrot.slane %v1772_v19, 7 }
  0xab   : > { %v550_v26 = vperm.slane %v535_v21, 0  ;;  %v552_v27 = vperm.slane %v537_v22, 0  ;;  %v547_v5 = vperm.slane %v532_v49, 0 }
  0xac   : > { %v551_v6 = vperm.slane %v536_v50, 0  ;;  %v553_v7 = vperm.slane %v538_v63, 0 }
  0xb0   : > { %v1774_v20 = vpop.f32.mrf.mxu1 }
  0xb1   : > { %v541_v23 = vrot.slane %v1774_v20, 3  ;;  %v540_v29 = vrot.slane %v1774_v20, 2  ;;  %v545_v30 = vrot.slane %v1774_v20, 7  ;;  %v542_v0 = vrot.slane %v1774_v20, 4 }
  0xb3   : > { %v557_v28 = vperm.slane %v541_v23, 0  ;;  %v556_v36 = vperm.slane %v540_v29, 0  ;;  %v561_v37 = vperm.slane %v545_v30, 0  ;;  %v558_v8 = vperm.slane %v542_v0, 0 }
  0xb8   : > { %v1779_v24 = vpop.f32.mrf.mxu1 }
  0xb9   : > { %v578_v31 = vadd.f32 %v546_v25, %v1779_v24  ;;  %v586_v33 = vadd.f32 %v550_v26, %v1779_v24  ;;  %v590_v34 = vadd.f32 %v552_v27, %v1779_v24  ;;  %v600_v35 = vadd.f32 %v557_v28, %v1779_v24 }
  0xba   : > { %v598_v43 = vadd.f32 %v556_v36, %v1779_v24  ;;  %v608_v44 = vadd.f32 %v561_v37, %v1779_v24  ;;  %v580_v13 = vadd.f32 %v547_v5, %v1779_v24  ;;  %v588_v14 = vadd.f32 %v551_v6, %v1779_v24 }
  0xbb   : > { %v614_v38 = vadd.f32 %v1788_v32, %v578_v31  ;;  %v622_v39 = vadd.f32 %v1788_v32, %v586_v33  ;;  %v626_v41 = vadd.f32 %v1788_v32, %v590_v34  ;;  %v636_v42 = vadd.f32 %v1788_v32, %v600_v35 }
  0xbc   : > { %v592_v15 = vadd.f32 %v553_v7, %v1779_v24  ;;  %v602_v16 = vadd.f32 %v558_v8, %v1779_v24  ;;  %v616_v23 = vadd.f32 %v1788_v32, %v580_v13  ;;  %v644_v31 = vadd.f32 %v1788_v32, %v608_v44 }
  0xbd   : > { %v646_v55 = vmax.f32 %v614_v38, 0.0  ;;  %v654_v56 = vmax.f32 %v622_v39, 0.0  ;;  %v658_v57 = vmax.f32 %v626_v41, 0.0  ;;  %v668_v58 = vmax.f32 %v636_v42, 0.0 }
  0xbe   : > { %v638_v29 = vadd.f32 %v1788_v32, %v602_v16  ;;  %v533_v35 = vrot.slane %v1772_v19, 2  ;;  %v676_v49 = vmax.f32 %v644_v31, 0.0 }
  0xc0   : > { %v1795_v40 = vpop.f32.mrf.mxu1 }
  0xc1   : > { %v579_v45 = vadd.f32 %v546_v25, %v1795_v40  ;;  %v587_v46 = vadd.f32 %v550_v26, %v1795_v40  ;;  %v591_v47 = vadd.f32 %v552_v27, %v1795_v40  ;;  %v601_v48 = vadd.f32 %v557_v28, %v1795_v40 }
  0xc2   : > { %v581_v9 = vadd.f32 %v547_v5, %v1795_v40  ;;  %v589_v10 = vadd.f32 %v551_v6, %v1795_v40  ;;  %v593_v11 = vadd.f32 %v553_v7, %v1795_v40  ;;  %v603_v12 = vadd.f32 %v558_v8, %v1795_v40 }
  0xc3   : > { %v615_v51 = vadd.f32 %v1788_v32, %v579_v45  ;;  %v623_v52 = vadd.f32 %v1788_v32, %v587_v46  ;;  %v627_v53 = vadd.f32 %v1788_v32, %v591_v47  ;;  %v637_v54 = vadd.f32 %v1788_v32, %v601_v48 }
  0xc4   : > { %v617_v17 = vadd.f32 %v1788_v32, %v581_v9  ;;  %v625_v18 = vadd.f32 %v1788_v32, %v589_v10  ;;  %v629_v21 = vadd.f32 %v1788_v32, %v593_v11  ;;  %v639_v22 = vadd.f32 %v1788_v32, %v603_v12 }
  0xc5   : > { %v647_v59 = vmax.f32 %v615_v51, 0.0  ;;  %v655_v60 = vmax.f32 %v623_v52, 0.0  ;;  %v659_v61 = vmax.f32 %v627_v53, 0.0  ;;  %v669_v62 = vmax.f32 %v637_v54, 0.0 }
  0xc6   : > { %v624_v25 = vadd.f32 %v1788_v32, %v588_v14  ;;  %v599_v26 = vadd.f32 %v556_v36, %v1795_v40  ;;  %v634_v27 = vadd.f32 %v1788_v32, %v598_v43  ;;  %v628_v28 = vadd.f32 %v1788_v32, %v592_v15 }
  0xc7   : > { %v678_v1 = vpack.c.bf16 %v647_v59, %v646_v55  ;;  %v682_v2 = vpack.c.bf16 %v655_v60, %v654_v56  ;;  %v684_v3 = vpack.c.bf16 %v659_v61, %v658_v57  ;;  %v689_v4 = vpack.c.bf16 %v669_v62, %v668_v58 }
  0xc8   : > { %v609_v30 = vadd.f32 %v561_v37, %v1795_v40  ;;  %v649_v33 = vmax.f32 %v617_v17, 0.0  ;;  %v657_v34 = vmax.f32 %v625_v18, 0.0  ;;  %v635_v38 = vadd.f32 %v1788_v32, %v599_v26 }
  0xc9   : > { %1374 = vmatmul.msk.bf16.vlgmr.msra.gmra.mxu0 %vm462_vm0, %v678_v1  ;;  %1378 = vmatmul.msk.bf16.vlgmr.msra.gmra.mxu1 %vm462_vm0, %v682_v2  ;;  %v661_v39 = vmax.f32 %v629_v21, 0.0  ;;  %v671_v41 = vmax.f32 %v639_v22, 0.0  ;;  %v543_v36 = vrot.slane %v1774_v20, 5  ;;  %v648_v43 = vmax.f32 %v616_v23, 0.0 }
  0xca   : > { %1380 = vmatmul.msk.bf16.vlgmr.msra.gmra.mxu2 %vm462_vm0, %v684_v3  ;;  %1385 = vmatmul.msk.bf16.vlgmr.msra.gmra.mxu3 %vm462_vm0, %v689_v4  ;;  %v645_v42 = vadd.f32 %v1788_v32, %v609_v30  ;;  %v656_v45 = vmax.f32 %v624_v25, 0.0  ;;  %v666_v46 = vmax.f32 %v634_v27, 0.0  ;;  %v667_v47 = vmax.f32 %v635_v38, 0.0  ;;  %v1494_v25 = vld [vmem:[#allocation2] ss:$0 sm:$0xff] }
  0xcb   : > { %v660_v48 = vmax.f32 %v628_v28, 0.0  ;;  %v670_v37 = vmax.f32 %v638_v29, 0.0  ;;  %v679_v50 = vpack.c.bf16 %v649_v33, %v648_v43  ;;  %v548_v56 = vperm.slane %v533_v35, 0 }
  0xcc   : > { %v677_v44 = vmax.f32 %v645_v42, 0.0  ;;  %v683_v51 = vpack.c.bf16 %v657_v34, %v656_v45  ;;  %v1841_v52 = vpack.c.bf16 %v667_v47, %v666_v46  ;;  %v554_v57 = vperm.slane %v1774_v20, 0 }
  0xcd   : > { %v685_v53 = vpack.c.bf16 %v661_v39, %v660_v48  ;;  %v690_v54 = vpack.c.bf16 %v671_v41, %v670_v37  ;;  %v559_v58 = vperm.slane %v543_v36, 0  ;;  %v583_v59 = vadd.f32 %v548_v56, %v1795_v40 }
  0xce   : > { %v1843_v55 = vpack.c.bf16 %v677_v44, %v676_v49  ;;  %v595_v60 = vadd.f32 %v554_v57, %v1795_v40  ;;  %v582_v62 = vadd.f32 %v548_v56, %v1779_v24  ;;  %v594_v63 = vadd.f32 %v554_v57, %v1779_v24 }
  0xcf   : > { %v605_v61 = vadd.f32 %v559_v58, %v1795_v40  ;;  %v604_v0 = vadd.f32 %v559_v58, %v1779_v24  ;;  %v619_v1 = vadd.f32 %v1788_v32, %v583_v59  ;;  %v534_v11 = vrot.slane %v1772_v19, 3 }
  0xd0   : > { %v631_v2 = vadd.f32 %v1788_v32, %v595_v60  ;;  %v618_v4 = vadd.f32 %v1788_v32, %v582_v62  ;;  %v630_v5 = vadd.f32 %v1788_v32, %v594_v63  ;;  %v539_v14 = vrot.slane %v1774_v20, 1 }
  0xd1   : > { %v641_v3 = vadd.f32 %v1788_v32, %v605_v61  ;;  %v640_v6 = vadd.f32 %v1788_v32, %v604_v0  ;;  %v651_v7 = vmax.f32 %v619_v1, 0.0  ;;  %v544_v15 = vrot.slane %v1774_v20, 6 }
  0xd2   : > { %v663_v8 = vmax.f32 %v631_v2, 0.0  ;;  %v650_v10 = vmax.f32 %v618_v4, 0.0  ;;  %v662_v12 = vmax.f32 %v630_v5, 0.0  ;;  %v549_v21 = vperm.slane %v534_v11, 0 }
  0xd3   : > { %v673_v9 = vmax.f32 %v641_v3, 0.0  ;;  %v672_v13 = vmax.f32 %v640_v6, 0.0  ;;  %v555_v22 = vperm.slane %v539_v14, 0  ;;  %v560_v23 = vperm.slane %v544_v15, 0 }
  0xd4   : > { %v680_v16 = vpack.c.bf16 %v651_v7, %v650_v10  ;;  %v686_v17 = vpack.c.bf16 %v663_v8, %v662_v12  ;;  %v585_v19 = vadd.f32 %v549_v21, %v1795_v40  ;;  %v1612_v26 = vmov 0  }
  0xd5   : > { %v691_v18 = vpack.c.bf16 %v673_v9, %v672_v13  ;;  %1491 = vset.pattern.permute.xlu1 %v1612_v26  ;;  %1492 = vset.pattern.permute.xlu0 %v1612_v26  ;;  %v597_v20 = vadd.f32 %v555_v22, %v1795_v40  ;;  %v607_v27 = vadd.f32 %v560_v23, %v1795_v40 }
  0xd6   : > { %1035 = vperm.xlu1 %1491, %v1494_v25   ;;  %v584_v28 = vadd.f32 %v549_v21, %v1779_v24  ;;  %v596_v29 = vadd.f32 %v555_v22, %v1779_v24  ;;  %v606_v30 = vadd.f32 %v560_v23, %v1779_v24  ;;  %v621_v31 = vadd.f32 %v1788_v32, %v585_v19 }
  0xd7   : > { %v633_v33 = vadd.f32 %v1788_v32, %v597_v20  ;;  %v643_v34 = vadd.f32 %v1788_v32, %v607_v27 }
  0xd8   : > { %v620_v35 = vadd.f32 %v1788_v32, %v584_v28  ;;  %v632_v38 = vadd.f32 %v1788_v32, %v596_v29  ;;  %v642_v39 = vadd.f32 %v1788_v32, %v606_v30  ;;  %v653_v40 = vmax.f32 %v621_v31, 0.0  ;;  %v1890_v32 = vld [vmem:[%s2166_s6] ss:$0 sm:$0xff] }
  0xd9   : > { %1375 = vmatmul.msk.bf16.gmra.mxu0 %vm462_vm0, %v679_v50  ;;  %1379 = vmatmul.msk.bf16.gmra.mxu1 %vm462_vm0, %v683_v51  ;;  %v665_v41 = vmax.f32 %v633_v33, 0.0  ;;  %v675_v36 = vmax.f32 %v643_v34, 0.0  ;;  %v1894_v50 = vld [vmem:[#allocation3] ss:$0 sm:$0xff] }
  0xda   : > { %1381 = vmatmul.msk.bf16.gmra.mxu2 %vm462_vm0, %v685_v53  ;;  %1386 = vmatmul.msk.bf16.gmra.mxu3 %vm462_vm0, %v690_v54  ;;  %v652_v42 = vmax.f32 %v620_v35, 0.0  ;;  %v664_v43 = vmax.f32 %v632_v38, 0.0  ;;  %v674_v45 = vmax.f32 %v642_v39, 0.0 }
  0xdc   : > { %v681_v46 = vpack.c.bf16 %v653_v40, %v652_v42  ;;  %v687_v24 = vpack.c.bf16 %v665_v41, %v664_v43  ;;  %v692_v47 = vpack.c.bf16 %v675_v36, %v674_v45 }
  0xe9   : > { %1376 = vmatmul.msk.bf16.gmra.mxu0 %vm462_vm0, %v680_v16 }
  0xea   : > { %1382 = vmatmul.msk.bf16.gmra.mxu2 %vm462_vm0, %v686_v17  ;;  %1387 = vmatmul.msk.bf16.gmra.mxu3 %vm462_vm0, %v691_v18 }
  0xf9   : > { %1377 = vmatmul.msk.bf16.gmra.mxu0 %vm462_vm0, %v681_v46 }
  0xfa   : > { %1383 = vmatmul.msk.bf16.gmra.mxu2 %vm462_vm0, %v687_v24  ;;  %1388 = vmatmul.msk.bf16.gmra.mxu3 %vm462_vm0, %v692_v47 }
 0x10a   : > { %1384 = vmatmul.msk.bf16.gmra.mxu2 %vm462_vm0, %v1841_v52  ;;  %1389 = vmatmul.msk.bf16.gmra.mxu3 %vm462_vm0, %v1843_v55 }
 0x146   : > { %v787_v48 = vpop.f32.mrf.mxu0  ;;  %v807_v37 = vpop.f32.mrf.mxu1 }
 0x147   : > { %v788_v49 = vadd.f32 %v1890_v32, %v787_v48  ;;  %v808_v44 = vadd.f32 %v1890_v32, %v807_v37 }
 0x149   : > { %v867_v51 = vmax.f32 %v788_v49, 0.0  ;;  %v875_v53 = vmax.f32 %v808_v44, 0.0 }
 0x14b   : > { %v911_v52 = vmul.f32 %v1894_v50, %v875_v53  ;;  %v903_v54 = vmul.f32 %v1894_v50, %v867_v51 }
 0x14d   : > { %v817_v55 = vpop.f32.mrf.mxu2  ;;  %v842_v56 = vpop.f32.mrf.mxu3  ;;  %v959_v57 = vsel %vm462_vm0, %v911_v52, 0.0  ;;  %v935_v58 = vsel %vm462_vm0, %v903_v54, 0.0 }
 0x14e   : > { %v818_v59 = vadd.f32 %v1890_v32, %v817_v55  ;;  %v843_v60 = vadd.f32 %v1890_v32, %v842_v56  ;;  %960 = vadd.xlane.f32.xlu2 %v959_v57  ;;  %v789_v61 = vpop.f32.mrf.mxu0  ;;  %936 = vadd.xlane.f32.xlu0 %v935_v58  ;;  %v809_v0 = vpop.f32.mrf.mxu1 }
 0x14f   : > { %v790_v1 = vadd.f32 %v1890_v32, %v789_v61  ;;  %v810_v13 = vadd.f32 %v1890_v32, %v809_v0 }
 0x150   : > { %v879_v62 = vmax.f32 %v818_v59, 0.0  ;;  %v889_v63 = vmax.f32 %v843_v60, 0.0 }
 0x151   : > { %v868_v4 = vmax.f32 %v790_v1, 0.0  ;;  %v876_v21 = vmax.f32 %v810_v13, 0.0 }
 0x152   : > { %v925_v2 = vmul.f32 %v1894_v50, %v889_v63  ;;  %v915_v3 = vmul.f32 %v1894_v50, %v879_v62 }
 0x153   : > { %v904_v14 = vmul.f32 %v1894_v50, %v868_v4  ;;  %v912_v31 = vmul.f32 %v1894_v50, %v876_v21 }
 0x154   : > { %v1001_v7 = vsel %vm462_vm0, %v925_v2, 0.0  ;;  %v971_v8 = vsel %vm462_vm0, %v915_v3, 0.0 }
 0x155   : > { %v819_v5 = vpop.f32.mrf.mxu2  ;;  %v844_v6 = vpop.f32.mrf.mxu3  ;;  %v938_v25 = vsel %vm462_vm0, %v904_v14, 0.0  ;;  %v962_v43 = vsel %vm462_vm0, %v912_v31, 0.0 }
 0x156   : > { %v820_v9 = vadd.f32 %v1890_v32, %v819_v5  ;;  %1002 = vadd.xlane.f32.xlu2 %v1001_v7  ;;  %v792_v10 = vpop.f32.mrf.mxu0  ;;  %972 = vadd.xlane.f32.xlu0 %v971_v8  ;;  %v812_v15 = vpop.f32.mrf.mxu1  ;;  %v845_v30 = vadd.f32 %v1890_v32, %v844_v6 }
 0x157   : > { %v793_v12 = vadd.f32 %v1890_v32, %v792_v10  ;;  %v813_v20 = vadd.f32 %v1890_v32, %v812_v15 }
 0x158   : > { %v880_v11 = vmax.f32 %v820_v9, 0.0  ;;  %v890_v41 = vmax.f32 %v845_v30, 0.0 }
 0x159   : > { %v869_v17 = vmax.f32 %v793_v12, 0.0  ;;  %v877_v34 = vmax.f32 %v813_v20, 0.0 }
 0x15a   : > { %v916_v16 = vmul.f32 %v1894_v50, %v880_v11  ;;  %v926_v49 = vmul.f32 %v1894_v50, %v890_v41 }
 0x15b   : > { %v905_v29 = vmul.f32 %v1894_v50, %v869_v17  ;;  %v913_v48 = vmul.f32 %v1894_v50, %v877_v34 }
 0x15c   : > { %v974_v18 = vsel %vm462_vm0, %v916_v16, 0.0  ;;  %v1004_v57 = vsel %vm462_vm0, %v926_v49, 0.0 }
 0x15d   : > { %v822_v22 = vpop.f32.mrf.mxu2  ;;  %v847_v23 = vpop.f32.mrf.mxu3  ;;  %975 = vadd.xlane.f32.xlu1 %v974_v18  ;;  %v941_v40 = vsel %vm462_vm0, %v905_v29, 0.0  ;;  %v965_v52 = vsel %vm462_vm0, %v913_v48, 0.0 }
 0x15e   : > { %v823_v19 = vadd.f32 %v1890_v32, %v822_v22  ;;  %v794_v26 = vpop.f32.mrf.mxu0  ;;  %939 = vadd.xlane.f32.xlu0 %v938_v25  ;;  %v848_v28 = vadd.f32 %v1890_v32, %v847_v23  ;;  %v814_v38 = vpop.f32.mrf.mxu1 }
 0x15f   : > { %v795_v46 = vadd.f32 %v1890_v32, %v794_v26  ;;  %v815_v24 = vadd.f32 %v1890_v32, %v814_v38 }
 0x160   : > { %v881_v27 = vmax.f32 %v823_v19, 0.0  ;;  %v891_v35 = vmax.f32 %v848_v28, 0.0 }
 0x161   : > { %v870_v44 = vmax.f32 %v795_v46, 0.0  ;;  %v878_v51 = vmax.f32 %v815_v24, 0.0 }
 0x162   : > { %v917_v33 = vmul.f32 %v1894_v50, %v881_v27  ;;  %v927_v47 = vmul.f32 %v1894_v50, %v891_v35 }
 0x163   : > { %v914_v61 = vmul.f32 %v1894_v50, %v878_v51  ;;  %v906_v62 = vmul.f32 %v1894_v50, %v870_v44 }
 0x164   : > { %v977_v39 = vsel %vm462_vm0, %v917_v33, 0.0  ;;  %v1007_v53 = vsel %vm462_vm0, %v927_v47, 0.0 }
 0x165   : > { %v824_v36 = vpop.f32.mrf.mxu2  ;;  %v849_v42 = vpop.f32.mrf.mxu3  ;;  %978 = vadd.xlane.f32.xlu2 %v977_v39  ;;  %942 = vadd.xlane.f32.xlu1 %v941_v40  ;;  %v968_v3 = vsel %vm462_vm0, %v914_v61, 0.0  ;;  %v944_v4 = vsel %vm462_vm0, %v906_v62, 0.0 }
 0x166   : > { %v797_v45 = vpop.f32.mrf.mxu0  ;;  %963 = vadd.xlane.f32.xlu0 %v962_v43  ;;  %v825_v37 = vadd.f32 %v1890_v32, %v824_v36  ;;  %v850_v63 = vadd.f32 %v1890_v32, %v849_v42 }
 0x167   : > { %v798_v59 = vadd.f32 %v1890_v32, %v797_v45 }
 0x168   : > { %v882_v54 = vmax.f32 %v825_v37, 0.0  ;;  %v892_v5 = vmax.f32 %v850_v63, 0.0 }
 0x169   : > { %v871_v1 = vmax.f32 %v798_v59, 0.0 }
 0x16a   : > { %v918_v0 = vmul.f32 %v1894_v50, %v882_v54  ;;  %v928_v14 = vmul.f32 %v1894_v50, %v892_v5 }
 0x16b   : > { %v907_v11 = vmul.f32 %v1894_v50, %v871_v1 }
 0x16c   : > { %v980_v8 = vsel %vm462_vm0, %v918_v0, 0.0  ;;  %v1010_v23 = vsel %vm462_vm0, %v928_v14, 0.0 }
 0x16d   : > { %v827_v55 = vpop.f32.mrf.mxu2  ;;  %v852_v56 = vpop.f32.mrf.mxu3  ;;  %1008 = vadd.xlane.f32.xlu2 %v1007_v53  ;;  %966 = vadd.xlane.f32.xlu1 %v965_v52  ;;  %v947_v16 = vsel %vm462_vm0, %v907_v11, 0.0 }
 0x16e   : > { %v799_v58 = vpop.f32.mrf.mxu0  ;;  %1005 = vadd.xlane.f32.xlu0 %v1004_v57  ;;  %v828_v60 = vadd.f32 %v1890_v32, %v827_v55  ;;  %v853_v10 = vadd.f32 %v1890_v32, %v852_v56 }
 0x16f   : > { %v800_v26 = vadd.f32 %v1890_v32, %v799_v58 }
 0x170   : > { %v883_v2 = vmax.f32 %v828_v60, 0.0  ;;  %v893_v15 = vmax.f32 %v853_v10, 0.0 }
 0x171   : > { %v872_v31 = vmax.f32 %v800_v26, 0.0 }
 0x172   : > { %v919_v12 = vmul.f32 %v1894_v50, %v883_v2  ;;  %v929_v20 = vmul.f32 %v1894_v50, %v893_v15 }
 0x173   : > { %v908_v43 = vmul.f32 %v1894_v50, %v872_v31 }
 0x174   : > { %v983_v17 = vsel %vm462_vm0, %v919_v12, 0.0  ;;  %v1013_v33 = vsel %vm462_vm0, %v929_v20, 0.0 }
 0x175   : > { %v829_v6 = vpop.f32.mrf.mxu2  ;;  %v854_v7 = vpop.f32.mrf.mxu3  ;;  %969 = vadd.xlane.f32.xlu2 %v968_v3  ;;  %945 = vadd.xlane.f32.xlu1 %v944_v4  ;;  %v950_v37 = vsel %vm462_vm0, %v908_v43, 0.0 }
 0x176   : > { %v802_v9 = vpop.f32.mrf.mxu0  ;;  %981 = vadd.xlane.f32.xlu0 %v980_v8  ;;  %v855_v13 = vadd.f32 %v1890_v32, %v854_v7  ;;  %v830_v36 = vadd.f32 %v1890_v32, %v829_v6 }
 0x177   : > { %v803_v27 = vadd.f32 %v1890_v32, %v802_v9 }
 0x178   : > { %v894_v18 = vmax.f32 %v855_v13, 0.0  ;;  %v884_v48 = vmax.f32 %v830_v36, 0.0 }
 0x179   : > { %v873_v34 = vmax.f32 %v803_v27, 0.0 }
 0x17a   : > { %v930_v29 = vmul.f32 %v1894_v50, %v894_v18  ;;  %v920_v55 = vmul.f32 %v1894_v50, %v884_v48 }
 0x17b   : > { %v909_v24 = vmul.f32 %v1894_v50, %v873_v34 }
 0x17c   : > { %v1016_v39 = vsel %vm462_vm0, %v930_v29, 0.0  ;;  %v986_v60 = vsel %vm462_vm0, %v920_v55, 0.0 }
 0x17d   : > { %v832_v21 = vpop.f32.mrf.mxu2  ;;  %v857_v22 = vpop.f32.mrf.mxu3  ;;  %948 = vadd.xlane.f32.xlu2 %v947_v16  ;;  %984 = vadd.xlane.f32.xlu1 %v983_v17  ;;  %v953_v52 = vsel %vm462_vm0, %v909_v24, 0.0 }
 0x17e   : > { %v804_v25 = vpop.f32.mrf.mxu0  ;;  %1011 = vadd.xlane.f32.xlu0 %v1010_v23  ;;  %v833_v45 = vadd.f32 %v1890_v32, %v832_v21  ;;  %v858_v54 = vadd.f32 %v1890_v32, %v857_v22  ;;  %v1990_v23 = vpop.permute.xlu1 %1035 }
 0x17f   : > { %v805_v19 = vadd.f32 %v1890_v32, %v804_v25 }
 0x180   : > { %v885_v49 = vmax.f32 %v833_v45, 0.0  ;;  %v895_v59 = vmax.f32 %v858_v54, 0.0 }
 0x181   : > { %v874_v28 = vmax.f32 %v805_v19, 0.0 }
 0x182   : > { %v921_v57 = vmul.f32 %v1894_v50, %v885_v49  ;;  %v931_v3 = vmul.f32 %v1894_v50, %v895_v59 }
 0x183   : > { %v910_v30 = vmul.f32 %v1894_v50, %v874_v28 }
 0x184   : > { %v989_v63 = vsel %vm462_vm0, %v921_v57, 0.0  ;;  %v1019_v7 = vsel %vm462_vm0, %v931_v3, 0.0 }
 0x185   : > { %v834_v35 = vpop.f32.mrf.mxu2  ;;  %1014 = vadd.xlane.f32.xlu2 %v1013_v33  ;;  %v956_v38 = vsel %vm462_vm0, %v910_v30, 0.0  ;;  %v859_v41 = vpop.f32.mrf.mxu3 }
 0x186   : > { %v835_v40 = vadd.f32 %v1890_v32, %v834_v35  ;;  %957 = vadd.xlane.f32.xlu1 %v956_v38  ;;  %1017 = vadd.xlane.f32.xlu0 %v1016_v39  ;;  %v860_v46 = vadd.f32 %v1890_v32, %v859_v41  ;;  %v1102_v39 = vlaneseq }
 0x188   : > { %v886_v42 = vmax.f32 %v835_v40, 0.0  ;;  %v896_v44 = vmax.f32 %v860_v46, 0.0  ;;  %v2004_v36 = vand.u32 127, %v1102_v39 }
 0x18a   : > { %v922_v47 = vmul.f32 %v1894_v50, %v886_v42  ;;  %v932_v56 = vmul.f32 %v1894_v50, %v896_v44 }
 0x18c   : > { %v992_v53 = vsel %vm462_vm0, %v922_v47, 0.0  ;;  %v1022_v62 = vsel %vm462_vm0, %v932_v56, 0.0  ;;  %v2013_v47 = vadd.s32 4294967288, %v2004_v36 }
 0x18d   : > { %v837_v51 = vpop.f32.mrf.mxu2  ;;  %951 = vadd.xlane.f32.xlu2 %v950_v37  ;;  %v862_v58 = vpop.f32.mrf.mxu3 }
 0x18e   : > { %993 = vadd.xlane.f32.xlu1 %v992_v53  ;;  %954 = vadd.xlane.f32.xlu0 %v953_v52  ;;  %v838_v1 = vadd.f32 %v1890_v32, %v837_v51  ;;  %v863_v4 = vadd.f32 %v1890_v32, %v862_v58 }
 0x190   : > { %v887_v6 = vmax.f32 %v838_v1, 0.0  ;;  %v897_v8 = vmax.f32 %v863_v4, 0.0 }
 0x192   : > { %v923_v12 = vmul.f32 %v1894_v50, %v887_v6  ;;  %v933_v13 = vmul.f32 %v1894_v50, %v897_v8 }
 0x194   : > { %v995_v15 = vsel %vm462_vm0, %v923_v12, 0.0  ;;  %v1025_v16 = vsel %vm462_vm0, %v933_v13, 0.0 }
 0x195   : > { %v839_v61 = vpop.f32.mrf.mxu2  ;;  %987 = vadd.xlane.f32.xlu2 %v986_v60  ;;  %v864_v9 = vpop.f32.mrf.mxu3 }
 0x196   : > { %v840_v0 = vadd.f32 %v1890_v32, %v839_v61  ;;  %1023 = vadd.xlane.f32.xlu1 %v1022_v62  ;;  %990 = vadd.xlane.f32.xlu0 %v989_v63  ;;  %v865_v11 = vadd.f32 %v1890_v32, %v864_v9 }
 0x198   : > { %v888_v2 = vmax.f32 %v840_v0, 0.0  ;;  %v898_v14 = vmax.f32 %v865_v11, 0.0 }
 0x19a   : > { %v924_v5 = vmul.f32 %v1894_v50, %v888_v2  ;;  %v934_v17 = vmul.f32 %v1894_v50, %v898_v14 }
 0x19c   : > { %v998_v10 = vsel %vm462_vm0, %v924_v5, 0.0  ;;  %v1028_v18 = vsel %vm462_vm0, %v934_v17, 0.0 }
 0x19d   : > { %1020 = vadd.xlane.f32.xlu2 %v1019_v7 }
 0x19e   : > { %999 = vadd.xlane.f32.xlu0 %v998_v10 }
 0x1a5   : > { %996 = vadd.xlane.f32.xlu2 %v995_v15 }
 0x1a6   : > { %1026 = vadd.xlane.f32.xlu0 %v1025_v16 }
 0x1ad   : > { %1029 = vadd.xlane.f32.xlu2 %v1028_v18 }
 0x1c1   : > { %v937_v21 = vpop.xlane.xlu0 %936  ;;  %v961_v22 = vpop.xlane.xlu2 %960 }
 0x1c2   : > { %v1046_v45 = vadd.f32 %v1990_v23, %v961_v22  ;;  %v1038_v24 = vadd.f32 %v1990_v23, %v937_v21 }
 0x1c4   : > { %v1118_v51 = vperm.slane %v1046_v45, %v2004_v36  ;;  %v1104_v52 = vperm.slane %v1038_v24, %v2004_v36 }
 0x1c9   : > { %v973_v32 = vpop.xlane.xlu0 %972  ;;  %v1992_v25 = vpop.xlane.xlu2 %1002 }
 0x1ca   : > { %v1050_v54 = vadd.f32 %v1990_v23, %v973_v32 }
 0x1cc   : > { %v1124_v18 = vperm.slane %v1050_v54, %v2004_v36 }
 0x1d0   : > { %v976_v19 = vpop.xlane.xlu1 %975 }
 0x1d1   : > { %v940_v26 = vpop.xlane.xlu0 %939  ;;  %v1051_v37 = vadd.f32 %v1990_v23, %v976_v19 }
 0x1d2   : > { %v1039_v42 = vadd.f32 %v1990_v23, %v940_v26 }
 0x1d3   : > { %v1125_v61 = vperm.slane %v1051_v37, %v2013_v47 }
 0x1d4   : > { %v1106_v49 = vperm.slane %v1039_v42, %v2013_v47 }
 0x1d6   : > { %v1108_v62 = vsel %vm1107_vm1, %v1106_v49, %v1104_v52 }
 0x1d8   : > { %v979_v20 = vpop.xlane.xlu2 %978  ;;  %v943_v27 = vpop.xlane.xlu1 %942 }
 0x1d9   : > { %v964_v28 = vpop.xlane.xlu0 %963  ;;  %v1040_v48 = vadd.f32 %v1990_v23, %v943_v27  ;;  %v1052_v2 = vadd.f32 %v1990_v23, %v979_v20  ;;  %v1126_v27 = vsel %vm1107_vm1, %v1125_v61, %v1124_v18 }
 0x1da   : > { %v1047_v55 = vadd.f32 %v1990_v23, %v964_v28 }
 0x1db   : > { %v1109_v57 = vperm.slane %v1040_v48, %v2004_v36  ;;  %v1127_v32 = vperm.slane %v1052_v2, %v2004_v36 }
 0x1dc   : > { %v1119_v6 = vperm.slane %v1047_v55, %v2013_v47 }
 0x1de   : > { %v1120_v21 = vsel %vm1107_vm1, %v1119_v6, %v1118_v51 }
 0x1e0   : > { %v1994_v29 = vpop.xlane.xlu2 %1008  ;;  %v967_v30 = vpop.xlane.xlu1 %966 }
 0x1e1   : > { %v1996_v31 = vpop.xlane.xlu0 %1005  ;;  %v1048_v63 = vadd.f32 %v1990_v23, %v967_v30 }
 0x1e2   : > { %v1061_v48 = vadd.f32 %v1990_v23, %v1996_v31  ;;  %v1062_v31 = vadd.f32 %v1990_v23, %v1994_v29 }
 0x1e3   : > { %v1121_v12 = vperm.slane %v1048_v63, %v2004_v36 }
 0x1e8   : > { %v970_v50 = vpop.xlane.xlu2 %969  ;;  %v946_v34 = vpop.xlane.xlu1 %945 }
 0x1e9   : > { %v982_v33 = vpop.xlane.xlu0 %981  ;;  %v1041_v46 = vadd.f32 %v1990_v23, %v946_v34  ;;  %v1049_v58 = vadd.f32 %v1990_v23, %v970_v50 }
 0x1ea   : > { %v1053_v4 = vadd.f32 %v1990_v23, %v982_v33 }
 0x1eb   : > { %v1110_v53 = vperm.slane %v1041_v46, %v2013_v47  ;;  %v1122_v9 = vperm.slane %v1049_v58, %v2013_v47 }
 0x1ec   : > { %v1128_v15 = vperm.slane %v1053_v4, %v2013_v47 }
 0x1ed   : > { %v1111_v3 = vsel %vm1107_vm1, %v1110_v53, %v1109_v57  ;;  %v1123_v19 = vsel %vm1107_vm1, %v1122_v9, %v1121_v12  ;;  %v1060_v53 = vadd.f32 %v1990_v23, %v1992_v25 }
 0x1ee   : > { %v1155_v13 = vsel %vm1154_vm2, %v1111_v3, %v1108_v62  ;;  %v1129_v50 = vsel %vm1107_vm1, %v1128_v15, %v1127_v32 }
 0x1f0   : > { %v949_v35 = vpop.xlane.xlu2 %948  ;;  %v2000_v40 = vpop.xlane.xlu1 %984 }
 0x1f1   : > { %v1998_v38 = vpop.xlane.xlu0 %1011  ;;  %v1042_v56 = vadd.f32 %v1990_v23, %v949_v35  ;;  %v1054_v37 = vadd.f32 %v1990_v23, %v2000_v40 }
 0x1f3   : > { %v1112_v7 = vperm.slane %v1042_v56, %v2004_v36  ;;  %v1130_v57 = vperm.slane %v1054_v37, %v2004_v36 }
 0x1f8   : > { %v2002_v41 = vpop.xlane.xlu2 %1014 }
 0x1f9   : > { %v2007_v43 = vpop.xlane.xlu0 %1017  ;;  %v958_v44 = vpop.xlane.xlu1 %957 }
 0x1fa   : > { %v1045_v59 = vadd.f32 %v1990_v23, %v958_v44  ;;  %v1063_v44 = vadd.f32 %v1990_v23, %v1998_v38  ;;  %v1065_v40 = vadd.f32 %v1990_v23, %v2007_v43  ;;  %v1140_v38 = vperm.slane %v1061_v48, %v2013_v47 }
 0x1fb   : > { %v1139_v43 = vperm.slane %v1060_v53, %v2004_v36 }
 0x1fc   : > { %v1116_v10 = vperm.slane %v1045_v59, %v2013_v47  ;;  %v1143_v25 = vperm.slane %v1063_v44, %v2013_v47  ;;  %v1064_v59 = vadd.f32 %v1990_v23, %v2002_v41  ;;  %v1146_v2 = vperm.slane %v1065_v40, %v2013_v47 }
 0x1fd   : > { %v1141_v4 = vsel %vm1107_vm1, %v1140_v38, %v1139_v43 }
 0x200   : > { %v952_v60 = vpop.xlane.xlu2 %951 }
 0x201   : > { %v1043_v0 = vadd.f32 %v1990_v23, %v952_v60  ;;  %v955_v1 = vpop.xlane.xlu0 %954  ;;  %v994_v39 = vpop.xlane.xlu1 %993 }
 0x202   : > { %v1044_v5 = vadd.f32 %v1990_v23, %v955_v1  ;;  %v1057_v46 = vadd.f32 %v1990_v23, %v994_v39  ;;  %v1142_v1 = vperm.slane %v1062_v31, %v2004_v36 }
 0x203   : > { %v1113_v8 = vperm.slane %v1043_v0, %v2013_v47 }
 0x204   : > { %v1115_v11 = vperm.slane %v1044_v5, %v2004_v36  ;;  %v1134_v52 = vperm.slane %v1057_v46, %v2013_v47 }
 0x205   : > { %v1114_v14 = vsel %vm1107_vm1, %v1113_v8, %v1112_v7  ;;  %v1144_v7 = vsel %vm1107_vm1, %v1143_v25, %v1142_v1  ;;  %v1145_v8 = vperm.slane %v1064_v59, %v2004_v36 }
 0x206   : > { %v1157_v16 = vsel %vm1156_vm3, %v1114_v14, %v1155_v13  ;;  %v1117_v17 = vsel %vm1107_vm1, %v1116_v10, %v1115_v11 }
 0x207   : > { %v1159_v22 = vsel %vm1158_vm4, %v1117_v17, %v1157_v16  ;;  %v1147_v14 = vsel %vm1107_vm1, %v1146_v2, %v1145_v8 }
 0x208   : > { %v1161_v26 = vsel %vm1160_vm5, %v1120_v21, %v1159_v22  ;;  %v988_v20 = vpop.xlane.xlu2 %987 }
 0x209   : > { %v1163_v28 = vsel %vm1162_vm6, %v1123_v19, %v1161_v26  ;;  %v991_v30 = vpop.xlane.xlu0 %990  ;;  %v1055_v24 = vadd.f32 %v1990_v23, %v988_v20  ;;  %v1024_v60 = vpop.xlane.xlu1 %1023 }
 0x20a   : > { %v1165_v33 = vsel %vm1164_vm7, %v1126_v27, %v1163_v28  ;;  %v1056_v42 = vadd.f32 %v1990_v23, %v991_v30  ;;  %v1067_v5 = vadd.f32 %v1990_v23, %v1024_v60 }
 0x20b   : > { %v1167_v34 = vsel %vm1166_vm8, %v1129_v50, %v1165_v33  ;;  %v1131_v54 = vperm.slane %v1055_v24, %v2013_v47 }
 0x20c   : > { %1178 = vst.msk [vmem:[%s2061_s30] sm:$0xff] %vm1177_vm9, %v1167_v34  ;;  %v1133_v49 = vperm.slane %v1056_v42, %v2004_v36  ;;  %v1149_v16 = vperm.slane %v1067_v5, %v2013_v47 }
 0x20d   : > { %v1132_v62 = vsel %vm1107_vm1, %v1131_v54, %v1130_v57 }
 0x20e   : > { %v1135_v58 = vsel %vm1107_vm1, %v1134_v52, %v1133_v49 }
 0x20f   : > { %v1168_v41 = vsel %vm1154_vm2, %v1135_v58, %v1132_v62 }
 0x210   : > { %v1021_v35 = vpop.xlane.xlu2 %1020 }
 0x211   : > { %v1000_v45 = vpop.xlane.xlu0 %999  ;;  %v1066_v63 = vadd.f32 %v1990_v23, %v1021_v35 }
 0x212   : > { %v1059_v51 = vadd.f32 %v1990_v23, %v1000_v45 }
 0x213   : > { %v1148_v11 = vperm.slane %v1066_v63, %v2004_v36 }
 0x214   : > { %v1137_v61 = vperm.slane %v1059_v51, %v2013_v47 }
 0x215   : > { %v1150_v22 = vsel %vm1107_vm1, %v1149_v16, %v1148_v11 }
 0x218   : > { %v997_v55 = vpop.xlane.xlu2 %996 }
 0x219   : > { %v1058_v56 = vadd.f32 %v1990_v23, %v997_v55  ;;  %v1027_v0 = vpop.xlane.xlu0 %1026 }
 0x21a   : > { %v1068_v10 = vadd.f32 %v1990_v23, %v1027_v0 }
 0x21b   : > { %v1136_v29 = vperm.slane %v1058_v56, %v2004_v36 }
 0x21c   : > { %v1151_v18 = vperm.slane %v1068_v10, %v2004_v36 }
 0x21d   : > { %v1138_v3 = vsel %vm1107_vm1, %v1137_v61, %v1136_v29 }
 0x21e   : > { %v1169_v6 = vsel %vm1156_vm3, %v1138_v3, %v1168_v41 }
 0x21f   : > { %v1170_v9 = vsel %vm1158_vm4, %v1141_v4, %v1169_v6 }
 0x220   : > { %v1171_v12 = vsel %vm1160_vm5, %v1144_v7, %v1170_v9  ;;  %v1030_v13 = vpop.xlane.xlu2 %1029 }
 0x221   : > { %v1069_v15 = vadd.f32 %v1990_v23, %v1030_v13  ;;  %v1172_v17 = vsel %vm1162_vm6, %v1147_v14, %v1171_v12 }
 0x222   : > { %v1173_v19 = vsel %vm1164_vm7, %v1150_v22, %v1172_v17 }
 0x223   : > { %v1152_v21 = vperm.slane %v1069_v15, %v2013_v47 }
 0x225   : > { %v1153_v32 = vsel %vm1107_vm1, %v1152_v21, %v1151_v18 }
 0x226   : > { %v1174_v23 = vsel %vm1166_vm8, %v1153_v32, %v1173_v19 }
 0x227   : > { %1179 = vst.msk [vmem:[%s2061_s30 + $0x8] sm:$0xff] %vm1177_vm9, %v1174_v23 }
 0x228   : > { %1554 = shalt.err (!%p1551_p9)
}
 0x229   : > { %s1613_s27 = smov 128   ;;  %s1614_s30 = smov 8  }
 0x22a   : > { %1426 = dma.vmem_to_hbm [thread:$0]  (%p1708_p4), %s1197_s8, 256, %s1199_s17, %s1181_s7, %s1613_s27, %s1613_s27, %s1614_s30  }
 0x22b PF: > { %p1438_p10 = scmp.ge.s32.totalorder %s1609_s16, 2  ;;  %s1213_s29 = sand.u32 1, %s1589_s11  }
 0x22c   : > { %s1214_s19 = scalar_lea.sflag [#allocation5], %s1213_s29 }
 0x22d   : > { %p1433_p11 = pnand %p1438_p10, %p1715_p8 }
 0x22f   : > { %p1434_p12 = pneg %p1433_p11 }
 0x231   : > { %1584 = dma.done.wait (%p1434_p12), %s1214_s19, 256  }
 0x232   : > { %1586 = vsyncadd (%p1434_p12), %s1214_s19, 4294967040  ;;  %s25_s16 = sadd.s32 1, %s1609_s16   ;;  %s2174_s11 = smov %s1593_s12 }
 0x233   : > { %p22_p13 = scmp.ge.s32.totalorder %s25_s16, 4   ;;  %s2175_s12 = smov %s1597_s13 }
 0x234   : > { %s2176_s13 = smov %s1721_s23  ;;  %s2177_s14 = smov %s1605_s15 }
 0x235   : > { %s2178_s15 = smov %s2180_s18  ;;  %24 = sbr.rel (!%p22_p13) target bundleno = 8 (0x8), region = 99 }
 0x23a   :  { %1220 = vsyncpa [#allocation4], 1 }
 0x23b   :  { %1222 = vsyncpa [#allocation4 + $0x1], 1 }
 0x23c   :  { %1223 = vsyncpa [#allocation5], 1 }
 0x23d   :  { %1225 = vsyncpa [#allocation5 + $0x1], 1 }

// kernel: _lambda_.8
= control target key start
LH: loop header
LB: loop body
LE: loop exit
PB: predicated region body
PF: predicated region fallthrough
CT: control target
= control target key end

     0   :  { %s2711_s21 = smov 0   ;;  %s3137_s0 = inlined_call_operand.vmem [shape: f32[2,16,64], index: 0, kind: input, shape index: {}]   ;;  %s3138_s1 = inlined_call_operand.vmem [shape: f32[2,16,64], index: 1, kind: input, shape index: {}]   ;;  %s3139_s2 = inlined_call_operand.vmem [shape: bf16[2,64,64], index: 2, kind: input, shape index: {}]   ;;  %s3140_s3 = inlined_call_operand.vmem [shape: f32[2,1,64], index: 3, kind: input, shape index: {}]   ;;  %s3141_s4 = inlined_call_operand.vmem [shape: bf16[2,64,128], index: 4, kind: input, shape index: {}]   ;;  %s3142_s5 = inlined_call_operand.vmem [shape: f32[2,1,128], index: 5, kind: input, shape index: {}]   ;;  %s3143_s6 = inlined_call_operand.vmem [shape: bf16[2,64,64], index: 6, kind: input, shape index: {}]   ;;  %s3144_s7 = inlined_call_operand.vmem [shape: f32[2,1,64], index: 7, kind: input, shape index: {}]   ;;  %s3145_s8 = inlined_call_operand.vmem [shape: bf16[2,64,128], index: 8, kind: input, shape index: {}]   ;;  %s3146_s9 = inlined_call_operand.vmem [shape: f32[2,1,128], index: 9, kind: input, shape index: {}]   ;;  %s3147_s10 = inlined_call_operand.vmem [shape: bf16[2,128,64], index: 10, kind: input, shape index: {}]   ;;  %s3148_s11 = inlined_call_operand.vmem [shape: f32[2,1,64], index: 11, kind: input, shape index: {}]   ;;  %s3149_s12 = inlined_call_operand.vmem [shape: f32[2,1,64], index: 12, kind: input, shape index: {}]   ;;  %s3150_s13 = inlined_call_operand.vmem [shape: f32[2,1,64], index: 13, kind: input, shape index: {}]   ;;  %s3151_s14 = inlined_call_operand.vmem [shape: f32[2,1,64], index: 14, kind: input, shape index: {}]   ;;  %s3152_s15 = inlined_call_operand.vmem [shape: f32[2,1,64], index: 15, kind: input, shape index: {}]   ;;  %s3153_s16 = inlined_call_operand.vmem [shape: f32[2,16,64], index: 16, kind: output, shape index: {}]  }
   0x1   :  { %3159 = sst [smem:[#allocation2_spill]] %s3137_s0 }
   0x2 LB: > { %s2149_s22 = sadd.s32 4294967295, %s2616_s21   ;;  %p2153_p0 = scmp.ge.s32.totalorder %s2616_s21, 1  ;;  %s2616_s21 = sphi %s2711_s21, %s26_s21  }
   0x3   : > { %p472_p1 = scmp.lt.s32.totalorder %s2616_s21, 3 }
   0x5   : > { %p473_p2 = pnand %p2153_p0, %p472_p1 }
   0x6   : > { %p527_p3 = scmp.lt.s32.totalorder (!%p473_p2), %s2149_s22, 1  ;;  %s3160_s19 = sld [smem:[#allocation2_spill]] (!%p473_p2) }
   0x7   : > { %476 = sbr.rel (%p473_p2) target bundleno = 4938 (0x134a), region = 84  ;;  %s2618_s26 = smov (!%p473_p2), 64  }
   0x8   : > { %s3156_s27 = smov (!%p473_p2), 48   ;;  %s2622_s29 = smov (!%p473_p2), 96  }
   0x9   : > { %s3154_s23 = smov (!%p473_p2), 16   ;;  %s3155_s30 = smov (!%p473_p2), 32  }
   0xa   : > { %s3163_s25 = smov (!%p473_p2), 32   ;;  %s3164_s17 = smov (!%p473_p2), 16  }
   0xc   : > { %v2447_v0 = vld [vmem:[%s3139_s2 + $0x18] sm:$0xff]  ;;  %v2446_v2 = vld [vmem:[%s3139_s2 + $0x10] sm:$0xff]  ;;  %s3166_s22 = smov (!%p527_p3, %s2149_s22), 1  ;;  %v2445_v4 = vld [vmem:[%s3139_s2 + $0x8] sm:$0xff]  ;;  %vm601_vm0 = vcmask 523264   ;;  %vm671_vm1 = vcmask 130048  }
   0xd   : > { %v2451_v1 = vld [vmem:[%s3141_s4 + $0x18] sm:$0xff]  ;;  %609 = vmatpush.bf16.msra.mxu0 %v2447_v0  ;;  %v2450_v3 = vld [vmem:[%s3141_s4 + $0x10] sm:$0xff]  ;;  %s2731_s0 = sshll.u32 %s3166_s22, 4  ;;  %v2449_v5 = vld [vmem:[%s3141_s4 + $0x8] sm:$0xff]  ;;  %s2619_s22 = smov 112  }
   0xe   : > { %654 = vmatpush.bf16.msra.mxu1 %v2451_v1  ;;  %s2737_s20 = scalar_lea.vmem %s3160_s19, %s2731_s0  ;;  %s536_s28 = scalar_lea.vmem %s3138_s1, %s2731_s0  ;;  %v2444_v6 = vld [vmem:[%s3139_s2] sm:$0xff]  ;;  %v2453_v41 = vld [vmem:[%s3143_s6 + $0x8] sm:$0xff] }
   0xf   : > { %v2448_v7 = vld [vmem:[%s3141_s4] sm:$0xff]  ;;  %v2759_v9 = vld [vmem:[%s2737_s20 + $0x8] sm:$0xff]  ;;  %s3162_s19 = smov 48  }
  0x10   : > { %v2756_v8 = vld [vmem:[%s2737_s20] sm:$0xff]  ;;  %v546_v11 = vld [vmem:[%s536_s28 + $0x8] sm:$0xff] }
  0x11   : > { %610 = vmatpush.bf16.msra.mxu0 %v2446_v2  ;;  %v545_v10 = vld [vmem:[%s536_s28] sm:$0xff]  ;;  %v572_v12 = vpack.c.bf16 %v2759_v9, %v2756_v8  ;;  %s3157_s28 = smov 80  }
  0x12   : > { %655 = vmatpush.bf16.msra.mxu1 %v2450_v3  ;;  %v2763_v13 = vpack.c.bf16 %v546_v11, %v545_v10  ;;  %v2509_v16 = vld [vmem:[%s3142_s5] ss:$0 sm:$0xff] }
  0x13   : > { %v2508_v20 = vld [vmem:[%s3140_s3] ss:$0 sm:$0xff] }
  0x14   : > { %v2452_v58 = vld [vmem:[%s3143_s6] sm:$0xff] }
  0x15   : > { %611 = vmatpush.bf16.msra.mxu0 %v2445_v4  ;;  %755 = vmatpush.bf16.msra.mxu3 %v2452_v58 }
  0x16   : > { %656 = vmatpush.bf16.msra.mxu1 %v2449_v5 }
  0x19   : > { %612 = vmatpush.bf16.msra.mxu0 %v2444_v6 }
  0x1a   : > { %657 = vmatpush.bf16.msra.mxu1 %v2448_v7 }
  0x1c   : > { %2176 = vmatmul.msk.bf16.vlgmr.msra.gmra.mxu0 %vm601_vm0, %v572_v12 }
  0x1d   : > { %2193 = vmatmul.msk.bf16.vlgmr.msra.gmra.mxu1 %vm601_vm0, %v2763_v13 }
  0x1e   : > { %851 = vmatpush.bf16.msrb.mxu1 %v2453_v41 }
  0x99   : > { %v614_v15 = vpop.f32.mrf.mxu0 }
  0x9a   : > { %v659_v14 = vpop.f32.mrf.mxu1  ;;  %v615_v24 = vadd.f32 %v2508_v20, %v614_v15 }
  0x9b   : > { %v660_v18 = vadd.f32 %v2509_v16, %v659_v14 }
  0xa1   : > { %v616_v22 = vpop.f32.mrf.mxu0 }
  0xa2   : > { %v661_v17 = vpop.f32.mrf.mxu1  ;;  %v617_v25 = vadd.f32 %v2508_v20, %v616_v22 }
  0xa3   : > { %v662_v19 = vadd.f32 %v2509_v16, %v661_v17 }
  0xa4   : > { %v2780_v26 = vpack.c.bf16 %v617_v25, %v615_v24 }
  0xa5   : > { %v2774_v21 = vpack.c.bf16 %v662_v19, %v660_v18 }
  0xa7   : > { %718 = vrot.lane.b32.xlu2 %v2774_v21, %s2618_s26  ;;  %v676_v23 = vsel %vm671_vm1, %v2774_v21, 0 }
  0xa8   : > { %685 = vmatpush.bf16.xpose.msra.mxu2 %v676_v23 }
  0xaf   : > { %767 = vrot.lane.b32.xlu2 %v2774_v21, %s2619_s22  ;;  %2194 = vmatmul.msk.bf16.vlgmr.msra.gmra.mxu2 %vm671_vm1, %v2780_v26 }
 0x101   : > { %v719_v27 = vpop.permute.xlu2 %718 }
 0x102   : > { %731 = vmatpush.bf16.msrb.mxu2 %v719_v27 }
 0x109   : > { %v768_v28 = vpop.permute.xlu2 %767 }
 0x10a   : > { %v773_v29 = vsel %vm671_vm1, %v768_v28, 0 }
 0x10b   : > { %782 = vmatpush.bf16.xpose.msra.mxu2 %v773_v29 }
 0x132   : > { %v687_v30 = vpop.f32.mrf.mxu2 }
 0x133   : > { %v692_v31 = vmul.f32 0.25, %v687_v30 }
 0x135   : > { %v694_v32 = vsel %vm671_vm1, %v692_v31, -inf }
 0x136   : > { %695 = vmax.xlane.f32.xlu0 %v694_v32 }
 0x13a   : > { %v689_v33 = vpop.f32.mrf.mxu2 }
 0x13b   : > { %v693_v34 = vmul.f32 0.25, %v689_v33 }
 0x13d   : > { %v697_v35 = vsel %vm671_vm1, %v693_v34, -inf }
 0x13e   : > { %698 = vmax.xlane.f32.xlu0 %v697_v35 }
 0x152   : > { %765 = vrot.lane.b32.xlu0 %v2780_v26, %s2619_s22 }
 0x15a   : > { %814 = vrot.lane.b32.xlu0 %v2774_v21, %s3156_s27 }
 0x162   : > { %957 = vrot.lane.b32.xlu0 %v2774_v21, %s3157_s28 }
 0x16a   : > { %860 = vrot.lane.b32.xlu0 %v2780_v26, %s2622_s29 }
 0x1a9   : > { %v696_v36 = vpop.xlane.xlu0 %695 }
 0x1aa   : > { %v700_v37 = vsub.f32 %v692_v31, %v696_v36 }
 0x1ac   : > { %v702_v38 = vmul.f32 1.442695, %v700_v37  ;;  %v2830_v37 = vld [vmem:[%s3144_s7] ss:$0 sm:$0xff] }
 0x1ae   : > { %2526 = vpow2.f32 %v702_v38 }
 0x1b1   : > { %v699_v39 = vpop.xlane.xlu0 %698 }
 0x1b2   : > { %v701_v40 = vsub.f32 %v693_v34, %v699_v39 }
 0x1b4   : > { %v2527_v42 = vpop.eup %2526  ;;  %v704_v43 = vmul.f32 1.442695, %v701_v40 }
 0x1b5   : > { %v706_v44 = vsel %vm671_vm1, %v2527_v42, 0.0 }
 0x1b6   : > { %2528 = vpow2.f32 %v704_v43  ;;  %707 = vadd.xlane.f32.xlu1 %v706_v44 }
 0x1bc   : > { %v2529_v45 = vpop.eup %2528 }
 0x1bd   : > { %v709_v46 = vsel %vm671_vm1, %v2529_v45, 0.0 }
 0x1be   : > { %710 = vadd.xlane.f32.xlu1 %v709_v46 }
 0x1c4   : > { %v766_v47 = vpop.permute.xlu0 %765 }
 0x1cc   : > { %v815_v48 = vpop.permute.xlu0 %814 }
 0x1cd   : > { %827 = vmatpush.bf16.msrb.mxu0 %v815_v48 }
 0x1d4   : > { %v958_v49 = vpop.permute.xlu0 %957 }
 0x1d5   : > { %v963_v50 = vsel %vm671_vm1, %v958_v49, 0 }
 0x1d6   : > { %972 = vmatpush.bf16.xpose.msra.mxu1 %v963_v50 }
 0x1dc   : > { %v861_v27 = vpop.permute.xlu0 %860 }
 0x229   : > { %v708_v51 = vpop.xlane.xlu1 %707 }
 0x22a   : > { %2530 = vrcp.f32 %v708_v51 }
 0x230   : > { %v2531_v53 = vpop.eup %2530 }
 0x231   : > { %v711_v52 = vpop.xlane.xlu1 %710  ;;  %v714_v55 = vmul.f32 %v2531_v53, %v2527_v42 }
 0x232   : > { %2532 = vrcp.f32 %v711_v52 }
 0x238   : > { %v2533_v54 = vpop.eup %2532 }
 0x239   : > { %v715_v56 = vmul.f32 %v2533_v54, %v2529_v45 }
 0x23b   : > { %v716_v57 = vpack.c.bf16 %v715_v56, %v714_v55 }
 0x23d   : > { %2195 = vmatmul.msk.bf16.vlgmr.msrb.gmra.mxu2 %vm671_vm1, %v716_v57 }
 0x24d   : > { %2201 = vmatmul.msk.bf16.vlgmr.msra.gmra.mxu2 %vm671_vm1, %v766_v47 }
 0x2c0   : > { %v733_v59 = vpop.f32.mrf.mxu2 }
 0x2c8   : > { %v735_v60 = vpop.f32.mrf.mxu2 }
 0x2c9   : > { %v738_v61 = vpack.c.bf16 %v735_v60, %v733_v59 }
 0x2cb   : > { %2200 = vmatmul.msk.bf16.vlgmr.msra.gmra.mxu3 %vm671_vm1, %v738_v61 }
 0x2d0   : > { %v784_v62 = vpop.f32.mrf.mxu2 }
 0x2d1   : > { %v789_v63 = vmul.f32 0.25, %v784_v62 }
 0x2d3   : > { %v791_v0 = vsel %vm671_vm1, %v789_v63, -inf }
 0x2d4   : > { %792 = vmax.xlane.f32.xlu1 %v791_v0 }
 0x2d8   : > { %v786_v1 = vpop.f32.mrf.mxu2 }
 0x2d9   : > { %v790_v2 = vmul.f32 0.25, %v786_v1 }
 0x2db   : > { %v794_v3 = vsel %vm671_vm1, %v790_v2, -inf }
 0x2dc   : > { %795 = vmax.xlane.f32.xlu2 %v794_v3 }
 0x2f4   : > { %955 = vrot.lane.b32.xlu2 %v2780_v26, %s3157_s28 }
 0x347   : > { %v793_v4 = vpop.xlane.xlu1 %792 }
 0x348   : > { %v797_v5 = vsub.f32 %v789_v63, %v793_v4 }
 0x34a   : > { %v799_v6 = vmul.f32 1.442695, %v797_v5 }
 0x34c   : > { %2534 = vpow2.f32 %v799_v6 }
 0x34e   : > { %v757_v30 = vpop.f32.mrf.mxu3 }
 0x34f   : > { %v796_v7 = vpop.xlane.xlu2 %795  ;;  %v762_v38 = vadd.f32 %v2830_v37, %v757_v30 }
 0x350   : > { %v798_v10 = vsub.f32 %v790_v2, %v796_v7 }
 0x352   : > { %v2535_v11 = vpop.eup %2534  ;;  %v801_v12 = vmul.f32 1.442695, %v798_v10 }
 0x353   : > { %v803_v14 = vsel %vm671_vm1, %v2535_v11, 0.0 }
 0x354   : > { %2536 = vpow2.f32 %v801_v12  ;;  %804 = vadd.xlane.f32.xlu1 %v803_v14 }
 0x356   : > { %v2821_v32 = vpop.f32.mrf.mxu3 }
 0x357   : > { %v956_v33 = vpop.permute.xlu2 %955 }
 0x35a   : > { %v2537_v15 = vpop.eup %2536 }
 0x35b   : > { %v806_v16 = vsel %vm671_vm1, %v2537_v15, 0.0 }
 0x35c   : > { %807 = vadd.xlane.f32.xlu1 %v806_v16 }
 0x375   : > { %862 = vrot.lane.b32.xlu1 %v2774_v21, %s2622_s29 }
 0x3c7   : > { %v805_v17 = vpop.xlane.xlu1 %804 }
 0x3c8   : > { %2538 = vrcp.f32 %v805_v17 }
 0x3ce   : > { %v2539_v19 = vpop.eup %2538 }
 0x3cf   : > { %v808_v18 = vpop.xlane.xlu1 %807  ;;  %v811_v22 = vmul.f32 %v2539_v19, %v2535_v11 }
 0x3d0   : > { %2540 = vrcp.f32 %v808_v18 }
 0x3d6   : > { %v2541_v20 = vpop.eup %2540 }
 0x3d7   : > { %v812_v23 = vmul.f32 %v2541_v20, %v2537_v15 }
 0x3d9   : > { %v813_v24 = vpack.c.bf16 %v812_v23, %v811_v22 }
 0x3db   : > { %2202 = vmatmul.msk.bf16.vlgmr.msrb.gmra.mxu0 %vm671_vm1, %v813_v24 }
 0x3e7   : > { %v863_v25 = vpop.permute.xlu1 %862 }
 0x3e8   : > { %v868_v26 = vsel %vm671_vm1, %v863_v25, 0 }
 0x3e9   : > { %877 = vmatpush.bf16.xpose.msrb.mxu3 %v868_v26  ;;  %v2455_v26 = vld [vmem:[%s3143_s6 + $0x18] sm:$0xff] }
 0x3f0   : > { %2208 = vmatmul.msk.bf16.vlgmr.msrb.gmra.mxu3 %vm671_vm1, %v861_v27  ;;  %v2454_v27 = vld [vmem:[%s3143_s6 + $0x10] sm:$0xff] }
 0x3f1   : > { %946 = vmatpush.bf16.msra.mxu0 %v2454_v27 }
 0x458   : > { %v829_v28 = vpop.f32.mrf.mxu0 }
 0x460   : > { %v831_v29 = vpop.f32.mrf.mxu0 }
 0x461   : > { %v834_v31 = vpack.c.bf16 %v831_v29, %v829_v28 }
 0x463   : > { %2207 = vmatmul.msk.bf16.vlgmr.msrb.gmra.mxu1 %vm671_vm1, %v834_v31 }
 0x473   : > { %v879_v34 = vpop.f32.mrf.mxu3  ;;  %2215 = vmatmul.msk.bf16.vlgmr.msra.gmra.mxu1 %vm671_vm1, %v956_v33 }
 0x474   : > { %v884_v35 = vmul.f32 0.25, %v879_v34 }
 0x476   : > { %v886_v36 = vsel %vm671_vm1, %v884_v35, -inf }
 0x477   : > { %887 = vmax.xlane.f32.xlu2 %v886_v36 }
 0x47b   : > { %v881_v48 = vpop.f32.mrf.mxu3 }
 0x47c   : > { %v885_v50 = vmul.f32 0.25, %v881_v48 }
 0x47e   : > { %v889_v54 = vsel %vm671_vm1, %v885_v50, -inf }
 0x48f   : > { %1004 = vrot.lane.b32.xlu2 %v2774_v21, %s3154_s23 }
 0x4e0   : > { %v853_v39 = vpop.f32.mrf.mxu1 }
 0x4e1   : > { %v2833_v40 = vadd.f32 %v853_v39, %v762_v38 }
 0x4e8   : > { %v2835_v41 = vpop.f32.mrf.mxu1 }
 0x4ea   : > { %v888_v42 = vpop.xlane.xlu2 %887 }
 0x4eb   : > { %v892_v45 = vsub.f32 %v884_v35, %v888_v42  ;;  %v763_v42 = vadd.f32 %v2830_v37, %v2821_v32 }
 0x4ed   : > { %v894_v49 = vmul.f32 1.442695, %v892_v45 }
 0x4ef   : > { %2542 = vpow2.f32 %v894_v49 }
 0x4f0   : > { %v974_v43 = vpop.f32.mrf.mxu1 }
 0x4f1   : > { %v979_v44 = vmul.f32 0.25, %v974_v43 }
 0x4f2   : > { %v1005_v46 = vpop.permute.xlu2 %1004 }
 0x4f3   : > { %1017 = vmatpush.bf16.msra.mxu3 %v1005_v46  ;;  %v981_v47 = vsel %vm671_vm1, %v979_v44, -inf }
 0x4f4   : > { %982 = vmax.xlane.f32.xlu0 %v981_v47 }
 0x4f5   : > { %v2543_v55 = vpop.eup %2542 }
 0x4f6   : > { %v898_v56 = vsel %vm671_vm1, %v2543_v55, 0.0 }
 0x4f8   : > { %v976_v51 = vpop.f32.mrf.mxu1 }
 0x4f9   : > { %v980_v52 = vmul.f32 0.25, %v976_v51 }
 0x4fb   : > { %v984_v53 = vsel %vm671_vm1, %v980_v52, -inf }
 0x4fc   : > { %985 = vmax.xlane.f32.xlu1 %v984_v53  ;;  %890 = vmax.xlane.f32.xlu0 %v889_v54 }
 0x504   : > { %899 = vadd.xlane.f32.xlu1 %v898_v56 }
 0x567   : > { %v983_v57 = vpop.xlane.xlu0 %982 }
 0x568   : > { %v987_v58 = vsub.f32 %v979_v44, %v983_v57  ;;  %v859_v44 = vadd.f32 %v2835_v41, %v763_v42 }
 0x56a   : > { %v989_v59 = vmul.f32 1.442695, %v987_v58 }
 0x56c   : > { %2544 = vpow2.f32 %v989_v59 }
 0x56f   : > { %v986_v60 = vpop.xlane.xlu1 %985  ;;  %v891_v61 = vpop.xlane.xlu0 %890 }
 0x570   : > { %v988_v62 = vsub.f32 %v980_v52, %v986_v60  ;;  %v893_v1 = vsub.f32 %v885_v50, %v891_v61 }
 0x572   : > { %v2545_v63 = vpop.eup %2544  ;;  %v991_v0 = vmul.f32 1.442695, %v988_v62  ;;  %v896_v3 = vmul.f32 1.442695, %v893_v1  ;;  %v2457_v1 = vld [vmem:[%s3145_s8 + $0x8] sm:$0xff] }
 0x573   : > { %v993_v2 = vsel %vm671_vm1, %v2545_v63, 0.0 }
 0x574   : > { %2546 = vpow2.f32 %v991_v0  ;;  %994 = vadd.xlane.f32.xlu1 %v993_v2  ;;  %v2458_v0 = vld [vmem:[%s3145_s8 + $0x10] sm:$0xff] }
 0x575   : > { %2548 = vpow2.f32 %v896_v3 }
 0x577   : > { %v900_v10 = vpop.xlane.xlu1 %899 }
 0x57a   : > { %v2547_v4 = vpop.eup %2546 }
 0x57b   : > { %v996_v5 = vsel %vm671_vm1, %v2547_v4, 0.0  ;;  %v2549_v6 = vpop.eup %2548 }
 0x57c   : > { %997 = vadd.xlane.f32.xlu0 %v996_v5  ;;  %v901_v7 = vsel %vm671_vm1, %v2549_v6, 0.0  ;;  %v2456_v5 = vld [vmem:[%s3145_s8] sm:$0xff] }
 0x584   : > { %902 = vadd.xlane.f32.xlu0 %v901_v7 }
 0x58d   : > { %909 = vrot.lane.b32.xlu1 %v2774_v21, %s3155_s30  ;;  %s541_s30 = scalar_lea.vmem %s3153_s16, %s2731_s0 }
 0x5e7   : > { %v995_v11 = vpop.xlane.xlu1 %994 }
 0x5e8   : > { %2550 = vrcp.f32 %v995_v11  ;;  %v2466_v11 = vld [vmem:[%s3147_s10 + $0x30] sm:$0xff] }
 0x5ee   : > { %v2551_v14 = vpop.eup %2550 }
 0x5ef   : > { %v998_v12 = vpop.xlane.xlu0 %997  ;;  %v1001_v16 = vmul.f32 %v2551_v14, %v2545_v63  ;;  %v2459_v63 = vld [vmem:[%s3145_s8 + $0x18] sm:$0xff] }
 0x5f0   : > { %2552 = vrcp.f32 %v998_v12  ;;  %1159 = vmatpush.bf16.msrb.mxu0 %v2459_v63 }
 0x5f1   : > { %2554 = vrcp.f32 %v900_v10 }
 0x5f4   : > { %1160 = vmatpush.bf16.msrb.mxu0 %v2458_v0 }
 0x5f6   : > { %v2553_v15 = vpop.eup %2552 }
 0x5f7   : > { %v1002_v17 = vmul.f32 %v2553_v15, %v2547_v4  ;;  %v903_v18 = vpop.xlane.xlu0 %902  ;;  %v2555_v20 = vpop.eup %2554 }
 0x5f8   : > { %2556 = vrcp.f32 %v903_v18  ;;  %v906_v23 = vmul.f32 %v2555_v20, %v2543_v55  ;;  %1161 = vmatpush.bf16.msrb.mxu0 %v2457_v1 }
 0x5f9   : > { %v1003_v19 = vpack.c.bf16 %v1002_v17, %v1001_v16  ;;  %v2465_v16 = vld [vmem:[%s3147_s10 + $0x28] sm:$0xff] }
 0x5fb   : > { %2216 = vmatmul.msk.bf16.vlgmr.msra.gmra.mxu3 %vm671_vm1, %v1003_v19  ;;  %v2464_v19 = vld [vmem:[%s3147_s10 + $0x20] sm:$0xff] }
 0x5fc   : > { %1162 = vmatpush.bf16.msrb.mxu0 %v2456_v5 }
 0x5fe   : > { %v2557_v22 = vpop.eup %2556 }
 0x5ff   : > { %v907_v24 = vmul.f32 %v2557_v22, %v2549_v6  ;;  %v910_v21 = vpop.permute.xlu1 %909  ;;  %v2467_v6 = vld [vmem:[%s3147_s10 + $0x38] sm:$0xff] }
 0x600   : > { %922 = vmatpush.bf16.msrb.mxu2 %v910_v21  ;;  %1240 = vmatpush.bf16.msrb.mxu1 %v2467_v6 }
 0x601   : > { %v908_v25 = vpack.c.bf16 %v907_v24, %v906_v23 }
 0x603   : > { %2209 = vmatmul.msk.bf16.vlgmr.msrb.gmra.mxu2 %vm671_vm1, %v908_v25 }
 0x604   : > { %1041 = vmatpush.bf16.msra.mxu2 %v2455_v26  ;;  %1241 = vmatpush.bf16.msrb.mxu1 %v2466_v11  ;;  %v2471_v11 = vld [vmem:[%s3139_s2 + $0x38] sm:$0xff] }
 0x605   : > { %1376 = vmatpush.bf16.msrb.mxu3 %v2471_v11 }
 0x608   : > { %1242 = vmatpush.bf16.msrb.mxu1 %v2465_v16 }
 0x60c   : > { %1243 = vmatpush.bf16.msrb.mxu1 %v2464_v19 }
 0x67e   : > { %v1019_v28 = vpop.f32.mrf.mxu3 }
 0x686   : > { %v924_v29 = vpop.f32.mrf.mxu2  ;;  %v1021_v30 = vpop.f32.mrf.mxu3 }
 0x687   : > { %v1024_v31 = vpack.c.bf16 %v1021_v30, %v1019_v28  ;;  %v2511_v28 = vld [vmem:[%s3149_s12] ss:$0 sm:$0xff] }
 0x689   : > { %2221 = vmatmul.msk.bf16.vlgmr.msra.gmra.mxu2 %vm671_vm1, %v1024_v31 }
 0x68e   : > { %v926_v33 = vpop.f32.mrf.mxu2 }
 0x68f   : > { %v929_v34 = vpack.c.bf16 %v926_v33, %v924_v29  ;;  %v2512_v33 = vld [vmem:[%s3150_s13] ss:$0 sm:$0xff] }
 0x691   : > { %2214 = vmatmul.msk.bf16.vlgmr.msra.gmra.mxu0 %vm671_vm1, %v929_v34 }
 0x70c   : > { %v1043_v35 = vpop.f32.mrf.mxu2 }
 0x70e   : > { %v948_v36 = vpop.f32.mrf.mxu0 }
 0x70f   : > { %v953_v38 = vadd.f32 %v948_v36, %v2833_v40  ;;  %v2625_v40 = vmov 64.0  }
 0x710   : > { %2558 = vrcp.f32 %v2625_v40 }
 0x711   : > { %v1048_v39 = vadd.f32 %v1043_v35, %v953_v38 }
 0x713   : > { %v1050_v43 = vadd.f32 %v1048_v39, %v2756_v8 }
 0x714   : > { %v1045_v48 = vpop.f32.mrf.mxu2 }
 0x715   : > { %v1054_v45 = vsel %vm601_vm0, %v1050_v43, 0.0 }
 0x716   : > { %1055 = vadd.xlane.f32.xlu0 %v1054_v45  ;;  %v950_v46 = vpop.f32.mrf.mxu0  ;;  %v2559_v52 = vpop.eup %2558  ;;  %v2461_v45 = vld [vmem:[%s3147_s10 + $0x8] sm:$0xff] }
 0x717   : > { %v954_v47 = vadd.f32 %v950_v46, %v859_v44  ;;  %v1061_v32 = vmul.f32 64.0, %v2559_v52  ;;  %vm1065_vm2 = vweird.f32 %v2559_v52  ;;  %v2462_v44 = vld [vmem:[%s3147_s10 + $0x10] sm:$0xff]  ;;  %v2460_v46 = vld [vmem:[%s3147_s10] sm:$0xff] }
 0x719   : > { %v1049_v49 = vadd.f32 %v1045_v48, %v954_v47  ;;  %v1062_v37 = vsub.f32 1.0, %v1061_v32  ;;  %v2513_v48 = vld [vmem:[%s3146_s9] ss:$0 sm:$0xff] }
 0x71b   : > { %v1051_v50 = vadd.f32 %v1049_v49, %v2759_v9  ;;  %v1063_v8 = vmul.f32 %v2559_v52, %v1062_v37  ;;  %v2514_v37 = vld [vmem:[%s3148_s11] ss:$0 sm:$0xff] }
 0x71d   : > { %v1057_v51 = vsel %vm601_vm0, %v1051_v50, 0.0  ;;  %v1064_v53 = vadd.f32 %v2559_v52, %v1063_v8 }
 0x71e   : > { %1058 = vadd.xlane.f32.xlu0 %v1057_v51 }
 0x71f   : > { %v2864_v41 = vsel %vm1065_vm2, %v2559_v52, %v1064_v53 }
 0x789   : > { %v1056_v54 = vpop.xlane.xlu0 %1055 }
 0x78a   : > { %v1067_v55 = vmul.f32 %v2864_v41, %v1056_v54 }
 0x78c   : > { %v1069_v56 = vsub.f32 %v1050_v43, %v1067_v55  ;;  %v2463_v43 = vld [vmem:[%s3147_s10 + $0x18] sm:$0xff] }
 0x78d   : > { %1244 = vmatpush.bf16.msrb.mxu1 %v2463_v43 }
 0x78e   : > { %v1071_v57 = vmul.f32 %v1069_v56, %v1069_v56 }
 0x790   : > { %v1073_v9 = vsel %vm601_vm0, %v1071_v57, 0.0 }
 0x791   : > { %1074 = vadd.xlane.f32.xlu0 %v1073_v9  ;;  %v1059_v58 = vpop.xlane.xlu0 %1058  ;;  %1245 = vmatpush.bf16.msrb.mxu1 %v2462_v44  ;;  %v2515_v44 = vld [vmem:[%s3151_s14] ss:$0 sm:$0xff] }
 0x792   : > { %v1068_v59 = vmul.f32 %v2864_v41, %v1059_v58 }
 0x794   : > { %v1070_v60 = vsub.f32 %v1051_v50, %v1068_v59  ;;  %v2475_v59 = vld [vmem:[%s3141_s4 + $0x38] sm:$0xff] }
 0x795   : > { %1246 = vmatpush.bf16.msrb.mxu1 %v2461_v45  ;;  %1419 = vmatpush.bf16.msrb.mxu2 %v2475_v59 }
 0x796   : > { %v1072_v61 = vmul.f32 %v1070_v60, %v1070_v60 }
 0x798   : > { %v1076_v62 = vsel %vm601_vm0, %v1072_v61, 0.0  ;;  %v2473_v61 = vld [vmem:[%s3141_s4 + $0x28] sm:$0xff] }
 0x799   : > { %1077 = vadd.xlane.f32.xlu2 %v1076_v62  ;;  %1247 = vmatpush.bf16.msrb.mxu1 %v2460_v46  ;;  %v2472_v62 = vld [vmem:[%s3141_s4 + $0x20] sm:$0xff] }
 0x804   : > { %v1075_v2 = vpop.xlane.xlu0 %1074 }
 0x805   : > { %v1079_v3 = vmul.f32 %v1075_v2, %v2864_v41 }
 0x807   : > { %v1081_v4 = vadd.f32 1e-05, %v1079_v3 }
 0x809   : > { %2560 = vrsqrt.f32 %v1081_v4  ;;  %vm1089_vm4 = vweird.f32 %v1081_v4 }
 0x80c   : > { %v1078_v7 = vpop.xlane.xlu2 %1077 }
 0x80d   : > { %v1080_v10 = vmul.f32 %v1078_v7, %v2864_v41 }
 0x80f   : > { %v2561_v12 = vpop.eup %2560  ;;  %v1082_v14 = vadd.f32 1e-05, %v1080_v10 }
 0x810   : > { %v1084_v15 = vmul.f32 %v2561_v12, %v1081_v4  ;;  %vm1090_vm3 = vweird.f32 %v2561_v12 }
 0x811   : > { %2562 = vrsqrt.f32 %v1082_v14  ;;  %vm1091_vm5 = vmor %vm1089_vm4, %vm1090_vm3  ;;  %vm1099_vm7 = vweird.f32 %v1082_v14 }
 0x812   : > { %v1085_v17 = vmul.f32 %v2561_v12, %v1084_v15 }
 0x814   : > { %v1086_v18 = vmul.f32 0.5, %v1085_v17  ;;  %v2468_v17 = vld [vmem:[%s3139_s2 + $0x20] sm:$0xff] }
 0x816   : > { %v1087_v20 = vsub.f32 1.5, %v1086_v18 }
 0x817   : > { %v2563_v22 = vpop.eup %2562 }
 0x818   : > { %v1088_v23 = vmul.f32 %v2561_v12, %v1087_v20  ;;  %v1094_v24 = vmul.f32 %v2563_v22, %v1082_v14  ;;  %vm1100_vm6 = vweird.f32 %v2563_v22 }
 0x819   : > { %vm1101_vm8 = vmor %vm1099_vm7, %vm1100_vm6 }
 0x81a   : > { %v1095_v21 = vmul.f32 %v2563_v22, %v1094_v24  ;;  %v1092_v25 = vsel %vm1091_vm5, %v2561_v12, %v1088_v23  ;;  %v2469_v12 = vld [vmem:[%s3139_s2 + $0x28] sm:$0xff] }
 0x81b   : > { %v1103_v29 = vmul.f32 %v1092_v25, %v1069_v56 }
 0x81c   : > { %v1096_v26 = vmul.f32 0.5, %v1095_v21  ;;  %v2517_v21 = vld [vmem:[%s3142_s5 + $0x1] ss:$0 sm:$0xff] }
 0x81d   : > { %v1108_v34 = vmul.f32 %v2511_v28, %v1103_v29 }
 0x81e   : > { %v1097_v27 = vsub.f32 1.5, %v1096_v26 }
 0x81f   : > { %v1113_v38 = vadd.f32 %v2512_v33, %v1108_v34 }
 0x820   : > { %v1098_v30 = vmul.f32 %v2563_v22, %v1097_v27 }
 0x822   : > { %v1102_v31 = vsel %vm1101_vm8, %v2563_v22, %v1098_v30 }
 0x823   : > { %v1104_v35 = vmul.f32 %v1102_v31, %v1070_v60  ;;  %v2474_v60 = vld [vmem:[%s3141_s4 + $0x30] sm:$0xff] }
 0x824   : > { %1420 = vmatpush.bf16.msrb.mxu2 %v2474_v60 }
 0x825   : > { %v1109_v36 = vmul.f32 %v2511_v28, %v1104_v35 }
 0x827   : > { %v1114_v39 = vadd.f32 %v2512_v33, %v1109_v36 }
 0x828   : > { %1421 = vmatpush.bf16.msrb.mxu2 %v2473_v61 }
 0x829   : > { %v1115_v42 = vpack.c.bf16 %v1114_v39, %v1113_v38 }
 0x82b   : > { %2238 = vmatmul.msk.bf16.vlgmr.msrb.gmra.mxu0 %vm601_vm0, %v1115_v42 }
 0x82c   : > { %1422 = vmatpush.bf16.msrb.mxu2 %v2472_v62 }
 0x82f   : > { %2330 = vmatmul.msk.bf16.vlgmr.msrb.gmra.mxu2 %vm601_vm0, %v2763_v13  ;;  %v2470_v13 = vld [vmem:[%s3139_s2 + $0x30] sm:$0xff] }
 0x830   : > { %1377 = vmatpush.bf16.msrb.mxu3 %v2470_v13  ;;  %v2476_v13 = vld [vmem:[%s3143_s6 + $0x20] sm:$0xff] }
 0x831   : > { %1520 = vmatpush.bf16.msra.mxu2 %v2476_v13 }
 0x834   : > { %1378 = vmatpush.bf16.msrb.mxu3 %v2469_v12 }
 0x838   : > { %1379 = vmatpush.bf16.msrb.mxu3 %v2468_v17 }
 0x8a8   : > { %v1164_v47 = vpop.f32.mrf.mxu0 }
 0x8a9   : > { %v1165_v49 = vadd.f32 %v2513_v48, %v1164_v47 }
 0x8ab   : > { %v1169_v40 = vmax.f32 %v1165_v49, 0.0 }
 0x8b0   : > { %v1166_v50 = vpop.f32.mrf.mxu0 }
 0x8b1   : > { %v1167_v51 = vadd.f32 %v2513_v48, %v1166_v50  ;;  %v2516_v48 = vld [vmem:[%s3152_s15] ss:$0 sm:$0xff] }
 0x8b2   : > { %v1424_v20 = vpop.f32.mrf.mxu2 }
 0x8b3   : > { %v1170_v52 = vmax.f32 %v1167_v51, 0.0  ;;  %v1425_v27 = vadd.f32 %v2517_v21, %v1424_v20 }
 0x8b5   : > { %v1171_v32 = vpack.c.bf16 %v1170_v52, %v1169_v40 }
 0x8b7   : > { %1248 = vmatmul.bf16.vlgmr.msrb.gmra.mxu1 %v1171_v32 }
 0x8ba   : > { %v1426_v28 = vpop.f32.mrf.mxu2 }
 0x8bb   : > { %v1427_v30 = vadd.f32 %v2517_v21, %v1426_v28 }
 0x8bd   : > { %v2958_v35 = vpack.c.bf16 %v1427_v30, %v1425_v27 }
 0x934   : > { %v1249_v8 = vpop.f32.mrf.mxu1 }
 0x935   : > { %v1250_v53 = vadd.f32 %v2514_v37, %v1249_v8 }
 0x937   : > { %v1254_v54 = vadd.f32 %v1250_v53, %v1113_v38  ;;  %v1441_v38 = vsel %vm671_vm1, %v2958_v35, 0 }
 0x938   : > { %1450 = vmatpush.bf16.xpose.msra.mxu0 %v1441_v38 }
 0x939   : > { %v1258_v55 = vsel %vm601_vm0, %v1254_v54, 0.0 }
 0x93a   : > { %1259 = vadd.xlane.f32.xlu1 %v1258_v55 }
 0x93c   : > { %v1251_v56 = vpop.f32.mrf.mxu1 }
 0x93d   : > { %v1252_v57 = vadd.f32 %v2514_v37, %v1251_v56 }
 0x93f   : > { %v1255_v9 = vadd.f32 %v1252_v57, %v1114_v39 }
 0x941   : > { %v1261_v58 = vsel %vm601_vm0, %v1255_v9, 0.0 }
 0x942   : > { %1262 = vadd.xlane.f32.xlu0 %v1261_v58 }
 0x9ad   : > { %v1260_v63 = vpop.xlane.xlu1 %1259 }
 0x9ae   : > { %v1264_v0 = vmul.f32 %v1260_v63, %v2864_v41 }
 0x9b0   : > { %v1266_v1 = vsub.f32 %v1254_v54, %v1264_v0  ;;  %v2518_v54 = vld [vmem:[%s3140_s3 + $0x1] ss:$0 sm:$0xff] }
 0x9b2   : > { %v1268_v2 = vmul.f32 %v1266_v1, %v1266_v1 }
 0x9b4   : > { %v1270_v3 = vsel %vm601_vm0, %v1268_v2, 0.0 }
 0x9b5   : > { %v1263_v4 = vpop.xlane.xlu0 %1262  ;;  %1271 = vadd.xlane.f32.xlu0 %v1270_v3 }
 0x9b6   : > { %v1265_v5 = vmul.f32 %v1263_v4, %v2864_v41 }
 0x9b8   : > { %v1267_v6 = vsub.f32 %v1255_v9, %v1265_v5 }
 0x9ba   : > { %v1269_v7 = vmul.f32 %v1267_v6, %v1267_v6 }
 0x9bc   : > { %v1273_v10 = vsel %vm601_vm0, %v1269_v7, 0.0 }
 0x9bd   : > { %1274 = vadd.xlane.f32.xlu0 %v1273_v10 }
 0x9d1   : > { %1532 = vrot.lane.b32.xlu0 %v2958_v35, %s2619_s22 }
 0xa28   : > { %v1272_v14 = vpop.xlane.xlu0 %1271 }
 0xa29   : > { %v1276_v15 = vmul.f32 %v1272_v14, %v2864_v41 }
 0xa2b   : > { %v1278_v16 = vadd.f32 1e-05, %v1276_v15 }
 0xa2d   : > { %2564 = vrsqrt.f32 %v1278_v16  ;;  %vm1286_vm10 = vweird.f32 %v1278_v16 }
 0xa30   : > { %v1275_v18 = vpop.xlane.xlu0 %1274 }
 0xa31   : > { %v1277_v19 = vmul.f32 %v1275_v18, %v2864_v41 }
 0xa33   : > { %v2565_v22 = vpop.eup %2564  ;;  %v1279_v23 = vadd.f32 1e-05, %v1277_v19 }
 0xa34   : > { %v1281_v24 = vmul.f32 %v2565_v22, %v1278_v16  ;;  %vm1287_vm9 = vweird.f32 %v2565_v22 }
 0xa35   : > { %2566 = vrsqrt.f32 %v1279_v23  ;;  %vm1288_vm11 = vmor %vm1286_vm10, %vm1287_vm9  ;;  %vm1296_vm13 = vweird.f32 %v1279_v23 }
 0xa36   : > { %v1282_v25 = vmul.f32 %v2565_v22, %v1281_v24 }
 0xa38   : > { %v1283_v26 = vmul.f32 0.5, %v1282_v25 }
 0xa3a   : > { %v1284_v29 = vsub.f32 1.5, %v1283_v26 }
 0xa3b   : > { %v2567_v31 = vpop.eup %2566 }
 0xa3c   : > { %v1285_v33 = vmul.f32 %v2565_v22, %v1284_v29  ;;  %v1291_v34 = vmul.f32 %v2567_v31, %v1279_v23  ;;  %vm1297_vm12 = vweird.f32 %v2567_v31 }
 0xa3d   : > { %vm1298_vm14 = vmor %vm1296_vm13, %vm1297_vm12 }
 0xa3e   : > { %v1292_v36 = vmul.f32 %v2567_v31, %v1291_v34  ;;  %v1289_v39 = vsel %vm1288_vm11, %v2565_v22, %v1285_v33  ;;  %v2477_v34 = vld [vmem:[%s3143_s6 + $0x28] sm:$0xff] }
 0xa3f   : > { %v1300_v45 = vmul.f32 %v1289_v39, %v1266_v1 }
 0xa40   : > { %v1293_v42 = vmul.f32 0.5, %v1292_v36 }
 0xa41   : > { %v1305_v49 = vmul.f32 %v2515_v44, %v1300_v45 }
 0xa42   : > { %v1294_v43 = vsub.f32 1.5, %v1293_v42 }
 0xa43   : > { %v2970_v40 = vadd.f32 %v2516_v48, %v1305_v49  ;;  %v1533_v37 = vpop.permute.xlu0 %1532 }
 0xa44   : > { %v1295_v46 = vmul.f32 %v2567_v31, %v1294_v43  ;;  %v1538_v8 = vsel %vm671_vm1, %v1533_v37, 0 }
 0xa45   : > { %1547 = vmatpush.bf16.xpose.msrb.mxu0 %v1538_v8 }
 0xa46   : > { %v1299_v47 = vsel %vm1298_vm14, %v2567_v31, %v1295_v46 }
 0xa47   : > { %v1301_v50 = vmul.f32 %v1299_v47, %v1267_v6 }
 0xa49   : > { %v1306_v51 = vmul.f32 %v2515_v44, %v1301_v50 }
 0xa4b   : > { %v2972_v52 = vadd.f32 %v2516_v48, %v1306_v51 }
 0xa4d   : > { %v1339_v32 = vpack.c.bf16 %v2972_v52, %v2970_v40 }
 0xa4f   : > { %2312 = vmatmul.msk.bf16.vlgmr.msrb.gmra.mxu3 %vm601_vm0, %v1339_v32 }
 0xad2   : > { %v1381_v53 = vpop.f32.mrf.mxu3 }
 0xad3   : > { %v1382_v56 = vadd.f32 %v2518_v54, %v1381_v53 }
 0xada   : > { %v1383_v55 = vpop.f32.mrf.mxu3 }
 0xadb   : > { %v1384_v57 = vadd.f32 %v2518_v54, %v1383_v55 }
 0xadd   : > { %v2981_v9 = vpack.c.bf16 %v1384_v57, %v1382_v56 }
 0xadf   : > { %1530 = vrot.lane.b32.xlu2 %v2981_v9, %s2619_s22  ;;  %2332 = vmatmul.msk.bf16.vlgmr.msra.gmra.mxu0 %vm671_vm1, %v2981_v9 }
 0xb39   : > { %v1531_v58 = vpop.permute.xlu2 %1530 }
 0xb3a   : > { %2339 = vmatmul.msk.bf16.vlgmr.msrb.gmra.mxu0 %vm671_vm1, %v1531_v58 }
 0xb5c   : > { %v1452_v59 = vpop.f32.mrf.mxu0 }
 0xb5d   : > { %v1457_v60 = vmul.f32 0.25, %v1452_v59 }
 0xb5f   : > { %v1459_v61 = vsel %vm671_vm1, %v1457_v60, -inf }
 0xb60   : > { %1460 = vmax.xlane.f32.xlu1 %v1459_v61 }
 0xb64   : > { %v1454_v62 = vpop.f32.mrf.mxu0 }
 0xb65   : > { %v1458_v63 = vmul.f32 0.25, %v1454_v62 }
 0xb67   : > { %v1462_v0 = vsel %vm671_vm1, %v1458_v63, -inf }
 0xb68   : > { %1463 = vmax.xlane.f32.xlu0 %v1462_v0 }
 0xb7c   : > { %1483 = vrot.lane.b32.xlu0 %v2958_v35, %s2618_s26 }
 0xb84   : > { %1627 = vrot.lane.b32.xlu0 %v2958_v35, %s2622_s29 }
 0xb8c   : > { %1625 = vrot.lane.b32.xlu0 %v2981_v9, %s2622_s29  ;;  %s3161_s29 = smov 80  }
 0xbb7   : > { %v1549_v1 = vpop.f32.mrf.mxu0 }
 0xbb8   : > { %v1554_v2 = vmul.f32 0.25, %v1549_v1 }
 0xbba   : > { %v1556_v3 = vsel %vm671_vm1, %v1554_v2, -inf }
 0xbbb   : > { %1557 = vmax.xlane.f32.xlu1 %v1556_v3 }
 0xbbf   : > { %v1551_v4 = vpop.f32.mrf.mxu0 }
 0xbc0   : > { %v1555_v5 = vmul.f32 0.25, %v1551_v4 }
 0xbc2   : > { %v1559_v6 = vsel %vm671_vm1, %v1555_v5, -inf }
 0xbc3   : > { %1560 = vmax.xlane.f32.xlu1 %v1559_v6 }
 0xbd3   : > { %v1461_v7 = vpop.xlane.xlu1 %1460 }
 0xbd4   : > { %v1465_v10 = vsub.f32 %v1457_v60, %v1461_v7 }
 0xbd6   : > { %v1467_v11 = vmul.f32 1.442695, %v1465_v10 }
 0xbd8   : > { %2568 = vpow2.f32 %v1467_v11 }
 0xbdb   : > { %v1464_v12 = vpop.xlane.xlu0 %1463 }
 0xbdc   : > { %v1466_v14 = vsub.f32 %v1458_v63, %v1464_v12 }
 0xbde   : > { %v2569_v15 = vpop.eup %2568  ;;  %v1469_v16 = vmul.f32 1.442695, %v1466_v14 }
 0xbdf   : > { %v1471_v17 = vsel %vm671_vm1, %v2569_v15, 0.0 }
 0xbe0   : > { %2570 = vpow2.f32 %v1469_v16  ;;  %1472 = vadd.xlane.f32.xlu2 %v1471_v17 }
 0xbe6   : > { %v2571_v18 = vpop.eup %2570 }
 0xbe7   : > { %v1474_v19 = vsel %vm671_vm1, %v2571_v18, 0.0 }
 0xbe8   : > { %1475 = vadd.xlane.f32.xlu1 %v1474_v19 }
 0xbee   : > { %v1484_v20 = vpop.permute.xlu0 %1483 }
 0xbef   : > { %1496 = vmatpush.bf16.msra.mxu3 %v1484_v20 }
 0xbf3   : > { %1616 = vmatpush.bf16.msrb.mxu3 %v2477_v34 }
 0xbf6   : > { %v1628_v22 = vpop.permute.xlu0 %1627 }
 0xbf7   : > { %v1633_v23 = vsel %vm671_vm1, %v1628_v22, 0 }
 0xbf8   : > { %1722 = vrot.lane.b32.xlu2 %v2958_v35, %s3161_s29  ;;  %1642 = vmatpush.bf16.xpose.msrb.mxu2 %v1633_v23 }
 0xbfe   : > { %v1626_v57 = vpop.permute.xlu0 %1625 }
 0xc2e   : > { %v1558_v24 = vpop.xlane.xlu1 %1557 }
 0xc2f   : > { %v1562_v21 = vsub.f32 %v1554_v2, %v1558_v24  ;;  %v2519_v2 = vld [vmem:[%s3144_s7 + $0x1] ss:$0 sm:$0xff] }
 0xc31   : > { %v1564_v25 = vmul.f32 1.442695, %v1562_v21 }
 0xc33   : > { %2572 = vpow2.f32 %v1564_v25 }
 0xc36   : > { %v1561_v26 = vpop.xlane.xlu1 %1560 }
 0xc37   : > { %v1563_v27 = vsub.f32 %v1555_v5, %v1561_v26 }
 0xc39   : > { %v2573_v28 = vpop.eup %2572  ;;  %v1566_v29 = vmul.f32 1.442695, %v1563_v27 }
 0xc3a   : > { %v1568_v30 = vsel %vm671_vm1, %v2573_v28, 0.0 }
 0xc3b   : > { %2574 = vpow2.f32 %v1566_v29  ;;  %1569 = vadd.xlane.f32.xlu1 %v1568_v30 }
 0xc41   : > { %v2575_v31 = vpop.eup %2574 }
 0xc42   : > { %v1571_v33 = vsel %vm671_vm1, %v2575_v31, 0.0 }
 0xc43   : > { %1572 = vadd.xlane.f32.xlu1 %v1571_v33 }
 0xc53   : > { %v1473_v36 = vpop.xlane.xlu2 %1472 }
 0xc54   : > { %2576 = vrcp.f32 %v1473_v36 }
 0xc5a   : > { %v2577_v39 = vpop.eup %2576 }
 0xc5b   : > { %v1476_v38 = vpop.xlane.xlu1 %1475  ;;  %v1479_v43 = vmul.f32 %v2577_v39, %v2569_v15  ;;  %v1723_v45 = vpop.permute.xlu2 %1722 }
 0xc5c   : > { %2578 = vrcp.f32 %v1476_v38  ;;  %1579 = vrot.lane.b32.xlu1 %v2958_v35, %s3162_s19  ;;  %v1728_v47 = vsel %vm671_vm1, %v1723_v45, 0 }
 0xc62   : > { %v2579_v42 = vpop.eup %2578 }
 0xc63   : > { %v1480_v44 = vmul.f32 %v2579_v42, %v2571_v18 }
 0xc64   : > { %1720 = vrot.lane.b32.xlu1 %v2981_v9, %s3161_s29 }
 0xc65   : > { %v1481_v46 = vpack.c.bf16 %v1480_v44, %v1479_v43 }
 0xc67   : > { %2333 = vmatmul.msk.bf16.vlgmr.msra.gmra.mxu3 %vm671_vm1, %v1481_v46 }
 0xc68   : > { %1737 = vmatpush.bf16.xpose.msra.mxu3 %v1728_v47 }
 0xcae   : > { %v1570_v48 = vpop.xlane.xlu1 %1569 }
 0xcb6   : > { %v1573_v49 = vpop.xlane.xlu1 %1572 }
 0xcb7   : > { %2580 = vrcp.f32 %v1573_v49 }
 0xcb8   : > { %2582 = vrcp.f32 %v1570_v48 }
 0xcbd   : > { %v2581_v50 = vpop.eup %2580 }
 0xcbe   : > { %v2583_v51 = vpop.eup %2582  ;;  %v1577_v32 = vmul.f32 %v2581_v50, %v2575_v31 }
 0xcbf   : > { %v1576_v37 = vmul.f32 %v2583_v51, %v2573_v28 }
 0xcc1   : > { %v1578_v53 = vpack.c.bf16 %v1577_v32, %v1576_v37 }
 0xcce   : > { %v1580_v8 = vpop.permute.xlu1 %1579 }
 0xccf   : > { %1592 = vmatpush.bf16.msra.mxu1 %v1580_v8 }
 0xcd2   : > { %2340 = vmatmul.msk.bf16.vlgmr.msra.gmra.mxu1 %vm671_vm1, %v1578_v53 }
 0xcd6   : > { %v1721_v60 = vpop.permute.xlu1 %1720 }
 0xcea   : > { %v1498_v54 = vpop.f32.mrf.mxu3 }
 0xcf2   : > { %v1500_v55 = vpop.f32.mrf.mxu3 }
 0xcf3   : > { %v1503_v56 = vpack.c.bf16 %v1500_v55, %v1498_v54 }
 0xcf5   : > { %2338 = vmatmul.msk.bf16.vlgmr.msra.gmra.mxu2 %vm671_vm1, %v1503_v56 }
 0xd05   : > { %2346 = vmatmul.msk.bf16.vlgmr.msrb.gmra.mxu2 %vm671_vm1, %v1626_v57 }
 0xd4f   : > { %v1594_v9 = vpop.f32.mrf.mxu1 }
 0xd57   : > { %v1596_v58 = vpop.f32.mrf.mxu1 }
 0xd58   : > { %v1599_v59 = vpack.c.bf16 %v1596_v58, %v1594_v9  ;;  %v2478_v9 = vld [vmem:[%s3143_s6 + $0x30] sm:$0xff]  ;;  %v2479_v58 = vld [vmem:[%s3143_s6 + $0x38] sm:$0xff] }
 0xd59   : > { %1711 = vmatpush.bf16.msrb.mxu1 %v2478_v9 }
 0xd5a   : > { %2345 = vmatmul.msk.bf16.vlgmr.msrb.gmra.mxu3 %vm671_vm1, %v1599_v59 }
 0xd6a   : > { %2353 = vmatmul.msk.bf16.vlgmr.msra.gmra.mxu3 %vm671_vm1, %v1721_v60 }
 0xd78   : > { %v1522_v61 = vpop.f32.mrf.mxu2 }
 0xd79   : > { %v1527_v3 = vadd.f32 %v2519_v2, %v1522_v61 }
 0xd80   : > { %v1524_v62 = vpop.f32.mrf.mxu2 }
 0xd81   : > { %v1528_v6 = vadd.f32 %v2519_v2, %v1524_v62 }
 0xd88   : > { %v1644_v63 = vpop.f32.mrf.mxu2 }
 0xd89   : > { %v1649_v0 = vmul.f32 0.25, %v1644_v63 }
 0xd8b   : > { %v1651_v1 = vsel %vm671_vm1, %v1649_v0, -inf }
 0xd8c   : > { %1652 = vmax.xlane.f32.xlu2 %v1651_v1 }
 0xd90   : > { %v1646_v14 = vpop.f32.mrf.mxu2 }
 0xd91   : > { %v1650_v15 = vmul.f32 0.25, %v1646_v14 }
 0xd93   : > { %v1654_v19 = vsel %vm671_vm1, %v1650_v15, -inf }
 0xddd   : > { %v1618_v4 = vpop.f32.mrf.mxu3 }
 0xdde   : > { %v3026_v5 = vadd.f32 %v1618_v4, %v1527_v3 }
 0xde5   : > { %v1620_v7 = vpop.f32.mrf.mxu3 }
 0xde6   : > { %v3028_v10 = vadd.f32 %v1620_v7, %v1528_v6 }
 0xded   : > { %v1739_v11 = vpop.f32.mrf.mxu3 }
 0xdee   : > { %v1744_v13 = vmul.f32 0.25, %v1739_v11 }
 0xdf0   : > { %v1746_v12 = vsel %vm671_vm1, %v1744_v13, -inf }
 0xdf1   : > { %1747 = vmax.xlane.f32.xlu1 %v1746_v12 }
 0xdf5   : > { %v1741_v16 = vpop.f32.mrf.mxu3 }
 0xdf6   : > { %v1745_v17 = vmul.f32 0.25, %v1741_v16 }
 0xdf8   : > { %v1749_v18 = vsel %vm671_vm1, %v1745_v17, -inf }
 0xdf9   : > { %1750 = vmax.xlane.f32.xlu0 %v1749_v18  ;;  %1655 = vmax.xlane.f32.xlu1 %v1654_v19 }
 0xdff   : > { %v1653_v20 = vpop.xlane.xlu2 %1652 }
 0xe00   : > { %v1657_v22 = vsub.f32 %v1649_v0, %v1653_v20 }
 0xe02   : > { %v1659_v23 = vmul.f32 1.442695, %v1657_v22 }
 0xe04   : > { %2584 = vpow2.f32 %v1659_v23 }
 0xe0a   : > { %v2585_v24 = vpop.eup %2584 }
 0xe0b   : > { %v1663_v21 = vsel %vm671_vm1, %v2585_v24, 0.0 }
 0xe0c   : > { %1664 = vadd.xlane.f32.xlu1 %v1663_v21  ;;  %v2482_v21 = vld [vmem:[%s3145_s8 + $0x30] sm:$0xff] }
 0xe25   : > { %1674 = vrot.lane.b32.xlu1 %v2958_v35, %s3163_s25 }
 0xe64   : > { %v1748_v25 = vpop.xlane.xlu1 %1747 }
 0xe65   : > { %v1752_v26 = vsub.f32 %v1744_v13, %v1748_v25  ;;  %v2481_v25 = vld [vmem:[%s3145_s8 + $0x28] sm:$0xff] }
 0xe67   : > { %v1754_v27 = vmul.f32 1.442695, %v1752_v26 }
 0xe69   : > { %2586 = vpow2.f32 %v1754_v27 }
 0xe6c   : > { %v1656_v28 = vpop.xlane.xlu1 %1655  ;;  %v1751_v29 = vpop.xlane.xlu0 %1750 }
 0xe6d   : > { %v1658_v30 = vsub.f32 %v1650_v15, %v1656_v28  ;;  %v1753_v31 = vsub.f32 %v1745_v17, %v1751_v29  ;;  %v2480_v28 = vld [vmem:[%s3145_s8 + $0x20] sm:$0xff] }
 0xe6f   : > { %v2587_v33 = vpop.eup %2586  ;;  %v1661_v34 = vmul.f32 1.442695, %v1658_v30  ;;  %v1756_v36 = vmul.f32 1.442695, %v1753_v31  ;;  %v2491_v30 = vld [vmem:[%s3147_s10 + $0x78] sm:$0xff] }
 0xe70   : > { %v1758_v38 = vsel %vm671_vm1, %v2587_v33, 0.0  ;;  %2004 = vmatpush.bf16.msrb.mxu3 %v2491_v30 }
 0xe71   : > { %2588 = vpow2.f32 %v1661_v34  ;;  %1759 = vadd.xlane.f32.xlu0 %v1758_v38  ;;  %v2490_v34 = vld [vmem:[%s3147_s10 + $0x70] sm:$0xff] }
 0xe72   : > { %2590 = vpow2.f32 %v1756_v36 }
 0xe74   : > { %2005 = vmatpush.bf16.msrb.mxu3 %v2490_v34 }
 0xe77   : > { %v2589_v39 = vpop.eup %2588 }
 0xe78   : > { %v2591_v42 = vpop.eup %2590  ;;  %v1666_v43 = vsel %vm671_vm1, %v2589_v39, 0.0 }
 0xe79   : > { %1667 = vadd.xlane.f32.xlu0 %v1666_v43  ;;  %v1761_v44 = vsel %vm671_vm1, %v2591_v42, 0.0 }
 0xe7a   : > { %1762 = vadd.xlane.f32.xlu2 %v1761_v44 }
 0xe7f   : > { %v1665_v45 = vpop.xlane.xlu1 %1664 }
 0xe80   : > { %2592 = vrcp.f32 %v1665_v45  ;;  %v2488_v45 = vld [vmem:[%s3147_s10 + $0x60] sm:$0xff] }
 0xe86   : > { %v2593_v50 = vpop.eup %2592 }
 0xe87   : > { %v1671_v8 = vmul.f32 %v2593_v50, %v2585_v24 }
 0xe92   : > { %1769 = vrot.lane.b32.xlu2 %v2958_v35, %s3164_s17 }
 0xe97   : > { %v1675_v46 = vpop.permute.xlu1 %1674 }
 0xe98   : > { %1687 = vmatpush.bf16.msra.mxu0 %v1675_v46 }
 0xe9c   : > { %1806 = vmatpush.bf16.msrb.mxu0 %v2479_v58 }
 0xee4   : > { %v1760_v47 = vpop.xlane.xlu0 %1759 }
 0xee5   : > { %2594 = vrcp.f32 %v1760_v47 }
 0xeeb   : > { %v2595_v51 = vpop.eup %2594 }
 0xeec   : > { %v1668_v48 = vpop.xlane.xlu0 %1667  ;;  %v1766_v54 = vmul.f32 %v2595_v51, %v2587_v33 }
 0xeed   : > { %v1763_v49 = vpop.xlane.xlu2 %1762  ;;  %2596 = vrcp.f32 %v1668_v48 }
 0xeee   : > { %2598 = vrcp.f32 %v1763_v49 }
 0xef3   : > { %v2597_v32 = vpop.eup %2596 }
 0xef4   : > { %v2599_v37 = vpop.eup %2598  ;;  %v1672_v53 = vmul.f32 %v2597_v32, %v2589_v39 }
 0xef5   : > { %v1767_v55 = vmul.f32 %v2599_v37, %v2591_v42  ;;  %v1770_v56 = vpop.permute.xlu2 %1769  ;;  %v2489_v42 = vld [vmem:[%s3147_s10 + $0x68] sm:$0xff] }
 0xef6   : > { %v1673_v57 = vpack.c.bf16 %v1672_v53, %v1671_v8  ;;  %1782 = vmatpush.bf16.msra.mxu2 %v1770_v56  ;;  %2006 = vmatpush.bf16.msrb.mxu3 %v2489_v42  ;;  %v2520_v8 = vld [vmem:[%s3149_s12 + $0x1] ss:$0 sm:$0xff] }
 0xef7   : > { %v1768_v35 = vpack.c.bf16 %v1767_v55, %v1766_v54  ;;  %v2521_v56 = vld [vmem:[%s3150_s13 + $0x1] ss:$0 sm:$0xff] }
 0xef8   : > { %2347 = vmatmul.msk.bf16.vlgmr.msra.gmra.mxu0 %vm671_vm1, %v1673_v57 }
 0xef9   : > { %2354 = vmatmul.msk.bf16.vlgmr.msra.gmra.mxu2 %vm671_vm1, %v1768_v35 }
 0xefa   : > { %2007 = vmatpush.bf16.msrb.mxu3 %v2488_v45 }
 0xf75   : > { %v1689_v59 = vpop.f32.mrf.mxu0 }
 0xf7c   : > { %v1784_v60 = vpop.f32.mrf.mxu2 }
 0xf7d   : > { %v1691_v61 = vpop.f32.mrf.mxu0 }
 0xf7e   : > { %v1694_v62 = vpack.c.bf16 %v1691_v61, %v1689_v59  ;;  %v2487_v61 = vld [vmem:[%s3147_s10 + $0x58] sm:$0xff] }
 0xf7f   : > { %2008 = vmatpush.bf16.msrb.mxu3 %v2487_v61 }
 0xf80   : > { %2352 = vmatmul.msk.bf16.vlgmr.msrb.gmra.mxu1 %vm671_vm1, %v1694_v62  ;;  %v2486_v62 = vld [vmem:[%s3147_s10 + $0x50] sm:$0xff] }
 0xf83   : > { %2009 = vmatpush.bf16.msrb.mxu3 %v2486_v62 }
 0xf84   : > { %v1786_v63 = vpop.f32.mrf.mxu2 }
 0xf85   : > { %v1789_v0 = vpack.c.bf16 %v1786_v63, %v1784_v60  ;;  %v2485_v63 = vld [vmem:[%s3147_s10 + $0x48] sm:$0xff] }
 0xf87   : > { %2359 = vmatmul.msk.bf16.vlgmr.msrb.gmra.mxu0 %vm671_vm1, %v1789_v0  ;;  %2010 = vmatpush.bf16.msrb.mxu3 %v2485_v63  ;;  %v2484_v0 = vld [vmem:[%s3147_s10 + $0x40] sm:$0xff] }
 0xf8b   : > { %2011 = vmatpush.bf16.msrb.mxu3 %v2484_v0 }
 0xffd   : > { %v1713_v1 = vpop.f32.mrf.mxu1 }
 0xffe   : > { %v1718_v2 = vadd.f32 %v1713_v1, %v3026_v5 }
0x1004   : > { %v1808_v3 = vpop.f32.mrf.mxu0 }
0x1005   : > { %v1813_v4 = vadd.f32 %v1808_v3, %v1718_v2  ;;  %v1715_v7 = vpop.f32.mrf.mxu1  ;;  %v2522_v2 = vld [vmem:[%s3146_s9 + $0x1] ss:$0 sm:$0xff] }
0x1006   : > { %v1719_v13 = vadd.f32 %v1715_v7, %v3028_v10 }
0x1007   : > { %v1815_v6 = vadd.f32 %v1813_v4, %v2970_v40 }
0x1009   : > { %v1821_v11 = vsel %vm601_vm0, %v1815_v6, 0.0 }
0x100a   : > { %1822 = vadd.xlane.f32.xlu0 %v1821_v11 }
0x100c   : > { %v1810_v12 = vpop.f32.mrf.mxu0 }
0x100d   : > { %v1814_v14 = vadd.f32 %v1810_v12, %v1719_v13  ;;  %v2523_v12 = vld [vmem:[%s3148_s11 + $0x1] ss:$0 sm:$0xff] }
0x100f   : > { %v1816_v15 = vadd.f32 %v1814_v14, %v2972_v52  ;;  %v2483_v52 = vld [vmem:[%s3145_s8 + $0x38] sm:$0xff] }
0x1010   : > { %1921 = vmatpush.bf16.msra.mxu1 %v2483_v52 }
0x1011   : > { %v1824_v16 = vsel %vm601_vm0, %v1816_v15, 0.0 }
0x1012   : > { %1825 = vadd.xlane.f32.xlu0 %v1824_v16 }
0x1014   : > { %1922 = vmatpush.bf16.msra.mxu1 %v2482_v21 }
0x1018   : > { %1923 = vmatpush.bf16.msra.mxu1 %v2481_v25 }
0x101c   : > { %1924 = vmatpush.bf16.msra.mxu1 %v2480_v28 }
0x107d   : > { %v1823_v17 = vpop.xlane.xlu0 %1822 }
0x107e   : > { %v1827_v5 = vmul.f32 %v1823_v17, %v2864_v41 }
0x1080   : > { %v1829_v18 = vsub.f32 %v1815_v6, %v1827_v5 }
0x1082   : > { %v1831_v19 = vmul.f32 %v1829_v18, %v1829_v18 }
0x1084   : > { %v1833_v40 = vsel %vm601_vm0, %v1831_v19, 0.0 }
0x1085   : > { %1834 = vadd.xlane.f32.xlu0 %v1833_v40  ;;  %v1826_v20 = vpop.xlane.xlu0 %1825 }
0x1086   : > { %v1828_v22 = vmul.f32 %v1826_v20, %v2864_v41 }
0x1088   : > { %v1830_v23 = vsub.f32 %v1816_v15, %v1828_v22 }
0x108a   : > { %v1832_v10 = vmul.f32 %v1830_v23, %v1830_v23 }
0x108c   : > { %v1836_v24 = vsel %vm601_vm0, %v1832_v10, 0.0 }
0x108d   : > { %1837 = vadd.xlane.f32.xlu2 %v1836_v24 }
0x10f8   : > { %v1835_v26 = vpop.xlane.xlu0 %1834 }
0x10f9   : > { %v1839_v27 = vmul.f32 %v1835_v26, %v2864_v41 }
0x10fb   : > { %v1841_v29 = vadd.f32 1e-05, %v1839_v27 }
0x10fd   : > { %2600 = vrsqrt.f32 %v1841_v29  ;;  %vm1849_vm1 = vweird.f32 %v1841_v29 }
0x1100   : > { %v1838_v31 = vpop.xlane.xlu2 %1837 }
0x1101   : > { %v1840_v33 = vmul.f32 %v1838_v31, %v2864_v41 }
0x1103   : > { %v2601_v36 = vpop.eup %2600  ;;  %v1842_v38 = vadd.f32 1e-05, %v1840_v33 }
0x1104   : > { %v1844_v39 = vmul.f32 %v2601_v36, %v1841_v29  ;;  %vm1850_vm15 = vweird.f32 %v2601_v36 }
0x1105   : > { %2602 = vrsqrt.f32 %v1842_v38  ;;  %vm1851_vm2 = vmor %vm1849_vm1, %vm1850_vm15  ;;  %vm1859_vm4 = vweird.f32 %v1842_v38 }
0x1106   : > { %v1845_v43 = vmul.f32 %v2601_v36, %v1844_v39 }
0x1108   : > { %v1846_v44 = vmul.f32 0.5, %v1845_v43 }
0x110a   : > { %v1847_v46 = vsub.f32 1.5, %v1846_v44 }
0x110b   : > { %v2603_v47 = vpop.eup %2602 }
0x110c   : > { %v1848_v48 = vmul.f32 %v2601_v36, %v1847_v46  ;;  %v1854_v49 = vmul.f32 %v2603_v47, %v1842_v38  ;;  %vm1860_vm3 = vweird.f32 %v2603_v47 }
0x110d   : > { %vm1861_vm5 = vmor %vm1859_vm4, %vm1860_vm3 }
0x110e   : > { %v1855_v50 = vmul.f32 %v2603_v47, %v1854_v49  ;;  %v1852_v51 = vsel %vm1851_vm2, %v2601_v36, %v1848_v48  ;;  %v2525_v49 = vld [vmem:[%s3152_s15 + $0x1] ss:$0 sm:$0xff] }
0x110f   : > { %v1863_v53 = vmul.f32 %v1852_v51, %v1829_v18 }
0x1110   : > { %v1856_v32 = vmul.f32 0.5, %v1855_v50 }
0x1111   : > { %v1868_v57 = vmul.f32 %v2520_v8, %v1863_v53 }
0x1112   : > { %v1857_v37 = vsub.f32 1.5, %v1856_v32 }
0x1113   : > { %v1873_v58 = vadd.f32 %v2521_v56, %v1868_v57 }
0x1114   : > { %v1858_v54 = vmul.f32 %v2603_v47, %v1857_v37 }
0x1116   : > { %v1862_v55 = vsel %vm1861_vm5, %v2603_v47, %v1858_v54  ;;  %v2524_v47 = vld [vmem:[%s3151_s14 + $0x1] ss:$0 sm:$0xff] }
0x1117   : > { %v1864_v35 = vmul.f32 %v1862_v55, %v1830_v23  ;;  %v2608_v54 = vld [vmem:[%s2737_s20] sm:$0xff] }
0x1119   : > { %v1869_v9 = vmul.f32 %v2520_v8, %v1864_v35 }
0x111b   : > { %v1874_v59 = vadd.f32 %v2521_v56, %v1869_v9 }
0x111d   : > { %v1875_v60 = vpack.c.bf16 %v1874_v59, %v1873_v58 }
0x111f   : > { %2387 = vmatmul.msk.bf16.vlgmr.msra.gmra.mxu1 %vm601_vm0, %v1875_v60 }
0x119c   : > { %v1926_v1 = vpop.f32.mrf.mxu1 }
0x119d   : > { %v1927_v3 = vadd.f32 %v2522_v2, %v1926_v1 }
0x119f   : > { %v1931_v7 = vmax.f32 %v1927_v3, 0.0 }
0x11a4   : > { %v1928_v4 = vpop.f32.mrf.mxu1 }
0x11a5   : > { %v1929_v6 = vadd.f32 %v2522_v2, %v1928_v4 }
0x11a7   : > { %v1932_v11 = vmax.f32 %v1929_v6, 0.0 }
0x11a9   : > { %v1933_v13 = vpack.c.bf16 %v1932_v11, %v1931_v7 }
0x11ab   : > { %2012 = vmatmul.bf16.vlgmr.msrb.gmra.mxu3 %v1933_v13 }
0x122e   : > { %v2013_v14 = vpop.f32.mrf.mxu3 }
0x122f   : > { %v2014_v15 = vadd.f32 %v2523_v12, %v2013_v14 }
0x1231   : > { %v2018_v16 = vadd.f32 %v2014_v15, %v1873_v58  ;;  %v2609_v58 = vld [vmem:[%s2737_s20 + $0x8] sm:$0xff] }
0x1233   : > { %v2024_v17 = vsel %vm601_vm0, %v2018_v16, 0.0 }
0x1234   : > { %2025 = vadd.xlane.f32.xlu0 %v2024_v17 }
0x1236   : > { %v2015_v5 = vpop.f32.mrf.mxu3 }
0x1237   : > { %v2016_v18 = vadd.f32 %v2523_v12, %v2015_v5 }
0x1239   : > { %v2019_v19 = vadd.f32 %v2016_v18, %v1874_v59 }
0x123b   : > { %v2027_v40 = vsel %vm601_vm0, %v2019_v19, 0.0 }
0x123c   : > { %2028 = vadd.xlane.f32.xlu1 %v2027_v40 }
0x12a7   : > { %v2026_v20 = vpop.xlane.xlu0 %2025 }
0x12a8   : > { %v2030_v22 = vmul.f32 %v2026_v20, %v2864_v41 }
0x12aa   : > { %v2032_v23 = vsub.f32 %v2018_v16, %v2030_v22 }
0x12ac   : > { %v2034_v10 = vmul.f32 %v2032_v23, %v2032_v23 }
0x12ae   : > { %v2036_v24 = vsel %vm601_vm0, %v2034_v10, 0.0 }
0x12af   : > { %v2029_v52 = vpop.xlane.xlu1 %2028  ;;  %2037 = vadd.xlane.f32.xlu0 %v2036_v24 }
0x12b0   : > { %v2031_v21 = vmul.f32 %v2029_v52, %v2864_v41 }
0x12b2   : > { %v2033_v25 = vsub.f32 %v2019_v19, %v2031_v21 }
0x12b4   : > { %v2035_v26 = vmul.f32 %v2033_v25, %v2033_v25 }
0x12b6   : > { %v2039_v27 = vsel %vm601_vm0, %v2035_v26, 0.0 }
0x12b7   : > { %2040 = vadd.xlane.f32.xlu0 %v2039_v27 }
0x1322   : > { %v2038_v28 = vpop.xlane.xlu0 %2037 }
0x1323   : > { %v2042_v29 = vmul.f32 %v2038_v28, %v2864_v41 }
0x1325   : > { %v2044_v30 = vadd.f32 1e-05, %v2042_v29 }
0x1327   : > { %2604 = vrsqrt.f32 %v2044_v30  ;;  %vm2052_vm7 = vweird.f32 %v2044_v30 }
0x132a   : > { %v2041_v31 = vpop.xlane.xlu0 %2040 }
0x132b   : > { %v2043_v33 = vmul.f32 %v2041_v31, %v2864_v41 }
0x132d   : > { %v2605_v34 = vpop.eup %2604  ;;  %v2045_v36 = vadd.f32 1e-05, %v2043_v33 }
0x132e   : > { %v2047_v38 = vmul.f32 %v2605_v34, %v2044_v30  ;;  %vm2053_vm6 = vweird.f32 %v2605_v34 }
0x132f   : > { %2606 = vrsqrt.f32 %v2045_v36  ;;  %vm2054_vm8 = vmor %vm2052_vm7, %vm2053_vm6  ;;  %vm2062_vm10 = vweird.f32 %v2045_v36 }
0x1330   : > { %v2048_v39 = vmul.f32 %v2605_v34, %v2047_v38 }
0x1332   : > { %v2049_v42 = vmul.f32 0.5, %v2048_v39 }
0x1334   : > { %v2050_v43 = vsub.f32 1.5, %v2049_v42 }
0x1335   : > { %v2607_v44 = vpop.eup %2606 }
0x1336   : > { %v2051_v45 = vmul.f32 %v2605_v34, %v2050_v43  ;;  %v2057_v46 = vmul.f32 %v2607_v44, %v2045_v36  ;;  %vm2063_vm9 = vweird.f32 %v2607_v44 }
0x1337   : > { %vm2064_vm11 = vmor %vm2062_vm10, %vm2063_vm9 }
0x1338   : > { %v2055_v41 = vsel %vm2054_vm8, %v2605_v34, %v2051_v45  ;;  %v2058_v48 = vmul.f32 %v2607_v44, %v2057_v46 }
0x1339   : > { %v2066_v50 = vmul.f32 %v2055_v41, %v2032_v23 }
0x133a   : > { %v2059_v51 = vmul.f32 0.5, %v2058_v48 }
0x133b   : > { %v2071_v32 = vmul.f32 %v2524_v47, %v2066_v50 }
0x133c   : > { %v2060_v37 = vsub.f32 1.5, %v2059_v51 }
0x133d   : > { %v2076_v8 = vadd.f32 %v2525_v49, %v2071_v32 }
0x133e   : > { %v2061_v53 = vmul.f32 %v2607_v44, %v2060_v37 }
0x133f   : > { %v2078_v55 = vadd.f32 %v2608_v54, %v2076_v8 }
0x1340   : > { %v2065_v56 = vsel %vm2064_vm11, %v2607_v44, %v2061_v53 }
0x1341   : > { %2080 = vst.msk [vmem:[%s541_s30] sm:$0xff] %vm601_vm0, %v2078_v55  ;;  %v2067_v57 = vmul.f32 %v2065_v56, %v2033_v25 }
0x1343   : > { %v2072_v35 = vmul.f32 %v2524_v47, %v2067_v57 }
0x1345   : > { %v2077_v9 = vadd.f32 %v2525_v49, %v2072_v35 }
0x1347   : > { %v2079_v59 = vadd.f32 %v2609_v58, %v2077_v9 }
0x1349   : > { %2081 = vst.msk [vmem:[%s541_s30 + $0x8] sm:$0xff] %vm601_vm0, %v2079_v59 }
0x134a PF: > { %s26_s21 = sadd.s32 1, %s2616_s21  }
0x134b   : > { %p23_p4 = scmp.ge.s32.totalorder %s26_s21, 4  }
0x134d   :  { %25 = sbr.rel (!%p23_p4) target bundleno = 2 (0x2), region = 131 }

// kernel: _lambda_.7
= control target key start
LH: loop header
LB: loop body
LE: loop exit
PB: predicated region body
PF: predicated region fallthrough
CT: control target
= control target key end

     0   :  { %s3765_s0 = inlined_call_operand.vmem [shape: f32[2,16,64], index: 0, kind: input, shape index: {}]   ;;  %s3766_s1 = inlined_call_operand.vmem [shape: f32[2,16,64], index: 1, kind: input, shape index: {}]   ;;  %s3767_s2 = inlined_call_operand.vmem [shape: bf16[2,64,64], index: 2, kind: input, shape index: {}]   ;;  %s3768_s3 = inlined_call_operand.hbm [shape: f32[2,1,64], index: 3, kind: input, shape index: {}]   ;;  %s3769_s4 = inlined_call_operand.vmem [shape: bf16[2,64,128], index: 4, kind: input, shape index: {}]   ;;  %s3770_s5 = inlined_call_operand.hbm [shape: f32[2,1,128], index: 5, kind: input, shape index: {}]   ;;  %s3771_s6 = inlined_call_operand.vmem [shape: bf16[2,64,64], index: 6, kind: input, shape index: {}]   ;;  %s3772_s7 = inlined_call_operand.hbm [shape: f32[2,1,64], index: 7, kind: input, shape index: {}]   ;;  %s3773_s8 = inlined_call_operand.vmem [shape: bf16[2,64,128], index: 8, kind: input, shape index: {}]   ;;  %s3774_s9 = inlined_call_operand.vmem [shape: f32[2,1,128], index: 9, kind: input, shape index: {}]   ;;  %s3775_s10 = inlined_call_operand.vmem [shape: bf16[2,128,64], index: 10, kind: input, shape index: {}]   ;;  %s3776_s11 = inlined_call_operand.hbm [shape: f32[2,1,64], index: 11, kind: input, shape index: {}]   ;;  %s3777_s12 = inlined_call_operand.hbm [shape: f32[2,1,64], index: 12, kind: input, shape index: {}]   ;;  %s3778_s13 = inlined_call_operand.hbm [shape: f32[2,1,64], index: 13, kind: input, shape index: {}]   ;;  %s3779_s14 = inlined_call_operand.hbm [shape: f32[2,1,64], index: 14, kind: input, shape index: {}]   ;;  %s3780_s15 = inlined_call_operand.hbm [shape: f32[2,1,64], index: 15, kind: input, shape index: {}]   ;;  %s3781_s16 = inlined_call_operand.vmem [shape: f32[2,16,64], index: 16, kind: output, shape index: {}]  }
   0x1   :  { %3783 = sst [smem:[#allocation20_spill]] %s3765_s0 }
   0x2   :  { %3784 = sst [smem:[#allocation21_spill]] %s3768_s3 }
   0x3   :  { %3785 = sst [smem:[#allocation22_spill]] %s3770_s5 }
   0x4   :  { %3786 = sst [smem:[#allocation23_spill]] %s3776_s11 }
   0x5   :  { %21 = vsyncpa [#allocation3], 0 }
   0x6   :  { %22 = vsyncpa [#allocation5], 0 }
   0x7   :  { %23 = vsyncpa [#allocation8], 0 }
   0x8   :  { %24 = vsyncpa [#allocation11], 0 }
   0x9   :  { %25 = vsyncpa [#allocation14], 0  ;;  %s3284_s21 = smov 0  }
   0xa LB: > { %s3290_s22 = sadd.s32 4294967295, %s3179_s21   ;;  %p2363_p0 = scmp.ge.s32.totalorder %s3179_s21, 1  ;;  %s3179_s21 = sphi %s3284_s21, %s31_s21  }
   0xb   : > { %p408_p1 = scmp.lt.s32.totalorder %s3179_s21, 3  ;;  %p2769_p2 = scmp.eq.s32.totalorder %s3290_s22, 0 }
   0xc   : > { %s3787_s5 = sld [smem:[#allocation22_spill]]  ;;  %s3181_s30 = smov [#allocation4]  }
   0xd   : > { %p3298_p3 = pnand %p2363_p0, %p408_p1  ;;  %s3789_s11 = sld [smem:[#allocation23_spill]] }
   0xe   : > { %s441_s0 = sshll.u32 %s3181_s30, 4  ;;  %s3182_s18 = smov [#allocation7]   ;;  %s442_s0 = int_to_ptr.vmem [resolvable:$true] %s441_s0 }
   0xf   : > { %p2744_p4 = pneg %p3298_p3  ;;  %s481_s19 = sshll.u32 %s3182_s18, 4  ;;  %s482_s19 = int_to_ptr.vmem [resolvable:$true] %s481_s19 }
  0x10   : > { %s507_s24 = sshll.u32 %s3778_s13, 4  ;;  %s3183_s27 = smov 16   ;;  %s508_s24 = int_to_ptr.hbm [resolvable:$true] %s507_s24 }
  0x11   : > { %p3309_p5 = pnand %p2769_p2, %p2744_p4  ;;  %s3184_s28 = smov 1  }
  0x12   : > { %s439_s25 = sshll.u32 %s3787_s5, 4  ;;  %s3185_s30 = smov [#allocation10]   ;;  %s440_s25 = int_to_ptr.hbm [resolvable:$true] %s439_s25 }
  0x13   : > { %s479_s29 = sshll.u32 %s3789_s11, 4  ;;  %s509_s18 = sshll.u32 %s3185_s30, 4  ;;  %s480_s29 = int_to_ptr.hbm [resolvable:$true] %s479_s29  ;;  %s510_s18 = int_to_ptr.vmem [resolvable:$true] %s509_s18 }
  0x14   : > { %2750 = dma.hbm_to_vmem [thread:$0]  (!%p3309_p5), %s440_s25, 32, %s442_s0, [#allocation5], %s3183_s27, %s3183_s27, %s3184_s28  }
  0x15   : > { %2756 = dma.hbm_to_vmem [thread:$0]  (!%p3309_p5), %s480_s29, 32, %s482_s19, [#allocation8], %s3183_s27, %s3183_s27, %s3184_s28  }
  0x16   : > { %s3791_s3 = sld [smem:[#allocation21_spill]]  ;;  %s456_s11 = sshll.u32 %s3772_s7, 4  ;;  %s457_s11 = int_to_ptr.hbm [resolvable:$true] %s456_s11 }
  0x17   : > { %2762 = dma.hbm_to_vmem [thread:$0]  (!%p3309_p5), %s508_s24, 32, %s510_s18, [#allocation11], %s3183_s27, %s3183_s27, %s3184_s28  }
  0x18   : > { %s3186_s29 = smov [#allocation2]   ;;  %s3187_s5 = smov [#allocation6]  }
  0x19   : > { %s424_s19 = sshll.u32 %s3186_s29, 4  ;;  %s458_s30 = sshll.u32 %s3187_s5, 4  ;;  %s425_s19 = int_to_ptr.vmem [resolvable:$true] %s424_s19  ;;  %s459_s30 = int_to_ptr.vmem [resolvable:$true] %s458_s30 }
  0x1a   : > { %s493_s24 = sshll.u32 %s3777_s12, 4  ;;  %s521_s0 = sshll.u32 %s3779_s14, 4  ;;  %s494_s24 = int_to_ptr.hbm [resolvable:$true] %s493_s24  ;;  %s522_s0 = int_to_ptr.hbm [resolvable:$true] %s521_s0 }
  0x1b   : > { %2753 = dma.hbm_to_vmem [thread:$0]  (!%p3309_p5), %s457_s11, 32, %s459_s30, [#allocation5], %s3183_s27, %s3183_s27, %s3184_s28  }
  0x1c   : > { %s422_s23 = sshll.u32 %s3791_s3, 4  ;;  %s3189_s3 = smov [#allocation12]   ;;  %s423_s23 = int_to_ptr.hbm [resolvable:$true] %s422_s23 }
  0x1d   : > { %2747 = dma.hbm_to_vmem [thread:$0]  (!%p3309_p5), %s423_s23, 32, %s425_s19, [#allocation3], %s3183_s27, %s3183_s27, %s3184_s28  }
  0x1e   : > { %s3188_s23 = smov [#allocation9]   ;;  %s523_s19 = sshll.u32 %s3189_s3, 4  ;;  %s524_s19 = int_to_ptr.vmem [resolvable:$true] %s523_s19 }
  0x1f   : > { %s495_s29 = sshll.u32 %s3188_s23, 4  ;;  %s535_s11 = sshll.u32 %s3780_s15, 4  ;;  %s496_s29 = int_to_ptr.vmem [resolvable:$true] %s495_s29  ;;  %s536_s11 = int_to_ptr.hbm [resolvable:$true] %s535_s11 }
  0x20   : > { %2759 = dma.hbm_to_vmem [thread:$0]  (!%p3309_p5), %s494_s24, 32, %s496_s29, [#allocation8], %s3183_s27, %s3183_s27, %s3184_s28  }
  0x21   : > { %2765 = dma.hbm_to_vmem [thread:$0]  (!%p3309_p5), %s522_s0, 32, %s524_s19, [#allocation11], %s3183_s27, %s3183_s27, %s3184_s28  }
  0x22   : > { %s3190_s30 = smov [#allocation13]   ;;  %569 = sbr.rel (%p3298_p3) target bundleno = 4974 (0x136e), region = 84 }
  0x23   : > { %s537_s18 = sshll.u32 %s3190_s30, 4  ;;  %s538_s18 = int_to_ptr.vmem [resolvable:$true] %s537_s18 }
  0x24   : > { %2768 = dma.hbm_to_vmem [thread:$0]  (!%p3309_p5), %s536_s11, 32, %s538_s18, [#allocation14], %s3183_s27, %s3183_s27, %s3184_s28  }
  0x27   : > { %3158 = dma.done.wait (%p2769_p2), [#allocation3], 32  }
  0x28   : > { %3160 = vsyncadd (%p2769_p2), [#allocation3], 4294967264 }
  0x29   : > { %3162 = dma.done.wait (%p2769_p2), [#allocation5], 64  }
  0x2a   : > { %3164 = vsyncadd (%p2769_p2), [#allocation5], 4294967232 }
  0x2b   : > { %3166 = dma.done.wait (%p2769_p2), [#allocation8], 64  }
  0x2c   : > { %3168 = vsyncadd (%p2769_p2), [#allocation8], 4294967232 }
  0x2d   : > { %3170 = dma.done.wait (%p2769_p2), [#allocation11], 64  }
  0x2e   : > { %3172 = vsyncadd (%p2769_p2), [#allocation11], 4294967232 }
  0x2f   : > { %3174 = dma.done.wait (%p2769_p2), [#allocation14], 32  }
  0x30   : > { %3176 = vsyncadd (%p2769_p2), [#allocation14], 4294967264  ;;  %p660_p6 = scmp.lt.s32.totalorder %s3290_s22, 1  ;;  %v2667_v0 = vld [vmem:[%s3767_s2 + $0x18] sm:$0xff]  ;;  %v2666_v2 = vld [vmem:[%s3767_s2 + $0x10] sm:$0xff]  ;;  %s3792_s18 = sld [smem:[#allocation20_spill]] }
  0x31   : > { %v2671_v1 = vld [vmem:[%s3769_s4 + $0x18] sm:$0xff]  ;;  %742 = vmatpush.bf16.msra.mxu0 %v2667_v0  ;;  %v2670_v3 = vld [vmem:[%s3769_s4 + $0x10] sm:$0xff]  ;;  %v2665_v4 = vld [vmem:[%s3767_s2 + $0x8] sm:$0xff]  ;;  %vm734_vm0 = vcmask 523264   ;;  %vm804_vm1 = vcmask 130048   ;;  %s3191_s23 = smov 64  }
  0x32   : > { %s3795_s22 = smov (!%p660_p6, %s3290_s22), 1  ;;  %787 = vmatpush.bf16.msra.mxu1 %v2671_v1  ;;  %v2669_v5 = vld [vmem:[%s3769_s4 + $0x8] sm:$0xff]  ;;  %v2664_v6 = vld [vmem:[%s3767_s2] sm:$0xff]  ;;  %s3192_s3 = smov 112  }
  0x33   : > { %s3407_s29 = sshll.u32 %s3795_s22, 4  ;;  %v2668_v7 = vld [vmem:[%s3769_s4] sm:$0xff]  ;;  %s3193_s19 = smov 48   ;;  %v2673_v41 = vld [vmem:[%s3771_s6 + $0x8] sm:$0xff] }
  0x34   : > { %s669_s27 = scalar_lea.vmem %s3766_s1, %s3407_s29  ;;  %v2812_v16 = vld [vmem:[#allocation4] ss:$0 sm:$0xff]  ;;  %v2811_v20 = vld [vmem:[#allocation2] ss:$0 sm:$0xff]  ;;  %s3194_s5 = smov 80  }
  0x35   : > { %743 = vmatpush.bf16.msra.mxu0 %v2666_v2  ;;  %v678_v10 = vld [vmem:[%s669_s27] sm:$0xff]  ;;  %v679_v11 = vld [vmem:[%s669_s27 + $0x8] sm:$0xff]  ;;  %s3195_s20 = smov 96   ;;  %s3782_s17 = smov 16  }
  0x36   : > { %s3419_s26 = scalar_lea.vmem %s3792_s18, %s3407_s29  ;;  %788 = vmatpush.bf16.msra.mxu1 %v2670_v3  ;;  %v3439_v13 = vpack.c.bf16 %v679_v11, %v678_v10  ;;  %v2672_v58 = vld [vmem:[%s3771_s6] sm:$0xff]  ;;  %s3197_s27 = smov 32  }
  0x37   : > { %v3432_v8 = vld [vmem:[%s3419_s26] sm:$0xff]  ;;  %v3435_v9 = vld [vmem:[%s3419_s26 + $0x8] sm:$0xff]  ;;  %888 = vmatpush.bf16.msra.mxu3 %v2672_v58  ;;  %s674_s11 = scalar_lea.vmem %s3781_s16, %s3407_s29 }
  0x38   : > { %v705_v12 = vpack.c.bf16 %v3435_v9, %v3432_v8 }
  0x39   : > { %744 = vmatpush.bf16.msra.mxu0 %v2665_v4 }
  0x3a   : > { %789 = vmatpush.bf16.msra.mxu1 %v2669_v5 }
  0x3d   : > { %745 = vmatpush.bf16.msra.mxu0 %v2664_v6 }
  0x3e   : > { %790 = vmatpush.bf16.msra.mxu1 %v2668_v7 }
  0x40   : > { %2404 = vmatmul.msk.bf16.vlgmr.msra.gmra.mxu0 %vm734_vm0, %v705_v12 }
  0x41   : > { %2421 = vmatmul.msk.bf16.vlgmr.msra.gmra.mxu1 %vm734_vm0, %v3439_v13 }
  0x42   : > { %984 = vmatpush.bf16.msrb.mxu1 %v2673_v41 }
  0xbd   : > { %v747_v15 = vpop.f32.mrf.mxu0 }
  0xbe   : > { %v792_v14 = vpop.f32.mrf.mxu1  ;;  %v748_v24 = vadd.f32 %v2811_v20, %v747_v15 }
  0xbf   : > { %v793_v18 = vadd.f32 %v2812_v16, %v792_v14 }
  0xc5   : > { %v749_v22 = vpop.f32.mrf.mxu0 }
  0xc6   : > { %v794_v17 = vpop.f32.mrf.mxu1  ;;  %v750_v25 = vadd.f32 %v2811_v20, %v749_v22 }
  0xc7   : > { %v795_v19 = vadd.f32 %v2812_v16, %v794_v17 }
  0xc8   : > { %v3450_v26 = vpack.c.bf16 %v750_v25, %v748_v24 }
  0xc9   : > { %v3444_v21 = vpack.c.bf16 %v795_v19, %v793_v18 }
  0xcb   : > { %851 = vrot.lane.b32.xlu2 %v3444_v21, %s3191_s23  ;;  %v809_v23 = vsel %vm804_vm1, %v3444_v21, 0 }
  0xcc   : > { %818 = vmatpush.bf16.xpose.msra.mxu2 %v809_v23 }
  0xd3   : > { %900 = vrot.lane.b32.xlu2 %v3444_v21, %s3192_s3  ;;  %2422 = vmatmul.msk.bf16.vlgmr.msra.gmra.mxu2 %vm804_vm1, %v3450_v26 }
 0x125   : > { %v852_v27 = vpop.permute.xlu2 %851 }
 0x126   : > { %864 = vmatpush.bf16.msrb.mxu2 %v852_v27 }
 0x12d   : > { %v901_v28 = vpop.permute.xlu2 %900 }
 0x12e   : > { %v906_v29 = vsel %vm804_vm1, %v901_v28, 0 }
 0x12f   : > { %915 = vmatpush.bf16.xpose.msra.mxu2 %v906_v29 }
 0x156   : > { %v820_v30 = vpop.f32.mrf.mxu2 }
 0x157   : > { %v825_v31 = vmul.f32 0.25, %v820_v30 }
 0x159   : > { %v827_v32 = vsel %vm804_vm1, %v825_v31, -inf }
 0x15a   : > { %828 = vmax.xlane.f32.xlu0 %v827_v32 }
 0x15e   : > { %v822_v33 = vpop.f32.mrf.mxu2 }
 0x15f   : > { %v826_v34 = vmul.f32 0.25, %v822_v33 }
 0x161   : > { %v830_v35 = vsel %vm804_vm1, %v826_v34, -inf }
 0x162   : > { %831 = vmax.xlane.f32.xlu0 %v830_v35 }
 0x176   : > { %898 = vrot.lane.b32.xlu0 %v3450_v26, %s3192_s3 }
 0x17e   : > { %947 = vrot.lane.b32.xlu0 %v3444_v21, %s3193_s19 }
 0x186   : > { %1090 = vrot.lane.b32.xlu0 %v3444_v21, %s3194_s5 }
 0x18e   : > { %993 = vrot.lane.b32.xlu0 %v3450_v26, %s3195_s20 }
 0x1cd   : > { %v829_v36 = vpop.xlane.xlu0 %828 }
 0x1ce   : > { %v833_v37 = vsub.f32 %v825_v31, %v829_v36 }
 0x1d0   : > { %v835_v38 = vmul.f32 1.442695, %v833_v37  ;;  %v3497_v37 = vld [vmem:[#allocation6] ss:$0 sm:$0xff] }
 0x1d2   : > { %2829 = vpow2.f32 %v835_v38 }
 0x1d5   : > { %v832_v39 = vpop.xlane.xlu0 %831 }
 0x1d6   : > { %v834_v40 = vsub.f32 %v826_v34, %v832_v39 }
 0x1d8   : > { %v2830_v42 = vpop.eup %2829  ;;  %v837_v43 = vmul.f32 1.442695, %v834_v40 }
 0x1d9   : > { %v839_v44 = vsel %vm804_vm1, %v2830_v42, 0.0 }
 0x1da   : > { %2831 = vpow2.f32 %v837_v43  ;;  %840 = vadd.xlane.f32.xlu1 %v839_v44 }
 0x1e0   : > { %v2832_v45 = vpop.eup %2831 }
 0x1e1   : > { %v842_v46 = vsel %vm804_vm1, %v2832_v45, 0.0 }
 0x1e2   : > { %843 = vadd.xlane.f32.xlu1 %v842_v46 }
 0x1e8   : > { %v899_v47 = vpop.permute.xlu0 %898 }
 0x1f0   : > { %v948_v48 = vpop.permute.xlu0 %947 }
 0x1f1   : > { %960 = vmatpush.bf16.msrb.mxu0 %v948_v48 }
 0x1f8   : > { %v1091_v49 = vpop.permute.xlu0 %1090 }
 0x1f9   : > { %v1096_v50 = vsel %vm804_vm1, %v1091_v49, 0 }
 0x1fa   : > { %1105 = vmatpush.bf16.xpose.msra.mxu1 %v1096_v50 }
 0x200   : > { %v994_v27 = vpop.permute.xlu0 %993 }
 0x24d   : > { %v841_v51 = vpop.xlane.xlu1 %840 }
 0x24e   : > { %2833 = vrcp.f32 %v841_v51 }
 0x254   : > { %v2834_v53 = vpop.eup %2833 }
 0x255   : > { %v844_v52 = vpop.xlane.xlu1 %843  ;;  %v847_v55 = vmul.f32 %v2834_v53, %v2830_v42 }
 0x256   : > { %2835 = vrcp.f32 %v844_v52 }
 0x25c   : > { %v2836_v54 = vpop.eup %2835 }
 0x25d   : > { %v848_v56 = vmul.f32 %v2836_v54, %v2832_v45 }
 0x25f   : > { %v849_v57 = vpack.c.bf16 %v848_v56, %v847_v55 }
 0x261   : > { %2423 = vmatmul.msk.bf16.vlgmr.msrb.gmra.mxu2 %vm804_vm1, %v849_v57 }
 0x271   : > { %2429 = vmatmul.msk.bf16.vlgmr.msra.gmra.mxu2 %vm804_vm1, %v899_v47 }
 0x2e4   : > { %v866_v59 = vpop.f32.mrf.mxu2 }
 0x2ec   : > { %v868_v60 = vpop.f32.mrf.mxu2 }
 0x2ed   : > { %v871_v61 = vpack.c.bf16 %v868_v60, %v866_v59 }
 0x2ef   : > { %2428 = vmatmul.msk.bf16.vlgmr.msra.gmra.mxu3 %vm804_vm1, %v871_v61 }
 0x2f4   : > { %v917_v62 = vpop.f32.mrf.mxu2 }
 0x2f5   : > { %v922_v63 = vmul.f32 0.25, %v917_v62 }
 0x2f7   : > { %v924_v0 = vsel %vm804_vm1, %v922_v63, -inf }
 0x2f8   : > { %925 = vmax.xlane.f32.xlu1 %v924_v0 }
 0x2fc   : > { %v919_v1 = vpop.f32.mrf.mxu2 }
 0x2fd   : > { %v923_v2 = vmul.f32 0.25, %v919_v1 }
 0x2ff   : > { %v927_v3 = vsel %vm804_vm1, %v923_v2, -inf }
 0x300   : > { %928 = vmax.xlane.f32.xlu2 %v927_v3 }
 0x318   : > { %1088 = vrot.lane.b32.xlu2 %v3450_v26, %s3194_s5 }
 0x36b   : > { %v926_v4 = vpop.xlane.xlu1 %925 }
 0x36c   : > { %v930_v5 = vsub.f32 %v922_v63, %v926_v4 }
 0x36e   : > { %v932_v6 = vmul.f32 1.442695, %v930_v5 }
 0x370   : > { %2837 = vpow2.f32 %v932_v6 }
 0x372   : > { %v890_v30 = vpop.f32.mrf.mxu3 }
 0x373   : > { %v929_v7 = vpop.xlane.xlu2 %928  ;;  %v895_v38 = vadd.f32 %v3497_v37, %v890_v30 }
 0x374   : > { %v931_v10 = vsub.f32 %v923_v2, %v929_v7 }
 0x376   : > { %v2838_v11 = vpop.eup %2837  ;;  %v934_v12 = vmul.f32 1.442695, %v931_v10 }
 0x377   : > { %v936_v14 = vsel %vm804_vm1, %v2838_v11, 0.0 }
 0x378   : > { %2839 = vpow2.f32 %v934_v12  ;;  %937 = vadd.xlane.f32.xlu1 %v936_v14 }
 0x37a   : > { %v3491_v32 = vpop.f32.mrf.mxu3 }
 0x37b   : > { %v1089_v33 = vpop.permute.xlu2 %1088 }
 0x37e   : > { %v2840_v15 = vpop.eup %2839 }
 0x37f   : > { %v939_v16 = vsel %vm804_vm1, %v2840_v15, 0.0 }
 0x380   : > { %940 = vadd.xlane.f32.xlu1 %v939_v16 }
 0x399   : > { %995 = vrot.lane.b32.xlu1 %v3444_v21, %s3195_s20 }
 0x3eb   : > { %v938_v17 = vpop.xlane.xlu1 %937 }
 0x3ec   : > { %2841 = vrcp.f32 %v938_v17 }
 0x3f2   : > { %v2842_v19 = vpop.eup %2841 }
 0x3f3   : > { %v941_v18 = vpop.xlane.xlu1 %940  ;;  %v944_v22 = vmul.f32 %v2842_v19, %v2838_v11 }
 0x3f4   : > { %2843 = vrcp.f32 %v941_v18 }
 0x3fa   : > { %v2844_v20 = vpop.eup %2843 }
 0x3fb   : > { %v945_v23 = vmul.f32 %v2844_v20, %v2840_v15 }
 0x3fd   : > { %v946_v24 = vpack.c.bf16 %v945_v23, %v944_v22 }
 0x3ff   : > { %2430 = vmatmul.msk.bf16.vlgmr.msrb.gmra.mxu0 %vm804_vm1, %v946_v24 }
 0x40b   : > { %v996_v25 = vpop.permute.xlu1 %995 }
 0x40c   : > { %v1001_v26 = vsel %vm804_vm1, %v996_v25, 0 }
 0x40d   : > { %1010 = vmatpush.bf16.xpose.msrb.mxu3 %v1001_v26  ;;  %v2675_v26 = vld [vmem:[%s3771_s6 + $0x18] sm:$0xff] }
 0x414   : > { %2436 = vmatmul.msk.bf16.vlgmr.msrb.gmra.mxu3 %vm804_vm1, %v994_v27  ;;  %v2674_v27 = vld [vmem:[%s3771_s6 + $0x10] sm:$0xff] }
 0x415   : > { %1079 = vmatpush.bf16.msra.mxu0 %v2674_v27 }
 0x47c   : > { %v962_v28 = vpop.f32.mrf.mxu0 }
 0x484   : > { %v964_v29 = vpop.f32.mrf.mxu0 }
 0x485   : > { %v967_v31 = vpack.c.bf16 %v964_v29, %v962_v28 }
 0x487   : > { %2435 = vmatmul.msk.bf16.vlgmr.msrb.gmra.mxu1 %vm804_vm1, %v967_v31 }
 0x497   : > { %v1012_v34 = vpop.f32.mrf.mxu3  ;;  %2443 = vmatmul.msk.bf16.vlgmr.msra.gmra.mxu1 %vm804_vm1, %v1089_v33 }
 0x498   : > { %v1017_v35 = vmul.f32 0.25, %v1012_v34 }
 0x49a   : > { %v1019_v36 = vsel %vm804_vm1, %v1017_v35, -inf }
 0x49b   : > { %1020 = vmax.xlane.f32.xlu2 %v1019_v36 }
 0x49f   : > { %v1014_v48 = vpop.f32.mrf.mxu3 }
 0x4a0   : > { %v1018_v50 = vmul.f32 0.25, %v1014_v48 }
 0x4a2   : > { %v1022_v54 = vsel %vm804_vm1, %v1018_v50, -inf }
 0x4b3   : > { %1137 = vrot.lane.b32.xlu2 %v3444_v21, %s3782_s17 }
 0x504   : > { %v986_v39 = vpop.f32.mrf.mxu1 }
 0x505   : > { %v3500_v40 = vadd.f32 %v986_v39, %v895_v38 }
 0x50c   : > { %v3502_v41 = vpop.f32.mrf.mxu1 }
 0x50e   : > { %v1021_v42 = vpop.xlane.xlu2 %1020 }
 0x50f   : > { %v1025_v45 = vsub.f32 %v1017_v35, %v1021_v42  ;;  %v896_v42 = vadd.f32 %v3497_v37, %v3491_v32 }
 0x511   : > { %v1027_v49 = vmul.f32 1.442695, %v1025_v45 }
 0x513   : > { %2845 = vpow2.f32 %v1027_v49 }
 0x514   : > { %v1107_v43 = vpop.f32.mrf.mxu1 }
 0x515   : > { %v1112_v44 = vmul.f32 0.25, %v1107_v43 }
 0x516   : > { %v1138_v46 = vpop.permute.xlu2 %1137 }
 0x517   : > { %1150 = vmatpush.bf16.msra.mxu3 %v1138_v46  ;;  %v1114_v47 = vsel %vm804_vm1, %v1112_v44, -inf }
 0x518   : > { %1115 = vmax.xlane.f32.xlu0 %v1114_v47 }
 0x519   : > { %v2846_v55 = vpop.eup %2845 }
 0x51a   : > { %v1031_v56 = vsel %vm804_vm1, %v2846_v55, 0.0 }
 0x51c   : > { %v1109_v51 = vpop.f32.mrf.mxu1 }
 0x51d   : > { %v1113_v52 = vmul.f32 0.25, %v1109_v51 }
 0x51f   : > { %v1117_v53 = vsel %vm804_vm1, %v1113_v52, -inf }
 0x520   : > { %1118 = vmax.xlane.f32.xlu1 %v1117_v53  ;;  %1023 = vmax.xlane.f32.xlu0 %v1022_v54 }
 0x528   : > { %1032 = vadd.xlane.f32.xlu1 %v1031_v56 }
 0x58b   : > { %v1116_v57 = vpop.xlane.xlu0 %1115 }
 0x58c   : > { %v1120_v58 = vsub.f32 %v1112_v44, %v1116_v57  ;;  %v992_v44 = vadd.f32 %v3502_v41, %v896_v42 }
 0x58e   : > { %v1122_v59 = vmul.f32 1.442695, %v1120_v58 }
 0x590   : > { %2847 = vpow2.f32 %v1122_v59 }
 0x593   : > { %v1119_v60 = vpop.xlane.xlu1 %1118  ;;  %v1024_v61 = vpop.xlane.xlu0 %1023 }
 0x594   : > { %v1121_v62 = vsub.f32 %v1113_v52, %v1119_v60  ;;  %v1026_v1 = vsub.f32 %v1018_v50, %v1024_v61 }
 0x596   : > { %v2848_v63 = vpop.eup %2847  ;;  %v1124_v0 = vmul.f32 1.442695, %v1121_v62  ;;  %v1029_v3 = vmul.f32 1.442695, %v1026_v1  ;;  %v2677_v1 = vld [vmem:[%s3773_s8 + $0x8] sm:$0xff] }
 0x597   : > { %v1126_v2 = vsel %vm804_vm1, %v2848_v63, 0.0 }
 0x598   : > { %2849 = vpow2.f32 %v1124_v0  ;;  %1127 = vadd.xlane.f32.xlu1 %v1126_v2  ;;  %v2678_v0 = vld [vmem:[%s3773_s8 + $0x10] sm:$0xff] }
 0x599   : > { %2851 = vpow2.f32 %v1029_v3 }
 0x59b   : > { %v1033_v10 = vpop.xlane.xlu1 %1032 }
 0x59e   : > { %v2850_v4 = vpop.eup %2849 }
 0x59f   : > { %v1129_v5 = vsel %vm804_vm1, %v2850_v4, 0.0  ;;  %v2852_v6 = vpop.eup %2851 }
 0x5a0   : > { %1130 = vadd.xlane.f32.xlu0 %v1129_v5  ;;  %v1034_v7 = vsel %vm804_vm1, %v2852_v6, 0.0  ;;  %v2676_v5 = vld [vmem:[%s3773_s8] sm:$0xff] }
 0x5a8   : > { %1035 = vadd.xlane.f32.xlu0 %v1034_v7 }
 0x5b1   : > { %1042 = vrot.lane.b32.xlu1 %v3444_v21, %s3197_s27 }
 0x60b   : > { %v1128_v11 = vpop.xlane.xlu1 %1127 }
 0x60c   : > { %2853 = vrcp.f32 %v1128_v11  ;;  %v2686_v11 = vld [vmem:[%s3775_s10 + $0x30] sm:$0xff] }
 0x612   : > { %v2854_v14 = vpop.eup %2853 }
 0x613   : > { %v1131_v12 = vpop.xlane.xlu0 %1130  ;;  %v1134_v16 = vmul.f32 %v2854_v14, %v2848_v63  ;;  %v2679_v63 = vld [vmem:[%s3773_s8 + $0x18] sm:$0xff] }
 0x614   : > { %2855 = vrcp.f32 %v1131_v12  ;;  %1292 = vmatpush.bf16.msrb.mxu0 %v2679_v63 }
 0x615   : > { %2857 = vrcp.f32 %v1033_v10 }
 0x618   : > { %1293 = vmatpush.bf16.msrb.mxu0 %v2678_v0 }
 0x61a   : > { %v2856_v15 = vpop.eup %2855 }
 0x61b   : > { %v1135_v17 = vmul.f32 %v2856_v15, %v2850_v4  ;;  %v1036_v18 = vpop.xlane.xlu0 %1035  ;;  %v2858_v20 = vpop.eup %2857 }
 0x61c   : > { %2859 = vrcp.f32 %v1036_v18  ;;  %v1039_v23 = vmul.f32 %v2858_v20, %v2846_v55  ;;  %1294 = vmatpush.bf16.msrb.mxu0 %v2677_v1 }
 0x61d   : > { %v1136_v19 = vpack.c.bf16 %v1135_v17, %v1134_v16  ;;  %v2685_v16 = vld [vmem:[%s3775_s10 + $0x28] sm:$0xff] }
 0x61f   : > { %2444 = vmatmul.msk.bf16.vlgmr.msra.gmra.mxu3 %vm804_vm1, %v1136_v19  ;;  %v2684_v19 = vld [vmem:[%s3775_s10 + $0x20] sm:$0xff] }
 0x620   : > { %1295 = vmatpush.bf16.msrb.mxu0 %v2676_v5 }
 0x622   : > { %v2860_v22 = vpop.eup %2859 }
 0x623   : > { %v1040_v24 = vmul.f32 %v2860_v22, %v2852_v6  ;;  %v1043_v21 = vpop.permute.xlu1 %1042  ;;  %v2687_v6 = vld [vmem:[%s3775_s10 + $0x38] sm:$0xff] }
 0x624   : > { %1055 = vmatpush.bf16.msrb.mxu2 %v1043_v21  ;;  %1373 = vmatpush.bf16.msrb.mxu1 %v2687_v6 }
 0x625   : > { %v1041_v25 = vpack.c.bf16 %v1040_v24, %v1039_v23 }
 0x627   : > { %2437 = vmatmul.msk.bf16.vlgmr.msrb.gmra.mxu2 %vm804_vm1, %v1041_v25 }
 0x628   : > { %1174 = vmatpush.bf16.msra.mxu2 %v2675_v26  ;;  %1374 = vmatpush.bf16.msrb.mxu1 %v2686_v11  ;;  %v2691_v11 = vld [vmem:[%s3767_s2 + $0x38] sm:$0xff] }
 0x629   : > { %1509 = vmatpush.bf16.msrb.mxu3 %v2691_v11 }
 0x62c   : > { %1375 = vmatpush.bf16.msrb.mxu1 %v2685_v16 }
 0x630   : > { %1376 = vmatpush.bf16.msrb.mxu1 %v2684_v19 }
 0x6a2   : > { %v1152_v28 = vpop.f32.mrf.mxu3 }
 0x6aa   : > { %v1057_v29 = vpop.f32.mrf.mxu2  ;;  %v1154_v30 = vpop.f32.mrf.mxu3 }
 0x6ab   : > { %v1157_v31 = vpack.c.bf16 %v1154_v30, %v1152_v28  ;;  %v2814_v28 = vld [vmem:[#allocation9] ss:$0 sm:$0xff] }
 0x6ad   : > { %2449 = vmatmul.msk.bf16.vlgmr.msra.gmra.mxu2 %vm804_vm1, %v1157_v31 }
 0x6b2   : > { %v1059_v33 = vpop.f32.mrf.mxu2 }
 0x6b3   : > { %v1062_v34 = vpack.c.bf16 %v1059_v33, %v1057_v29  ;;  %v2815_v33 = vld [vmem:[#allocation10] ss:$0 sm:$0xff] }
 0x6b5   : > { %2442 = vmatmul.msk.bf16.vlgmr.msra.gmra.mxu0 %vm804_vm1, %v1062_v34 }
 0x730   : > { %v1176_v35 = vpop.f32.mrf.mxu2 }
 0x732   : > { %v1081_v36 = vpop.f32.mrf.mxu0 }
 0x733   : > { %v1086_v38 = vadd.f32 %v1081_v36, %v3500_v40  ;;  %v3198_v40 = vmov 64.0  }
 0x734   : > { %2861 = vrcp.f32 %v3198_v40 }
 0x735   : > { %v1181_v39 = vadd.f32 %v1176_v35, %v1086_v38 }
 0x737   : > { %v1183_v43 = vadd.f32 %v1181_v39, %v3432_v8 }
 0x738   : > { %v1178_v48 = vpop.f32.mrf.mxu2 }
 0x739   : > { %v1187_v45 = vsel %vm734_vm0, %v1183_v43, 0.0 }
 0x73a   : > { %1188 = vadd.xlane.f32.xlu0 %v1187_v45  ;;  %v1083_v46 = vpop.f32.mrf.mxu0  ;;  %v2862_v52 = vpop.eup %2861  ;;  %v2681_v45 = vld [vmem:[%s3775_s10 + $0x8] sm:$0xff] }
 0x73b   : > { %v1087_v47 = vadd.f32 %v1083_v46, %v992_v44  ;;  %v1194_v32 = vmul.f32 64.0, %v2862_v52  ;;  %vm1198_vm2 = vweird.f32 %v2862_v52  ;;  %v2682_v44 = vld [vmem:[%s3775_s10 + $0x10] sm:$0xff]  ;;  %v2680_v46 = vld [vmem:[%s3775_s10] sm:$0xff] }
 0x73d   : > { %v1182_v49 = vadd.f32 %v1178_v48, %v1087_v47  ;;  %v1195_v37 = vsub.f32 1.0, %v1194_v32  ;;  %v2816_v48 = vld [vmem:[%s3774_s9] ss:$0 sm:$0xff] }
 0x73f   : > { %v1184_v50 = vadd.f32 %v1182_v49, %v3435_v9  ;;  %v1196_v8 = vmul.f32 %v2862_v52, %v1195_v37  ;;  %v2817_v37 = vld [vmem:[#allocation7] ss:$0 sm:$0xff] }
 0x741   : > { %v1190_v51 = vsel %vm734_vm0, %v1184_v50, 0.0  ;;  %v1197_v53 = vadd.f32 %v2862_v52, %v1196_v8 }
 0x742   : > { %1191 = vadd.xlane.f32.xlu0 %v1190_v51 }
 0x743   : > { %v3531_v41 = vsel %vm1198_vm2, %v2862_v52, %v1197_v53 }
 0x7ad   : > { %v1189_v54 = vpop.xlane.xlu0 %1188 }
 0x7ae   : > { %v1200_v55 = vmul.f32 %v3531_v41, %v1189_v54 }
 0x7b0   : > { %v1202_v56 = vsub.f32 %v1183_v43, %v1200_v55  ;;  %v2683_v43 = vld [vmem:[%s3775_s10 + $0x18] sm:$0xff] }
 0x7b1   : > { %1377 = vmatpush.bf16.msrb.mxu1 %v2683_v43 }
 0x7b2   : > { %v1204_v57 = vmul.f32 %v1202_v56, %v1202_v56 }
 0x7b4   : > { %v1206_v9 = vsel %vm734_vm0, %v1204_v57, 0.0 }
 0x7b5   : > { %1207 = vadd.xlane.f32.xlu0 %v1206_v9  ;;  %v1192_v58 = vpop.xlane.xlu0 %1191  ;;  %1378 = vmatpush.bf16.msrb.mxu1 %v2682_v44  ;;  %v2818_v44 = vld [vmem:[#allocation12] ss:$0 sm:$0xff] }
 0x7b6   : > { %v1201_v59 = vmul.f32 %v3531_v41, %v1192_v58 }
 0x7b8   : > { %v1203_v60 = vsub.f32 %v1184_v50, %v1201_v59  ;;  %v2695_v59 = vld [vmem:[%s3769_s4 + $0x38] sm:$0xff] }
 0x7b9   : > { %1379 = vmatpush.bf16.msrb.mxu1 %v2681_v45  ;;  %1552 = vmatpush.bf16.msrb.mxu2 %v2695_v59 }
 0x7ba   : > { %v1205_v61 = vmul.f32 %v1203_v60, %v1203_v60 }
 0x7bc   : > { %v1209_v62 = vsel %vm734_vm0, %v1205_v61, 0.0  ;;  %v2693_v61 = vld [vmem:[%s3769_s4 + $0x28] sm:$0xff] }
 0x7bd   : > { %1210 = vadd.xlane.f32.xlu2 %v1209_v62  ;;  %1380 = vmatpush.bf16.msrb.mxu1 %v2680_v46  ;;  %v2692_v62 = vld [vmem:[%s3769_s4 + $0x20] sm:$0xff] }
 0x828   : > { %v1208_v2 = vpop.xlane.xlu0 %1207 }
 0x829   : > { %v1212_v3 = vmul.f32 %v1208_v2, %v3531_v41 }
 0x82b   : > { %v1214_v4 = vadd.f32 1e-05, %v1212_v3 }
 0x82d   : > { %2863 = vrsqrt.f32 %v1214_v4  ;;  %vm1222_vm4 = vweird.f32 %v1214_v4 }
 0x830   : > { %v1211_v7 = vpop.xlane.xlu2 %1210 }
 0x831   : > { %v1213_v10 = vmul.f32 %v1211_v7, %v3531_v41 }
 0x833   : > { %v2864_v12 = vpop.eup %2863  ;;  %v1215_v14 = vadd.f32 1e-05, %v1213_v10 }
 0x834   : > { %v1217_v15 = vmul.f32 %v2864_v12, %v1214_v4  ;;  %vm1223_vm3 = vweird.f32 %v2864_v12 }
 0x835   : > { %2865 = vrsqrt.f32 %v1215_v14  ;;  %vm1224_vm5 = vmor %vm1222_vm4, %vm1223_vm3  ;;  %vm1232_vm7 = vweird.f32 %v1215_v14 }
 0x836   : > { %v1218_v17 = vmul.f32 %v2864_v12, %v1217_v15 }
 0x838   : > { %v1219_v18 = vmul.f32 0.5, %v1218_v17  ;;  %v2688_v17 = vld [vmem:[%s3767_s2 + $0x20] sm:$0xff] }
 0x83a   : > { %v1220_v20 = vsub.f32 1.5, %v1219_v18 }
 0x83b   : > { %v2866_v22 = vpop.eup %2865 }
 0x83c   : > { %v1221_v23 = vmul.f32 %v2864_v12, %v1220_v20  ;;  %v1227_v24 = vmul.f32 %v2866_v22, %v1215_v14  ;;  %vm1233_vm6 = vweird.f32 %v2866_v22 }
 0x83d   : > { %vm1234_vm8 = vmor %vm1232_vm7, %vm1233_vm6 }
 0x83e   : > { %v1228_v21 = vmul.f32 %v2866_v22, %v1227_v24  ;;  %v1225_v25 = vsel %vm1224_vm5, %v2864_v12, %v1221_v23  ;;  %v2689_v12 = vld [vmem:[%s3767_s2 + $0x28] sm:$0xff] }
 0x83f   : > { %v1236_v29 = vmul.f32 %v1225_v25, %v1202_v56 }
 0x840   : > { %v1229_v26 = vmul.f32 0.5, %v1228_v21  ;;  %v2820_v21 = vld [vmem:[#allocation4 + $0x1] ss:$0 sm:$0xff] }
 0x841   : > { %v1241_v34 = vmul.f32 %v2814_v28, %v1236_v29 }
 0x842   : > { %v1230_v27 = vsub.f32 1.5, %v1229_v26 }
 0x843   : > { %v1246_v38 = vadd.f32 %v2815_v33, %v1241_v34 }
 0x844   : > { %v1231_v30 = vmul.f32 %v2866_v22, %v1230_v27 }
 0x846   : > { %v1235_v31 = vsel %vm1234_vm8, %v2866_v22, %v1231_v30 }
 0x847   : > { %v1237_v35 = vmul.f32 %v1235_v31, %v1203_v60  ;;  %v2694_v60 = vld [vmem:[%s3769_s4 + $0x30] sm:$0xff] }
 0x848   : > { %1553 = vmatpush.bf16.msrb.mxu2 %v2694_v60 }
 0x849   : > { %v1242_v36 = vmul.f32 %v2814_v28, %v1237_v35 }
 0x84b   : > { %v1247_v39 = vadd.f32 %v2815_v33, %v1242_v36 }
 0x84c   : > { %1554 = vmatpush.bf16.msrb.mxu2 %v2693_v61 }
 0x84d   : > { %v1248_v42 = vpack.c.bf16 %v1247_v39, %v1246_v38 }
 0x84f   : > { %2466 = vmatmul.msk.bf16.vlgmr.msrb.gmra.mxu0 %vm734_vm0, %v1248_v42 }
 0x850   : > { %1555 = vmatpush.bf16.msrb.mxu2 %v2692_v62 }
 0x853   : > { %2556 = vmatmul.msk.bf16.vlgmr.msrb.gmra.mxu2 %vm734_vm0, %v3439_v13  ;;  %v2690_v13 = vld [vmem:[%s3767_s2 + $0x30] sm:$0xff] }
 0x854   : > { %1510 = vmatpush.bf16.msrb.mxu3 %v2690_v13  ;;  %v2696_v13 = vld [vmem:[%s3771_s6 + $0x20] sm:$0xff] }
 0x855   : > { %1653 = vmatpush.bf16.msra.mxu2 %v2696_v13 }
 0x858   : > { %1511 = vmatpush.bf16.msrb.mxu3 %v2689_v12 }
 0x85c   : > { %1512 = vmatpush.bf16.msrb.mxu3 %v2688_v17 }
 0x8cc   : > { %v1297_v47 = vpop.f32.mrf.mxu0 }
 0x8cd   : > { %v1298_v49 = vadd.f32 %v2816_v48, %v1297_v47 }
 0x8cf   : > { %v1302_v40 = vmax.f32 %v1298_v49, 0.0 }
 0x8d4   : > { %v1299_v50 = vpop.f32.mrf.mxu0 }
 0x8d5   : > { %v1300_v51 = vadd.f32 %v2816_v48, %v1299_v50  ;;  %v2819_v48 = vld [vmem:[#allocation13] ss:$0 sm:$0xff] }
 0x8d6   : > { %v1557_v20 = vpop.f32.mrf.mxu2 }
 0x8d7   : > { %v1303_v52 = vmax.f32 %v1300_v51, 0.0  ;;  %v1558_v27 = vadd.f32 %v2820_v21, %v1557_v20 }
 0x8d9   : > { %v1304_v32 = vpack.c.bf16 %v1303_v52, %v1302_v40 }
 0x8db   : > { %1381 = vmatmul.bf16.vlgmr.msrb.gmra.mxu1 %v1304_v32 }
 0x8de   : > { %v1559_v28 = vpop.f32.mrf.mxu2 }
 0x8df   : > { %v1560_v30 = vadd.f32 %v2820_v21, %v1559_v28 }
 0x8e1   : > { %v3613_v35 = vpack.c.bf16 %v1560_v30, %v1558_v27 }
 0x958   : > { %v1382_v8 = vpop.f32.mrf.mxu1 }
 0x959   : > { %v1383_v53 = vadd.f32 %v2817_v37, %v1382_v8 }
 0x95b   : > { %v1387_v54 = vadd.f32 %v1383_v53, %v1246_v38  ;;  %v1574_v38 = vsel %vm804_vm1, %v3613_v35, 0 }
 0x95c   : > { %1583 = vmatpush.bf16.xpose.msra.mxu0 %v1574_v38 }
 0x95d   : > { %v1391_v55 = vsel %vm734_vm0, %v1387_v54, 0.0 }
 0x95e   : > { %1392 = vadd.xlane.f32.xlu1 %v1391_v55 }
 0x960   : > { %v1384_v56 = vpop.f32.mrf.mxu1 }
 0x961   : > { %v1385_v57 = vadd.f32 %v2817_v37, %v1384_v56 }
 0x963   : > { %v1388_v9 = vadd.f32 %v1385_v57, %v1247_v39 }
 0x965   : > { %v1394_v58 = vsel %vm734_vm0, %v1388_v9, 0.0 }
 0x966   : > { %1395 = vadd.xlane.f32.xlu0 %v1394_v58 }
 0x9d1   : > { %v1393_v63 = vpop.xlane.xlu1 %1392 }
 0x9d2   : > { %v1397_v0 = vmul.f32 %v1393_v63, %v3531_v41 }
 0x9d4   : > { %v1399_v1 = vsub.f32 %v1387_v54, %v1397_v0  ;;  %v2821_v54 = vld [vmem:[#allocation2 + $0x1] ss:$0 sm:$0xff] }
 0x9d6   : > { %v1401_v2 = vmul.f32 %v1399_v1, %v1399_v1 }
 0x9d8   : > { %v1403_v3 = vsel %vm734_vm0, %v1401_v2, 0.0 }
 0x9d9   : > { %v1396_v4 = vpop.xlane.xlu0 %1395  ;;  %1404 = vadd.xlane.f32.xlu0 %v1403_v3 }
 0x9da   : > { %v1398_v5 = vmul.f32 %v1396_v4, %v3531_v41 }
 0x9dc   : > { %v1400_v6 = vsub.f32 %v1388_v9, %v1398_v5 }
 0x9de   : > { %v1402_v7 = vmul.f32 %v1400_v6, %v1400_v6 }
 0x9e0   : > { %v1406_v10 = vsel %vm734_vm0, %v1402_v7, 0.0 }
 0x9e1   : > { %1407 = vadd.xlane.f32.xlu0 %v1406_v10 }
 0x9f5   : > { %1665 = vrot.lane.b32.xlu0 %v3613_v35, %s3192_s3 }
 0xa4c   : > { %v1405_v14 = vpop.xlane.xlu0 %1404 }
 0xa4d   : > { %v1409_v15 = vmul.f32 %v1405_v14, %v3531_v41 }
 0xa4f   : > { %v1411_v16 = vadd.f32 1e-05, %v1409_v15 }
 0xa51   : > { %2867 = vrsqrt.f32 %v1411_v16  ;;  %vm1419_vm10 = vweird.f32 %v1411_v16 }
 0xa54   : > { %v1408_v18 = vpop.xlane.xlu0 %1407 }
 0xa55   : > { %v1410_v19 = vmul.f32 %v1408_v18, %v3531_v41 }
 0xa57   : > { %v2868_v22 = vpop.eup %2867  ;;  %v1412_v23 = vadd.f32 1e-05, %v1410_v19 }
 0xa58   : > { %v1414_v24 = vmul.f32 %v2868_v22, %v1411_v16  ;;  %vm1420_vm9 = vweird.f32 %v2868_v22 }
 0xa59   : > { %2869 = vrsqrt.f32 %v1412_v23  ;;  %vm1421_vm11 = vmor %vm1419_vm10, %vm1420_vm9  ;;  %vm1429_vm13 = vweird.f32 %v1412_v23 }
 0xa5a   : > { %v1415_v25 = vmul.f32 %v2868_v22, %v1414_v24 }
 0xa5c   : > { %v1416_v26 = vmul.f32 0.5, %v1415_v25 }
 0xa5e   : > { %v1417_v29 = vsub.f32 1.5, %v1416_v26 }
 0xa5f   : > { %v2870_v31 = vpop.eup %2869 }
 0xa60   : > { %v1418_v33 = vmul.f32 %v2868_v22, %v1417_v29  ;;  %v1424_v34 = vmul.f32 %v2870_v31, %v1412_v23  ;;  %vm1430_vm12 = vweird.f32 %v2870_v31 }
 0xa61   : > { %vm1431_vm14 = vmor %vm1429_vm13, %vm1430_vm12 }
 0xa62   : > { %v1425_v36 = vmul.f32 %v2870_v31, %v1424_v34  ;;  %v1422_v39 = vsel %vm1421_vm11, %v2868_v22, %v1418_v33  ;;  %v2697_v34 = vld [vmem:[%s3771_s6 + $0x28] sm:$0xff] }
 0xa63   : > { %v1433_v45 = vmul.f32 %v1422_v39, %v1399_v1 }
 0xa64   : > { %v1426_v42 = vmul.f32 0.5, %v1425_v36 }
 0xa65   : > { %v1438_v49 = vmul.f32 %v2818_v44, %v1433_v45 }
 0xa66   : > { %v1427_v43 = vsub.f32 1.5, %v1426_v42 }
 0xa67   : > { %v3619_v40 = vadd.f32 %v2819_v48, %v1438_v49  ;;  %v1666_v37 = vpop.permute.xlu0 %1665 }
 0xa68   : > { %v1428_v46 = vmul.f32 %v2870_v31, %v1427_v43  ;;  %v1671_v8 = vsel %vm804_vm1, %v1666_v37, 0 }
 0xa69   : > { %1680 = vmatpush.bf16.xpose.msrb.mxu0 %v1671_v8 }
 0xa6a   : > { %v1432_v47 = vsel %vm1431_vm14, %v2870_v31, %v1428_v46 }
 0xa6b   : > { %v1434_v50 = vmul.f32 %v1432_v47, %v1400_v6 }
 0xa6d   : > { %v1439_v51 = vmul.f32 %v2818_v44, %v1434_v50 }
 0xa6f   : > { %v3621_v52 = vadd.f32 %v2819_v48, %v1439_v51 }
 0xa71   : > { %v1472_v32 = vpack.c.bf16 %v3621_v52, %v3619_v40 }
 0xa73   : > { %2539 = vmatmul.msk.bf16.vlgmr.msrb.gmra.mxu3 %vm734_vm0, %v1472_v32 }
 0xaf6   : > { %v1514_v53 = vpop.f32.mrf.mxu3 }
 0xaf7   : > { %v1515_v56 = vadd.f32 %v2821_v54, %v1514_v53 }
 0xafe   : > { %v1516_v55 = vpop.f32.mrf.mxu3 }
 0xaff   : > { %v1517_v57 = vadd.f32 %v2821_v54, %v1516_v55 }
 0xb01   : > { %v3627_v9 = vpack.c.bf16 %v1517_v57, %v1515_v56 }
 0xb03   : > { %1663 = vrot.lane.b32.xlu2 %v3627_v9, %s3192_s3  ;;  %2557 = vmatmul.msk.bf16.vlgmr.msra.gmra.mxu0 %vm804_vm1, %v3627_v9 }
 0xb5d   : > { %v1664_v58 = vpop.permute.xlu2 %1663 }
 0xb5e   : > { %2564 = vmatmul.msk.bf16.vlgmr.msrb.gmra.mxu0 %vm804_vm1, %v1664_v58 }
 0xb80   : > { %v1585_v59 = vpop.f32.mrf.mxu0 }
 0xb81   : > { %v1590_v60 = vmul.f32 0.25, %v1585_v59 }
 0xb83   : > { %v1592_v61 = vsel %vm804_vm1, %v1590_v60, -inf }
 0xb84   : > { %1593 = vmax.xlane.f32.xlu1 %v1592_v61 }
 0xb88   : > { %v1587_v62 = vpop.f32.mrf.mxu0 }
 0xb89   : > { %v1591_v63 = vmul.f32 0.25, %v1587_v62 }
 0xb8b   : > { %v1595_v0 = vsel %vm804_vm1, %v1591_v63, -inf }
 0xb8c   : > { %1596 = vmax.xlane.f32.xlu0 %v1595_v0 }
 0xba0   : > { %1616 = vrot.lane.b32.xlu0 %v3613_v35, %s3191_s23 }
 0xba8   : > { %1760 = vrot.lane.b32.xlu0 %v3613_v35, %s3195_s20 }
 0xbb0   : > { %1758 = vrot.lane.b32.xlu0 %v3627_v9, %s3195_s20 }
 0xbdb   : > { %v1682_v1 = vpop.f32.mrf.mxu0 }
 0xbdc   : > { %v1687_v2 = vmul.f32 0.25, %v1682_v1 }
 0xbde   : > { %v1689_v3 = vsel %vm804_vm1, %v1687_v2, -inf }
 0xbdf   : > { %1690 = vmax.xlane.f32.xlu1 %v1689_v3 }
 0xbe3   : > { %v1684_v4 = vpop.f32.mrf.mxu0 }
 0xbe4   : > { %v1688_v5 = vmul.f32 0.25, %v1684_v4 }
 0xbe6   : > { %v1692_v6 = vsel %vm804_vm1, %v1688_v5, -inf }
 0xbe7   : > { %1693 = vmax.xlane.f32.xlu1 %v1692_v6 }
 0xbf7   : > { %v1594_v7 = vpop.xlane.xlu1 %1593 }
 0xbf8   : > { %v1598_v10 = vsub.f32 %v1590_v60, %v1594_v7 }
 0xbfa   : > { %v1600_v11 = vmul.f32 1.442695, %v1598_v10 }
 0xbfc   : > { %2871 = vpow2.f32 %v1600_v11 }
 0xbff   : > { %v1597_v12 = vpop.xlane.xlu0 %1596 }
 0xc00   : > { %v1599_v14 = vsub.f32 %v1591_v63, %v1597_v12 }
 0xc02   : > { %v2872_v15 = vpop.eup %2871  ;;  %v1602_v16 = vmul.f32 1.442695, %v1599_v14 }
 0xc03   : > { %v1604_v17 = vsel %vm804_vm1, %v2872_v15, 0.0 }
 0xc04   : > { %2873 = vpow2.f32 %v1602_v16  ;;  %1605 = vadd.xlane.f32.xlu2 %v1604_v17 }
 0xc0a   : > { %v2874_v18 = vpop.eup %2873 }
 0xc0b   : > { %v1607_v19 = vsel %vm804_vm1, %v2874_v18, 0.0 }
 0xc0c   : > { %1608 = vadd.xlane.f32.xlu1 %v1607_v19 }
 0xc12   : > { %v1617_v20 = vpop.permute.xlu0 %1616 }
 0xc13   : > { %1629 = vmatpush.bf16.msra.mxu3 %v1617_v20 }
 0xc17   : > { %1749 = vmatpush.bf16.msrb.mxu3 %v2697_v34 }
 0xc1a   : > { %v1761_v22 = vpop.permute.xlu0 %1760 }
 0xc1b   : > { %v1766_v23 = vsel %vm804_vm1, %v1761_v22, 0 }
 0xc1c   : > { %1855 = vrot.lane.b32.xlu2 %v3613_v35, %s3194_s5  ;;  %1775 = vmatpush.bf16.xpose.msrb.mxu2 %v1766_v23 }
 0xc22   : > { %v1759_v57 = vpop.permute.xlu0 %1758 }
 0xc52   : > { %v1691_v24 = vpop.xlane.xlu1 %1690 }
 0xc53   : > { %v1695_v21 = vsub.f32 %v1687_v2, %v1691_v24  ;;  %v2822_v2 = vld [vmem:[#allocation6 + $0x1] ss:$0 sm:$0xff] }
 0xc55   : > { %v1697_v25 = vmul.f32 1.442695, %v1695_v21 }
 0xc57   : > { %2875 = vpow2.f32 %v1697_v25 }
 0xc5a   : > { %v1694_v26 = vpop.xlane.xlu1 %1693 }
 0xc5b   : > { %v1696_v27 = vsub.f32 %v1688_v5, %v1694_v26 }
 0xc5d   : > { %v2876_v28 = vpop.eup %2875  ;;  %v1699_v29 = vmul.f32 1.442695, %v1696_v27 }
 0xc5e   : > { %v1701_v30 = vsel %vm804_vm1, %v2876_v28, 0.0 }
 0xc5f   : > { %2877 = vpow2.f32 %v1699_v29  ;;  %1702 = vadd.xlane.f32.xlu1 %v1701_v30 }
 0xc65   : > { %v2878_v31 = vpop.eup %2877 }
 0xc66   : > { %v1704_v33 = vsel %vm804_vm1, %v2878_v31, 0.0 }
 0xc67   : > { %1705 = vadd.xlane.f32.xlu1 %v1704_v33 }
 0xc77   : > { %v1606_v36 = vpop.xlane.xlu2 %1605 }
 0xc78   : > { %2879 = vrcp.f32 %v1606_v36 }
 0xc7e   : > { %v2880_v39 = vpop.eup %2879 }
 0xc7f   : > { %v1609_v38 = vpop.xlane.xlu1 %1608  ;;  %v1612_v43 = vmul.f32 %v2880_v39, %v2872_v15  ;;  %v1856_v45 = vpop.permute.xlu2 %1855 }
 0xc80   : > { %2881 = vrcp.f32 %v1609_v38  ;;  %1712 = vrot.lane.b32.xlu1 %v3613_v35, %s3193_s19  ;;  %v1861_v47 = vsel %vm804_vm1, %v1856_v45, 0  ;;  %s3793_s19 = smov 16  }
 0xc86   : > { %v2882_v42 = vpop.eup %2881 }
 0xc87   : > { %v1613_v44 = vmul.f32 %v2882_v42, %v2874_v18 }
 0xc88   : > { %1853 = vrot.lane.b32.xlu1 %v3627_v9, %s3194_s5 }
 0xc89   : > { %v1614_v46 = vpack.c.bf16 %v1613_v44, %v1612_v43 }
 0xc8b   : > { %2558 = vmatmul.msk.bf16.vlgmr.msra.gmra.mxu3 %vm804_vm1, %v1614_v46 }
 0xc8c   : > { %1870 = vmatpush.bf16.xpose.msra.mxu3 %v1861_v47 }
 0xcd2   : > { %v1703_v48 = vpop.xlane.xlu1 %1702 }
 0xcda   : > { %v1706_v49 = vpop.xlane.xlu1 %1705 }
 0xcdb   : > { %2883 = vrcp.f32 %v1706_v49 }
 0xcdc   : > { %2885 = vrcp.f32 %v1703_v48 }
 0xce1   : > { %v2884_v50 = vpop.eup %2883 }
 0xce2   : > { %v2886_v51 = vpop.eup %2885  ;;  %v1710_v32 = vmul.f32 %v2884_v50, %v2878_v31 }
 0xce3   : > { %v1709_v37 = vmul.f32 %v2886_v51, %v2876_v28 }
 0xce5   : > { %v1711_v53 = vpack.c.bf16 %v1710_v32, %v1709_v37 }
 0xcf2   : > { %v1713_v8 = vpop.permute.xlu1 %1712 }
 0xcf3   : > { %1725 = vmatpush.bf16.msra.mxu1 %v1713_v8 }
 0xcf6   : > { %2565 = vmatmul.msk.bf16.vlgmr.msra.gmra.mxu1 %vm804_vm1, %v1711_v53 }
 0xcfa   : > { %v1854_v60 = vpop.permute.xlu1 %1853 }
 0xd0e   : > { %v1631_v54 = vpop.f32.mrf.mxu3 }
 0xd16   : > { %v1633_v55 = vpop.f32.mrf.mxu3 }
 0xd17   : > { %v1636_v56 = vpack.c.bf16 %v1633_v55, %v1631_v54 }
 0xd19   : > { %2563 = vmatmul.msk.bf16.vlgmr.msra.gmra.mxu2 %vm804_vm1, %v1636_v56 }
 0xd29   : > { %2571 = vmatmul.msk.bf16.vlgmr.msrb.gmra.mxu2 %vm804_vm1, %v1759_v57 }
 0xd73   : > { %v1727_v9 = vpop.f32.mrf.mxu1 }
 0xd7b   : > { %v1729_v58 = vpop.f32.mrf.mxu1 }
 0xd7c   : > { %v1732_v59 = vpack.c.bf16 %v1729_v58, %v1727_v9  ;;  %v2698_v9 = vld [vmem:[%s3771_s6 + $0x30] sm:$0xff]  ;;  %v2699_v58 = vld [vmem:[%s3771_s6 + $0x38] sm:$0xff] }
 0xd7d   : > { %1844 = vmatpush.bf16.msrb.mxu1 %v2698_v9 }
 0xd7e   : > { %2570 = vmatmul.msk.bf16.vlgmr.msrb.gmra.mxu3 %vm804_vm1, %v1732_v59 }
 0xd8e   : > { %2578 = vmatmul.msk.bf16.vlgmr.msra.gmra.mxu3 %vm804_vm1, %v1854_v60 }
 0xd9c   : > { %v1655_v61 = vpop.f32.mrf.mxu2 }
 0xd9d   : > { %v1660_v3 = vadd.f32 %v2822_v2, %v1655_v61 }
 0xda4   : > { %v1657_v62 = vpop.f32.mrf.mxu2 }
 0xda5   : > { %v1661_v6 = vadd.f32 %v2822_v2, %v1657_v62 }
 0xdac   : > { %v1777_v63 = vpop.f32.mrf.mxu2 }
 0xdad   : > { %v1782_v0 = vmul.f32 0.25, %v1777_v63 }
 0xdaf   : > { %v1784_v1 = vsel %vm804_vm1, %v1782_v0, -inf }
 0xdb0   : > { %1785 = vmax.xlane.f32.xlu2 %v1784_v1 }
 0xdb4   : > { %v1779_v14 = vpop.f32.mrf.mxu2 }
 0xdb5   : > { %v1783_v15 = vmul.f32 0.25, %v1779_v14 }
 0xdb7   : > { %v1787_v19 = vsel %vm804_vm1, %v1783_v15, -inf }
 0xe01   : > { %v1751_v4 = vpop.f32.mrf.mxu3 }
 0xe02   : > { %v3669_v5 = vadd.f32 %v1751_v4, %v1660_v3 }
 0xe09   : > { %v1753_v7 = vpop.f32.mrf.mxu3 }
 0xe0a   : > { %v3671_v10 = vadd.f32 %v1753_v7, %v1661_v6 }
 0xe11   : > { %v1872_v11 = vpop.f32.mrf.mxu3 }
 0xe12   : > { %v1877_v13 = vmul.f32 0.25, %v1872_v11 }
 0xe14   : > { %v1879_v12 = vsel %vm804_vm1, %v1877_v13, -inf }
 0xe15   : > { %1880 = vmax.xlane.f32.xlu1 %v1879_v12 }
 0xe19   : > { %v1874_v16 = vpop.f32.mrf.mxu3 }
 0xe1a   : > { %v1878_v17 = vmul.f32 0.25, %v1874_v16 }
 0xe1c   : > { %v1882_v18 = vsel %vm804_vm1, %v1878_v17, -inf }
 0xe1d   : > { %1883 = vmax.xlane.f32.xlu0 %v1882_v18  ;;  %1788 = vmax.xlane.f32.xlu1 %v1787_v19 }
 0xe23   : > { %v1786_v20 = vpop.xlane.xlu2 %1785 }
 0xe24   : > { %v1790_v22 = vsub.f32 %v1782_v0, %v1786_v20 }
 0xe26   : > { %v1792_v23 = vmul.f32 1.442695, %v1790_v22 }
 0xe28   : > { %2887 = vpow2.f32 %v1792_v23 }
 0xe2e   : > { %v2888_v24 = vpop.eup %2887 }
 0xe2f   : > { %v1796_v21 = vsel %vm804_vm1, %v2888_v24, 0.0 }
 0xe30   : > { %1797 = vadd.xlane.f32.xlu1 %v1796_v21  ;;  %v2702_v21 = vld [vmem:[%s3773_s8 + $0x30] sm:$0xff] }
 0xe49   : > { %1807 = vrot.lane.b32.xlu1 %v3613_v35, %s3197_s27 }
 0xe88   : > { %v1881_v25 = vpop.xlane.xlu1 %1880 }
 0xe89   : > { %v1885_v26 = vsub.f32 %v1877_v13, %v1881_v25  ;;  %v2701_v25 = vld [vmem:[%s3773_s8 + $0x28] sm:$0xff] }
 0xe8b   : > { %v1887_v27 = vmul.f32 1.442695, %v1885_v26 }
 0xe8d   : > { %2889 = vpow2.f32 %v1887_v27 }
 0xe90   : > { %v1789_v28 = vpop.xlane.xlu1 %1788  ;;  %v1884_v29 = vpop.xlane.xlu0 %1883 }
 0xe91   : > { %v1791_v30 = vsub.f32 %v1783_v15, %v1789_v28  ;;  %v1886_v31 = vsub.f32 %v1878_v17, %v1884_v29  ;;  %v2700_v28 = vld [vmem:[%s3773_s8 + $0x20] sm:$0xff] }
 0xe93   : > { %v2890_v33 = vpop.eup %2889  ;;  %v1794_v34 = vmul.f32 1.442695, %v1791_v30  ;;  %v1889_v36 = vmul.f32 1.442695, %v1886_v31  ;;  %v2711_v30 = vld [vmem:[%s3775_s10 + $0x78] sm:$0xff] }
 0xe94   : > { %v1891_v38 = vsel %vm804_vm1, %v2890_v33, 0.0  ;;  %2137 = vmatpush.bf16.msrb.mxu3 %v2711_v30 }
 0xe95   : > { %2891 = vpow2.f32 %v1794_v34  ;;  %1892 = vadd.xlane.f32.xlu0 %v1891_v38  ;;  %v2710_v34 = vld [vmem:[%s3775_s10 + $0x70] sm:$0xff] }
 0xe96   : > { %2893 = vpow2.f32 %v1889_v36 }
 0xe98   : > { %2138 = vmatpush.bf16.msrb.mxu3 %v2710_v34 }
 0xe9b   : > { %v2892_v39 = vpop.eup %2891 }
 0xe9c   : > { %v2894_v42 = vpop.eup %2893  ;;  %v1799_v43 = vsel %vm804_vm1, %v2892_v39, 0.0 }
 0xe9d   : > { %1800 = vadd.xlane.f32.xlu0 %v1799_v43  ;;  %v1894_v44 = vsel %vm804_vm1, %v2894_v42, 0.0 }
 0xe9e   : > { %1895 = vadd.xlane.f32.xlu2 %v1894_v44 }
 0xea3   : > { %v1798_v45 = vpop.xlane.xlu1 %1797 }
 0xea4   : > { %2895 = vrcp.f32 %v1798_v45  ;;  %v2708_v45 = vld [vmem:[%s3775_s10 + $0x60] sm:$0xff] }
 0xeaa   : > { %v2896_v50 = vpop.eup %2895 }
 0xeab   : > { %v1804_v8 = vmul.f32 %v2896_v50, %v2888_v24 }
 0xeb6   : > { %1902 = vrot.lane.b32.xlu2 %v3613_v35, %s3793_s19 }
 0xebb   : > { %v1808_v46 = vpop.permute.xlu1 %1807 }
 0xebc   : > { %1820 = vmatpush.bf16.msra.mxu0 %v1808_v46 }
 0xec0   : > { %1939 = vmatpush.bf16.msrb.mxu0 %v2699_v58 }
 0xf08   : > { %v1893_v47 = vpop.xlane.xlu0 %1892 }
 0xf09   : > { %2897 = vrcp.f32 %v1893_v47 }
 0xf0f   : > { %v2898_v51 = vpop.eup %2897 }
 0xf10   : > { %v1801_v48 = vpop.xlane.xlu0 %1800  ;;  %v1899_v54 = vmul.f32 %v2898_v51, %v2890_v33 }
 0xf11   : > { %v1896_v49 = vpop.xlane.xlu2 %1895  ;;  %2899 = vrcp.f32 %v1801_v48 }
 0xf12   : > { %2901 = vrcp.f32 %v1896_v49 }
 0xf17   : > { %v2900_v32 = vpop.eup %2899 }
 0xf18   : > { %v2902_v37 = vpop.eup %2901  ;;  %v1805_v53 = vmul.f32 %v2900_v32, %v2892_v39 }
 0xf19   : > { %v1900_v55 = vmul.f32 %v2902_v37, %v2894_v42  ;;  %v1903_v56 = vpop.permute.xlu2 %1902  ;;  %v2709_v42 = vld [vmem:[%s3775_s10 + $0x68] sm:$0xff] }
 0xf1a   : > { %v1806_v57 = vpack.c.bf16 %v1805_v53, %v1804_v8  ;;  %1915 = vmatpush.bf16.msra.mxu2 %v1903_v56  ;;  %2139 = vmatpush.bf16.msrb.mxu3 %v2709_v42  ;;  %v2823_v8 = vld [vmem:[#allocation9 + $0x1] ss:$0 sm:$0xff]  ;;  %v2824_v56 = vld [vmem:[#allocation10 + $0x1] ss:$0 sm:$0xff] }
 0xf1b   : > { %v1901_v35 = vpack.c.bf16 %v1900_v55, %v1899_v54 }
 0xf1c   : > { %2572 = vmatmul.msk.bf16.vlgmr.msra.gmra.mxu0 %vm804_vm1, %v1806_v57 }
 0xf1d   : > { %2579 = vmatmul.msk.bf16.vlgmr.msra.gmra.mxu2 %vm804_vm1, %v1901_v35 }
 0xf1e   : > { %2140 = vmatpush.bf16.msrb.mxu3 %v2708_v45 }
 0xf99   : > { %v1822_v59 = vpop.f32.mrf.mxu0 }
 0xfa0   : > { %v1917_v60 = vpop.f32.mrf.mxu2 }
 0xfa1   : > { %v1824_v61 = vpop.f32.mrf.mxu0 }
 0xfa2   : > { %v1827_v62 = vpack.c.bf16 %v1824_v61, %v1822_v59  ;;  %v2707_v61 = vld [vmem:[%s3775_s10 + $0x58] sm:$0xff] }
 0xfa3   : > { %2141 = vmatpush.bf16.msrb.mxu3 %v2707_v61 }
 0xfa4   : > { %2577 = vmatmul.msk.bf16.vlgmr.msrb.gmra.mxu1 %vm804_vm1, %v1827_v62  ;;  %v2706_v62 = vld [vmem:[%s3775_s10 + $0x50] sm:$0xff] }
 0xfa7   : > { %2142 = vmatpush.bf16.msrb.mxu3 %v2706_v62 }
 0xfa8   : > { %v1919_v63 = vpop.f32.mrf.mxu2 }
 0xfa9   : > { %v1922_v0 = vpack.c.bf16 %v1919_v63, %v1917_v60  ;;  %v2705_v63 = vld [vmem:[%s3775_s10 + $0x48] sm:$0xff] }
 0xfab   : > { %2584 = vmatmul.msk.bf16.vlgmr.msrb.gmra.mxu0 %vm804_vm1, %v1922_v0  ;;  %2143 = vmatpush.bf16.msrb.mxu3 %v2705_v63  ;;  %v2704_v0 = vld [vmem:[%s3775_s10 + $0x40] sm:$0xff] }
 0xfaf   : > { %2144 = vmatpush.bf16.msrb.mxu3 %v2704_v0 }
0x1021   : > { %v1846_v1 = vpop.f32.mrf.mxu1 }
0x1022   : > { %v1851_v2 = vadd.f32 %v1846_v1, %v3669_v5 }
0x1028   : > { %v1941_v3 = vpop.f32.mrf.mxu0 }
0x1029   : > { %v1946_v4 = vadd.f32 %v1941_v3, %v1851_v2  ;;  %v1848_v7 = vpop.f32.mrf.mxu1  ;;  %v2825_v2 = vld [vmem:[%s3774_s9 + $0x1] ss:$0 sm:$0xff] }
0x102a   : > { %v1852_v13 = vadd.f32 %v1848_v7, %v3671_v10 }
0x102b   : > { %v1948_v6 = vadd.f32 %v1946_v4, %v3619_v40 }
0x102d   : > { %v1954_v11 = vsel %vm734_vm0, %v1948_v6, 0.0 }
0x102e   : > { %1955 = vadd.xlane.f32.xlu0 %v1954_v11 }
0x1030   : > { %v1943_v12 = vpop.f32.mrf.mxu0 }
0x1031   : > { %v1947_v14 = vadd.f32 %v1943_v12, %v1852_v13  ;;  %v2826_v12 = vld [vmem:[#allocation7 + $0x1] ss:$0 sm:$0xff] }
0x1033   : > { %v1949_v15 = vadd.f32 %v1947_v14, %v3621_v52  ;;  %v2703_v52 = vld [vmem:[%s3773_s8 + $0x38] sm:$0xff] }
0x1034   : > { %2054 = vmatpush.bf16.msra.mxu1 %v2703_v52 }
0x1035   : > { %v1957_v16 = vsel %vm734_vm0, %v1949_v15, 0.0 }
0x1036   : > { %1958 = vadd.xlane.f32.xlu0 %v1957_v16 }
0x1038   : > { %2055 = vmatpush.bf16.msra.mxu1 %v2702_v21 }
0x103c   : > { %2056 = vmatpush.bf16.msra.mxu1 %v2701_v25 }
0x1040   : > { %2057 = vmatpush.bf16.msra.mxu1 %v2700_v28 }
0x10a1   : > { %v1956_v17 = vpop.xlane.xlu0 %1955 }
0x10a2   : > { %v1960_v5 = vmul.f32 %v1956_v17, %v3531_v41 }
0x10a4   : > { %v1962_v18 = vsub.f32 %v1948_v6, %v1960_v5 }
0x10a6   : > { %v1964_v19 = vmul.f32 %v1962_v18, %v1962_v18 }
0x10a8   : > { %v1966_v40 = vsel %vm734_vm0, %v1964_v19, 0.0 }
0x10a9   : > { %1967 = vadd.xlane.f32.xlu0 %v1966_v40  ;;  %v1959_v20 = vpop.xlane.xlu0 %1958 }
0x10aa   : > { %v1961_v22 = vmul.f32 %v1959_v20, %v3531_v41 }
0x10ac   : > { %v1963_v23 = vsub.f32 %v1949_v15, %v1961_v22 }
0x10ae   : > { %v1965_v10 = vmul.f32 %v1963_v23, %v1963_v23 }
0x10b0   : > { %v1969_v24 = vsel %vm734_vm0, %v1965_v10, 0.0 }
0x10b1   : > { %1970 = vadd.xlane.f32.xlu2 %v1969_v24 }
0x111c   : > { %v1968_v26 = vpop.xlane.xlu0 %1967 }
0x111d   : > { %v1972_v27 = vmul.f32 %v1968_v26, %v3531_v41 }
0x111f   : > { %v1974_v29 = vadd.f32 1e-05, %v1972_v27 }
0x1121   : > { %2903 = vrsqrt.f32 %v1974_v29  ;;  %vm1982_vm1 = vweird.f32 %v1974_v29 }
0x1124   : > { %v1971_v31 = vpop.xlane.xlu2 %1970 }
0x1125   : > { %v1973_v33 = vmul.f32 %v1971_v31, %v3531_v41 }
0x1127   : > { %v2904_v36 = vpop.eup %2903  ;;  %v1975_v38 = vadd.f32 1e-05, %v1973_v33 }
0x1128   : > { %v1977_v39 = vmul.f32 %v2904_v36, %v1974_v29  ;;  %vm1983_vm15 = vweird.f32 %v2904_v36 }
0x1129   : > { %2905 = vrsqrt.f32 %v1975_v38  ;;  %vm1984_vm2 = vmor %vm1982_vm1, %vm1983_vm15  ;;  %vm1992_vm4 = vweird.f32 %v1975_v38 }
0x112a   : > { %v1978_v43 = vmul.f32 %v2904_v36, %v1977_v39 }
0x112c   : > { %v1979_v44 = vmul.f32 0.5, %v1978_v43 }
0x112e   : > { %v1980_v46 = vsub.f32 1.5, %v1979_v44 }
0x112f   : > { %v2906_v47 = vpop.eup %2905 }
0x1130   : > { %v1981_v48 = vmul.f32 %v2904_v36, %v1980_v46  ;;  %v1987_v49 = vmul.f32 %v2906_v47, %v1975_v38  ;;  %vm1993_vm3 = vweird.f32 %v2906_v47 }
0x1131   : > { %vm1994_vm5 = vmor %vm1992_vm4, %vm1993_vm3 }
0x1132   : > { %v1988_v50 = vmul.f32 %v2906_v47, %v1987_v49  ;;  %v1985_v51 = vsel %vm1984_vm2, %v2904_v36, %v1981_v48 }
0x1133   : > { %v1996_v53 = vmul.f32 %v1985_v51, %v1962_v18 }
0x1134   : > { %v1989_v32 = vmul.f32 0.5, %v1988_v50  ;;  %v2828_v50 = vld [vmem:[#allocation13 + $0x1] ss:$0 sm:$0xff] }
0x1135   : > { %v2001_v57 = vmul.f32 %v2823_v8, %v1996_v53 }
0x1136   : > { %v1990_v37 = vsub.f32 1.5, %v1989_v32 }
0x1137   : > { %v2006_v58 = vadd.f32 %v2824_v56, %v2001_v57 }
0x1138   : > { %v1991_v54 = vmul.f32 %v2906_v47, %v1990_v37 }
0x113a   : > { %v1995_v55 = vsel %vm1994_vm5, %v2906_v47, %v1991_v54  ;;  %v2827_v47 = vld [vmem:[#allocation12 + $0x1] ss:$0 sm:$0xff]  ;;  %v2911_v54 = vld [vmem:[%s3419_s26] sm:$0xff] }
0x113b   : > { %v1997_v35 = vmul.f32 %v1995_v55, %v1963_v23 }
0x113d   : > { %v2002_v9 = vmul.f32 %v2823_v8, %v1997_v35 }
0x113f   : > { %v2007_v59 = vadd.f32 %v2824_v56, %v2002_v9 }
0x1141   : > { %v2008_v60 = vpack.c.bf16 %v2007_v59, %v2006_v58 }
0x1143   : > { %2610 = vmatmul.msk.bf16.vlgmr.msra.gmra.mxu1 %vm734_vm0, %v2008_v60 }
0x11c0   : > { %v2059_v1 = vpop.f32.mrf.mxu1 }
0x11c1   : > { %v2060_v3 = vadd.f32 %v2825_v2, %v2059_v1 }
0x11c3   : > { %v2064_v7 = vmax.f32 %v2060_v3, 0.0 }
0x11c8   : > { %v2061_v4 = vpop.f32.mrf.mxu1 }
0x11c9   : > { %v2062_v6 = vadd.f32 %v2825_v2, %v2061_v4 }
0x11cb   : > { %v2065_v11 = vmax.f32 %v2062_v6, 0.0 }
0x11cd   : > { %v2066_v13 = vpack.c.bf16 %v2065_v11, %v2064_v7 }
0x11cf   : > { %2145 = vmatmul.bf16.vlgmr.msrb.gmra.mxu3 %v2066_v13 }
0x1252   : > { %v2146_v14 = vpop.f32.mrf.mxu3 }
0x1253   : > { %v2147_v15 = vadd.f32 %v2826_v12, %v2146_v14 }
0x1255   : > { %v2151_v16 = vadd.f32 %v2147_v15, %v2006_v58  ;;  %v2912_v58 = vld [vmem:[%s3419_s26 + $0x8] sm:$0xff] }
0x1257   : > { %v2157_v17 = vsel %vm734_vm0, %v2151_v16, 0.0 }
0x1258   : > { %2158 = vadd.xlane.f32.xlu0 %v2157_v17 }
0x125a   : > { %v2148_v5 = vpop.f32.mrf.mxu3 }
0x125b   : > { %v2149_v18 = vadd.f32 %v2826_v12, %v2148_v5 }
0x125d   : > { %v2152_v19 = vadd.f32 %v2149_v18, %v2007_v59 }
0x125f   : > { %v2160_v40 = vsel %vm734_vm0, %v2152_v19, 0.0 }
0x1260   : > { %2161 = vadd.xlane.f32.xlu1 %v2160_v40 }
0x12cb   : > { %v2159_v20 = vpop.xlane.xlu0 %2158 }
0x12cc   : > { %v2163_v22 = vmul.f32 %v2159_v20, %v3531_v41 }
0x12ce   : > { %v2165_v23 = vsub.f32 %v2151_v16, %v2163_v22 }
0x12d0   : > { %v2167_v10 = vmul.f32 %v2165_v23, %v2165_v23 }
0x12d2   : > { %v2169_v24 = vsel %vm734_vm0, %v2167_v10, 0.0 }
0x12d3   : > { %v2162_v52 = vpop.xlane.xlu1 %2161  ;;  %2170 = vadd.xlane.f32.xlu0 %v2169_v24 }
0x12d4   : > { %v2164_v21 = vmul.f32 %v2162_v52, %v3531_v41 }
0x12d6   : > { %v2166_v25 = vsub.f32 %v2152_v19, %v2164_v21 }
0x12d8   : > { %v2168_v26 = vmul.f32 %v2166_v25, %v2166_v25 }
0x12da   : > { %v2172_v27 = vsel %vm734_vm0, %v2168_v26, 0.0 }
0x12db   : > { %2173 = vadd.xlane.f32.xlu0 %v2172_v27 }
0x1346   : > { %v2171_v28 = vpop.xlane.xlu0 %2170 }
0x1347   : > { %v2175_v29 = vmul.f32 %v2171_v28, %v3531_v41 }
0x1349   : > { %v2177_v30 = vadd.f32 1e-05, %v2175_v29 }
0x134b   : > { %2907 = vrsqrt.f32 %v2177_v30  ;;  %vm2185_vm7 = vweird.f32 %v2177_v30 }
0x134e   : > { %v2174_v31 = vpop.xlane.xlu0 %2173 }
0x134f   : > { %v2176_v33 = vmul.f32 %v2174_v31, %v3531_v41 }
0x1351   : > { %v2908_v34 = vpop.eup %2907  ;;  %v2178_v36 = vadd.f32 1e-05, %v2176_v33 }
0x1352   : > { %v2180_v38 = vmul.f32 %v2908_v34, %v2177_v30  ;;  %vm2186_vm6 = vweird.f32 %v2908_v34 }
0x1353   : > { %2909 = vrsqrt.f32 %v2178_v36  ;;  %vm2187_vm8 = vmor %vm2185_vm7, %vm2186_vm6  ;;  %vm2195_vm10 = vweird.f32 %v2178_v36 }
0x1354   : > { %v2181_v39 = vmul.f32 %v2908_v34, %v2180_v38 }
0x1356   : > { %v2182_v42 = vmul.f32 0.5, %v2181_v39 }
0x1358   : > { %v2183_v43 = vsub.f32 1.5, %v2182_v42 }
0x1359   : > { %v2910_v44 = vpop.eup %2909 }
0x135a   : > { %v2184_v45 = vmul.f32 %v2908_v34, %v2183_v43  ;;  %v2190_v46 = vmul.f32 %v2910_v44, %v2178_v36  ;;  %vm2196_vm9 = vweird.f32 %v2910_v44 }
0x135b   : > { %vm2197_vm11 = vmor %vm2195_vm10, %vm2196_vm9 }
0x135c   : > { %v2188_v48 = vsel %vm2187_vm8, %v2908_v34, %v2184_v45  ;;  %v2191_v49 = vmul.f32 %v2910_v44, %v2190_v46 }
0x135d   : > { %v2199_v41 = vmul.f32 %v2188_v48, %v2165_v23 }
0x135e   : > { %v2192_v51 = vmul.f32 0.5, %v2191_v49 }
0x135f   : > { %v2204_v32 = vmul.f32 %v2827_v47, %v2199_v41 }
0x1360   : > { %v2193_v37 = vsub.f32 1.5, %v2192_v51 }
0x1361   : > { %v2209_v8 = vadd.f32 %v2828_v50, %v2204_v32 }
0x1362   : > { %v2194_v53 = vmul.f32 %v2910_v44, %v2193_v37 }
0x1363   : > { %v2211_v55 = vadd.f32 %v2911_v54, %v2209_v8 }
0x1364   : > { %v2198_v56 = vsel %vm2197_vm11, %v2910_v44, %v2194_v53 }
0x1365   : > { %2213 = vst.msk [vmem:[%s674_s11] sm:$0xff] %vm734_vm0, %v2211_v55  ;;  %v2200_v57 = vmul.f32 %v2198_v56, %v2166_v25 }
0x1367   : > { %v2205_v35 = vmul.f32 %v2827_v47, %v2200_v57 }
0x1369   : > { %v2210_v9 = vadd.f32 %v2828_v50, %v2205_v35 }
0x136b   : > { %v2212_v59 = vadd.f32 %v2912_v58, %v2210_v9 }
0x136d   : > { %2214 = vst.msk [vmem:[%s674_s11 + $0x8] sm:$0xff] %vm734_vm0, %v2212_v59 }
0x136e PF: > { %s31_s21 = sadd.s32 1, %s3179_s21  }
0x136f   : > { %p28_p7 = scmp.ge.s32.totalorder %s31_s21, 4  }
0x1371   :  { %30 = sbr.rel (!%p28_p7) target bundleno = 10 (0xa), region = 164 }
0x1376   :  { %2236 = vsyncpa [#allocation3], 1 }
0x1377   :  { %2238 = vsyncpa [#allocation3 + $0x1], 1 }
0x1378   :  { %2239 = vsyncpa [#allocation5], 1 }
0x1379   :  { %2240 = vsyncpa [#allocation8], 1 }
0x137a   :  { %2241 = vsyncpa [#allocation11], 1 }
0x137b   :  { %2242 = vsyncpa [#allocation14], 1 }

</bundles_post_ra>
